<compile_context>
chip_gen: v6e
topology: v6e:2x2x1
jax: 0.10.0
libtpu: 0.0.40
codegen_flags: <defaults>
</compile_context>

<pallas_src>
import functools
import math

import numpy as np
import jax
import jax.numpy as jnp
from jax.experimental import pallas as pl
from jax.experimental.pallas import tpu as pltpu


_BN_EPS = 1e-5
_MXU_DTYPE = jnp.bfloat16   # MXU operand dtype; accumulation / BN stay f32.


# ----------------------------------------------------------------------------
# In-kernel helpers (operate on VMEM-resident values / refs)
# ----------------------------------------------------------------------------
def _conv_slab(a_bf16, bw_ref, s_ref):
    """Conv as structured matmuls on a lane-dense slab.

    a_bf16 : (R_in, W_in*Cin) bf16 slab (row = n*H_in + y, lane = x*Cin + c).
    bw_ref : (kh, W_in*Cin, W_out*Ctot) bf16 banded block weights (horizontal
             taps / stride / zero-padding folded in).
    s_ref  : (kh, R_out, R_in) f32 0/1 row-selection (vertical taps / stride /
             zero-padding, block-diagonal per image).
    Returns (R_out, W_out*Ctot) f32.
    """
    kh = bw_ref.shape[0]
    acc = None
    for dy in range(kh):
        p = jnp.dot(a_bf16, bw_ref[dy], preferred_element_type=jnp.float32)
        q = jnp.dot(s_ref[dy], p, preferred_element_type=jnp.float32)
        acc = q if acc is None else acc + q
    return acc


def _bn_slab(y, t, tt, count, eps):
    """Training-mode BatchNorm (gamma=1, beta=0) on a lane-dense slab.

    y  : (R, W*C) f32.
    t  : (W*C, C) f32 0/1 channel-collapse matrix; tt: (C, W*C) its transpose.
    Mean-subtracted two-pass variance (avoids E[x^2]-E[x]^2 cancellation).
    """
    inv = 1.0 / count
    ch = jnp.dot(y, t, preferred_element_type=jnp.float32)          # (R, C)
    mean_c = jnp.sum(ch, axis=0, keepdims=True) * inv                # (1, C)
    mean_s = jnp.dot(mean_c, tt, preferred_element_type=jnp.float32)  # (1, W*C)
    d = y - mean_s
    chsq = jnp.dot(d * d, t, preferred_element_type=jnp.float32)     # (R, C)
    var_c = jnp.sum(chsq, axis=0, keepdims=True) * inv               # (1, C)
    var_s = jnp.dot(var_c, tt, preferred_element_type=jnp.float32)   # (1, W*C)
    return d * jax.lax.rsqrt(var_s + eps)


# ----------------------------------------------------------------------------
# Fused backbone kernel: stem + n_layers x (ResBlockDown, ResBlock)
# ----------------------------------------------------------------------------
def _backbone_kernel(x_ref, stem_bw_ref, stem_b_ref, *rest, counts, eps):
    out_ref = rest[-1]
    layer_refs = rest[:-1]
    n_layers = len(layer_refs) // 10

    # Stem 1x1 conv (+ zero-init bias): S is the identity -> single matmul.
    a = (jnp.dot(x_ref[...].astype(_MXU_DTYPE), stem_bw_ref[0],
                 preferred_element_type=jnp.float32) + stem_b_ref[...])

    for li in range(n_layers):
        (s3_s2, s1_s2, s3_s1, t_ref, tt_ref,
         bw_dc1, bw_sc, bw_dc2, bw_rc1, bw_rc2) = layer_refs[10 * li: 10 * (li + 1)]
        t = t_ref[...]
        tt = tt_ref[...]
        cnt = counts[li]

        # ---- ResBlockDown: relu(BN(conv2(relu(BN(conv1_s2(a))))) + BN(sc_s2(a)))
        # (conv biases are zero-init and exactly cancelled by gamma=1/beta=0
        #  training-mode BN, so they are dropped)
        ab = a.astype(_MXU_DTYPE)
        h = jnp.maximum(
            _bn_slab(_conv_slab(ab, bw_dc1, s3_s2), t, tt, cnt, eps), 0.0)
        sc = _bn_slab(_conv_slab(ab, bw_sc, s1_s2), t, tt, cnt, eps)
        m = _bn_slab(_conv_slab(h.astype(_MXU_DTYPE), bw_dc2, s3_s1),
                     t, tt, cnt, eps)
        a = jnp.maximum(m + sc, 0.0)

        # ---- ResBlock (identity shortcut): relu(BN(conv2(relu(BN(conv1(a))))) + a)
        ab = a.astype(_MXU_DTYPE)
        h = jnp.maximum(
            _bn_slab(_conv_slab(ab, bw_rc1, s3_s1), t, tt, cnt, eps), 0.0)
        m = _bn_slab(_conv_slab(h.astype(_MXU_DTYPE), bw_rc2, s3_s1),
                     t, tt, cnt, eps)
        a = jnp.maximum(m + a, 0.0)

    out_ref[...] = a


# ----------------------------------------------------------------------------
# Operand builders (run once, outside jit)
# ----------------------------------------------------------------------------
def _build_bw(w, w_in, stride):
    """Fold horizontal taps + channel mixing into a banded block matrix.

    w: (kh, kw, Cin, Cout) f32  ->  (kh, W_in*Cin, W_out*Cout) bf16.
    """
    kh, kw, cin, cout = w.shape
    pad = (kw - 1) // 2
    w_out = (w_in + 2 * pad - kw) // stride + 1
    place = np.zeros((kw, w_in, w_out), np.float32)
    for xo in range(w_out):
        for dx in range(kw):
            xi = stride * xo + dx - pad
            if 0 <= xi < w_in:
                place[dx, xi, xo] = 1.0
    bw = jnp.einsum("dxo,ydic->yxioc", jnp.asarray(place), w)
    return bw.reshape(kh, w_in * cin, w_out * cout).astype(_MXU_DTYPE)


def _build_s(n, h_in, kh, stride):
    """0/1 vertical tap/stride/padding row-selection matrices (per image)."""
    pad = (kh - 1) // 2
    h_out = (h_in + 2 * pad - kh) // stride + 1
    s = np.zeros((kh, n * h_out, n * h_in), np.float32)
    for dy in range(kh):
        for b in range(n):
            for yo in range(h_out):
                yi = stride * yo + dy - pad
                if 0 <= yi < h_in:
                    s[dy, b * h_out + yo, b * h_in + yi] = 1.0
    return jnp.asarray(s)


def _build_t(w, c):
    """0/1 channel-collapse matrix (W*C, C) and its transpose."""
    t = np.tile(np.eye(c, dtype=np.float32), (w, 1))
    return jnp.asarray(t), jnp.asarray(np.ascontiguousarray(t.T))


def build_backbone_operands(params, *, batch, img_hw):
    """Derive the structured lane-dense matmul operands for the fused backbone
    kernel from the raw conv weights.  Done once, outside jit (weights are
    pre-cast to bf16; S/T matrices depend only on batch / spatial shape)."""
    hidden = params["stem"][0].shape[-1]
    h = img_hw

    stem_bw = _build_bw(params["stem"][0], h, 1)                   # (1, h*3, h*hidden)
    stem_b = jnp.tile(params["stem"][1], (h,)).reshape(1, h * hidden).astype(jnp.float32)

    layers = []
    h_in = h
    for lp in params["layers"]:
        h_out = h_in // 2
        t, tt = _build_t(h_out, hidden)
        layers.append(dict(
            s3_s2=_build_s(batch, h_in, 3, 2),
            s1_s2=_build_s(batch, h_in, 1, 2),
            s3_s1=_build_s(batch, h_out, 3, 1),
            t=t, tt=tt,
            bw_dc1=_build_bw(lp["down"]["conv1"][0], h_in, 2),
            bw_sc=_build_bw(lp["down"]["sc"][0], h_in, 2),
            bw_dc2=_build_bw(lp["down"]["conv2"][0], h_out, 1),
            bw_rc1=_build_bw(lp["res"]["conv1"][0], h_out, 1),
            bw_rc2=_build_bw(lp["res"]["conv2"][0], h_out, 1),
        ))
        h_in = h_out

    return dict(stem_bw=stem_bw, stem_b=stem_b, layers=layers,
                cls_token=params["cls_token"], mask_token=params["mask_token"])


# ----------------------------------------------------------------------------
# pallas_call wrapper for the fused backbone
# ----------------------------------------------------------------------------
_LAYER_KEYS = ("s3_s2", "s1_s2", "s3_s1", "t", "tt",
               "bw_dc1", "bw_sc", "bw_dc2", "bw_rc1", "bw_rc2")


def _full_spec(shape):
    nd = len(shape)
    return pl.BlockSpec(shape, lambda i, _nd=nd: (0,) * _nd)


def backbone_forward(ops, x_nchw):
    """Fused stem + ResNet backbone.  x_nchw: (N, 3, H, W) f32.
    Returns (N, H/2^L, W/2^L, hidden) f32."""
    n, c, h, w = x_nchw.shape
    hidden = ops["stem_bw"].shape[2] // w
    n_layers = len(ops["layers"])

    # lane-dense input slab: row = n*H + y, lane = x*C + c
    x_slab = jnp.transpose(x_nchw, (0, 2, 3, 1)).reshape(n * h, w * c)

    args = [x_slab, ops["stem_bw"], ops["stem_b"]]
    counts = []
    for lp in ops["layers"]:
        args.extend(lp[k] for k in _LAYER_KEYS)
        w_out = lp["bw_dc1"].shape[2] // hidden
        r_out = lp["s3_s2"].shape[1]
        counts.append(float(r_out * w_out))        # N*H_out*W_out per-channel count

    h_last = h // (2 ** n_layers)
    w_last = w // (2 ** n_layers)
    out_shape = (n * h_last, w_last * hidden)      # lane-dense output slab

    kernel = functools.partial(_backbone_kernel, counts=tuple(counts), eps=_BN_EPS)
    out = pl.pallas_call(
        kernel,
        out_shape=jax.ShapeDtypeStruct(out_shape, jnp.float32),
        grid=(1,),
        in_specs=[_full_spec(a.shape) for a in args],
        out_specs=_full_spec(out_shape),
        compiler_params=pltpu.CompilerParams(
            dimension_semantics=("arbitrary",),
            vmem_limit_bytes=32 * 1024 * 1024),
    )(*args)
    return out.reshape(n, h_last, w_last, hidden)


# ----------------------------------------------------------------------------
# Masking (patchify / random masking / unpatchify) — index glue in plain JAX
# ----------------------------------------------------------------------------
def patchify(imgs, p):                    # imgs: (N, 3, H, W)
    N, _, H, W = imgs.shape
    h = w = H // p
    x = imgs.reshape(N, 3, h, p, w, p)
    x = jnp.einsum("nchpwq->nhwpqc", x)
    return x.reshape(N, h * w, p * p * 3)


def unpatchify(x, p):                     # x: (N, L, p*p*3)
    N, L, _ = x.shape
    h = w = int(L ** 0.5)
    x = x.reshape(N, h, w, p, p, 3)
    x = jnp.einsum("nhwpqc->nchpwq", x)
    return x.reshape(N, 3, h * p, w * p)


def apply_mask(params, imgs, key, mask_ratio, p):
    x = patchify(imgs, p)
    N, L, D = x.shape
    len_keep = int(L * (1 - mask_ratio))

    noise = jax.random.uniform(key, (N, L))
    ids_shuffle = jnp.argsort(noise, axis=1)
    ids_restore = jnp.argsort(ids_shuffle, axis=1)
    ids_keep = ids_shuffle[:, :len_keep]
    x_masked = jnp.take_along_axis(
        x, jnp.repeat(ids_keep[:, :, None], D, axis=-1), axis=1)

    mask = jnp.ones((N, L), jnp.float32).at[:, :len_keep].set(0.0)
    mask = jnp.take_along_axis(mask, ids_restore, axis=1)

    cls_tokens = jnp.broadcast_to(params["cls_token"], (N, 1, D))
    xc = jnp.concatenate([cls_tokens, x_masked], axis=1)
    mask_tokens = jnp.broadcast_to(
        params["mask_token"], (N, L + 1 - xc.shape[1], D))
    x_ = jnp.concatenate([xc[:, 1:, :], mask_tokens], axis=1)
    x_ = jnp.take_along_axis(
        x_, jnp.repeat(ids_restore[:, :, None], D, axis=-1), axis=1)
    # torch code: cat cls back then drop it -> result is just x_
    imgs_masked = unpatchify(x_, p)
    return imgs_masked, mask, ids_restore


# ----------------------------------------------------------------------------
# Encoder forward
# ----------------------------------------------------------------------------
def encoder_forward(ops, imgs, noise_key, *, mask_ratio=0.75, patch_size=4):
    x_img, mask, ids_restore = apply_mask(ops, imgs, noise_key,
                                          mask_ratio, patch_size)
    feat = backbone_forward(ops, x_img)                 # (N, h, w, hidden)
    n, hh, ww, cc = feat.shape
    tokens = feat.reshape(n, hh * ww, cc)               # == NCHW reshape + permute

    # torch: x[keep_mask.bool(), :].reshape(b, -1, c) -> kept tokens, orig order
    L = mask.shape[1]
    len_keep = int(L * (1 - mask_ratio))
    keep_ids = jnp.argsort(mask, axis=1, stable=True)[:, :len_keep]
    out = jnp.take_along_axis(
        tokens, jnp.repeat(keep_ids[:, :, None], cc, axis=-1), axis=1)
    return out, mask, ids_restore


# ----------------------------------------------------------------------------
# Deterministic parameter init (matches module shapes; xavier_uniform, zero bias)
# ----------------------------------------------------------------------------
def init_params(key, img_channels=3, hidden_dim=32, patch_size=4):
    n_layers = int(math.log2(patch_size))
    keys = iter(jax.random.split(key, 8 + 8 * n_layers))

    def conv_init(kh, kw, cin, cout):
        fan_in, fan_out = cin * kh * kw, cout * kh * kw
        bound = math.sqrt(6.0 / (fan_in + fan_out))
        w = jax.random.uniform(next(keys), (kh, kw, cin, cout),
                               jnp.float32, -bound, bound)
        return w, jnp.zeros((cout,), jnp.float32)

    params = {
        "cls_token": 0.02 * jax.random.normal(
            next(keys), (1, 1, 3 * patch_size ** 2), jnp.float32),
        "mask_token": 0.02 * jax.random.normal(
            next(keys), (1, 1, 3 * patch_size ** 2), jnp.float32),
        "stem": conv_init(1, 1, img_channels, hidden_dim),
        "layers": [],
    }
    for _ in range(n_layers):
        down = {"conv1": conv_init(3, 3, hidden_dim, hidden_dim),
                "conv2": conv_init(3, 3, hidden_dim, hidden_dim),
                "sc":    conv_init(1, 1, hidden_dim, hidden_dim)}
        res = {"conv1": conv_init(3, 3, hidden_dim, hidden_dim),
               "conv2": conv_init(3, 3, hidden_dim, hidden_dim)}
        params["layers"].append({"down": down, "res": res})
    return params


# ----------------------------------------------------------------------------
# Plain-JAX f32 reference of the backbone (for a numerical sanity check)
# ----------------------------------------------------------------------------
def _ref_backbone(params, x_nchw):
    def conv(x, wb, stride):
        w, b = wb
        k = w.shape[0]
        p = (k - 1) // 2
        y = jax.lax.conv_general_dilated(
            x, w, window_strides=(stride, stride),
            padding=[(p, p), (p, p)],
            dimension_numbers=("NHWC", "HWIO", "NHWC"),
            precision=jax.lax.Precision.HIGHEST)
        return y + b

    def bn(x):
        mean = jnp.mean(x, axis=(0, 1, 2), keepdims=True)
        var = jnp.mean((x - mean) ** 2, axis=(0, 1, 2), keepdims=True)
        return (x - mean) * jax.lax.rsqrt(var + _BN_EPS)

    x = jnp.transpose(x_nchw, (0, 2, 3, 1))
    x = conv(x, params["stem"], 1)
    for lp in params["layers"]:
        d, r = lp["down"], lp["res"]
        h = jax.nn.relu(bn(conv(x, d["conv1"], 2)))
        m = bn(conv(h, d["conv2"], 1))
        s = bn(conv(x, d["sc"], 2))
        x = jax.nn.relu(m + s)
        h = jax.nn.relu(bn(conv(x, r["conv1"], 1)))
        m = bn(conv(h, r["conv2"], 1))
        x = jax.nn.relu(m + x)
    return x


# ----------------------------------------------------------------------------
if __name__ == "__main__":
    patch_size = 4          # -> n_layers = log2(4) = 2 downsampling stages
    hidden_dim = 32
    batch, H = 2, 16
    mask_ratio = 0.75

    key = jax.random.PRNGKey(0)
    pkey, xkey, nkey = jax.random.split(key, 3)

    params = init_params(pkey, img_channels=3,
                         hidden_dim=hidden_dim, patch_size=patch_size)
    ops = build_backbone_operands(params, batch=batch, img_hw=H)
    imgs = jax.random.normal(xkey, (batch, 3, H, H), jnp.float32)

    fwd = jax.jit(functools.partial(encoder_forward, mask_ratio=mask_ratio,
                                    patch_size=patch_size))
    out, mask, ids_restore = fwd(ops, imgs, nkey)
    jax.block_until_ready((out, mask, ids_restore))

    L = (H // patch_size) ** 2
    len_keep = int(L * (1 - mask_ratio))
    assert out.shape == (batch, len_keep, hidden_dim), out.shape
    assert mask.shape == (batch, L) and ids_restore.shape == (batch, L)

    # Numerical check of the fused Pallas backbone against a plain-JAX f32
    # reference (bf16 MXU operands in the kernel -> loose tolerance).
    x_img, _, _ = apply_mask(ops, imgs, nkey, mask_ratio, patch_size)
    got = backbone_forward(ops, x_img)
    ref = jax.jit(_ref_backbone)(params, x_img)
    jax.block_until_ready((got, ref))
    err = float(jnp.max(jnp.abs(got - ref)))
    assert err < 0.35, f"backbone mismatch: max abs err {err}"

    print("KERNEL_OK")
</pallas_src>

<mosaic_0001>
module attributes {stable_mosaic.version = 11 : i64} {
  func.func @_backbone_kernel(%arg0: i32, %arg1: memref<32x48xf32, #tpu.memory_space<vmem>>, %arg2: memref<1x48x512xbf16, #tpu.memory_space<vmem>>, %arg3: memref<1x512xf32, #tpu.memory_space<vmem>>, %arg4: memref<3x16x32xf32, #tpu.memory_space<vmem>>, %arg5: memref<1x16x32xf32, #tpu.memory_space<vmem>>, %arg6: memref<3x16x16xf32, #tpu.memory_space<vmem>>, %arg7: memref<256x32xf32, #tpu.memory_space<vmem>>, %arg8: memref<32x256xf32, #tpu.memory_space<vmem>>, %arg9: memref<3x512x256xbf16, #tpu.memory_space<vmem>>, %arg10: memref<1x512x256xbf16, #tpu.memory_space<vmem>>, %arg11: memref<3x256x256xbf16, #tpu.memory_space<vmem>>, %arg12: memref<3x256x256xbf16, #tpu.memory_space<vmem>>, %arg13: memref<3x256x256xbf16, #tpu.memory_space<vmem>>, %arg14: memref<3x8x16xf32, #tpu.memory_space<vmem>>, %arg15: memref<1x8x16xf32, #tpu.memory_space<vmem>>, %arg16: memref<3x8x8xf32, #tpu.memory_space<vmem>>, %arg17: memref<128x32xf32, #tpu.memory_space<vmem>>, %arg18: memref<32x128xf32, #tpu.memory_space<vmem>>, %arg19: memref<3x256x128xbf16, #tpu.memory_space<vmem>>, %arg20: memref<1x256x128xbf16, #tpu.memory_space<vmem>>, %arg21: memref<3x128x128xbf16, #tpu.memory_space<vmem>>, %arg22: memref<3x128x128xbf16, #tpu.memory_space<vmem>>, %arg23: memref<3x128x128xbf16, #tpu.memory_space<vmem>>, %arg24: memref<8x128xf32, #tpu.memory_space<vmem>>) attributes {dimension_semantics = [#tpu.dimension_semantics<arbitrary>], iteration_bounds = array<i64: 1>, scalar_prefetch = 0 : i64, scratch_operands = 0 : i64, tpu.core_type = #tpu.core_type<tc>, window_params = [{pipeline_mode = #tpu.pipeline_mode<synchronous>, transform_indices = @transform_0, window_bounds = array<i64: 32, 48>}, {pipeline_mode = #tpu.pipeline_mode<synchronous>, transform_indices = @transform_1, window_bounds = array<i64: 1, 48, 512>}, {pipeline_mode = #tpu.pipeline_mode<synchronous>, transform_indices = @transform_2, window_bounds = array<i64: 1, 512>}, {pipeline_mode = #tpu.pipeline_mode<synchronous>, transform_indices = @transform_3, window_bounds = array<i64: 3, 16, 32>}, {pipeline_mode = #tpu.pipeline_mode<synchronous>, transform_indices = @transform_4, window_bounds = array<i64: 1, 16, 32>}, {pipeline_mode = #tpu.pipeline_mode<synchronous>, transform_indices = @transform_5, window_bounds = array<i64: 3, 16, 16>}, {pipeline_mode = #tpu.pipeline_mode<synchronous>, transform_indices = @transform_6, window_bounds = array<i64: 256, 32>}, {pipeline_mode = #tpu.pipeline_mode<synchronous>, transform_indices = @transform_7, window_bounds = array<i64: 32, 256>}, {pipeline_mode = #tpu.pipeline_mode<synchronous>, transform_indices = @transform_8, window_bounds = array<i64: 3, 512, 256>}, {pipeline_mode = #tpu.pipeline_mode<synchronous>, transform_indices = @transform_9, window_bounds = array<i64: 1, 512, 256>}, {pipeline_mode = #tpu.pipeline_mode<synchronous>, transform_indices = @transform_10, window_bounds = array<i64: 3, 256, 256>}, {pipeline_mode = #tpu.pipeline_mode<synchronous>, transform_indices = @transform_11, window_bounds = array<i64: 3, 256, 256>}, {pipeline_mode = #tpu.pipeline_mode<synchronous>, transform_indices = @transform_12, window_bounds = array<i64: 3, 256, 256>}, {pipeline_mode = #tpu.pipeline_mode<synchronous>, transform_indices = @transform_13, window_bounds = array<i64: 3, 8, 16>}, {pipeline_mode = #tpu.pipeline_mode<synchronous>, transform_indices = @transform_14, window_bounds = array<i64: 1, 8, 16>}, {pipeline_mode = #tpu.pipeline_mode<synchronous>, transform_indices = @transform_15, window_bounds = array<i64: 3, 8, 8>}, {pipeline_mode = #tpu.pipeline_mode<synchronous>, transform_indices = @transform_16, window_bounds = array<i64: 128, 32>}, {pipeline_mode = #tpu.pipeline_mode<synchronous>, transform_indices = @transform_17, window_bounds = array<i64: 32, 128>}, {pipeline_mode = #tpu.pipeline_mode<synchronous>, transform_indices = @transform_18, window_bounds = array<i64: 3, 256, 128>}, {pipeline_mode = #tpu.pipeline_mode<synchronous>, transform_indices = @transform_19, window_bounds = array<i64: 1, 256, 128>}, {pipeline_mode = #tpu.pipeline_mode<synchronous>, transform_indices = @transform_20, window_bounds = array<i64: 3, 128, 128>}, {pipeline_mode = #tpu.pipeline_mode<synchronous>, transform_indices = @transform_21, window_bounds = array<i64: 3, 128, 128>}, {pipeline_mode = #tpu.pipeline_mode<synchronous>, transform_indices = @transform_22, window_bounds = array<i64: 3, 128, 128>}, {pipeline_mode = #tpu.pipeline_mode<synchronous>, transform_indices = @transform_23, window_bounds = array<i64: 8, 128>}]} {
    %c0 = arith.constant 0 : index
    %c0_0 = arith.constant 0 : index
    %0 = vector.load %arg1[%c0, %c0_0] : memref<32x48xf32, #tpu.memory_space<vmem>>, vector<32x48xf32>
    %1 = arith.truncf %0 : vector<32x48xf32> to vector<32x48xbf16>
    %c0_1 = arith.constant 0 : index
    %c0_2 = arith.constant 0 : index
    %c0_3 = arith.constant 0 : index
    %2 = vector.load %arg2[%c0_1, %c0_2, %c0_3] : memref<1x48x512xbf16, #tpu.memory_space<vmem>>, vector<1x48x512xbf16>
    %3 = vector.shape_cast %2 : vector<1x48x512xbf16> to vector<48x512xbf16>
    %cst = arith.constant dense<0.000000e+00> : vector<32x512xf32>
    %4 = tpu.matmul %1, %3, %cst {dimension_numbers = #tpu.dot_dimension_numbers<[1], [0], [0], [1], [0, 0, 1, 1], [], []>} : vector<32x48xbf16>, vector<48x512xbf16>, vector<32x512xf32> -> vector<32x512xf32>
    %c0_4 = arith.constant 0 : index
    %c0_5 = arith.constant 0 : index
    %5 = vector.load %arg3[%c0_4, %c0_5] : memref<1x512xf32, #tpu.memory_space<vmem>>, vector<1x512xf32>
    %6 = vector.broadcast %5 : vector<1x512xf32> to vector<32x512xf32>
    %7 = arith.addf %4, %6 : vector<32x512xf32>
    %c0_6 = arith.constant 0 : index
    %c0_7 = arith.constant 0 : index
    %8 = vector.load %arg7[%c0_6, %c0_7] : memref<256x32xf32, #tpu.memory_space<vmem>>, vector<256x32xf32>
    %c0_8 = arith.constant 0 : index
    %c0_9 = arith.constant 0 : index
    %9 = vector.load %arg8[%c0_8, %c0_9] : memref<32x256xf32, #tpu.memory_space<vmem>>, vector<32x256xf32>
    %10 = arith.truncf %7 : vector<32x512xf32> to vector<32x512xbf16>
    %c0_10 = arith.constant 0 : index
    %c0_11 = arith.constant 0 : index
    %c0_12 = arith.constant 0 : index
    %11 = vector.load %arg9[%c0_10, %c0_11, %c0_12] : memref<3x512x256xbf16, #tpu.memory_space<vmem>>, vector<1x512x256xbf16>
    %12 = vector.shape_cast %11 : vector<1x512x256xbf16> to vector<512x256xbf16>
    %cst_13 = arith.constant dense<0.000000e+00> : vector<32x256xf32>
    %13 = tpu.matmul %10, %12, %cst_13 {dimension_numbers = #tpu.dot_dimension_numbers<[1], [0], [0], [1], [0, 0, 1, 1], [], []>} : vector<32x512xbf16>, vector<512x256xbf16>, vector<32x256xf32> -> vector<32x256xf32>
    %c0_14 = arith.constant 0 : index
    %c0_15 = arith.constant 0 : index
    %c0_16 = arith.constant 0 : index
    %14 = vector.load %arg4[%c0_14, %c0_15, %c0_16] : memref<3x16x32xf32, #tpu.memory_space<vmem>>, vector<1x16x32xf32>
    %15 = vector.shape_cast %14 : vector<1x16x32xf32> to vector<16x32xf32>
    %cst_17 = arith.constant dense<0.000000e+00> : vector<16x256xf32>
    %16 = tpu.matmul %15, %13, %cst_17 {dimension_numbers = #tpu.dot_dimension_numbers<[1], [0], [0], [1], [0, 0, 1, 1], [], []>} : vector<16x32xf32>, vector<32x256xf32>, vector<16x256xf32> -> vector<16x256xf32>
    %c1 = arith.constant 1 : index
    %c0_18 = arith.constant 0 : index
    %c0_19 = arith.constant 0 : index
    %17 = vector.load %arg9[%c1, %c0_18, %c0_19] : memref<3x512x256xbf16, #tpu.memory_space<vmem>>, vector<1x512x256xbf16>
    %18 = vector.shape_cast %17 : vector<1x512x256xbf16> to vector<512x256xbf16>
    %cst_20 = arith.constant dense<0.000000e+00> : vector<32x256xf32>
    %19 = tpu.matmul %10, %18, %cst_20 {dimension_numbers = #tpu.dot_dimension_numbers<[1], [0], [0], [1], [0, 0, 1, 1], [], []>} : vector<32x512xbf16>, vector<512x256xbf16>, vector<32x256xf32> -> vector<32x256xf32>
    %c1_21 = arith.constant 1 : index
    %c0_22 = arith.constant 0 : index
    %c0_23 = arith.constant 0 : index
    %20 = vector.load %arg4[%c1_21, %c0_22, %c0_23] : memref<3x16x32xf32, #tpu.memory_space<vmem>>, vector<1x16x32xf32>
    %21 = vector.shape_cast %20 : vector<1x16x32xf32> to vector<16x32xf32>
    %cst_24 = arith.constant dense<0.000000e+00> : vector<16x256xf32>
    %22 = tpu.matmul %21, %19, %cst_24 {dimension_numbers = #tpu.dot_dimension_numbers<[1], [0], [0], [1], [0, 0, 1, 1], [], []>} : vector<16x32xf32>, vector<32x256xf32>, vector<16x256xf32> -> vector<16x256xf32>
    %23 = arith.addf %16, %22 : vector<16x256xf32>
    %c2 = arith.constant 2 : index
    %c0_25 = arith.constant 0 : index
    %c0_26 = arith.constant 0 : index
    %24 = vector.load %arg9[%c2, %c0_25, %c0_26] : memref<3x512x256xbf16, #tpu.memory_space<vmem>>, vector<1x512x256xbf16>
    %25 = vector.shape_cast %24 : vector<1x512x256xbf16> to vector<512x256xbf16>
    %cst_27 = arith.constant dense<0.000000e+00> : vector<32x256xf32>
    %26 = tpu.matmul %10, %25, %cst_27 {dimension_numbers = #tpu.dot_dimension_numbers<[1], [0], [0], [1], [0, 0, 1, 1], [], []>} : vector<32x512xbf16>, vector<512x256xbf16>, vector<32x256xf32> -> vector<32x256xf32>
    %c2_28 = arith.constant 2 : index
    %c0_29 = arith.constant 0 : index
    %c0_30 = arith.constant 0 : index
    %27 = vector.load %arg4[%c2_28, %c0_29, %c0_30] : memref<3x16x32xf32, #tpu.memory_space<vmem>>, vector<1x16x32xf32>
    %28 = vector.shape_cast %27 : vector<1x16x32xf32> to vector<16x32xf32>
    %cst_31 = arith.constant dense<0.000000e+00> : vector<16x256xf32>
    %29 = tpu.matmul %28, %26, %cst_31 {dimension_numbers = #tpu.dot_dimension_numbers<[1], [0], [0], [1], [0, 0, 1, 1], [], []>} : vector<16x32xf32>, vector<32x256xf32>, vector<16x256xf32> -> vector<16x256xf32>
    %30 = arith.addf %23, %29 : vector<16x256xf32>
    %cst_32 = arith.constant dense<0.000000e+00> : vector<16x32xf32>
    %31 = tpu.matmul %30, %8, %cst_32 {dimension_numbers = #tpu.dot_dimension_numbers<[1], [0], [0], [1], [0, 0, 1, 1], [], []>} : vector<16x256xf32>, vector<256x32xf32>, vector<16x32xf32> -> vector<16x32xf32>
    %cst_33 = arith.constant dense<0.000000e+00> : vector<32xf32>
    %32 = vector.multi_reduction <add>, %31, %cst_33 [0] : vector<16x32xf32> to vector<32xf32>
    %33 = vector.shape_cast %32 : vector<32xf32> to vector<1x32xf32>
    %cst_34 = arith.constant 7.812500e-03 : f32
    %34 = vector.broadcast %cst_34 : f32 to vector<1x32xf32>
    %35 = arith.mulf %33, %34 : vector<1x32xf32>
    %cst_35 = arith.constant dense<0.000000e+00> : vector<1x256xf32>
    %36 = tpu.matmul %35, %9, %cst_35 {dimension_numbers = #tpu.dot_dimension_numbers<[1], [0], [0], [1], [0, 0, 1, 1], [], []>} : vector<1x32xf32>, vector<32x256xf32>, vector<1x256xf32> -> vector<1x256xf32>
    %37 = vector.broadcast %36 : vector<1x256xf32> to vector<16x256xf32>
    %38 = arith.subf %30, %37 : vector<16x256xf32>
    %39 = arith.mulf %38, %38 : vector<16x256xf32>
    %cst_36 = arith.constant dense<0.000000e+00> : vector<16x32xf32>
    %40 = tpu.matmul %39, %8, %cst_36 {dimension_numbers = #tpu.dot_dimension_numbers<[1], [0], [0], [1], [0, 0, 1, 1], [], []>} : vector<16x256xf32>, vector<256x32xf32>, vector<16x32xf32> -> vector<16x32xf32>
    %cst_37 = arith.constant dense<0.000000e+00> : vector<32xf32>
    %41 = vector.multi_reduction <add>, %40, %cst_37 [0] : vector<16x32xf32> to vector<32xf32>
    %42 = vector.shape_cast %41 : vector<32xf32> to vector<1x32xf32>
    %cst_38 = arith.constant 7.812500e-03 : f32
    %43 = vector.broadcast %cst_38 : f32 to vector<1x32xf32>
    %44 = arith.mulf %42, %43 : vector<1x32xf32>
    %cst_39 = arith.constant dense<0.000000e+00> : vector<1x256xf32>
    %45 = tpu.matmul %44, %9, %cst_39 {dimension_numbers = #tpu.dot_dimension_numbers<[1], [0], [0], [1], [0, 0, 1, 1], [], []>} : vector<1x32xf32>, vector<32x256xf32>, vector<1x256xf32> -> vector<1x256xf32>
    %cst_40 = arith.constant 9.99999974E-6 : f32
    %46 = vector.broadcast %cst_40 : f32 to vector<1x256xf32>
    %47 = arith.addf %45, %46 : vector<1x256xf32>
    %48 = math.rsqrt %47 : vector<1x256xf32>
    %49 = vector.broadcast %48 : vector<1x256xf32> to vector<16x256xf32>
    %50 = arith.mulf %38, %49 : vector<16x256xf32>
    %cst_41 = arith.constant 0.000000e+00 : f32
    %51 = vector.broadcast %cst_41 : f32 to vector<16x256xf32>
    %52 = arith.maximumf %50, %51 : vector<16x256xf32>
    %c0_42 = arith.constant 0 : index
    %c0_43 = arith.constant 0 : index
    %c0_44 = arith.constant 0 : index
    %53 = vector.load %arg10[%c0_42, %c0_43, %c0_44] : memref<1x512x256xbf16, #tpu.memory_space<vmem>>, vector<1x512x256xbf16>
    %54 = vector.shape_cast %53 : vector<1x512x256xbf16> to vector<512x256xbf16>
    %cst_45 = arith.constant dense<0.000000e+00> : vector<32x256xf32>
    %55 = tpu.matmul %10, %54, %cst_45 {dimension_numbers = #tpu.dot_dimension_numbers<[1], [0], [0], [1], [0, 0, 1, 1], [], []>} : vector<32x512xbf16>, vector<512x256xbf16>, vector<32x256xf32> -> vector<32x256xf32>
    %c0_46 = arith.constant 0 : index
    %c0_47 = arith.constant 0 : index
    %c0_48 = arith.constant 0 : index
    %56 = vector.load %arg5[%c0_46, %c0_47, %c0_48] : memref<1x16x32xf32, #tpu.memory_space<vmem>>, vector<1x16x32xf32>
    %57 = vector.shape_cast %56 : vector<1x16x32xf32> to vector<16x32xf32>
    %cst_49 = arith.constant dense<0.000000e+00> : vector<16x256xf32>
    %58 = tpu.matmul %57, %55, %cst_49 {dimension_numbers = #tpu.dot_dimension_numbers<[1], [0], [0], [1], [0, 0, 1, 1], [], []>} : vector<16x32xf32>, vector<32x256xf32>, vector<16x256xf32> -> vector<16x256xf32>
    %cst_50 = arith.constant dense<0.000000e+00> : vector<16x32xf32>
    %59 = tpu.matmul %58, %8, %cst_50 {dimension_numbers = #tpu.dot_dimension_numbers<[1], [0], [0], [1], [0, 0, 1, 1], [], []>} : vector<16x256xf32>, vector<256x32xf32>, vector<16x32xf32> -> vector<16x32xf32>
    %cst_51 = arith.constant dense<0.000000e+00> : vector<32xf32>
    %60 = vector.multi_reduction <add>, %59, %cst_51 [0] : vector<16x32xf32> to vector<32xf32>
    %61 = vector.shape_cast %60 : vector<32xf32> to vector<1x32xf32>
    %cst_52 = arith.constant 7.812500e-03 : f32
    %62 = vector.broadcast %cst_52 : f32 to vector<1x32xf32>
    %63 = arith.mulf %61, %62 : vector<1x32xf32>
    %cst_53 = arith.constant dense<0.000000e+00> : vector<1x256xf32>
    %64 = tpu.matmul %63, %9, %cst_53 {dimension_numbers = #tpu.dot_dimension_numbers<[1], [0], [0], [1], [0, 0, 1, 1], [], []>} : vector<1x32xf32>, vector<32x256xf32>, vector<1x256xf32> -> vector<1x256xf32>
    %65 = vector.broadcast %64 : vector<1x256xf32> to vector<16x256xf32>
    %66 = arith.subf %58, %65 : vector<16x256xf32>
    %67 = arith.mulf %66, %66 : vector<16x256xf32>
    %cst_54 = arith.constant dense<0.000000e+00> : vector<16x32xf32>
    %68 = tpu.matmul %67, %8, %cst_54 {dimension_numbers = #tpu.dot_dimension_numbers<[1], [0], [0], [1], [0, 0, 1, 1], [], []>} : vector<16x256xf32>, vector<256x32xf32>, vector<16x32xf32> -> vector<16x32xf32>
    %cst_55 = arith.constant dense<0.000000e+00> : vector<32xf32>
    %69 = vector.multi_reduction <add>, %68, %cst_55 [0] : vector<16x32xf32> to vector<32xf32>
    %70 = vector.shape_cast %69 : vector<32xf32> to vector<1x32xf32>
    %cst_56 = arith.constant 7.812500e-03 : f32
    %71 = vector.broadcast %cst_56 : f32 to vector<1x32xf32>
    %72 = arith.mulf %70, %71 : vector<1x32xf32>
    %cst_57 = arith.constant dense<0.000000e+00> : vector<1x256xf32>
    %73 = tpu.matmul %72, %9, %cst_57 {dimension_numbers = #tpu.dot_dimension_numbers<[1], [0], [0], [1], [0, 0, 1, 1], [], []>} : vector<1x32xf32>, vector<32x256xf32>, vector<1x256xf32> -> vector<1x256xf32>
    %cst_58 = arith.constant 9.99999974E-6 : f32
    %74 = vector.broadcast %cst_58 : f32 to vector<1x256xf32>
    %75 = arith.addf %73, %74 : vector<1x256xf32>
    %76 = math.rsqrt %75 : vector<1x256xf32>
    %77 = vector.broadcast %76 : vector<1x256xf32> to vector<16x256xf32>
    %78 = arith.mulf %66, %77 : vector<16x256xf32>
    %79 = arith.truncf %52 : vector<16x256xf32> to vector<16x256xbf16>
    %c0_59 = arith.constant 0 : index
    %c0_60 = arith.constant 0 : index
    %c0_61 = arith.constant 0 : index
    %80 = vector.load %arg11[%c0_59, %c0_60, %c0_61] : memref<3x256x256xbf16, #tpu.memory_space<vmem>>, vector<1x256x256xbf16>
    %81 = vector.shape_cast %80 : vector<1x256x256xbf16> to vector<256x256xbf16>
    %cst_62 = arith.constant dense<0.000000e+00> : vector<16x256xf32>
    %82 = tpu.matmul %79, %81, %cst_62 {dimension_numbers = #tpu.dot_dimension_numbers<[1], [0], [0], [1], [0, 0, 1, 1], [], []>} : vector<16x256xbf16>, vector<256x256xbf16>, vector<16x256xf32> -> vector<16x256xf32>
    %c0_63 = arith.constant 0 : index
    %c0_64 = arith.constant 0 : index
    %c0_65 = arith.constant 0 : index
    %83 = vector.load %arg6[%c0_63, %c0_64, %c0_65] : memref<3x16x16xf32, #tpu.memory_space<vmem>>, vector<1x16x16xf32>
    %84 = vector.shape_cast %83 : vector<1x16x16xf32> to vector<16x16xf32>
    %cst_66 = arith.constant dense<0.000000e+00> : vector<16x256xf32>
    %85 = tpu.matmul %84, %82, %cst_66 {dimension_numbers = #tpu.dot_dimension_numbers<[1], [0], [0], [1], [0, 0, 1, 1], [], []>} : vector<16x16xf32>, vector<16x256xf32>, vector<16x256xf32> -> vector<16x256xf32>
    %c1_67 = arith.constant 1 : index
    %c0_68 = arith.constant 0 : index
    %c0_69 = arith.constant 0 : index
    %86 = vector.load %arg11[%c1_67, %c0_68, %c0_69] : memref<3x256x256xbf16, #tpu.memory_space<vmem>>, vector<1x256x256xbf16>
    %87 = vector.shape_cast %86 : vector<1x256x256xbf16> to vector<256x256xbf16>
    %cst_70 = arith.constant dense<0.000000e+00> : vector<16x256xf32>
    %88 = tpu.matmul %79, %87, %cst_70 {dimension_numbers = #tpu.dot_dimension_numbers<[1], [0], [0], [1], [0, 0, 1, 1], [], []>} : vector<16x256xbf16>, vector<256x256xbf16>, vector<16x256xf32> -> vector<16x256xf32>
    %c1_71 = arith.constant 1 : index
    %c0_72 = arith.constant 0 : index
    %c0_73 = arith.constant 0 : index
    %89 = vector.load %arg6[%c1_71, %c0_72, %c0_73] : memref<3x16x16xf32, #tpu.memory_space<vmem>>, vector<1x16x16xf32>
    %90 = vector.shape_cast %89 : vector<1x16x16xf32> to vector<16x16xf32>
    %cst_74 = arith.constant dense<0.000000e+00> : vector<16x256xf32>
    %91 = tpu.matmul %90, %88, %cst_74 {dimension_numbers = #tpu.dot_dimension_numbers<[1], [0], [0], [1], [0, 0, 1, 1], [], []>} : vector<16x16xf32>, vector<16x256xf32>, vector<16x256xf32> -> vector<16x256xf32>
    %92 = arith.addf %85, %91 : vector<16x256xf32>
    %c2_75 = arith.constant 2 : index
    %c0_76 = arith.constant 0 : index
    %c0_77 = arith.constant 0 : index
    %93 = vector.load %arg11[%c2_75, %c0_76, %c0_77] : memref<3x256x256xbf16, #tpu.memory_space<vmem>>, vector<1x256x256xbf16>
    %94 = vector.shape_cast %93 : vector<1x256x256xbf16> to vector<256x256xbf16>
    %cst_78 = arith.constant dense<0.000000e+00> : vector<16x256xf32>
    %95 = tpu.matmul %79, %94, %cst_78 {dimension_numbers = #tpu.dot_dimension_numbers<[1], [0], [0], [1], [0, 0, 1, 1], [], []>} : vector<16x256xbf16>, vector<256x256xbf16>, vector<16x256xf32> -> vector<16x256xf32>
    %c2_79 = arith.constant 2 : index
    %c0_80 = arith.constant 0 : index
    %c0_81 = arith.constant 0 : index
    %96 = vector.load %arg6[%c2_79, %c0_80, %c0_81] : memref<3x16x16xf32, #tpu.memory_space<vmem>>, vector<1x16x16xf32>
    %97 = vector.shape_cast %96 : vector<1x16x16xf32> to vector<16x16xf32>
    %cst_82 = arith.constant dense<0.000000e+00> : vector<16x256xf32>
    %98 = tpu.matmul %97, %95, %cst_82 {dimension_numbers = #tpu.dot_dimension_numbers<[1], [0], [0], [1], [0, 0, 1, 1], [], []>} : vector<16x16xf32>, vector<16x256xf32>, vector<16x256xf32> -> vector<16x256xf32>
    %99 = arith.addf %92, %98 : vector<16x256xf32>
    %cst_83 = arith.constant dense<0.000000e+00> : vector<16x32xf32>
    %100 = tpu.matmul %99, %8, %cst_83 {dimension_numbers = #tpu.dot_dimension_numbers<[1], [0], [0], [1], [0, 0, 1, 1], [], []>} : vector<16x256xf32>, vector<256x32xf32>, vector<16x32xf32> -> vector<16x32xf32>
    %cst_84 = arith.constant dense<0.000000e+00> : vector<32xf32>
    %101 = vector.multi_reduction <add>, %100, %cst_84 [0] : vector<16x32xf32> to vector<32xf32>
    %102 = vector.shape_cast %101 : vector<32xf32> to vector<1x32xf32>
    %cst_85 = arith.constant 7.812500e-03 : f32
    %103 = vector.broadcast %cst_85 : f32 to vector<1x32xf32>
    %104 = arith.mulf %102, %103 : vector<1x32xf32>
    %cst_86 = arith.constant dense<0.000000e+00> : vector<1x256xf32>
    %105 = tpu.matmul %104, %9, %cst_86 {dimension_numbers = #tpu.dot_dimension_numbers<[1], [0], [0], [1], [0, 0, 1, 1], [], []>} : vector<1x32xf32>, vector<32x256xf32>, vector<1x256xf32> -> vector<1x256xf32>
    %106 = vector.broadcast %105 : vector<1x256xf32> to vector<16x256xf32>
    %107 = arith.subf %99, %106 : vector<16x256xf32>
    %108 = arith.mulf %107, %107 : vector<16x256xf32>
    %cst_87 = arith.constant dense<0.000000e+00> : vector<16x32xf32>
    %109 = tpu.matmul %108, %8, %cst_87 {dimension_numbers = #tpu.dot_dimension_numbers<[1], [0], [0], [1], [0, 0, 1, 1], [], []>} : vector<16x256xf32>, vector<256x32xf32>, vector<16x32xf32> -> vector<16x32xf32>
    %cst_88 = arith.constant dense<0.000000e+00> : vector<32xf32>
    %110 = vector.multi_reduction <add>, %109, %cst_88 [0] : vector<16x32xf32> to vector<32xf32>
    %111 = vector.shape_cast %110 : vector<32xf32> to vector<1x32xf32>
    %cst_89 = arith.constant 7.812500e-03 : f32
    %112 = vector.broadcast %cst_89 : f32 to vector<1x32xf32>
    %113 = arith.mulf %111, %112 : vector<1x32xf32>
    %cst_90 = arith.constant dense<0.000000e+00> : vector<1x256xf32>
    %114 = tpu.matmul %113, %9, %cst_90 {dimension_numbers = #tpu.dot_dimension_numbers<[1], [0], [0], [1], [0, 0, 1, 1], [], []>} : vector<1x32xf32>, vector<32x256xf32>, vector<1x256xf32> -> vector<1x256xf32>
    %cst_91 = arith.constant 9.99999974E-6 : f32
    %115 = vector.broadcast %cst_91 : f32 to vector<1x256xf32>
    %116 = arith.addf %114, %115 : vector<1x256xf32>
    %117 = math.rsqrt %116 : vector<1x256xf32>
    %118 = vector.broadcast %117 : vector<1x256xf32> to vector<16x256xf32>
    %119 = arith.mulf %107, %118 : vector<16x256xf32>
    %120 = arith.addf %119, %78 : vector<16x256xf32>
    %cst_92 = arith.constant 0.000000e+00 : f32
    %121 = vector.broadcast %cst_92 : f32 to vector<16x256xf32>
    %122 = arith.maximumf %120, %121 : vector<16x256xf32>
    %123 = arith.truncf %122 : vector<16x256xf32> to vector<16x256xbf16>
    %c0_93 = arith.constant 0 : index
    %c0_94 = arith.constant 0 : index
    %c0_95 = arith.constant 0 : index
    %124 = vector.load %arg12[%c0_93, %c0_94, %c0_95] : memref<3x256x256xbf16, #tpu.memory_space<vmem>>, vector<1x256x256xbf16>
    %125 = vector.shape_cast %124 : vector<1x256x256xbf16> to vector<256x256xbf16>
    %cst_96 = arith.constant dense<0.000000e+00> : vector<16x256xf32>
    %126 = tpu.matmul %123, %125, %cst_96 {dimension_numbers = #tpu.dot_dimension_numbers<[1], [0], [0], [1], [0, 0, 1, 1], [], []>} : vector<16x256xbf16>, vector<256x256xbf16>, vector<16x256xf32> -> vector<16x256xf32>
    %c0_97 = arith.constant 0 : index
    %c0_98 = arith.constant 0 : index
    %c0_99 = arith.constant 0 : index
    %127 = vector.load %arg6[%c0_97, %c0_98, %c0_99] : memref<3x16x16xf32, #tpu.memory_space<vmem>>, vector<1x16x16xf32>
    %128 = vector.shape_cast %127 : vector<1x16x16xf32> to vector<16x16xf32>
    %cst_100 = arith.constant dense<0.000000e+00> : vector<16x256xf32>
    %129 = tpu.matmul %128, %126, %cst_100 {dimension_numbers = #tpu.dot_dimension_numbers<[1], [0], [0], [1], [0, 0, 1, 1], [], []>} : vector<16x16xf32>, vector<16x256xf32>, vector<16x256xf32> -> vector<16x256xf32>
    %c1_101 = arith.constant 1 : index
    %c0_102 = arith.constant 0 : index
    %c0_103 = arith.constant 0 : index
    %130 = vector.load %arg12[%c1_101, %c0_102, %c0_103] : memref<3x256x256xbf16, #tpu.memory_space<vmem>>, vector<1x256x256xbf16>
    %131 = vector.shape_cast %130 : vector<1x256x256xbf16> to vector<256x256xbf16>
    %cst_104 = arith.constant dense<0.000000e+00> : vector<16x256xf32>
    %132 = tpu.matmul %123, %131, %cst_104 {dimension_numbers = #tpu.dot_dimension_numbers<[1], [0], [0], [1], [0, 0, 1, 1], [], []>} : vector<16x256xbf16>, vector<256x256xbf16>, vector<16x256xf32> -> vector<16x256xf32>
    %c1_105 = arith.constant 1 : index
    %c0_106 = arith.constant 0 : index
    %c0_107 = arith.constant 0 : index
    %133 = vector.load %arg6[%c1_105, %c0_106, %c0_107] : memref<3x16x16xf32, #tpu.memory_space<vmem>>, vector<1x16x16xf32>
    %134 = vector.shape_cast %133 : vector<1x16x16xf32> to vector<16x16xf32>
    %cst_108 = arith.constant dense<0.000000e+00> : vector<16x256xf32>
    %135 = tpu.matmul %134, %132, %cst_108 {dimension_numbers = #tpu.dot_dimension_numbers<[1], [0], [0], [1], [0, 0, 1, 1], [], []>} : vector<16x16xf32>, vector<16x256xf32>, vector<16x256xf32> -> vector<16x256xf32>
    %136 = arith.addf %129, %135 : vector<16x256xf32>
    %c2_109 = arith.constant 2 : index
    %c0_110 = arith.constant 0 : index
    %c0_111 = arith.constant 0 : index
    %137 = vector.load %arg12[%c2_109, %c0_110, %c0_111] : memref<3x256x256xbf16, #tpu.memory_space<vmem>>, vector<1x256x256xbf16>
    %138 = vector.shape_cast %137 : vector<1x256x256xbf16> to vector<256x256xbf16>
    %cst_112 = arith.constant dense<0.000000e+00> : vector<16x256xf32>
    %139 = tpu.matmul %123, %138, %cst_112 {dimension_numbers = #tpu.dot_dimension_numbers<[1], [0], [0], [1], [0, 0, 1, 1], [], []>} : vector<16x256xbf16>, vector<256x256xbf16>, vector<16x256xf32> -> vector<16x256xf32>
    %c2_113 = arith.constant 2 : index
    %c0_114 = arith.constant 0 : index
    %c0_115 = arith.constant 0 : index
    %140 = vector.load %arg6[%c2_113, %c0_114, %c0_115] : memref<3x16x16xf32, #tpu.memory_space<vmem>>, vector<1x16x16xf32>
    %141 = vector.shape_cast %140 : vector<1x16x16xf32> to vector<16x16xf32>
    %cst_116 = arith.constant dense<0.000000e+00> : vector<16x256xf32>
    %142 = tpu.matmul %141, %139, %cst_116 {dimension_numbers = #tpu.dot_dimension_numbers<[1], [0], [0], [1], [0, 0, 1, 1], [], []>} : vector<16x16xf32>, vector<16x256xf32>, vector<16x256xf32> -> vector<16x256xf32>
    %143 = arith.addf %136, %142 : vector<16x256xf32>
    %cst_117 = arith.constant dense<0.000000e+00> : vector<16x32xf32>
    %144 = tpu.matmul %143, %8, %cst_117 {dimension_numbers = #tpu.dot_dimension_numbers<[1], [0], [0], [1], [0, 0, 1, 1], [], []>} : vector<16x256xf32>, vector<256x32xf32>, vector<16x32xf32> -> vector<16x32xf32>
    %cst_118 = arith.constant dense<0.000000e+00> : vector<32xf32>
    %145 = vector.multi_reduction <add>, %144, %cst_118 [0] : vector<16x32xf32> to vector<32xf32>
    %146 = vector.shape_cast %145 : vector<32xf32> to vector<1x32xf32>
    %cst_119 = arith.constant 7.812500e-03 : f32
    %147 = vector.broadcast %cst_119 : f32 to vector<1x32xf32>
    %148 = arith.mulf %146, %147 : vector<1x32xf32>
    %cst_120 = arith.constant dense<0.000000e+00> : vector<1x256xf32>
    %149 = tpu.matmul %148, %9, %cst_120 {dimension_numbers = #tpu.dot_dimension_numbers<[1], [0], [0], [1], [0, 0, 1, 1], [], []>} : vector<1x32xf32>, vector<32x256xf32>, vector<1x256xf32> -> vector<1x256xf32>
    %150 = vector.broadcast %149 : vector<1x256xf32> to vector<16x256xf32>
    %151 = arith.subf %143, %150 : vector<16x256xf32>
    %152 = arith.mulf %151, %151 : vector<16x256xf32>
    %cst_121 = arith.constant dense<0.000000e+00> : vector<16x32xf32>
    %153 = tpu.matmul %152, %8, %cst_121 {dimension_numbers = #tpu.dot_dimension_numbers<[1], [0], [0], [1], [0, 0, 1, 1], [], []>} : vector<16x256xf32>, vector<256x32xf32>, vector<16x32xf32> -> vector<16x32xf32>
    %cst_122 = arith.constant dense<0.000000e+00> : vector<32xf32>
    %154 = vector.multi_reduction <add>, %153, %cst_122 [0] : vector<16x32xf32> to vector<32xf32>
    %155 = vector.shape_cast %154 : vector<32xf32> to vector<1x32xf32>
    %cst_123 = arith.constant 7.812500e-03 : f32
    %156 = vector.broadcast %cst_123 : f32 to vector<1x32xf32>
    %157 = arith.mulf %155, %156 : vector<1x32xf32>
    %cst_124 = arith.constant dense<0.000000e+00> : vector<1x256xf32>
    %158 = tpu.matmul %157, %9, %cst_124 {dimension_numbers = #tpu.dot_dimension_numbers<[1], [0], [0], [1], [0, 0, 1, 1], [], []>} : vector<1x32xf32>, vector<32x256xf32>, vector<1x256xf32> -> vector<1x256xf32>
    %cst_125 = arith.constant 9.99999974E-6 : f32
    %159 = vector.broadcast %cst_125 : f32 to vector<1x256xf32>
    %160 = arith.addf %158, %159 : vector<1x256xf32>
    %161 = math.rsqrt %160 : vector<1x256xf32>
    %162 = vector.broadcast %161 : vector<1x256xf32> to vector<16x256xf32>
    %163 = arith.mulf %151, %162 : vector<16x256xf32>
    %cst_126 = arith.constant 0.000000e+00 : f32
    %164 = vector.broadcast %cst_126 : f32 to vector<16x256xf32>
    %165 = arith.maximumf %163, %164 : vector<16x256xf32>
    %166 = arith.truncf %165 : vector<16x256xf32> to vector<16x256xbf16>
    %c0_127 = arith.constant 0 : index
    %c0_128 = arith.constant 0 : index
    %c0_129 = arith.constant 0 : index
    %167 = vector.load %arg13[%c0_127, %c0_128, %c0_129] : memref<3x256x256xbf16, #tpu.memory_space<vmem>>, vector<1x256x256xbf16>
    %168 = vector.shape_cast %167 : vector<1x256x256xbf16> to vector<256x256xbf16>
    %cst_130 = arith.constant dense<0.000000e+00> : vector<16x256xf32>
    %169 = tpu.matmul %166, %168, %cst_130 {dimension_numbers = #tpu.dot_dimension_numbers<[1], [0], [0], [1], [0, 0, 1, 1], [], []>} : vector<16x256xbf16>, vector<256x256xbf16>, vector<16x256xf32> -> vector<16x256xf32>
    %c0_131 = arith.constant 0 : index
    %c0_132 = arith.constant 0 : index
    %c0_133 = arith.constant 0 : index
    %170 = vector.load %arg6[%c0_131, %c0_132, %c0_133] : memref<3x16x16xf32, #tpu.memory_space<vmem>>, vector<1x16x16xf32>
    %171 = vector.shape_cast %170 : vector<1x16x16xf32> to vector<16x16xf32>
    %cst_134 = arith.constant dense<0.000000e+00> : vector<16x256xf32>
    %172 = tpu.matmul %171, %169, %cst_134 {dimension_numbers = #tpu.dot_dimension_numbers<[1], [0], [0], [1], [0, 0, 1, 1], [], []>} : vector<16x16xf32>, vector<16x256xf32>, vector<16x256xf32> -> vector<16x256xf32>
    %c1_135 = arith.constant 1 : index
    %c0_136 = arith.constant 0 : index
    %c0_137 = arith.constant 0 : index
    %173 = vector.load %arg13[%c1_135, %c0_136, %c0_137] : memref<3x256x256xbf16, #tpu.memory_space<vmem>>, vector<1x256x256xbf16>
    %174 = vector.shape_cast %173 : vector<1x256x256xbf16> to vector<256x256xbf16>
    %cst_138 = arith.constant dense<0.000000e+00> : vector<16x256xf32>
    %175 = tpu.matmul %166, %174, %cst_138 {dimension_numbers = #tpu.dot_dimension_numbers<[1], [0], [0], [1], [0, 0, 1, 1], [], []>} : vector<16x256xbf16>, vector<256x256xbf16>, vector<16x256xf32> -> vector<16x256xf32>
    %c1_139 = arith.constant 1 : index
    %c0_140 = arith.constant 0 : index
    %c0_141 = arith.constant 0 : index
    %176 = vector.load %arg6[%c1_139, %c0_140, %c0_141] : memref<3x16x16xf32, #tpu.memory_space<vmem>>, vector<1x16x16xf32>
    %177 = vector.shape_cast %176 : vector<1x16x16xf32> to vector<16x16xf32>
    %cst_142 = arith.constant dense<0.000000e+00> : vector<16x256xf32>
    %178 = tpu.matmul %177, %175, %cst_142 {dimension_numbers = #tpu.dot_dimension_numbers<[1], [0], [0], [1], [0, 0, 1, 1], [], []>} : vector<16x16xf32>, vector<16x256xf32>, vector<16x256xf32> -> vector<16x256xf32>
    %179 = arith.addf %172, %178 : vector<16x256xf32>
    %c2_143 = arith.constant 2 : index
    %c0_144 = arith.constant 0 : index
    %c0_145 = arith.constant 0 : index
    %180 = vector.load %arg13[%c2_143, %c0_144, %c0_145] : memref<3x256x256xbf16, #tpu.memory_space<vmem>>, vector<1x256x256xbf16>
    %181 = vector.shape_cast %180 : vector<1x256x256xbf16> to vector<256x256xbf16>
    %cst_146 = arith.constant dense<0.000000e+00> : vector<16x256xf32>
    %182 = tpu.matmul %166, %181, %cst_146 {dimension_numbers = #tpu.dot_dimension_numbers<[1], [0], [0], [1], [0, 0, 1, 1], [], []>} : vector<16x256xbf16>, vector<256x256xbf16>, vector<16x256xf32> -> vector<16x256xf32>
    %c2_147 = arith.constant 2 : index
    %c0_148 = arith.constant 0 : index
    %c0_149 = arith.constant 0 : index
    %183 = vector.load %arg6[%c2_147, %c0_148, %c0_149] : memref<3x16x16xf32, #tpu.memory_space<vmem>>, vector<1x16x16xf32>
    %184 = vector.shape_cast %183 : vector<1x16x16xf32> to vector<16x16xf32>
    %cst_150 = arith.constant dense<0.000000e+00> : vector<16x256xf32>
    %185 = tpu.matmul %184, %182, %cst_150 {dimension_numbers = #tpu.dot_dimension_numbers<[1], [0], [0], [1], [0, 0, 1, 1], [], []>} : vector<16x16xf32>, vector<16x256xf32>, vector<16x256xf32> -> vector<16x256xf32>
    %186 = arith.addf %179, %185 : vector<16x256xf32>
    %cst_151 = arith.constant dense<0.000000e+00> : vector<16x32xf32>
    %187 = tpu.matmul %186, %8, %cst_151 {dimension_numbers = #tpu.dot_dimension_numbers<[1], [0], [0], [1], [0, 0, 1, 1], [], []>} : vector<16x256xf32>, vector<256x32xf32>, vector<16x32xf32> -> vector<16x32xf32>
    %cst_152 = arith.constant dense<0.000000e+00> : vector<32xf32>
    %188 = vector.multi_reduction <add>, %187, %cst_152 [0] : vector<16x32xf32> to vector<32xf32>
    %189 = vector.shape_cast %188 : vector<32xf32> to vector<1x32xf32>
    %cst_153 = arith.constant 7.812500e-03 : f32
    %190 = vector.broadcast %cst_153 : f32 to vector<1x32xf32>
    %191 = arith.mulf %189, %190 : vector<1x32xf32>
    %cst_154 = arith.constant dense<0.000000e+00> : vector<1x256xf32>
    %192 = tpu.matmul %191, %9, %cst_154 {dimension_numbers = #tpu.dot_dimension_numbers<[1], [0], [0], [1], [0, 0, 1, 1], [], []>} : vector<1x32xf32>, vector<32x256xf32>, vector<1x256xf32> -> vector<1x256xf32>
    %193 = vector.broadcast %192 : vector<1x256xf32> to vector<16x256xf32>
    %194 = arith.subf %186, %193 : vector<16x256xf32>
    %195 = arith.mulf %194, %194 : vector<16x256xf32>
    %cst_155 = arith.constant dense<0.000000e+00> : vector<16x32xf32>
    %196 = tpu.matmul %195, %8, %cst_155 {dimension_numbers = #tpu.dot_dimension_numbers<[1], [0], [0], [1], [0, 0, 1, 1], [], []>} : vector<16x256xf32>, vector<256x32xf32>, vector<16x32xf32> -> vector<16x32xf32>
    %cst_156 = arith.constant dense<0.000000e+00> : vector<32xf32>
    %197 = vector.multi_reduction <add>, %196, %cst_156 [0] : vector<16x32xf32> to vector<32xf32>
    %198 = vector.shape_cast %197 : vector<32xf32> to vector<1x32xf32>
    %cst_157 = arith.constant 7.812500e-03 : f32
    %199 = vector.broadcast %cst_157 : f32 to vector<1x32xf32>
    %200 = arith.mulf %198, %199 : vector<1x32xf32>
    %cst_158 = arith.constant dense<0.000000e+00> : vector<1x256xf32>
    %201 = tpu.matmul %200, %9, %cst_158 {dimension_numbers = #tpu.dot_dimension_numbers<[1], [0], [0], [1], [0, 0, 1, 1], [], []>} : vector<1x32xf32>, vector<32x256xf32>, vector<1x256xf32> -> vector<1x256xf32>
    %cst_159 = arith.constant 9.99999974E-6 : f32
    %202 = vector.broadcast %cst_159 : f32 to vector<1x256xf32>
    %203 = arith.addf %201, %202 : vector<1x256xf32>
    %204 = math.rsqrt %203 : vector<1x256xf32>
    %205 = vector.broadcast %204 : vector<1x256xf32> to vector<16x256xf32>
    %206 = arith.mulf %194, %205 : vector<16x256xf32>
    %207 = arith.addf %206, %122 : vector<16x256xf32>
    %cst_160 = arith.constant 0.000000e+00 : f32
    %208 = vector.broadcast %cst_160 : f32 to vector<16x256xf32>
    %209 = arith.maximumf %207, %208 : vector<16x256xf32>
    %c0_161 = arith.constant 0 : index
    %c0_162 = arith.constant 0 : index
    %210 = vector.load %arg17[%c0_161, %c0_162] : memref<128x32xf32, #tpu.memory_space<vmem>>, vector<128x32xf32>
    %c0_163 = arith.constant 0 : index
    %c0_164 = arith.constant 0 : index
    %211 = vector.load %arg18[%c0_163, %c0_164] : memref<32x128xf32, #tpu.memory_space<vmem>>, vector<32x128xf32>
    %212 = arith.truncf %209 : vector<16x256xf32> to vector<16x256xbf16>
    %c0_165 = arith.constant 0 : index
    %c0_166 = arith.constant 0 : index
    %c0_167 = arith.constant 0 : index
    %213 = vector.load %arg19[%c0_165, %c0_166, %c0_167] : memref<3x256x128xbf16, #tpu.memory_space<vmem>>, vector<1x256x128xbf16>
    %214 = vector.shape_cast %213 : vector<1x256x128xbf16> to vector<256x128xbf16>
    %cst_168 = arith.constant dense<0.000000e+00> : vector<16x128xf32>
    %215 = tpu.matmul %212, %214, %cst_168 {dimension_numbers = #tpu.dot_dimension_numbers<[1], [0], [0], [1], [0, 0, 1, 1], [], []>} : vector<16x256xbf16>, vector<256x128xbf16>, vector<16x128xf32> -> vector<16x128xf32>
    %c0_169 = arith.constant 0 : index
    %c0_170 = arith.constant 0 : index
    %c0_171 = arith.constant 0 : index
    %216 = vector.load %arg14[%c0_169, %c0_170, %c0_171] : memref<3x8x16xf32, #tpu.memory_space<vmem>>, vector<1x8x16xf32>
    %217 = vector.shape_cast %216 : vector<1x8x16xf32> to vector<8x16xf32>
    %cst_172 = arith.constant dense<0.000000e+00> : vector<8x128xf32>
    %218 = tpu.matmul %217, %215, %cst_172 {dimension_numbers = #tpu.dot_dimension_numbers<[1], [0], [0], [1], [0, 0, 1, 1], [], []>} : vector<8x16xf32>, vector<16x128xf32>, vector<8x128xf32> -> vector<8x128xf32>
    %c1_173 = arith.constant 1 : index
    %c0_174 = arith.constant 0 : index
    %c0_175 = arith.constant 0 : index
    %219 = vector.load %arg19[%c1_173, %c0_174, %c0_175] : memref<3x256x128xbf16, #tpu.memory_space<vmem>>, vector<1x256x128xbf16>
    %220 = vector.shape_cast %219 : vector<1x256x128xbf16> to vector<256x128xbf16>
    %cst_176 = arith.constant dense<0.000000e+00> : vector<16x128xf32>
    %221 = tpu.matmul %212, %220, %cst_176 {dimension_numbers = #tpu.dot_dimension_numbers<[1], [0], [0], [1], [0, 0, 1, 1], [], []>} : vector<16x256xbf16>, vector<256x128xbf16>, vector<16x128xf32> -> vector<16x128xf32>
    %c1_177 = arith.constant 1 : index
    %c0_178 = arith.constant 0 : index
    %c0_179 = arith.constant 0 : index
    %222 = vector.load %arg14[%c1_177, %c0_178, %c0_179] : memref<3x8x16xf32, #tpu.memory_space<vmem>>, vector<1x8x16xf32>
    %223 = vector.shape_cast %222 : vector<1x8x16xf32> to vector<8x16xf32>
    %cst_180 = arith.constant dense<0.000000e+00> : vector<8x128xf32>
    %224 = tpu.matmul %223, %221, %cst_180 {dimension_numbers = #tpu.dot_dimension_numbers<[1], [0], [0], [1], [0, 0, 1, 1], [], []>} : vector<8x16xf32>, vector<16x128xf32>, vector<8x128xf32> -> vector<8x128xf32>
    %225 = arith.addf %218, %224 : vector<8x128xf32>
    %c2_181 = arith.constant 2 : index
    %c0_182 = arith.constant 0 : index
    %c0_183 = arith.constant 0 : index
    %226 = vector.load %arg19[%c2_181, %c0_182, %c0_183] : memref<3x256x128xbf16, #tpu.memory_space<vmem>>, vector<1x256x128xbf16>
    %227 = vector.shape_cast %226 : vector<1x256x128xbf16> to vector<256x128xbf16>
    %cst_184 = arith.constant dense<0.000000e+00> : vector<16x128xf32>
    %228 = tpu.matmul %212, %227, %cst_184 {dimension_numbers = #tpu.dot_dimension_numbers<[1], [0], [0], [1], [0, 0, 1, 1], [], []>} : vector<16x256xbf16>, vector<256x128xbf16>, vector<16x128xf32> -> vector<16x128xf32>
    %c2_185 = arith.constant 2 : index
    %c0_186 = arith.constant 0 : index
    %c0_187 = arith.constant 0 : index
    %229 = vector.load %arg14[%c2_185, %c0_186, %c0_187] : memref<3x8x16xf32, #tpu.memory_space<vmem>>, vector<1x8x16xf32>
    %230 = vector.shape_cast %229 : vector<1x8x16xf32> to vector<8x16xf32>
    %cst_188 = arith.constant dense<0.000000e+00> : vector<8x128xf32>
    %231 = tpu.matmul %230, %228, %cst_188 {dimension_numbers = #tpu.dot_dimension_numbers<[1], [0], [0], [1], [0, 0, 1, 1], [], []>} : vector<8x16xf32>, vector<16x128xf32>, vector<8x128xf32> -> vector<8x128xf32>
    %232 = arith.addf %225, %231 : vector<8x128xf32>
    %cst_189 = arith.constant dense<0.000000e+00> : vector<8x32xf32>
    %233 = tpu.matmul %232, %210, %cst_189 {dimension_numbers = #tpu.dot_dimension_numbers<[1], [0], [0], [1], [0, 0, 1, 1], [], []>} : vector<8x128xf32>, vector<128x32xf32>, vector<8x32xf32> -> vector<8x32xf32>
    %cst_190 = arith.constant dense<0.000000e+00> : vector<32xf32>
    %234 = vector.multi_reduction <add>, %233, %cst_190 [0] : vector<8x32xf32> to vector<32xf32>
    %235 = vector.shape_cast %234 : vector<32xf32> to vector<1x32xf32>
    %cst_191 = arith.constant 3.125000e-02 : f32
    %236 = vector.broadcast %cst_191 : f32 to vector<1x32xf32>
    %237 = arith.mulf %235, %236 : vector<1x32xf32>
    %cst_192 = arith.constant dense<0.000000e+00> : vector<1x128xf32>
    %238 = tpu.matmul %237, %211, %cst_192 {dimension_numbers = #tpu.dot_dimension_numbers<[1], [0], [0], [1], [0, 0, 1, 1], [], []>} : vector<1x32xf32>, vector<32x128xf32>, vector<1x128xf32> -> vector<1x128xf32>
    %239 = vector.broadcast %238 : vector<1x128xf32> to vector<8x128xf32>
    %240 = arith.subf %232, %239 : vector<8x128xf32>
    %241 = arith.mulf %240, %240 : vector<8x128xf32>
    %cst_193 = arith.constant dense<0.000000e+00> : vector<8x32xf32>
    %242 = tpu.matmul %241, %210, %cst_193 {dimension_numbers = #tpu.dot_dimension_numbers<[1], [0], [0], [1], [0, 0, 1, 1], [], []>} : vector<8x128xf32>, vector<128x32xf32>, vector<8x32xf32> -> vector<8x32xf32>
    %cst_194 = arith.constant dense<0.000000e+00> : vector<32xf32>
    %243 = vector.multi_reduction <add>, %242, %cst_194 [0] : vector<8x32xf32> to vector<32xf32>
    %244 = vector.shape_cast %243 : vector<32xf32> to vector<1x32xf32>
    %cst_195 = arith.constant 3.125000e-02 : f32
    %245 = vector.broadcast %cst_195 : f32 to vector<1x32xf32>
    %246 = arith.mulf %244, %245 : vector<1x32xf32>
    %cst_196 = arith.constant dense<0.000000e+00> : vector<1x128xf32>
    %247 = tpu.matmul %246, %211, %cst_196 {dimension_numbers = #tpu.dot_dimension_numbers<[1], [0], [0], [1], [0, 0, 1, 1], [], []>} : vector<1x32xf32>, vector<32x128xf32>, vector<1x128xf32> -> vector<1x128xf32>
    %cst_197 = arith.constant 9.99999974E-6 : f32
    %248 = vector.broadcast %cst_197 : f32 to vector<1x128xf32>
    %249 = arith.addf %247, %248 : vector<1x128xf32>
    %250 = math.rsqrt %249 : vector<1x128xf32>
    %251 = vector.broadcast %250 : vector<1x128xf32> to vector<8x128xf32>
    %252 = arith.mulf %240, %251 : vector<8x128xf32>
    %cst_198 = arith.constant 0.000000e+00 : f32
    %253 = vector.broadcast %cst_198 : f32 to vector<8x128xf32>
    %254 = arith.maximumf %252, %253 : vector<8x128xf32>
    %c0_199 = arith.constant 0 : index
    %c0_200 = arith.constant 0 : index
    %c0_201 = arith.constant 0 : index
    %255 = vector.load %arg20[%c0_199, %c0_200, %c0_201] : memref<1x256x128xbf16, #tpu.memory_space<vmem>>, vector<1x256x128xbf16>
    %256 = vector.shape_cast %255 : vector<1x256x128xbf16> to vector<256x128xbf16>
    %cst_202 = arith.constant dense<0.000000e+00> : vector<16x128xf32>
    %257 = tpu.matmul %212, %256, %cst_202 {dimension_numbers = #tpu.dot_dimension_numbers<[1], [0], [0], [1], [0, 0, 1, 1], [], []>} : vector<16x256xbf16>, vector<256x128xbf16>, vector<16x128xf32> -> vector<16x128xf32>
    %c0_203 = arith.constant 0 : index
    %c0_204 = arith.constant 0 : index
    %c0_205 = arith.constant 0 : index
    %258 = vector.load %arg15[%c0_203, %c0_204, %c0_205] : memref<1x8x16xf32, #tpu.memory_space<vmem>>, vector<1x8x16xf32>
    %259 = vector.shape_cast %258 : vector<1x8x16xf32> to vector<8x16xf32>
    %cst_206 = arith.constant dense<0.000000e+00> : vector<8x128xf32>
    %260 = tpu.matmul %259, %257, %cst_206 {dimension_numbers = #tpu.dot_dimension_numbers<[1], [0], [0], [1], [0, 0, 1, 1], [], []>} : vector<8x16xf32>, vector<16x128xf32>, vector<8x128xf32> -> vector<8x128xf32>
    %cst_207 = arith.constant dense<0.000000e+00> : vector<8x32xf32>
    %261 = tpu.matmul %260, %210, %cst_207 {dimension_numbers = #tpu.dot_dimension_numbers<[1], [0], [0], [1], [0, 0, 1, 1], [], []>} : vector<8x128xf32>, vector<128x32xf32>, vector<8x32xf32> -> vector<8x32xf32>
    %cst_208 = arith.constant dense<0.000000e+00> : vector<32xf32>
    %262 = vector.multi_reduction <add>, %261, %cst_208 [0] : vector<8x32xf32> to vector<32xf32>
    %263 = vector.shape_cast %262 : vector<32xf32> to vector<1x32xf32>
    %cst_209 = arith.constant 3.125000e-02 : f32
    %264 = vector.broadcast %cst_209 : f32 to vector<1x32xf32>
    %265 = arith.mulf %263, %264 : vector<1x32xf32>
    %cst_210 = arith.constant dense<0.000000e+00> : vector<1x128xf32>
    %266 = tpu.matmul %265, %211, %cst_210 {dimension_numbers = #tpu.dot_dimension_numbers<[1], [0], [0], [1], [0, 0, 1, 1], [], []>} : vector<1x32xf32>, vector<32x128xf32>, vector<1x128xf32> -> vector<1x128xf32>
    %267 = vector.broadcast %266 : vector<1x128xf32> to vector<8x128xf32>
    %268 = arith.subf %260, %267 : vector<8x128xf32>
    %269 = arith.mulf %268, %268 : vector<8x128xf32>
    %cst_211 = arith.constant dense<0.000000e+00> : vector<8x32xf32>
    %270 = tpu.matmul %269, %210, %cst_211 {dimension_numbers = #tpu.dot_dimension_numbers<[1], [0], [0], [1], [0, 0, 1, 1], [], []>} : vector<8x128xf32>, vector<128x32xf32>, vector<8x32xf32> -> vector<8x32xf32>
    %cst_212 = arith.constant dense<0.000000e+00> : vector<32xf32>
    %271 = vector.multi_reduction <add>, %270, %cst_212 [0] : vector<8x32xf32> to vector<32xf32>
    %272 = vector.shape_cast %271 : vector<32xf32> to vector<1x32xf32>
    %cst_213 = arith.constant 3.125000e-02 : f32
    %273 = vector.broadcast %cst_213 : f32 to vector<1x32xf32>
    %274 = arith.mulf %272, %273 : vector<1x32xf32>
    %cst_214 = arith.constant dense<0.000000e+00> : vector<1x128xf32>
    %275 = tpu.matmul %274, %211, %cst_214 {dimension_numbers = #tpu.dot_dimension_numbers<[1], [0], [0], [1], [0, 0, 1, 1], [], []>} : vector<1x32xf32>, vector<32x128xf32>, vector<1x128xf32> -> vector<1x128xf32>
    %cst_215 = arith.constant 9.99999974E-6 : f32
    %276 = vector.broadcast %cst_215 : f32 to vector<1x128xf32>
    %277 = arith.addf %275, %276 : vector<1x128xf32>
    %278 = math.rsqrt %277 : vector<1x128xf32>
    %279 = vector.broadcast %278 : vector<1x128xf32> to vector<8x128xf32>
    %280 = arith.mulf %268, %279 : vector<8x128xf32>
    %281 = arith.truncf %254 : vector<8x128xf32> to vector<8x128xbf16>
    %c0_216 = arith.constant 0 : index
    %c0_217 = arith.constant 0 : index
    %c0_218 = arith.constant 0 : index
    %282 = vector.load %arg21[%c0_216, %c0_217, %c0_218] : memref<3x128x128xbf16, #tpu.memory_space<vmem>>, vector<1x128x128xbf16>
    %283 = vector.shape_cast %282 : vector<1x128x128xbf16> to vector<128x128xbf16>
    %cst_219 = arith.constant dense<0.000000e+00> : vector<8x128xf32>
    %284 = tpu.matmul %281, %283, %cst_219 {dimension_numbers = #tpu.dot_dimension_numbers<[1], [0], [0], [1], [0, 0, 1, 1], [], []>} : vector<8x128xbf16>, vector<128x128xbf16>, vector<8x128xf32> -> vector<8x128xf32>
    %c0_220 = arith.constant 0 : index
    %c0_221 = arith.constant 0 : index
    %c0_222 = arith.constant 0 : index
    %285 = vector.load %arg16[%c0_220, %c0_221, %c0_222] : memref<3x8x8xf32, #tpu.memory_space<vmem>>, vector<1x8x8xf32>
    %286 = vector.shape_cast %285 : vector<1x8x8xf32> to vector<8x8xf32>
    %cst_223 = arith.constant dense<0.000000e+00> : vector<8x128xf32>
    %287 = tpu.matmul %286, %284, %cst_223 {dimension_numbers = #tpu.dot_dimension_numbers<[1], [0], [0], [1], [0, 0, 1, 1], [], []>} : vector<8x8xf32>, vector<8x128xf32>, vector<8x128xf32> -> vector<8x128xf32>
    %c1_224 = arith.constant 1 : index
    %c0_225 = arith.constant 0 : index
    %c0_226 = arith.constant 0 : index
    %288 = vector.load %arg21[%c1_224, %c0_225, %c0_226] : memref<3x128x128xbf16, #tpu.memory_space<vmem>>, vector<1x128x128xbf16>
    %289 = vector.shape_cast %288 : vector<1x128x128xbf16> to vector<128x128xbf16>
    %cst_227 = arith.constant dense<0.000000e+00> : vector<8x128xf32>
    %290 = tpu.matmul %281, %289, %cst_227 {dimension_numbers = #tpu.dot_dimension_numbers<[1], [0], [0], [1], [0, 0, 1, 1], [], []>} : vector<8x128xbf16>, vector<128x128xbf16>, vector<8x128xf32> -> vector<8x128xf32>
    %c1_228 = arith.constant 1 : index
    %c0_229 = arith.constant 0 : index
    %c0_230 = arith.constant 0 : index
    %291 = vector.load %arg16[%c1_228, %c0_229, %c0_230] : memref<3x8x8xf32, #tpu.memory_space<vmem>>, vector<1x8x8xf32>
    %292 = vector.shape_cast %291 : vector<1x8x8xf32> to vector<8x8xf32>
    %cst_231 = arith.constant dense<0.000000e+00> : vector<8x128xf32>
    %293 = tpu.matmul %292, %290, %cst_231 {dimension_numbers = #tpu.dot_dimension_numbers<[1], [0], [0], [1], [0, 0, 1, 1], [], []>} : vector<8x8xf32>, vector<8x128xf32>, vector<8x128xf32> -> vector<8x128xf32>
    %294 = arith.addf %287, %293 : vector<8x128xf32>
    %c2_232 = arith.constant 2 : index
    %c0_233 = arith.constant 0 : index
    %c0_234 = arith.constant 0 : index
    %295 = vector.load %arg21[%c2_232, %c0_233, %c0_234] : memref<3x128x128xbf16, #tpu.memory_space<vmem>>, vector<1x128x128xbf16>
    %296 = vector.shape_cast %295 : vector<1x128x128xbf16> to vector<128x128xbf16>
    %cst_235 = arith.constant dense<0.000000e+00> : vector<8x128xf32>
    %297 = tpu.matmul %281, %296, %cst_235 {dimension_numbers = #tpu.dot_dimension_numbers<[1], [0], [0], [1], [0, 0, 1, 1], [], []>} : vector<8x128xbf16>, vector<128x128xbf16>, vector<8x128xf32> -> vector<8x128xf32>
    %c2_236 = arith.constant 2 : index
    %c0_237 = arith.constant 0 : index
    %c0_238 = arith.constant 0 : index
    %298 = vector.load %arg16[%c2_236, %c0_237, %c0_238] : memref<3x8x8xf32, #tpu.memory_space<vmem>>, vector<1x8x8xf32>
    %299 = vector.shape_cast %298 : vector<1x8x8xf32> to vector<8x8xf32>
    %cst_239 = arith.constant dense<0.000000e+00> : vector<8x128xf32>
    %300 = tpu.matmul %299, %297, %cst_239 {dimension_numbers = #tpu.dot_dimension_numbers<[1], [0], [0], [1], [0, 0, 1, 1], [], []>} : vector<8x8xf32>, vector<8x128xf32>, vector<8x128xf32> -> vector<8x128xf32>
    %301 = arith.addf %294, %300 : vector<8x128xf32>
    %cst_240 = arith.constant dense<0.000000e+00> : vector<8x32xf32>
    %302 = tpu.matmul %301, %210, %cst_240 {dimension_numbers = #tpu.dot_dimension_numbers<[1], [0], [0], [1], [0, 0, 1, 1], [], []>} : vector<8x128xf32>, vector<128x32xf32>, vector<8x32xf32> -> vector<8x32xf32>
    %cst_241 = arith.constant dense<0.000000e+00> : vector<32xf32>
    %303 = vector.multi_reduction <add>, %302, %cst_241 [0] : vector<8x32xf32> to vector<32xf32>
    %304 = vector.shape_cast %303 : vector<32xf32> to vector<1x32xf32>
    %cst_242 = arith.constant 3.125000e-02 : f32
    %305 = vector.broadcast %cst_242 : f32 to vector<1x32xf32>
    %306 = arith.mulf %304, %305 : vector<1x32xf32>
    %cst_243 = arith.constant dense<0.000000e+00> : vector<1x128xf32>
    %307 = tpu.matmul %306, %211, %cst_243 {dimension_numbers = #tpu.dot_dimension_numbers<[1], [0], [0], [1], [0, 0, 1, 1], [], []>} : vector<1x32xf32>, vector<32x128xf32>, vector<1x128xf32> -> vector<1x128xf32>
    %308 = vector.broadcast %307 : vector<1x128xf32> to vector<8x128xf32>
    %309 = arith.subf %301, %308 : vector<8x128xf32>
    %310 = arith.mulf %309, %309 : vector<8x128xf32>
    %cst_244 = arith.constant dense<0.000000e+00> : vector<8x32xf32>
    %311 = tpu.matmul %310, %210, %cst_244 {dimension_numbers = #tpu.dot_dimension_numbers<[1], [0], [0], [1], [0, 0, 1, 1], [], []>} : vector<8x128xf32>, vector<128x32xf32>, vector<8x32xf32> -> vector<8x32xf32>
    %cst_245 = arith.constant dense<0.000000e+00> : vector<32xf32>
    %312 = vector.multi_reduction <add>, %311, %cst_245 [0] : vector<8x32xf32> to vector<32xf32>
    %313 = vector.shape_cast %312 : vector<32xf32> to vector<1x32xf32>
    %cst_246 = arith.constant 3.125000e-02 : f32
    %314 = vector.broadcast %cst_246 : f32 to vector<1x32xf32>
    %315 = arith.mulf %313, %314 : vector<1x32xf32>
    %cst_247 = arith.constant dense<0.000000e+00> : vector<1x128xf32>
    %316 = tpu.matmul %315, %211, %cst_247 {dimension_numbers = #tpu.dot_dimension_numbers<[1], [0], [0], [1], [0, 0, 1, 1], [], []>} : vector<1x32xf32>, vector<32x128xf32>, vector<1x128xf32> -> vector<1x128xf32>
    %cst_248 = arith.constant 9.99999974E-6 : f32
    %317 = vector.broadcast %cst_248 : f32 to vector<1x128xf32>
    %318 = arith.addf %316, %317 : vector<1x128xf32>
    %319 = math.rsqrt %318 : vector<1x128xf32>
    %320 = vector.broadcast %319 : vector<1x128xf32> to vector<8x128xf32>
    %321 = arith.mulf %309, %320 : vector<8x128xf32>
    %322 = arith.addf %321, %280 : vector<8x128xf32>
    %cst_249 = arith.constant 0.000000e+00 : f32
    %323 = vector.broadcast %cst_249 : f32 to vector<8x128xf32>
    %324 = arith.maximumf %322, %323 : vector<8x128xf32>
    %325 = arith.truncf %324 : vector<8x128xf32> to vector<8x128xbf16>
    %c0_250 = arith.constant 0 : index
    %c0_251 = arith.constant 0 : index
    %c0_252 = arith.constant 0 : index
    %326 = vector.load %arg22[%c0_250, %c0_251, %c0_252] : memref<3x128x128xbf16, #tpu.memory_space<vmem>>, vector<1x128x128xbf16>
    %327 = vector.shape_cast %326 : vector<1x128x128xbf16> to vector<128x128xbf16>
    %cst_253 = arith.constant dense<0.000000e+00> : vector<8x128xf32>
    %328 = tpu.matmul %325, %327, %cst_253 {dimension_numbers = #tpu.dot_dimension_numbers<[1], [0], [0], [1], [0, 0, 1, 1], [], []>} : vector<8x128xbf16>, vector<128x128xbf16>, vector<8x128xf32> -> vector<8x128xf32>
    %c0_254 = arith.constant 0 : index
    %c0_255 = arith.constant 0 : index
    %c0_256 = arith.constant 0 : index
    %329 = vector.load %arg16[%c0_254, %c0_255, %c0_256] : memref<3x8x8xf32, #tpu.memory_space<vmem>>, vector<1x8x8xf32>
    %330 = vector.shape_cast %329 : vector<1x8x8xf32> to vector<8x8xf32>
    %cst_257 = arith.constant dense<0.000000e+00> : vector<8x128xf32>
    %331 = tpu.matmul %330, %328, %cst_257 {dimension_numbers = #tpu.dot_dimension_numbers<[1], [0], [0], [1], [0, 0, 1, 1], [], []>} : vector<8x8xf32>, vector<8x128xf32>, vector<8x128xf32> -> vector<8x128xf32>
    %c1_258 = arith.constant 1 : index
    %c0_259 = arith.constant 0 : index
    %c0_260 = arith.constant 0 : index
    %332 = vector.load %arg22[%c1_258, %c0_259, %c0_260] : memref<3x128x128xbf16, #tpu.memory_space<vmem>>, vector<1x128x128xbf16>
    %333 = vector.shape_cast %332 : vector<1x128x128xbf16> to vector<128x128xbf16>
    %cst_261 = arith.constant dense<0.000000e+00> : vector<8x128xf32>
    %334 = tpu.matmul %325, %333, %cst_261 {dimension_numbers = #tpu.dot_dimension_numbers<[1], [0], [0], [1], [0, 0, 1, 1], [], []>} : vector<8x128xbf16>, vector<128x128xbf16>, vector<8x128xf32> -> vector<8x128xf32>
    %c1_262 = arith.constant 1 : index
    %c0_263 = arith.constant 0 : index
    %c0_264 = arith.constant 0 : index
    %335 = vector.load %arg16[%c1_262, %c0_263, %c0_264] : memref<3x8x8xf32, #tpu.memory_space<vmem>>, vector<1x8x8xf32>
    %336 = vector.shape_cast %335 : vector<1x8x8xf32> to vector<8x8xf32>
    %cst_265 = arith.constant dense<0.000000e+00> : vector<8x128xf32>
    %337 = tpu.matmul %336, %334, %cst_265 {dimension_numbers = #tpu.dot_dimension_numbers<[1], [0], [0], [1], [0, 0, 1, 1], [], []>} : vector<8x8xf32>, vector<8x128xf32>, vector<8x128xf32> -> vector<8x128xf32>
    %338 = arith.addf %331, %337 : vector<8x128xf32>
    %c2_266 = arith.constant 2 : index
    %c0_267 = arith.constant 0 : index
    %c0_268 = arith.constant 0 : index
    %339 = vector.load %arg22[%c2_266, %c0_267, %c0_268] : memref<3x128x128xbf16, #tpu.memory_space<vmem>>, vector<1x128x128xbf16>
    %340 = vector.shape_cast %339 : vector<1x128x128xbf16> to vector<128x128xbf16>
    %cst_269 = arith.constant dense<0.000000e+00> : vector<8x128xf32>
    %341 = tpu.matmul %325, %340, %cst_269 {dimension_numbers = #tpu.dot_dimension_numbers<[1], [0], [0], [1], [0, 0, 1, 1], [], []>} : vector<8x128xbf16>, vector<128x128xbf16>, vector<8x128xf32> -> vector<8x128xf32>
    %c2_270 = arith.constant 2 : index
    %c0_271 = arith.constant 0 : index
    %c0_272 = arith.constant 0 : index
    %342 = vector.load %arg16[%c2_270, %c0_271, %c0_272] : memref<3x8x8xf32, #tpu.memory_space<vmem>>, vector<1x8x8xf32>
    %343 = vector.shape_cast %342 : vector<1x8x8xf32> to vector<8x8xf32>
    %cst_273 = arith.constant dense<0.000000e+00> : vector<8x128xf32>
    %344 = tpu.matmul %343, %341, %cst_273 {dimension_numbers = #tpu.dot_dimension_numbers<[1], [0], [0], [1], [0, 0, 1, 1], [], []>} : vector<8x8xf32>, vector<8x128xf32>, vector<8x128xf32> -> vector<8x128xf32>
    %345 = arith.addf %338, %344 : vector<8x128xf32>
    %cst_274 = arith.constant dense<0.000000e+00> : vector<8x32xf32>
    %346 = tpu.matmul %345, %210, %cst_274 {dimension_numbers = #tpu.dot_dimension_numbers<[1], [0], [0], [1], [0, 0, 1, 1], [], []>} : vector<8x128xf32>, vector<128x32xf32>, vector<8x32xf32> -> vector<8x32xf32>
    %cst_275 = arith.constant dense<0.000000e+00> : vector<32xf32>
    %347 = vector.multi_reduction <add>, %346, %cst_275 [0] : vector<8x32xf32> to vector<32xf32>
    %348 = vector.shape_cast %347 : vector<32xf32> to vector<1x32xf32>
    %cst_276 = arith.constant 3.125000e-02 : f32
    %349 = vector.broadcast %cst_276 : f32 to vector<1x32xf32>
    %350 = arith.mulf %348, %349 : vector<1x32xf32>
    %cst_277 = arith.constant dense<0.000000e+00> : vector<1x128xf32>
    %351 = tpu.matmul %350, %211, %cst_277 {dimension_numbers = #tpu.dot_dimension_numbers<[1], [0], [0], [1], [0, 0, 1, 1], [], []>} : vector<1x32xf32>, vector<32x128xf32>, vector<1x128xf32> -> vector<1x128xf32>
    %352 = vector.broadcast %351 : vector<1x128xf32> to vector<8x128xf32>
    %353 = arith.subf %345, %352 : vector<8x128xf32>
    %354 = arith.mulf %353, %353 : vector<8x128xf32>
    %cst_278 = arith.constant dense<0.000000e+00> : vector<8x32xf32>
    %355 = tpu.matmul %354, %210, %cst_278 {dimension_numbers = #tpu.dot_dimension_numbers<[1], [0], [0], [1], [0, 0, 1, 1], [], []>} : vector<8x128xf32>, vector<128x32xf32>, vector<8x32xf32> -> vector<8x32xf32>
    %cst_279 = arith.constant dense<0.000000e+00> : vector<32xf32>
    %356 = vector.multi_reduction <add>, %355, %cst_279 [0] : vector<8x32xf32> to vector<32xf32>
    %357 = vector.shape_cast %356 : vector<32xf32> to vector<1x32xf32>
    %cst_280 = arith.constant 3.125000e-02 : f32
    %358 = vector.broadcast %cst_280 : f32 to vector<1x32xf32>
    %359 = arith.mulf %357, %358 : vector<1x32xf32>
    %cst_281 = arith.constant dense<0.000000e+00> : vector<1x128xf32>
    %360 = tpu.matmul %359, %211, %cst_281 {dimension_numbers = #tpu.dot_dimension_numbers<[1], [0], [0], [1], [0, 0, 1, 1], [], []>} : vector<1x32xf32>, vector<32x128xf32>, vector<1x128xf32> -> vector<1x128xf32>
    %cst_282 = arith.constant 9.99999974E-6 : f32
    %361 = vector.broadcast %cst_282 : f32 to vector<1x128xf32>
    %362 = arith.addf %360, %361 : vector<1x128xf32>
    %363 = math.rsqrt %362 : vector<1x128xf32>
    %364 = vector.broadcast %363 : vector<1x128xf32> to vector<8x128xf32>
    %365 = arith.mulf %353, %364 : vector<8x128xf32>
    %cst_283 = arith.constant 0.000000e+00 : f32
    %366 = vector.broadcast %cst_283 : f32 to vector<8x128xf32>
    %367 = arith.maximumf %365, %366 : vector<8x128xf32>
    %368 = arith.truncf %367 : vector<8x128xf32> to vector<8x128xbf16>
    %c0_284 = arith.constant 0 : index
    %c0_285 = arith.constant 0 : index
    %c0_286 = arith.constant 0 : index
    %369 = vector.load %arg23[%c0_284, %c0_285, %c0_286] : memref<3x128x128xbf16, #tpu.memory_space<vmem>>, vector<1x128x128xbf16>
    %370 = vector.shape_cast %369 : vector<1x128x128xbf16> to vector<128x128xbf16>
    %cst_287 = arith.constant dense<0.000000e+00> : vector<8x128xf32>
    %371 = tpu.matmul %368, %370, %cst_287 {dimension_numbers = #tpu.dot_dimension_numbers<[1], [0], [0], [1], [0, 0, 1, 1], [], []>} : vector<8x128xbf16>, vector<128x128xbf16>, vector<8x128xf32> -> vector<8x128xf32>
    %c0_288 = arith.constant 0 : index
    %c0_289 = arith.constant 0 : index
    %c0_290 = arith.constant 0 : index
    %372 = vector.load %arg16[%c0_288, %c0_289, %c0_290] : memref<3x8x8xf32, #tpu.memory_space<vmem>>, vector<1x8x8xf32>
    %373 = vector.shape_cast %372 : vector<1x8x8xf32> to vector<8x8xf32>
    %cst_291 = arith.constant dense<0.000000e+00> : vector<8x128xf32>
    %374 = tpu.matmul %373, %371, %cst_291 {dimension_numbers = #tpu.dot_dimension_numbers<[1], [0], [0], [1], [0, 0, 1, 1], [], []>} : vector<8x8xf32>, vector<8x128xf32>, vector<8x128xf32> -> vector<8x128xf32>
    %c1_292 = arith.constant 1 : index
    %c0_293 = arith.constant 0 : index
    %c0_294 = arith.constant 0 : index
    %375 = vector.load %arg23[%c1_292, %c0_293, %c0_294] : memref<3x128x128xbf16, #tpu.memory_space<vmem>>, vector<1x128x128xbf16>
    %376 = vector.shape_cast %375 : vector<1x128x128xbf16> to vector<128x128xbf16>
    %cst_295 = arith.constant dense<0.000000e+00> : vector<8x128xf32>
    %377 = tpu.matmul %368, %376, %cst_295 {dimension_numbers = #tpu.dot_dimension_numbers<[1], [0], [0], [1], [0, 0, 1, 1], [], []>} : vector<8x128xbf16>, vector<128x128xbf16>, vector<8x128xf32> -> vector<8x128xf32>
    %c1_296 = arith.constant 1 : index
    %c0_297 = arith.constant 0 : index
    %c0_298 = arith.constant 0 : index
    %378 = vector.load %arg16[%c1_296, %c0_297, %c0_298] : memref<3x8x8xf32, #tpu.memory_space<vmem>>, vector<1x8x8xf32>
    %379 = vector.shape_cast %378 : vector<1x8x8xf32> to vector<8x8xf32>
    %cst_299 = arith.constant dense<0.000000e+00> : vector<8x128xf32>
    %380 = tpu.matmul %379, %377, %cst_299 {dimension_numbers = #tpu.dot_dimension_numbers<[1], [0], [0], [1], [0, 0, 1, 1], [], []>} : vector<8x8xf32>, vector<8x128xf32>, vector<8x128xf32> -> vector<8x128xf32>
    %381 = arith.addf %374, %380 : vector<8x128xf32>
    %c2_300 = arith.constant 2 : index
    %c0_301 = arith.constant 0 : index
    %c0_302 = arith.constant 0 : index
    %382 = vector.load %arg23[%c2_300, %c0_301, %c0_302] : memref<3x128x128xbf16, #tpu.memory_space<vmem>>, vector<1x128x128xbf16>
    %383 = vector.shape_cast %382 : vector<1x128x128xbf16> to vector<128x128xbf16>
    %cst_303 = arith.constant dense<0.000000e+00> : vector<8x128xf32>
    %384 = tpu.matmul %368, %383, %cst_303 {dimension_numbers = #tpu.dot_dimension_numbers<[1], [0], [0], [1], [0, 0, 1, 1], [], []>} : vector<8x128xbf16>, vector<128x128xbf16>, vector<8x128xf32> -> vector<8x128xf32>
    %c2_304 = arith.constant 2 : index
    %c0_305 = arith.constant 0 : index
    %c0_306 = arith.constant 0 : index
    %385 = vector.load %arg16[%c2_304, %c0_305, %c0_306] : memref<3x8x8xf32, #tpu.memory_space<vmem>>, vector<1x8x8xf32>
    %386 = vector.shape_cast %385 : vector<1x8x8xf32> to vector<8x8xf32>
    %cst_307 = arith.constant dense<0.000000e+00> : vector<8x128xf32>
    %387 = tpu.matmul %386, %384, %cst_307 {dimension_numbers = #tpu.dot_dimension_numbers<[1], [0], [0], [1], [0, 0, 1, 1], [], []>} : vector<8x8xf32>, vector<8x128xf32>, vector<8x128xf32> -> vector<8x128xf32>
    %388 = arith.addf %381, %387 : vector<8x128xf32>
    %cst_308 = arith.constant dense<0.000000e+00> : vector<8x32xf32>
    %389 = tpu.matmul %388, %210, %cst_308 {dimension_numbers = #tpu.dot_dimension_numbers<[1], [0], [0], [1], [0, 0, 1, 1], [], []>} : vector<8x128xf32>, vector<128x32xf32>, vector<8x32xf32> -> vector<8x32xf32>
    %cst_309 = arith.constant dense<0.000000e+00> : vector<32xf32>
    %390 = vector.multi_reduction <add>, %389, %cst_309 [0] : vector<8x32xf32> to vector<32xf32>
    %391 = vector.shape_cast %390 : vector<32xf32> to vector<1x32xf32>
    %cst_310 = arith.constant 3.125000e-02 : f32
    %392 = vector.broadcast %cst_310 : f32 to vector<1x32xf32>
    %393 = arith.mulf %391, %392 : vector<1x32xf32>
    %cst_311 = arith.constant dense<0.000000e+00> : vector<1x128xf32>
    %394 = tpu.matmul %393, %211, %cst_311 {dimension_numbers = #tpu.dot_dimension_numbers<[1], [0], [0], [1], [0, 0, 1, 1], [], []>} : vector<1x32xf32>, vector<32x128xf32>, vector<1x128xf32> -> vector<1x128xf32>
    %395 = vector.broadcast %394 : vector<1x128xf32> to vector<8x128xf32>
    %396 = arith.subf %388, %395 : vector<8x128xf32>
    %397 = arith.mulf %396, %396 : vector<8x128xf32>
    %cst_312 = arith.constant dense<0.000000e+00> : vector<8x32xf32>
    %398 = tpu.matmul %397, %210, %cst_312 {dimension_numbers = #tpu.dot_dimension_numbers<[1], [0], [0], [1], [0, 0, 1, 1], [], []>} : vector<8x128xf32>, vector<128x32xf32>, vector<8x32xf32> -> vector<8x32xf32>
    %cst_313 = arith.constant dense<0.000000e+00> : vector<32xf32>
    %399 = vector.multi_reduction <add>, %398, %cst_313 [0] : vector<8x32xf32> to vector<32xf32>
    %400 = vector.shape_cast %399 : vector<32xf32> to vector<1x32xf32>
    %cst_314 = arith.constant 3.125000e-02 : f32
    %401 = vector.broadcast %cst_314 : f32 to vector<1x32xf32>
    %402 = arith.mulf %400, %401 : vector<1x32xf32>
    %cst_315 = arith.constant dense<0.000000e+00> : vector<1x128xf32>
    %403 = tpu.matmul %402, %211, %cst_315 {dimension_numbers = #tpu.dot_dimension_numbers<[1], [0], [0], [1], [0, 0, 1, 1], [], []>} : vector<1x32xf32>, vector<32x128xf32>, vector<1x128xf32> -> vector<1x128xf32>
    %cst_316 = arith.constant 9.99999974E-6 : f32
    %404 = vector.broadcast %cst_316 : f32 to vector<1x128xf32>
    %405 = arith.addf %403, %404 : vector<1x128xf32>
    %406 = math.rsqrt %405 : vector<1x128xf32>
    %407 = vector.broadcast %406 : vector<1x128xf32> to vector<8x128xf32>
    %408 = arith.mulf %396, %407 : vector<8x128xf32>
    %409 = arith.addf %408, %324 : vector<8x128xf32>
    %cst_317 = arith.constant 0.000000e+00 : f32
    %410 = vector.broadcast %cst_317 : f32 to vector<8x128xf32>
    %411 = arith.maximumf %409, %410 : vector<8x128xf32>
    %c0_318 = arith.constant 0 : index
    %c0_319 = arith.constant 0 : index
    %412 = vector.load %arg24[%c0_318, %c0_319] : memref<8x128xf32, #tpu.memory_space<vmem>>, vector<8x128xf32>
    tpu.vector_store %arg24[%c0_318, %c0_319], %411 {strides = array<i32>} : memref<8x128xf32, #tpu.memory_space<vmem>>, vector<8x128xf32>,
    return
  }
  func.func @transform_0(%arg0: i32) -> (i32, i32) {
    %c0_i32 = arith.constant 0 : i32
    %c0_i32_0 = arith.constant 0 : i32
    %c0_i32_1 = arith.constant 0 : i32
    return %c0_i32, %c0_i32_0 : i32, i32
  }
  func.func @transform_1(%arg0: i32) -> (i32, i32, i32) {
    %c0_i32 = arith.constant 0 : i32
    %c0_i32_0 = arith.constant 0 : i32
    %c0_i32_1 = arith.constant 0 : i32
    %c0_i32_2 = arith.constant 0 : i32
    return %c0_i32, %c0_i32_0, %c0_i32_1 : i32, i32, i32
  }
  func.func @transform_2(%arg0: i32) -> (i32, i32) {
    %c0_i32 = arith.constant 0 : i32
    %c0_i32_0 = arith.constant 0 : i32
    %c0_i32_1 = arith.constant 0 : i32
    return %c0_i32, %c0_i32_0 : i32, i32
  }
  func.func @transform_3(%arg0: i32) -> (i32, i32, i32) {
    %c0_i32 = arith.constant 0 : i32
    %c0_i32_0 = arith.constant 0 : i32
    %c0_i32_1 = arith.constant 0 : i32
    %c0_i32_2 = arith.constant 0 : i32
    return %c0_i32, %c0_i32_0, %c0_i32_1 : i32, i32, i32
  }
  func.func @transform_4(%arg0: i32) -> (i32, i32, i32) {
    %c0_i32 = arith.constant 0 : i32
    %c0_i32_0 = arith.constant 0 : i32
    %c0_i32_1 = arith.constant 0 : i32
    %c0_i32_2 = arith.constant 0 : i32
    return %c0_i32, %c0_i32_0, %c0_i32_1 : i32, i32, i32
  }
  func.func @transform_5(%arg0: i32) -> (i32, i32, i32) {
    %c0_i32 = arith.constant 0 : i32
    %c0_i32_0 = arith.constant 0 : i32
    %c0_i32_1 = arith.constant 0 : i32
    %c0_i32_2 = arith.constant 0 : i32
    return %c0_i32, %c0_i32_0, %c0_i32_1 : i32, i32, i32
  }
  func.func @transform_6(%arg0: i32) -> (i32, i32) {
    %c0_i32 = arith.constant 0 : i32
    %c0_i32_0 = arith.constant 0 : i32
    %c0_i32_1 = arith.constant 0 : i32
    return %c0_i32, %c0_i32_0 : i32, i32
  }
  func.func @transform_7(%arg0: i32) -> (i32, i32) {
    %c0_i32 = arith.constant 0 : i32
    %c0_i32_0 = arith.constant 0 : i32
    %c0_i32_1 = arith.constant 0 : i32
    return %c0_i32, %c0_i32_0 : i32, i32
  }
  func.func @transform_8(%arg0: i32) -> (i32, i32, i32) {
    %c0_i32 = arith.constant 0 : i32
    %c0_i32_0 = arith.constant 0 : i32
    %c0_i32_1 = arith.constant 0 : i32
    %c0_i32_2 = arith.constant 0 : i32
    return %c0_i32, %c0_i32_0, %c0_i32_1 : i32, i32, i32
  }
  func.func @transform_9(%arg0: i32) -> (i32, i32, i32) {
    %c0_i32 = arith.constant 0 : i32
    %c0_i32_0 = arith.constant 0 : i32
    %c0_i32_1 = arith.constant 0 : i32
    %c0_i32_2 = arith.constant 0 : i32
    return %c0_i32, %c0_i32_0, %c0_i32_1 : i32, i32, i32
  }
  func.func @transform_10(%arg0: i32) -> (i32, i32, i32) {
    %c0_i32 = arith.constant 0 : i32
    %c0_i32_0 = arith.constant 0 : i32
    %c0_i32_1 = arith.constant 0 : i32
    %c0_i32_2 = arith.constant 0 : i32
    return %c0_i32, %c0_i32_0, %c0_i32_1 : i32, i32, i32
  }
  func.func @transform_11(%arg0: i32) -> (i32, i32, i32) {
    %c0_i32 = arith.constant 0 : i32
    %c0_i32_0 = arith.constant 0 : i32
    %c0_i32_1 = arith.constant 0 : i32
    %c0_i32_2 = arith.constant 0 : i32
    return %c0_i32, %c0_i32_0, %c0_i32_1 : i32, i32, i32
  }
  func.func @transform_12(%arg0: i32) -> (i32, i32, i32) {
    %c0_i32 = arith.constant 0 : i32
    %c0_i32_0 = arith.constant 0 : i32
    %c0_i32_1 = arith.constant 0 : i32
    %c0_i32_2 = arith.constant 0 : i32
    return %c0_i32, %c0_i32_0, %c0_i32_1 : i32, i32, i32
  }
  func.func @transform_13(%arg0: i32) -> (i32, i32, i32) {
    %c0_i32 = arith.constant 0 : i32
    %c0_i32_0 = arith.constant 0 : i32
    %c0_i32_1 = arith.constant 0 : i32
    %c0_i32_2 = arith.constant 0 : i32
    return %c0_i32, %c0_i32_0, %c0_i32_1 : i32, i32, i32
  }
  func.func @transform_14(%arg0: i32) -> (i32, i32, i32) {
    %c0_i32 = arith.constant 0 : i32
    %c0_i32_0 = arith.constant 0 : i32
    %c0_i32_1 = arith.constant 0 : i32
    %c0_i32_2 = arith.constant 0 : i32
    return %c0_i32, %c0_i32_0, %c0_i32_1 : i32, i32, i32
  }
  func.func @transform_15(%arg0: i32) -> (i32, i32, i32) {
    %c0_i32 = arith.constant 0 : i32
    %c0_i32_0 = arith.constant 0 : i32
    %c0_i32_1 = arith.constant 0 : i32
    %c0_i32_2 = arith.constant 0 : i32
    return %c0_i32, %c0_i32_0, %c0_i32_1 : i32, i32, i32
  }
  func.func @transform_16(%arg0: i32) -> (i32, i32) {
    %c0_i32 = arith.constant 0 : i32
    %c0_i32_0 = arith.constant 0 : i32
    %c0_i32_1 = arith.constant 0 : i32
    return %c0_i32, %c0_i32_0 : i32, i32
  }
  func.func @transform_17(%arg0: i32) -> (i32, i32) {
    %c0_i32 = arith.constant 0 : i32
    %c0_i32_0 = arith.constant 0 : i32
    %c0_i32_1 = arith.constant 0 : i32
    return %c0_i32, %c0_i32_0 : i32, i32
  }
  func.func @transform_18(%arg0: i32) -> (i32, i32, i32) {
    %c0_i32 = arith.constant 0 : i32
    %c0_i32_0 = arith.constant 0 : i32
    %c0_i32_1 = arith.constant 0 : i32
    %c0_i32_2 = arith.constant 0 : i32
    return %c0_i32, %c0_i32_0, %c0_i32_1 : i32, i32, i32
  }
  func.func @transform_19(%arg0: i32) -> (i32, i32, i32) {
    %c0_i32 = arith.constant 0 : i32
    %c0_i32_0 = arith.constant 0 : i32
    %c0_i32_1 = arith.constant 0 : i32
    %c0_i32_2 = arith.constant 0 : i32
    return %c0_i32, %c0_i32_0, %c0_i32_1 : i32, i32, i32
  }
  func.func @transform_20(%arg0: i32) -> (i32, i32, i32) {
    %c0_i32 = arith.constant 0 : i32
    %c0_i32_0 = arith.constant 0 : i32
    %c0_i32_1 = arith.constant 0 : i32
    %c0_i32_2 = arith.constant 0 : i32
    return %c0_i32, %c0_i32_0, %c0_i32_1 : i32, i32, i32
  }
  func.func @transform_21(%arg0: i32) -> (i32, i32, i32) {
    %c0_i32 = arith.constant 0 : i32
    %c0_i32_0 = arith.constant 0 : i32
    %c0_i32_1 = arith.constant 0 : i32
    %c0_i32_2 = arith.constant 0 : i32
    return %c0_i32, %c0_i32_0, %c0_i32_1 : i32, i32, i32
  }
  func.func @transform_22(%arg0: i32) -> (i32, i32, i32) {
    %c0_i32 = arith.constant 0 : i32
    %c0_i32_0 = arith.constant 0 : i32
    %c0_i32_1 = arith.constant 0 : i32
    %c0_i32_2 = arith.constant 0 : i32
    return %c0_i32, %c0_i32_0, %c0_i32_1 : i32, i32, i32
  }
  func.func @transform_23(%arg0: i32) -> (i32, i32) {
    %c0_i32 = arith.constant 0 : i32
    %c0_i32_0 = arith.constant 0 : i32
    %c0_i32_1 = arith.constant 0 : i32
    return %c0_i32, %c0_i32_0 : i32, i32
  }
}

</mosaic_0001>

<bundles_post_ra>
// kernel: encoder_forward.1
= control target key start
LH: loop header
LB: loop body
LE: loop exit
PB: predicated region body
PF: predicated region fallthrough
CT: control target
= control target key end

     0   :  { %v15368_v1 = vmov 0   ;;  %vm175_vm0 = vcmask 392192   ;;  %vm1322_vm1 = vcmask 261120   ;;  %vm3823_vm2 = vcmask 130048   ;;  %s20198_s1 = inlined_call_operand.vmem [shape: bf16[1,48,512], index: 1, kind: input, shape index: {}]   ;;  %s20199_s0 = inlined_call_operand.vmem [shape: f32[32,48], index: 0, kind: input, shape index: {}]   ;;  %s20200_s8 = inlined_call_operand.vmem [shape: bf16[3,512,256], index: 8, kind: input, shape index: {}]   ;;  %s20201_s2 = inlined_call_operand.vmem [shape: f32[1,512], index: 2, kind: input, shape index: {}]   ;;  %s20202_s3 = inlined_call_operand.vmem [shape: f32[3,16,32], index: 3, kind: input, shape index: {}]   ;;  %s20203_s6 = inlined_call_operand.vmem [shape: f32[256,32], index: 6, kind: input, shape index: {}]   ;;  %s20204_s7 = inlined_call_operand.vmem [shape: f32[32,256], index: 7, kind: input, shape index: {}]   ;;  %s20205_s9 = inlined_call_operand.vmem [shape: bf16[1,512,256], index: 9, kind: input, shape index: {}]   ;;  %s20206_s4 = inlined_call_operand.vmem [shape: f32[1,16,32], index: 4, kind: input, shape index: {}]   ;;  %s20207_s10 = inlined_call_operand.vmem [shape: bf16[3,256,256], index: 10, kind: input, shape index: {}]   ;;  %s20208_s5 = inlined_call_operand.vmem [shape: f32[3,16,16], index: 5, kind: input, shape index: {}]   ;;  %s20209_s11 = inlined_call_operand.vmem [shape: bf16[3,256,256], index: 11, kind: input, shape index: {}]   ;;  %s20210_s12 = inlined_call_operand.vmem [shape: bf16[3,256,256], index: 12, kind: input, shape index: {}]   ;;  %s20211_s18 = inlined_call_operand.vmem [shape: bf16[3,256,128], index: 18, kind: input, shape index: {}]   ;;  %s20212_s13 = inlined_call_operand.vmem [shape: f32[3,8,16], index: 13, kind: input, shape index: {}]   ;;  %s20213_s16 = inlined_call_operand.vmem [shape: f32[128,32], index: 16, kind: input, shape index: {}]   ;;  %s20214_s17 = inlined_call_operand.vmem [shape: f32[32,128], index: 17, kind: input, shape index: {}]   ;;  %s20215_s19 = inlined_call_operand.vmem [shape: bf16[1,256,128], index: 19, kind: input, shape index: {}]   ;;  %s20216_s14 = inlined_call_operand.vmem [shape: f32[1,8,16], index: 14, kind: input, shape index: {}]   ;;  %s20217_s20 = inlined_call_operand.vmem [shape: bf16[3,128,128], index: 20, kind: input, shape index: {}]   ;;  %s20218_s15 = inlined_call_operand.vmem [shape: f32[3,8,8], index: 15, kind: input, shape index: {}]   ;;  %s20219_s21 = inlined_call_operand.vmem [shape: bf16[3,128,128], index: 21, kind: input, shape index: {}]   ;;  %s20220_s22 = inlined_call_operand.vmem [shape: bf16[3,128,128], index: 22, kind: input, shape index: {}]   ;;  %s20221_s23 = inlined_call_operand.vmem [shape: f32[8,128], index: 23, kind: output, shape index: {}]  }
   0x1   :  { %20255 = sst [smem:[#allocation12_spill]] %s20198_s1  ;;  %214 = vmatprep.mubr.bf16.mxu0 %v15368_v1  ;;  %267 = vmatprep.mubr.bf16.mxu1 %v15368_v1  ;;  %vm15370_vm3 = vmmov 0   ;;  %vm9109_vm4 = vcmask 64512  }
   0x2   :  { %20256 = sst [smem:[#allocation13_spill]] %s20199_s0 }
   0x3   :  { %20257 = sst [smem:[#allocation14_spill]] %s20200_s8 }
   0x4   :  { %20258 = sst [smem:[#allocation15_spill]] %s20201_s2 }
   0x5   :  { %20259 = sst [smem:[#allocation16_spill]] %s20202_s3 }
   0x6   :  { %20260 = sst [smem:[#allocation17_spill]] %s20203_s6 }
   0x7   :  { %20261 = sst [smem:[#allocation18_spill]] %s20204_s7 }
   0x8   :  { %20262 = sst [smem:[#allocation19_spill]] %s20205_s9 }
   0x9   :  { %s20263_s24 = sld [smem:[#allocation12_spill]] }
   0xa   :  { %s20264_s2 = sld [smem:[#allocation13_spill]] }
   0xb   :  { %s20265_s6 = sld [smem:[#allocation14_spill]] }
   0xc   :  { %s20266_s3 = sld [smem:[#allocation15_spill]] }
   0xd   :  { %s20269_s9 = sld [smem:[#allocation16_spill]] }
   0xe   :  { %s20270_s0 = sld [smem:[#allocation17_spill]] }
   0xf   :  { %v14203_v0 = vld [vmem:[%s20263_s24 + $0x44] ss:$16 sps:$4 sm:$0xff]   ;;  %v14205_v2 = vld [vmem:[%s20263_s24 + $0x4c] ss:$16 sps:$4 sm:$0xff]   ;;  %v14207_v3 = vld [vmem:[%s20263_s24 + $0x40] ss:$16 sps:$4 sm:$0xff]  }
  0x10   :  { %192 = vmatprep.subr.bf16.mxu0 %v14203_v0  ;;  %v14208_v4 = vld [vmem:[%s20263_s24 + $0x48] ss:$16 sps:$4 sm:$0xff]   ;;  %245 = vmatprep.subr.bf16.mxu1 %v14205_v2  ;;  %v14209_v5 = vld [vmem:[%s20263_s24 + $0x24] ss:$16 sps:$4 sm:$0xff]   ;;  %v14211_v6 = vld [vmem:[%s20263_s24 + $0x2c] ss:$16 sps:$4 sm:$0xff]  }
  0x11   :  { %193 = vmatpush1.bf16.msra.mxu0 %v14207_v3  ;;  %246 = vmatpush1.bf16.msra.mxu1 %v14208_v4  ;;  %v14213_v7 = vld [vmem:[%s20263_s24 + $0x20] ss:$16 sps:$4 sm:$0xff]   ;;  %v14214_v8 = vld [vmem:[%s20263_s24 + $0x28] ss:$16 sps:$4 sm:$0xff]   ;;  %v14215_v9 = vld [vmem:[%s20263_s24 + $0x4] ss:$16 sps:$4 sm:$0xff]  }
  0x12   :  { %194 = vmatprep.subr.bf16.mxu0 %v14209_v5  ;;  %247 = vmatprep.subr.bf16.mxu1 %v14211_v6  ;;  %v14217_v10 = vld [vmem:[%s20263_s24 + $0xc] ss:$16 sps:$4 sm:$0xff]   ;;  %v14219_v11 = vld [vmem:[%s20263_s24] ss:$16 sps:$4 sm:$0xff]   ;;  %v14220_v12 = vld [vmem:[%s20263_s24 + $0x8] ss:$16 sps:$4 sm:$0xff]  }
  0x13   :  { %v75_v13 = vld [vmem:[%s20264_s2] sm:$0xff]  ;;  %v76_v14 = vld [vmem:[%s20264_s2 + $0x8] sm:$0xff]  ;;  %v14223_v15 = vld [vmem:[%s20265_s6 + $0x74] ss:$8 sps:$4 sm:$0xff]   ;;  %s20277_s28 = sld [smem:[#allocation19_spill]] }
  0x14   :  { %v79_v16 = vpack.c.bf16 %v76_v14, %v75_v13  ;;  %v14226_v17 = vld [vmem:[%s20265_s6 + $0x174] ss:$8 sps:$4 sm:$0xff]   ;;  %v14221_v18 = vld [vmem:[%s20265_s6 + $0x70] ss:$8 sps:$4 sm:$0xff]   ;;  %v14229_v20 = vld [vmem:[%s20265_s6 + $0x64] ss:$8 sps:$4 sm:$0xff]  }
  0x15   :  { %195 = vmatpush1.bf16.msra.mxu0 %v14213_v7  ;;  %248 = vmatpush1.bf16.msra.mxu1 %v14214_v8  ;;  %v14224_v19 = vld [vmem:[%s20265_s6 + $0x170] ss:$8 sps:$4 sm:$0xff]   ;;  %v14232_v21 = vld [vmem:[%s20265_s6 + $0x164] ss:$8 sps:$4 sm:$0xff]   ;;  %v14227_v24 = vld [vmem:[%s20265_s6 + $0x60] ss:$8 sps:$4 sm:$0xff]  }
  0x16   :  { %196 = vmatprep.subr.bf16.mxu0 %v14215_v9  ;;  %249 = vmatprep.subr.bf16.mxu1 %v14217_v10  ;;  %v77_v22 = vld [vmem:[%s20264_s2 + $0x10] sm:$0xff]  ;;  %v78_v23 = vld [vmem:[%s20264_s2 + $0x18] sm:$0xff]  ;;  %v14230_v25 = vld [vmem:[%s20265_s6 + $0x160] ss:$8 sps:$4 sm:$0xff]  }
  0x17   :  { %v14235_v26 = vld [vmem:[%s20265_s6 + $0x54] ss:$8 sps:$4 sm:$0xff]   ;;  %v80_v28 = vpack.c.bf16 %v78_v23, %v77_v22  ;;  %v14233_v29 = vld [vmem:[%s20265_s6 + $0x50] ss:$8 sps:$4 sm:$0xff]   ;;  %v14241_v31 = vld [vmem:[%s20265_s6 + $0x44] ss:$8 sps:$4 sm:$0xff]  }
  0x18   :  { %v14238_v27 = vld [vmem:[%s20265_s6 + $0x154] ss:$8 sps:$4 sm:$0xff]   ;;  %v14236_v30 = vld [vmem:[%s20265_s6 + $0x150] ss:$8 sps:$4 sm:$0xff]   ;;  %v14244_v32 = vld [vmem:[%s20265_s6 + $0x144] ss:$8 sps:$4 sm:$0xff]  }
  0x19   :  { %197 = vmatpush1.bf16.msra.mxu0 %v14219_v11  ;;  %250 = vmatpush1.bf16.msra.mxu1 %v14220_v12  ;;  %v14239_v33 = vld [vmem:[%s20265_s6 + $0x40] ss:$8 sps:$4 sm:$0xff]   ;;  %v14247_v35 = vld [vmem:[%s20265_s6 + $0x34] ss:$8 sps:$4 sm:$0xff]   ;;  %v14245_v37 = vld [vmem:[%s20265_s6 + $0x30] ss:$8 sps:$4 sm:$0xff]  }
  0x1a   :  { %720 = vmatprep.subr.bf16.mxu0 %v14223_v15  ;;  %773 = vmatprep.subr.bf16.mxu1 %v14226_v17  ;;  %v14242_v34 = vld [vmem:[%s20265_s6 + $0x140] ss:$8 sps:$4 sm:$0xff]   ;;  %v14250_v36 = vld [vmem:[%s20265_s6 + $0x134] ss:$8 sps:$4 sm:$0xff]   ;;  %v14248_v38 = vld [vmem:[%s20265_s6 + $0x130] ss:$8 sps:$4 sm:$0xff]  }
  0x1b   :  { %v14253_v39 = vld [vmem:[%s20265_s6 + $0x24] ss:$8 sps:$4 sm:$0xff]   ;;  %v14251_v41 = vld [vmem:[%s20265_s6 + $0x20] ss:$8 sps:$4 sm:$0xff]   ;;  %v14259_v43 = vld [vmem:[%s20265_s6 + $0x14] ss:$8 sps:$4 sm:$0xff]  }
  0x1c   :  { %11453 = vmatmul.mubr.msk.bf16.vlgmr.msra.gmra.mxu0 %vm175_vm0, %v79_v16  ;;  %11455 = vmatmul.mubr.msk.bf16.vlgmr.msra.gmra.mxu1 %vm175_vm0, %v79_v16  ;;  %v14256_v40 = vld [vmem:[%s20265_s6 + $0x124] ss:$8 sps:$4 sm:$0xff]   ;;  %v14254_v42 = vld [vmem:[%s20265_s6 + $0x120] ss:$8 sps:$4 sm:$0xff]   ;;  %v14262_v44 = vld [vmem:[%s20265_s6 + $0x114] ss:$8 sps:$4 sm:$0xff]  }
  0x1d   :  { %224 = vmatprep.mubr.bf16.mxu0 %v15368_v1  ;;  %277 = vmatprep.mubr.bf16.mxu1 %v15368_v1  ;;  %v14257_v45 = vld [vmem:[%s20265_s6 + $0x10] ss:$8 sps:$4 sm:$0xff]   ;;  %v14265_v47 = vld [vmem:[%s20265_s6 + $0x4] ss:$8 sps:$4 sm:$0xff]   ;;  %v14263_v49 = vld [vmem:[%s20265_s6] ss:$8 sps:$4 sm:$0xff]  }
  0x1e   :  { %721 = vmatpush1.bf16.msra.mxu0 %v14221_v18  ;;  %774 = vmatpush1.bf16.msra.mxu1 %v14224_v19  ;;  %v14260_v46 = vld [vmem:[%s20265_s6 + $0x110] ss:$8 sps:$4 sm:$0xff]   ;;  %v14268_v48 = vld [vmem:[%s20265_s6 + $0x104] ss:$8 sps:$4 sm:$0xff]   ;;  %v14266_v50 = vld [vmem:[%s20265_s6 + $0x100] ss:$8 sps:$4 sm:$0xff]  }
  0x1f   :  { %722 = vmatprep.subr.bf16.mxu0 %v14229_v20  ;;  %775 = vmatprep.subr.bf16.mxu1 %v14232_v21  ;;  %v14271_v51 = vld [vmem:[%s20265_s6 + $0xf4] ss:$8 sps:$4 sm:$0xff]   ;;  %v14269_v53 = vld [vmem:[%s20265_s6 + $0xf0] ss:$8 sps:$4 sm:$0xff]   ;;  %v14277_v55 = vld [vmem:[%s20265_s6 + $0xe4] ss:$8 sps:$4 sm:$0xff]   ;;  %v95_v21 = vlaneseq }
  0x20   :  { %v14274_v52 = vld [vmem:[%s20265_s6 + $0x1f4] ss:$8 sps:$4 sm:$0xff]   ;;  %v14272_v54 = vld [vmem:[%s20265_s6 + $0x1f0] ss:$8 sps:$4 sm:$0xff]   ;;  %v14280_v56 = vld [vmem:[%s20265_s6 + $0x1e4] ss:$8 sps:$4 sm:$0xff]  }
  0x21   :  { %v14275_v57 = vld [vmem:[%s20265_s6 + $0xe0] ss:$8 sps:$4 sm:$0xff]   ;;  %v14283_v59 = vld [vmem:[%s20265_s6 + $0xd4] ss:$8 sps:$4 sm:$0xff]   ;;  %v14281_v61 = vld [vmem:[%s20265_s6 + $0xd0] ss:$8 sps:$4 sm:$0xff]  }
  0x22   :  { %723 = vmatpush1.bf16.msra.mxu0 %v14227_v24  ;;  %776 = vmatpush1.bf16.msra.mxu1 %v14230_v25  ;;  %v14278_v58 = vld [vmem:[%s20265_s6 + $0x1e0] ss:$8 sps:$4 sm:$0xff]   ;;  %v14286_v60 = vld [vmem:[%s20265_s6 + $0x1d4] ss:$8 sps:$4 sm:$0xff]   ;;  %v14284_v62 = vld [vmem:[%s20265_s6 + $0x1d0] ss:$8 sps:$4 sm:$0xff]  }
  0x23   :  { %724 = vmatprep.subr.bf16.mxu0 %v14235_v26  ;;  %777 = vmatprep.subr.bf16.mxu1 %v14238_v27  ;;  %v14289_v63 = vld [vmem:[%s20265_s6 + $0xc4] ss:$8 sps:$4 sm:$0xff]   ;;  %v14287_v1 = vld [vmem:[%s20265_s6 + $0xc0] ss:$8 sps:$4 sm:$0xff]   ;;  %v14295_v3 = vld [vmem:[%s20265_s6 + $0xb4] ss:$8 sps:$4 sm:$0xff]  }
  0x24   :  { %11454 = vmatmul.mubr.msk.bf16.gmra.mxu0 %vm175_vm0, %v80_v28  ;;  %11456 = vmatmul.mubr.msk.bf16.gmra.mxu1 %vm175_vm0, %v80_v28  ;;  %v14292_v0 = vld [vmem:[%s20265_s6 + $0x1c4] ss:$8 sps:$4 sm:$0xff]   ;;  %v14290_v2 = vld [vmem:[%s20265_s6 + $0x1c0] ss:$8 sps:$4 sm:$0xff]   ;;  %v14298_v4 = vld [vmem:[%s20265_s6 + $0x1b4] ss:$8 sps:$4 sm:$0xff]  }
  0x25   :  { %v14293_v5 = vld [vmem:[%s20265_s6 + $0xb0] ss:$8 sps:$4 sm:$0xff]   ;;  %v14301_v7 = vld [vmem:[%s20265_s6 + $0xa4] ss:$8 sps:$4 sm:$0xff]   ;;  %v14299_v9 = vld [vmem:[%s20265_s6 + $0xa0] ss:$8 sps:$4 sm:$0xff]  }
  0x26   :  { %725 = vmatpush1.bf16.msra.mxu0 %v14233_v29  ;;  %778 = vmatpush1.bf16.msra.mxu1 %v14236_v30  ;;  %v14296_v6 = vld [vmem:[%s20265_s6 + $0x1b0] ss:$8 sps:$4 sm:$0xff]   ;;  %v14304_v8 = vld [vmem:[%s20265_s6 + $0x1a4] ss:$8 sps:$4 sm:$0xff]   ;;  %v14302_v10 = vld [vmem:[%s20265_s6 + $0x1a0] ss:$8 sps:$4 sm:$0xff]  }
  0x27   :  { %726 = vmatprep.subr.bf16.mxu0 %v14241_v31  ;;  %779 = vmatprep.subr.bf16.mxu1 %v14244_v32  ;;  %v14307_v11 = vld [vmem:[%s20265_s6 + $0x94] ss:$8 sps:$4 sm:$0xff]   ;;  %v14305_v13 = vld [vmem:[%s20265_s6 + $0x90] ss:$8 sps:$4 sm:$0xff]   ;;  %v14313_v15 = vld [vmem:[%s20265_s6 + $0x84] ss:$8 sps:$4 sm:$0xff]  }
  0x28   :  { %v14310_v12 = vld [vmem:[%s20265_s6 + $0x194] ss:$8 sps:$4 sm:$0xff]   ;;  %v14308_v14 = vld [vmem:[%s20265_s6 + $0x190] ss:$8 sps:$4 sm:$0xff]   ;;  %v14316_v16 = vld [vmem:[%s20265_s6 + $0x184] ss:$8 sps:$4 sm:$0xff]  }
  0x29   :  { %v14311_v17 = vld [vmem:[%s20265_s6 + $0x80] ss:$8 sps:$4 sm:$0xff]   ;;  %v14319_v19 = vld [vmem:[%s20265_s6 + $0x274] ss:$8 sps:$4 sm:$0xff]   ;;  %v96_v22 = vshrl.u32 %v95_v21, 7 }
  0x2a   :  { %727 = vmatpush1.bf16.msra.mxu0 %v14239_v33  ;;  %780 = vmatpush1.bf16.msra.mxu1 %v14242_v34  ;;  %v14314_v18 = vld [vmem:[%s20265_s6 + $0x180] ss:$8 sps:$4 sm:$0xff]   ;;  %v14322_v20 = vld [vmem:[%s20265_s6 + $0x374] ss:$8 sps:$4 sm:$0xff]  }
  0x2b   :  { %728 = vmatprep.subr.bf16.mxu0 %v14247_v35  ;;  %781 = vmatprep.subr.bf16.mxu1 %v14250_v36  ;;  %v101_v23 = vsub.s32 1, %v96_v22  ;;  %v109_v24 = vsub.s32 3, %v96_v22  ;;  %v15741_v25 = vsub.s32 0, %v96_v22  ;;  %v105_v27 = vsub.s32 2, %v96_v22  ;;  %v93_v29 = vld [vmem:[%s20266_s3] sm:$0xf] }
  0x2c   :  { %v14338_v21 = vld [vmem:[%s20265_s6 + $0x340] ss:$8 sps:$4 sm:$0xff]   ;;  %v14343_v22 = vld [vmem:[%s20265_s6 + $0x234] ss:$8 sps:$4 sm:$0xff]  }
  0x2d   :  { %v102_v32 = vrot.slane %v93_v29, %v101_v23  ;;  %v110_v33 = vrot.slane %v93_v29, %v109_v24  ;;  %v98_v34 = vrot.slane %v93_v29, %v15741_v25  ;;  %v106_v35 = vrot.slane %v93_v29, %v105_v27  ;;  %v14346_v23 = vld [vmem:[%s20265_s6 + $0x334] ss:$8 sps:$4 sm:$0xff]   ;;  %v14341_v24 = vld [vmem:[%s20265_s6 + $0x230] ss:$8 sps:$4 sm:$0xff]   ;;  %v14349_v27 = vld [vmem:[%s20265_s6 + $0x224] ss:$8 sps:$4 sm:$0xff]  }
  0x2e   :  { %729 = vmatpush1.bf16.msra.mxu0 %v14245_v37  ;;  %782 = vmatpush1.bf16.msra.mxu1 %v14248_v38  ;;  %v14347_v29 = vld [vmem:[%s20265_s6 + $0x220] ss:$8 sps:$4 sm:$0xff]  }
  0x2f   :  { %730 = vmatprep.subr.bf16.mxu0 %v14253_v39  ;;  %783 = vmatprep.subr.bf16.mxu1 %v14256_v40 }
  0x32   :  { %731 = vmatpush1.bf16.msra.mxu0 %v14251_v41  ;;  %784 = vmatpush1.bf16.msra.mxu1 %v14254_v42 }
  0x33   :  { %732 = vmatprep.subr.bf16.mxu0 %v14259_v43  ;;  %785 = vmatprep.subr.bf16.mxu1 %v14262_v44 }
  0x36   :  { %733 = vmatpush1.bf16.msra.mxu0 %v14257_v45  ;;  %786 = vmatpush1.bf16.msra.mxu1 %v14260_v46 }
  0x37   :  { %734 = vmatprep.subr.bf16.mxu0 %v14265_v47  ;;  %787 = vmatprep.subr.bf16.mxu1 %v14268_v48 }
  0x3a   :  { %735 = vmatpush1.bf16.msra.mxu0 %v14263_v49  ;;  %788 = vmatpush1.bf16.msra.mxu1 %v14266_v50 }
  0x3b   :  { %736 = vmatprep.subr.bf16.mxu0 %v14271_v51  ;;  %789 = vmatprep.subr.bf16.mxu1 %v14274_v52  ;;  %v14317_v52 = vld [vmem:[%s20265_s6 + $0x270] ss:$8 sps:$4 sm:$0xff]  }
  0x3e   :  { %737 = vmatpush2.bf16.msra.mxu0 %v14269_v53  ;;  %790 = vmatpush2.bf16.msra.mxu1 %v14272_v54  ;;  %v14320_v53 = vld [vmem:[%s20265_s6 + $0x370] ss:$8 sps:$4 sm:$0xff]  }
  0x3f   :  { %738 = vmatprep.subr.bf16.mxu0 %v14277_v55  ;;  %791 = vmatprep.subr.bf16.mxu1 %v14280_v56 }
  0x42   :  { %739 = vmatpush2.bf16.msra.mxu0 %v14275_v57  ;;  %792 = vmatpush2.bf16.msra.mxu1 %v14278_v58  ;;  %v14325_v58 = vld [vmem:[%s20265_s6 + $0x264] ss:$8 sps:$4 sm:$0xff]  }
  0x43   :  { %740 = vmatprep.subr.bf16.mxu0 %v14283_v59  ;;  %793 = vmatprep.subr.bf16.mxu1 %v14286_v60  ;;  %v14328_v59 = vld [vmem:[%s20265_s6 + $0x364] ss:$8 sps:$4 sm:$0xff]  }
  0x46   :  { %741 = vmatpush2.bf16.msra.mxu0 %v14281_v61  ;;  %794 = vmatpush2.bf16.msra.mxu1 %v14284_v62 }
  0x47   :  { %742 = vmatprep.subr.bf16.mxu0 %v14289_v63  ;;  %795 = vmatprep.subr.bf16.mxu1 %v14292_v0 }
  0x4a   :  { %743 = vmatpush2.bf16.msra.mxu0 %v14287_v1  ;;  %796 = vmatpush2.bf16.msra.mxu1 %v14290_v2 }
  0x4b   :  { %744 = vmatprep.subr.bf16.mxu0 %v14295_v3  ;;  %797 = vmatprep.subr.bf16.mxu1 %v14298_v4  ;;  %v14323_v4 = vld [vmem:[%s20265_s6 + $0x260] ss:$8 sps:$4 sm:$0xff]  }
  0x4e   :  { %745 = vmatpush2.bf16.msra.mxu0 %v14293_v5  ;;  %798 = vmatpush2.bf16.msra.mxu1 %v14296_v6  ;;  %v14326_v5 = vld [vmem:[%s20265_s6 + $0x360] ss:$8 sps:$4 sm:$0xff]  }
  0x4f   :  { %746 = vmatprep.subr.bf16.mxu0 %v14301_v7  ;;  %799 = vmatprep.subr.bf16.mxu1 %v14304_v8  ;;  %v14331_v8 = vld [vmem:[%s20265_s6 + $0x254] ss:$8 sps:$4 sm:$0xff]  }
  0x52   :  { %747 = vmatpush2.bf16.msra.mxu0 %v14299_v9  ;;  %800 = vmatpush2.bf16.msra.mxu1 %v14302_v10  ;;  %v14334_v9 = vld [vmem:[%s20265_s6 + $0x354] ss:$8 sps:$4 sm:$0xff]  }
  0x53   :  { %748 = vmatprep.subr.bf16.mxu0 %v14307_v11  ;;  %801 = vmatprep.subr.bf16.mxu1 %v14310_v12 }
  0x56   :  { %749 = vmatpush2.bf16.msra.mxu0 %v14305_v13  ;;  %802 = vmatpush2.bf16.msra.mxu1 %v14308_v14 }
  0x57   :  { %750 = vmatprep.subr.bf16.mxu0 %v14313_v15  ;;  %803 = vmatprep.subr.bf16.mxu1 %v14316_v16  ;;  %v14329_v16 = vld [vmem:[%s20265_s6 + $0x250] ss:$8 sps:$4 sm:$0xff]  }
  0x5a   :  { %751 = vmatpush2.bf16.msra.mxu0 %v14311_v17  ;;  %804 = vmatpush2.bf16.msra.mxu1 %v14314_v18  ;;  %v14332_v17 = vld [vmem:[%s20265_s6 + $0x350] ss:$8 sps:$4 sm:$0xff]   ;;  %v14337_v18 = vld [vmem:[%s20265_s6 + $0x244] ss:$8 sps:$4 sm:$0xff]  }
  0x5b   :  { %1213 = vmatprep.subr.bf16.mxu0 %v14319_v19  ;;  %1266 = vmatprep.subr.bf16.mxu1 %v14322_v20  ;;  %v14340_v19 = vld [vmem:[%s20265_s6 + $0x344] ss:$8 sps:$4 sm:$0xff]   ;;  %v14335_v20 = vld [vmem:[%s20265_s6 + $0x240] ss:$8 sps:$4 sm:$0xff]  }
  0xdc   :  { %v216_v26 = vpop.f32.mrf.mxu0  ;;  %v269_v28 = vpop.f32.mrf.mxu1 }
  0xdd   :  { %v217_v46 = vadd.f32 %v216_v26, %v98_v34  ;;  %v270_v47 = vadd.f32 %v269_v28, %v106_v35  ;;  %v14344_v26 = vld [vmem:[%s20265_s6 + $0x330] ss:$8 sps:$4 sm:$0xff]   ;;  %v14352_v28 = vld [vmem:[%s20265_s6 + $0x324] ss:$8 sps:$4 sm:$0xff]  }
  0xde   :  { %v218_v30 = vpop.f32.mrf.mxu0  ;;  %v271_v31 = vpop.f32.mrf.mxu1 }
  0xdf   :  { %v219_v42 = vadd.f32 %v218_v30, %v102_v32  ;;  %v272_v43 = vadd.f32 %v271_v31, %v110_v33  ;;  %v14350_v30 = vld [vmem:[%s20265_s6 + $0x320] ss:$8 sps:$4 sm:$0xff]   ;;  %v14355_v31 = vld [vmem:[%s20265_s6 + $0x214] ss:$8 sps:$4 sm:$0xff]  }
  0xe0   :  { %v220_v36 = vpop.f32.mrf.mxu0  ;;  %v273_v37 = vpop.f32.mrf.mxu1 }
  0xe1   :  { %v221_v38 = vadd.f32 %v220_v36, %v98_v34  ;;  %v274_v39 = vadd.f32 %v273_v37, %v106_v35  ;;  %v14364_v36 = vld [vmem:[%s20265_s6 + $0x304] ss:$8 sps:$4 sm:$0xff]   ;;  %v14359_v37 = vld [vmem:[%s20265_s6 + $0x200] ss:$8 sps:$4 sm:$0xff]  }
  0xe2   :  { %v222_v40 = vpop.f32.mrf.mxu0  ;;  %v275_v41 = vpop.f32.mrf.mxu1 }
  0xe3   :  { %v223_v44 = vadd.f32 %v222_v40, %v102_v32  ;;  %v276_v45 = vadd.f32 %v275_v41, %v110_v33  ;;  %v15757_v54 = vpack.c.bf16 %v221_v38, %v217_v46  ;;  %v15759_v55 = vpack.c.bf16 %v274_v39, %v270_v47  ;;  %v14362_v38 = vld [vmem:[%s20265_s6 + $0x300] ss:$8 sps:$4 sm:$0xff]   ;;  %v14367_v39 = vld [vmem:[%s20265_s6 + $0x2f4] ss:$8 sps:$4 sm:$0xff]   ;;  %v14365_v41 = vld [vmem:[%s20265_s6 + $0x2f0] ss:$8 sps:$4 sm:$0xff]  }
  0xe4   :  { %v226_v48 = vpop.f32.mrf.mxu0  ;;  %v279_v49 = vpop.f32.mrf.mxu1  ;;  %v14370_v40 = vld [vmem:[%s20265_s6 + $0x3f4] ss:$8 sps:$4 sm:$0xff]   ;;  %v14374_v46 = vld [vmem:[%s20265_s6 + $0x3e0] ss:$8 sps:$4 sm:$0xff]  }
  0xe5   :  { %v15747_v50 = vpack.c.bf16 %v223_v44, %v219_v42  ;;  %v15749_v51 = vpack.c.bf16 %v276_v45, %v272_v43  ;;  %v227_v60 = vadd.f32 %v226_v48, %v98_v34  ;;  %v280_v61 = vadd.f32 %v279_v49, %v106_v35  ;;  %v14368_v42 = vld [vmem:[%s20265_s6 + $0x3f0] ss:$8 sps:$4 sm:$0xff]   ;;  %v14373_v43 = vld [vmem:[%s20265_s6 + $0x2e4] ss:$8 sps:$4 sm:$0xff]   ;;  %v14371_v45 = vld [vmem:[%s20265_s6 + $0x2e0] ss:$8 sps:$4 sm:$0xff]  }
  0xe6   :  { %v228_v56 = vpop.f32.mrf.mxu0  ;;  %v281_v57 = vpop.f32.mrf.mxu1  ;;  %v14376_v44 = vld [vmem:[%s20265_s6 + $0x3e4] ss:$8 sps:$4 sm:$0xff]   ;;  %v14379_v47 = vld [vmem:[%s20265_s6 + $0x2d4] ss:$8 sps:$4 sm:$0xff]   ;;  %v14377_v49 = vld [vmem:[%s20265_s6 + $0x2d0] ss:$8 sps:$4 sm:$0xff]  }
  0xe7   :  { %752 = vmatprep.mubr.bf16.mxu0 %v15747_v50  ;;  %805 = vmatprep.mubr.bf16.mxu1 %v15749_v51  ;;  %v229_v62 = vadd.f32 %v228_v56, %v102_v32  ;;  %v282_v1 = vadd.f32 %v281_v57, %v110_v33  ;;  %v14382_v48 = vld [vmem:[%s20265_s6 + $0x3d4] ss:$8 sps:$4 sm:$0xff]   ;;  %v14388_v56 = vld [vmem:[%s20265_s6 + $0x3c4] ss:$8 sps:$4 sm:$0xff]   ;;  %v14383_v57 = vld [vmem:[%s20265_s6 + $0x2c0] ss:$8 sps:$4 sm:$0xff]  }
  0xe8   :  { %v230_v63 = vpop.f32.mrf.mxu0  ;;  %v283_v0 = vpop.f32.mrf.mxu1  ;;  %753 = vmatmul.mubr.bf16.vlgmr.msra.gmra.mxu0 %v15757_v54  ;;  %806 = vmatmul.mubr.bf16.vlgmr.msra.gmra.mxu1 %v15759_v55 }
  0xe9   :  { %v231_v2 = vadd.f32 %v230_v63, %v98_v34  ;;  %v284_v3 = vadd.f32 %v283_v0, %v106_v35  ;;  %1214 = vmatpush1.bf16.msra.mxu0 %v14317_v52  ;;  %1267 = vmatpush1.bf16.msra.mxu1 %v14320_v53  ;;  %v14356_v34 = vld [vmem:[%s20265_s6 + $0x310] ss:$8 sps:$4 sm:$0xff]   ;;  %v14361_v35 = vld [vmem:[%s20265_s6 + $0x204] ss:$8 sps:$4 sm:$0xff]  }
  0xea   :  { %v232_v6 = vpop.f32.mrf.mxu0  ;;  %v285_v7 = vpop.f32.mrf.mxu1  ;;  %1215 = vmatprep.subr.bf16.mxu0 %v14325_v58  ;;  %1268 = vmatprep.subr.bf16.mxu1 %v14328_v59  ;;  %v14380_v52 = vld [vmem:[%s20265_s6 + $0x3d0] ss:$8 sps:$4 sm:$0xff]   ;;  %v14385_v53 = vld [vmem:[%s20265_s6 + $0x2c4] ss:$8 sps:$4 sm:$0xff]   ;;  %v14386_v58 = vld [vmem:[%s20265_s6 + $0x3c0] ss:$8 sps:$4 sm:$0xff]  }
  0xeb   :  { %v233_v10 = vadd.f32 %v232_v6, %v102_v32  ;;  %v286_v11 = vadd.f32 %v285_v7, %v110_v33  ;;  %v15783_v12 = vpack.c.bf16 %v231_v2, %v227_v60  ;;  %v15785_v13 = vpack.c.bf16 %v284_v3, %v280_v61  ;;  %v14358_v32 = vld [vmem:[%s20265_s6 + $0x314] ss:$8 sps:$4 sm:$0xff]   ;;  %v14353_v33 = vld [vmem:[%s20265_s6 + $0x210] ss:$8 sps:$4 sm:$0xff]   ;;  %v14397_v63 = vld [vmem:[%s20265_s6 + $0x2a4] ss:$8 sps:$4 sm:$0xff]  }
  0xec   :  { %v14391_v59 = vld [vmem:[%s20265_s6 + $0x2b4] ss:$8 sps:$4 sm:$0xff]   ;;  %v14389_v61 = vld [vmem:[%s20265_s6 + $0x2b0] ss:$8 sps:$4 sm:$0xff]   ;;  %v14400_v0 = vld [vmem:[%s20265_s6 + $0x3a4] ss:$8 sps:$4 sm:$0xff]  }
  0xed   :  { %20267 = vst [vmem:[#allocation2_spill] sm:$0xff] %v15783_v12  ;;  %v15787_v14 = vpack.c.bf16 %v233_v10, %v229_v62  ;;  %v15789_v15 = vpack.c.bf16 %v286_v11, %v282_v1  ;;  %1216 = vmatpush1.bf16.msra.mxu0 %v14323_v4  ;;  %1269 = vmatpush1.bf16.msra.mxu1 %v14326_v5  ;;  %v14394_v60 = vld [vmem:[%s20265_s6 + $0x3b4] ss:$8 sps:$4 sm:$0xff]   ;;  %v14392_v62 = vld [vmem:[%s20265_s6 + $0x3b0] ss:$8 sps:$4 sm:$0xff]  }
  0xee   :  { %1217 = vmatprep.subr.bf16.mxu0 %v14331_v8  ;;  %1270 = vmatprep.subr.bf16.mxu1 %v14334_v9  ;;  %v14395_v1 = vld [vmem:[%s20265_s6 + $0x2a0] ss:$8 sps:$4 sm:$0xff]   ;;  %v14403_v3 = vld [vmem:[%s20265_s6 + $0x294] ss:$8 sps:$4 sm:$0xff]   ;;  %v14401_v5 = vld [vmem:[%s20265_s6 + $0x290] ss:$8 sps:$4 sm:$0xff]  }
  0xef   :  { %20268 = vst [vmem:[#allocation3_spill] sm:$0xff] %v15787_v14  ;;  %762 = vmatprep.mubr.bf16.mxu0 %v15787_v14  ;;  %815 = vmatprep.mubr.bf16.mxu1 %v15789_v15  ;;  %v14398_v2 = vld [vmem:[%s20265_s6 + $0x3a0] ss:$8 sps:$4 sm:$0xff]   ;;  %v14406_v4 = vld [vmem:[%s20265_s6 + $0x394] ss:$8 sps:$4 sm:$0xff]  }
  0xf0   :  { %763 = vmatmul.mubr.bf16.gmra.mxu0 %v15783_v12  ;;  %816 = vmatmul.mubr.bf16.gmra.mxu1 %v15785_v13  ;;  %v14404_v6 = vld [vmem:[%s20265_s6 + $0x390] ss:$8 sps:$4 sm:$0xff]   ;;  %v14409_v7 = vld [vmem:[%s20265_s6 + $0x284] ss:$8 sps:$4 sm:$0xff]   ;;  %v14407_v9 = vld [vmem:[%s20265_s6 + $0x280] ss:$8 sps:$4 sm:$0xff]  }
  0xf1   :  { %1218 = vmatpush1.bf16.msra.mxu0 %v14329_v16  ;;  %1271 = vmatpush1.bf16.msra.mxu1 %v14332_v17  ;;  %v14412_v8 = vld [vmem:[%s20265_s6 + $0x384] ss:$8 sps:$4 sm:$0xff]   ;;  %v14410_v10 = vld [vmem:[%s20265_s6 + $0x380] ss:$8 sps:$4 sm:$0xff]   ;;  %v14415_v11 = vld [vmem:[%s20265_s6 + $0x574] ss:$8 sps:$4 sm:$0xff]  }
  0xf2   :  { %1245 = vmatprep.mubr.bf16.mxu0 %v15747_v50  ;;  %1298 = vmatprep.mubr.bf16.mxu1 %v15749_v51  ;;  %v14413_v16 = vld [vmem:[%s20265_s6 + $0x570] ss:$8 sps:$4 sm:$0xff]   ;;  %v14418_v17 = vld [vmem:[%s20265_s6 + $0x564] ss:$8 sps:$4 sm:$0xff]  }
  0xf3   :  { %1219 = vmatprep.subr.bf16.mxu0 %v14337_v18  ;;  %1272 = vmatprep.subr.bf16.mxu1 %v14340_v19  ;;  %v14416_v18 = vld [vmem:[%s20265_s6 + $0x560] ss:$8 sps:$4 sm:$0xff]   ;;  %v14421_v19 = vld [vmem:[%s20265_s6 + $0x554] ss:$8 sps:$4 sm:$0xff]  }
  0xf5   :  { %1220 = vmatpush1.bf16.msra.mxu0 %v14335_v20  ;;  %1273 = vmatpush1.bf16.msra.mxu1 %v14338_v21  ;;  %v14419_v20 = vld [vmem:[%s20265_s6 + $0x550] ss:$8 sps:$4 sm:$0xff]   ;;  %v14424_v21 = vld [vmem:[%s20265_s6 + $0x544] ss:$8 sps:$4 sm:$0xff]  }
  0xf6   :  { %1221 = vmatprep.subr.bf16.mxu0 %v14343_v22  ;;  %1274 = vmatprep.subr.bf16.mxu1 %v14346_v23  ;;  %v14422_v22 = vld [vmem:[%s20265_s6 + $0x540] ss:$8 sps:$4 sm:$0xff]   ;;  %v14427_v23 = vld [vmem:[%s20265_s6 + $0x534] ss:$8 sps:$4 sm:$0xff]  }
  0xf9   :  { %1222 = vmatpush1.bf16.msra.mxu0 %v14341_v24  ;;  %1275 = vmatpush1.bf16.msra.mxu1 %v14344_v26  ;;  %v14425_v24 = vld [vmem:[%s20265_s6 + $0x530] ss:$8 sps:$4 sm:$0xff]   ;;  %v14430_v26 = vld [vmem:[%s20265_s6 + $0x524] ss:$8 sps:$4 sm:$0xff]  }
  0xfa   :  { %1223 = vmatprep.subr.bf16.mxu0 %v14349_v27  ;;  %1276 = vmatprep.subr.bf16.mxu1 %v14352_v28  ;;  %v14428_v27 = vld [vmem:[%s20265_s6 + $0x520] ss:$8 sps:$4 sm:$0xff]   ;;  %v14433_v28 = vld [vmem:[%s20265_s6 + $0x514] ss:$8 sps:$4 sm:$0xff]  }
  0xfd   :  { %1224 = vmatpush1.bf16.msra.mxu0 %v14347_v29  ;;  %1277 = vmatpush1.bf16.msra.mxu1 %v14350_v30  ;;  %v14431_v29 = vld [vmem:[%s20265_s6 + $0x510] ss:$8 sps:$4 sm:$0xff]   ;;  %v14436_v30 = vld [vmem:[%s20265_s6 + $0x504] ss:$8 sps:$4 sm:$0xff]  }
  0xfe   :  { %1225 = vmatprep.subr.bf16.mxu0 %v14355_v31  ;;  %1278 = vmatprep.subr.bf16.mxu1 %v14358_v32  ;;  %v14434_v31 = vld [vmem:[%s20265_s6 + $0x500] ss:$8 sps:$4 sm:$0xff]   ;;  %v14439_v32 = vld [vmem:[%s20265_s6 + $0x5f4] ss:$8 sps:$4 sm:$0xff]  }
 0x101   :  { %1226 = vmatpush1.bf16.msra.mxu0 %v14353_v33  ;;  %1279 = vmatpush1.bf16.msra.mxu1 %v14356_v34  ;;  %v14437_v33 = vld [vmem:[%s20265_s6 + $0x5f0] ss:$8 sps:$4 sm:$0xff]   ;;  %v14442_v34 = vld [vmem:[%s20265_s6 + $0x5e4] ss:$8 sps:$4 sm:$0xff]  }
 0x102   :  { %1227 = vmatprep.subr.bf16.mxu0 %v14361_v35  ;;  %1280 = vmatprep.subr.bf16.mxu1 %v14364_v36  ;;  %v14440_v35 = vld [vmem:[%s20265_s6 + $0x5e0] ss:$8 sps:$4 sm:$0xff]   ;;  %v14445_v36 = vld [vmem:[%s20265_s6 + $0x5d4] ss:$8 sps:$4 sm:$0xff]  }
 0x105   :  { %1228 = vmatpush1.bf16.msra.mxu0 %v14359_v37  ;;  %1281 = vmatpush1.bf16.msra.mxu1 %v14362_v38  ;;  %v14443_v37 = vld [vmem:[%s20265_s6 + $0x5d0] ss:$8 sps:$4 sm:$0xff]   ;;  %v14448_v38 = vld [vmem:[%s20265_s6 + $0x5c4] ss:$8 sps:$4 sm:$0xff]  }
 0x106   :  { %1229 = vmatprep.subr.bf16.mxu0 %v14367_v39  ;;  %1282 = vmatprep.subr.bf16.mxu1 %v14370_v40  ;;  %v14446_v39 = vld [vmem:[%s20265_s6 + $0x5c0] ss:$8 sps:$4 sm:$0xff]   ;;  %v14451_v40 = vld [vmem:[%s20265_s6 + $0x5b4] ss:$8 sps:$4 sm:$0xff]  }
 0x109   :  { %1230 = vmatpush2.bf16.msra.mxu0 %v14365_v41  ;;  %1283 = vmatpush2.bf16.msra.mxu1 %v14368_v42  ;;  %v14449_v41 = vld [vmem:[%s20265_s6 + $0x5b0] ss:$8 sps:$4 sm:$0xff]   ;;  %v14454_v42 = vld [vmem:[%s20265_s6 + $0x5a4] ss:$8 sps:$4 sm:$0xff]  }
 0x10a   :  { %1231 = vmatprep.subr.bf16.mxu0 %v14373_v43  ;;  %1284 = vmatprep.subr.bf16.mxu1 %v14376_v44  ;;  %v14452_v43 = vld [vmem:[%s20265_s6 + $0x5a0] ss:$8 sps:$4 sm:$0xff]   ;;  %v14457_v44 = vld [vmem:[%s20265_s6 + $0x594] ss:$8 sps:$4 sm:$0xff]  }
 0x10d   :  { %1232 = vmatpush2.bf16.msra.mxu0 %v14371_v45  ;;  %1285 = vmatpush2.bf16.msra.mxu1 %v14374_v46  ;;  %v14455_v45 = vld [vmem:[%s20265_s6 + $0x590] ss:$8 sps:$4 sm:$0xff]   ;;  %v14460_v46 = vld [vmem:[%s20265_s6 + $0x584] ss:$8 sps:$4 sm:$0xff]  }
 0x10e   :  { %1233 = vmatprep.subr.bf16.mxu0 %v14379_v47  ;;  %1286 = vmatprep.subr.bf16.mxu1 %v14382_v48  ;;  %v14458_v47 = vld [vmem:[%s20265_s6 + $0x580] ss:$8 sps:$4 sm:$0xff]   ;;  %v20229_v48 = vmov 0.0  }
 0x111   :  { %1234 = vmatpush2.bf16.msra.mxu0 %v14377_v49  ;;  %1287 = vmatpush2.bf16.msra.mxu1 %v14380_v52 }
 0x112   :  { %1235 = vmatprep.subr.bf16.mxu0 %v14385_v53  ;;  %1288 = vmatprep.subr.bf16.mxu1 %v14388_v56 }
 0x115   :  { %1236 = vmatpush2.bf16.msra.mxu0 %v14383_v57  ;;  %1289 = vmatpush2.bf16.msra.mxu1 %v14386_v58 }
 0x116   :  { %1237 = vmatprep.subr.bf16.mxu0 %v14391_v59  ;;  %1290 = vmatprep.subr.bf16.mxu1 %v14394_v60 }
 0x119   :  { %1238 = vmatpush2.bf16.msra.mxu0 %v14389_v61  ;;  %1291 = vmatpush2.bf16.msra.mxu1 %v14392_v62 }
 0x11a   :  { %1239 = vmatprep.subr.bf16.mxu0 %v14397_v63  ;;  %1292 = vmatprep.subr.bf16.mxu1 %v14400_v0 }
 0x11d   :  { %1240 = vmatpush2.bf16.msra.mxu0 %v14395_v1  ;;  %1293 = vmatpush2.bf16.msra.mxu1 %v14398_v2 }
 0x11e   :  { %1241 = vmatprep.subr.bf16.mxu0 %v14403_v3  ;;  %1294 = vmatprep.subr.bf16.mxu1 %v14406_v4 }
 0x121   :  { %1242 = vmatpush2.bf16.msra.mxu0 %v14401_v5  ;;  %1295 = vmatpush2.bf16.msra.mxu1 %v14404_v6 }
 0x122   :  { %1243 = vmatprep.subr.bf16.mxu0 %v14409_v7  ;;  %1296 = vmatprep.subr.bf16.mxu1 %v14412_v8 }
 0x125   :  { %1244 = vmatpush2.bf16.msra.mxu0 %v14407_v9  ;;  %1297 = vmatpush2.bf16.msra.mxu1 %v14410_v10 }
 0x126   :  { %1927 = vmatprep.subr.bf16.mxu1 %v14415_v11 }
 0x128   :  { %1246 = vmatmul.mubr.bf16.vlgmr.msra.gmra.mxu0 %v15757_v54  ;;  %1299 = vmatmul.mubr.bf16.vlgmr.msra.gmra.mxu1 %v15759_v55 }
 0x129   :  { %1255 = vmatprep.mubr.bf16.mxu0 %v15787_v14  ;;  %1308 = vmatprep.mubr.bf16.mxu1 %v15789_v15 }
 0x12a   :  { %1928 = vmatpush1.bf16.msra.mxu1 %v14413_v16 }
 0x12b   :  { %1929 = vmatprep.subr.bf16.mxu1 %v14418_v17 }
 0x12e   :  { %1930 = vmatpush1.bf16.msra.mxu1 %v14416_v18 }
 0x12f   :  { %1931 = vmatprep.subr.bf16.mxu1 %v14421_v19 }
 0x130   :  { %1256 = vmatmul.mubr.bf16.gmra.mxu0 %v15783_v12  ;;  %1309 = vmatmul.mubr.bf16.gmra.mxu1 %v15785_v13 }
 0x131   :  { %1959 = vmatprep.mubr.bf16.mxu1 %v15749_v51  ;;  %1393 = vmatprep.mubr.f32.mxu0 %v20229_v48 }
 0x132   :  { %1932 = vmatpush1.bf16.msra.mxu1 %v14419_v20 }
 0x133   :  { %1933 = vmatprep.subr.bf16.mxu1 %v14424_v21 }
 0x136   :  { %1934 = vmatpush1.bf16.msra.mxu1 %v14422_v22 }
 0x137   :  { %1935 = vmatprep.subr.bf16.mxu1 %v14427_v23 }
 0x13a   :  { %1936 = vmatpush1.bf16.msra.mxu1 %v14425_v24 }
 0x13b   :  { %1937 = vmatprep.subr.bf16.mxu1 %v14430_v26 }
 0x13e   :  { %1938 = vmatpush1.bf16.msra.mxu1 %v14428_v27 }
 0x13f   :  { %1939 = vmatprep.subr.bf16.mxu1 %v14433_v28 }
 0x142   :  { %1940 = vmatpush1.bf16.msra.mxu1 %v14431_v29 }
 0x143   :  { %1941 = vmatprep.subr.bf16.mxu1 %v14436_v30 }
 0x146   :  { %1942 = vmatpush1.bf16.msra.mxu1 %v14434_v31 }
 0x147   :  { %1943 = vmatprep.subr.bf16.mxu1 %v14439_v32 }
 0x14a   :  { %1944 = vmatpush2.bf16.msra.mxu1 %v14437_v33 }
 0x14b   :  { %1945 = vmatprep.subr.bf16.mxu1 %v14442_v34  ;;  %v11649_v34 = vld [vmem:[%s20269_s9 + $0x10] sm:$0xff] }
 0x14e   :  { %1946 = vmatpush2.bf16.msra.mxu1 %v14440_v35 }
 0x14f   :  { %1947 = vmatprep.subr.bf16.mxu1 %v14445_v36 }
 0x152   :  { %1948 = vmatpush2.bf16.msra.mxu1 %v14443_v37 }
 0x153   :  { %1949 = vmatprep.subr.bf16.mxu1 %v14448_v38 }
 0x156   :  { %1950 = vmatpush2.bf16.msra.mxu1 %v14446_v39  ;;  %v11650_v39 = vld [vmem:[%s20269_s9 + $0x18] sm:$0xff] }
 0x157   :  { %1951 = vmatprep.subr.bf16.mxu1 %v14451_v40 }
 0x15a   :  { %1952 = vmatpush2.bf16.msra.mxu1 %v14449_v41 }
 0x15b   :  { %1953 = vmatprep.subr.bf16.mxu1 %v14454_v42 }
 0x15e   :  { %1954 = vmatpush2.bf16.msra.mxu1 %v14452_v43  ;;  %v14463_v43 = vld [vmem:[%s20265_s6 + $0x474] ss:$8 sps:$4 sm:$0xff]  }
 0x15f   :  { %1955 = vmatprep.subr.bf16.mxu1 %v14457_v44 }
 0x162   :  { %1956 = vmatpush2.bf16.msra.mxu1 %v14455_v45  ;;  %v826_v45 = vld [vmem:[%s20269_s9] sm:$0xff] }
 0x163   :  { %1957 = vmatprep.subr.bf16.mxu1 %v14460_v46  ;;  %v14461_v46 = vld [vmem:[%s20265_s6 + $0x470] ss:$8 sps:$4 sm:$0xff]  }
 0x166   :  { %1958 = vmatpush2.bf16.msra.mxu1 %v14458_v47  ;;  %v14466_v47 = vld [vmem:[%s20265_s6 + $0x464] ss:$8 sps:$4 sm:$0xff]  }
 0x169   :  { %1960 = vmatmul.mubr.bf16.vlgmr.msra.gmra.mxu1 %v15759_v55 }
 0x16a   :  { %1969 = vmatprep.mubr.bf16.mxu1 %v15789_v15 }
 0x171   :  { %1970 = vmatmul.mubr.bf16.gmra.mxu1 %v15785_v13 }
 0x1a8   :  { %v16066_v49 = vpop.f32.mrf.mxu0  ;;  %v16068_v52 = vpop.f32.mrf.mxu1 }
 0x1a9   :  { %v808_v44 = vadd.f32 %v16068_v52, %v16066_v49  ;;  %v827_v49 = vld [vmem:[%s20269_s9 + $0x8] sm:$0xff] }
 0x1aa   :  { %v756_v53 = vpop.f32.mrf.mxu0  ;;  %v809_v56 = vpop.f32.mrf.mxu1  ;;  %v14464_v52 = vld [vmem:[%s20265_s6 + $0x460] ss:$8 sps:$4 sm:$0xff]  }
 0x1ab   :  { %v810_v42 = vadd.f32 %v809_v56, %v756_v53  ;;  %v14469_v53 = vld [vmem:[%s20265_s6 + $0x454] ss:$8 sps:$4 sm:$0xff]   ;;  %v14467_v56 = vld [vmem:[%s20265_s6 + $0x450] ss:$8 sps:$4 sm:$0xff]  }
 0x1ac   :  { %v758_v57 = vpop.f32.mrf.mxu0  ;;  %v811_v58 = vpop.f32.mrf.mxu1 }
 0x1ad   :  { %v812_v41 = vadd.f32 %v811_v58, %v758_v57  ;;  %v14472_v57 = vld [vmem:[%s20265_s6 + $0x444] ss:$8 sps:$4 sm:$0xff]   ;;  %v14470_v58 = vld [vmem:[%s20265_s6 + $0x440] ss:$8 sps:$4 sm:$0xff]  }
 0x1ae   :  { %v760_v59 = vpop.f32.mrf.mxu0  ;;  %v813_v60 = vpop.f32.mrf.mxu1 }
 0x1af   :  { %v814_v40 = vadd.f32 %v813_v60, %v760_v59  ;;  %v14475_v59 = vld [vmem:[%s20265_s6 + $0x434] ss:$8 sps:$4 sm:$0xff]   ;;  %v14473_v60 = vld [vmem:[%s20265_s6 + $0x430] ss:$8 sps:$4 sm:$0xff]  }
 0x1b0   :  { %v764_v61 = vpop.f32.mrf.mxu0  ;;  %v817_v62 = vpop.f32.mrf.mxu1 }
 0x1b1   :  { %v818_v38 = vadd.f32 %v817_v62, %v764_v61  ;;  %v14478_v61 = vld [vmem:[%s20265_s6 + $0x424] ss:$8 sps:$4 sm:$0xff]   ;;  %v14476_v62 = vld [vmem:[%s20265_s6 + $0x420] ss:$8 sps:$4 sm:$0xff]  }
 0x1b2   :  { %v766_v63 = vpop.f32.mrf.mxu0  ;;  %v819_v0 = vpop.f32.mrf.mxu1 }
 0x1b3   :  { %v820_v37 = vadd.f32 %v819_v0, %v766_v63  ;;  %v14481_v63 = vld [vmem:[%s20265_s6 + $0x414] ss:$8 sps:$4 sm:$0xff]   ;;  %v14479_v0 = vld [vmem:[%s20265_s6 + $0x410] ss:$8 sps:$4 sm:$0xff]  }
 0x1b4   :  { %v768_v1 = vpop.f32.mrf.mxu0  ;;  %v821_v2 = vpop.f32.mrf.mxu1 }
 0x1b5   :  { %v822_v36 = vadd.f32 %v821_v2, %v768_v1  ;;  %v14484_v1 = vld [vmem:[%s20265_s6 + $0x404] ss:$8 sps:$4 sm:$0xff]   ;;  %v14482_v2 = vld [vmem:[%s20265_s6 + $0x400] ss:$8 sps:$4 sm:$0xff]  }
 0x1b6   :  { %v770_v3 = vpop.f32.mrf.mxu0  ;;  %v823_v4 = vpop.f32.mrf.mxu1 }
 0x1b7   :  { %v824_v35 = vadd.f32 %v823_v4, %v770_v3  ;;  %v14487_v3 = vld [vmem:[%s20265_s6 + $0x4f4] ss:$8 sps:$4 sm:$0xff]   ;;  %v14485_v4 = vld [vmem:[%s20265_s6 + $0x4f0] ss:$8 sps:$4 sm:$0xff]  }
 0x1e8   :  { %v1247_v5 = vpop.f32.mrf.mxu0  ;;  %v1300_v6 = vpop.f32.mrf.mxu1 }
 0x1e9   :  { %v1301_v33 = vadd.f32 %v1300_v6, %v1247_v5  ;;  %v14490_v5 = vld [vmem:[%s20265_s6 + $0x4e4] ss:$8 sps:$4 sm:$0xff]   ;;  %v14488_v6 = vld [vmem:[%s20265_s6 + $0x4e0] ss:$8 sps:$4 sm:$0xff]  }
 0x1ea   :  { %v1249_v7 = vpop.f32.mrf.mxu0  ;;  %v1302_v8 = vpop.f32.mrf.mxu1 }
 0x1eb   :  { %v1303_v32 = vadd.f32 %v1302_v8, %v1249_v7  ;;  %v14493_v7 = vld [vmem:[%s20265_s6 + $0x4d4] ss:$8 sps:$4 sm:$0xff]   ;;  %v14491_v8 = vld [vmem:[%s20265_s6 + $0x4d0] ss:$8 sps:$4 sm:$0xff]  }
 0x1ec   :  { %v1251_v9 = vpop.f32.mrf.mxu0  ;;  %v1304_v10 = vpop.f32.mrf.mxu1 }
 0x1ed   :  { %v1305_v31 = vadd.f32 %v1304_v10, %v1251_v9  ;;  %v14496_v9 = vld [vmem:[%s20265_s6 + $0x4c4] ss:$8 sps:$4 sm:$0xff]   ;;  %v14494_v10 = vld [vmem:[%s20265_s6 + $0x4c0] ss:$8 sps:$4 sm:$0xff]  }
 0x1ee   :  { %v1253_v11 = vpop.f32.mrf.mxu0  ;;  %v1306_v16 = vpop.f32.mrf.mxu1 }
 0x1ef   :  { %v1307_v30 = vadd.f32 %v1306_v16, %v1253_v11  ;;  %v14499_v11 = vld [vmem:[%s20265_s6 + $0x4b4] ss:$8 sps:$4 sm:$0xff]   ;;  %v14497_v16 = vld [vmem:[%s20265_s6 + $0x4b0] ss:$8 sps:$4 sm:$0xff]  }
 0x1f0   :  { %v1257_v17 = vpop.f32.mrf.mxu0  ;;  %v1310_v18 = vpop.f32.mrf.mxu1 }
 0x1f1   :  { %v1311_v29 = vadd.f32 %v1310_v18, %v1257_v17  ;;  %v14502_v17 = vld [vmem:[%s20265_s6 + $0x4a4] ss:$8 sps:$4 sm:$0xff]   ;;  %v14500_v18 = vld [vmem:[%s20265_s6 + $0x4a0] ss:$8 sps:$4 sm:$0xff]  }
 0x1f2   :  { %v1259_v19 = vpop.f32.mrf.mxu0  ;;  %v1312_v20 = vpop.f32.mrf.mxu1 }
 0x1f3   :  { %v1313_v28 = vadd.f32 %v1312_v20, %v1259_v19  ;;  %v14505_v19 = vld [vmem:[%s20265_s6 + $0x494] ss:$8 sps:$4 sm:$0xff]   ;;  %v14503_v20 = vld [vmem:[%s20265_s6 + $0x490] ss:$8 sps:$4 sm:$0xff]  }
 0x1f4   :  { %v1261_v21 = vpop.f32.mrf.mxu0  ;;  %v1314_v22 = vpop.f32.mrf.mxu1 }
 0x1f5   :  { %v1315_v27 = vadd.f32 %v1314_v22, %v1261_v21  ;;  %v14508_v21 = vld [vmem:[%s20265_s6 + $0x484] ss:$8 sps:$4 sm:$0xff]   ;;  %v14506_v22 = vld [vmem:[%s20265_s6 + $0x480] ss:$8 sps:$4 sm:$0xff]   ;;  %s20272_s6 = sld [smem:[#allocation18_spill]] }
 0x1f6   :  { %v1263_v23 = vpop.f32.mrf.mxu0  ;;  %v1316_v24 = vpop.f32.mrf.mxu1 }
 0x1f7   :  { %v1317_v26 = vadd.f32 %v1316_v24, %v1263_v23  ;;  %v16195_v23 = vld [vmem:[%s20270_s0 + $0xf8] sm:$0xff] }
 0x1f8   :  { %v16200_v24 = vld [vmem:[%s20270_s0 + $0x78] sm:$0xff]  ;;  %12688 = vmatprep.subr.mxu1 %v16195_v23 }
 0x1f9   :  { %1353 = vmatprep.subr.mxu0 %v1317_v26  ;;  %v16205_v26 = vld [vmem:[%s20270_s0 + $0xf0] sm:$0xff]  ;;  %12689 = vmatpush3.msra.mxu1 %v16200_v24 }
 0x1fa   :  { %1354 = vmatpush1.msra.mxu0 %v1315_v27  ;;  %v16211_v27 = vld [vmem:[%s20270_s0 + $0x70] sm:$0xff]  ;;  %12690 = vmatprep.subr.mxu1 %v16205_v26 }
 0x1fb   :  { %1355 = vmatprep.subr.mxu0 %v1313_v28  ;;  %v16217_v28 = vld [vmem:[%s20270_s0 + $0xe8] sm:$0xff]  ;;  %12691 = vmatpush3.msra.mxu1 %v16211_v27 }
 0x1fc   :  { %1356 = vmatpush1.msra.mxu0 %v1311_v29  ;;  %v16223_v29 = vld [vmem:[%s20270_s0 + $0x68] sm:$0xff]  ;;  %12692 = vmatprep.subr.mxu1 %v16217_v28 }
 0x1fd   :  { %1357 = vmatprep.subr.mxu0 %v1307_v30  ;;  %v16229_v30 = vld [vmem:[%s20270_s0 + $0xe0] sm:$0xff]  ;;  %12693 = vmatpush3.msra.mxu1 %v16223_v29 }
 0x1fe   :  { %1358 = vmatpush1.msra.mxu0 %v1305_v31  ;;  %v16235_v31 = vld [vmem:[%s20270_s0 + $0x60] sm:$0xff]  ;;  %12694 = vmatprep.subr.mxu1 %v16229_v30 }
 0x1ff   :  { %1359 = vmatprep.subr.mxu0 %v1303_v32  ;;  %v16241_v32 = vld [vmem:[%s20270_s0 + $0xd8] sm:$0xff]  ;;  %12695 = vmatpush3.msra.mxu1 %v16235_v31 }
 0x200   :  { %1360 = vmatpush1.msra.mxu0 %v1301_v33  ;;  %v16247_v33 = vld [vmem:[%s20270_s0 + $0x58] sm:$0xff]  ;;  %12696 = vmatprep.subr.mxu1 %v16241_v32 }
 0x201   :  { %11651 = vmatmul.mubr.msk.f32.vlgmr.msra.gmra.mxu0 %vm1322_vm1, %v11649_v34  ;;  %1436 = vmatprep.subr.mxu0 %v824_v35  ;;  %v16253_v34 = vld [vmem:[%s20270_s0 + $0xd0] sm:$0xff] }
 0x202   :  { %1437 = vmatpush1.msra.mxu0 %v822_v36  ;;  %1399 = vmatprep.mubr.f32.mxu0 %v20229_v48  ;;  %v16259_v35 = vld [vmem:[%s20270_s0 + $0x50] sm:$0xff]  ;;  %v16265_v36 = vld [vmem:[%s20270_s0 + $0xc8] sm:$0xff] }
 0x203   :  { %1438 = vmatprep.subr.mxu0 %v820_v37  ;;  %12697 = vmatpush3.msra.mxu1 %v16247_v33  ;;  %v16271_v37 = vld [vmem:[%s20270_s0 + $0x48] sm:$0xff] }
 0x204   :  { %1439 = vmatpush1.msra.mxu0 %v818_v38  ;;  %12698 = vmatprep.subr.mxu1 %v16253_v34  ;;  %v16277_v38 = vld [vmem:[%s20270_s0 + $0xc0] sm:$0xff] }
 0x205   :  { %11652 = vmatmul.mubr.msk.f32.gmra.mxu0 %vm1322_vm1, %v11650_v39  ;;  %1440 = vmatprep.subr.mxu0 %v814_v40  ;;  %v16283_v39 = vld [vmem:[%s20270_s0 + $0x40] sm:$0xff]  ;;  %v16289_v40 = vld [vmem:[%s20270_s0 + $0xb8] sm:$0xff] }
 0x206   :  { %1441 = vmatpush1.msra.mxu0 %v812_v41  ;;  %1476 = vmatprep.mubr.f32.mxu0 %v20229_v48  ;;  %v16295_v41 = vld [vmem:[%s20270_s0 + $0x38] sm:$0xff] }
 0x207   :  { %1442 = vmatprep.subr.mxu0 %v810_v42  ;;  %12699 = vmatpush3.msra.mxu1 %v16259_v35  ;;  %v16301_v42 = vld [vmem:[%s20270_s0 + $0xb0] sm:$0xff] }
 0x208   :  { %1443 = vmatpush1.msra.mxu0 %v808_v44  ;;  %12700 = vmatprep.subr.mxu1 %v16265_v36  ;;  %v16313_v44 = vld [vmem:[%s20270_s0 + $0xa8] sm:$0xff] }
 0x209   :  { %11653 = vmatmul.mubr.msk.f32.vlgmr.msra.gmra.mxu0 %vm1322_vm1, %v826_v45  ;;  %1874 = vmatprep.subr.bf16.mxu0 %v14463_v43  ;;  %v16307_v43 = vld [vmem:[%s20270_s0 + $0x30] sm:$0xff]  ;;  %v16319_v45 = vld [vmem:[%s20270_s0 + $0x28] sm:$0xff] }
 0x20a   :  { %1875 = vmatpush1.bf16.msra.mxu0 %v14461_v46  ;;  %1482 = vmatprep.mubr.f32.mxu0 %v20229_v48  ;;  %v16325_v46 = vld [vmem:[%s20270_s0 + $0xa0] sm:$0xff] }
 0x20b   :  { %1876 = vmatprep.subr.bf16.mxu0 %v14466_v47  ;;  %12701 = vmatpush3.msra.mxu1 %v16271_v37  ;;  %v16331_v47 = vld [vmem:[%s20270_s0 + $0x20] sm:$0xff] }
 0x20c   :  { %12702 = vmatprep.subr.mxu1 %v16277_v38 }
 0x20d   :  { %11654 = vmatmul.mubr.msk.f32.gmra.mxu0 %vm1322_vm1, %v827_v49  ;;  %12703 = vmatpush3.msra.mxu1 %v16283_v39  ;;  %v16337_v49 = vld [vmem:[%s20270_s0 + $0x98] sm:$0xff] }
 0x20e   :  { %1877 = vmatpush1.bf16.msra.mxu0 %v14464_v52  ;;  %1906 = vmatprep.mubr.bf16.mxu0 %v15747_v50  ;;  %v16343_v52 = vld [vmem:[%s20270_s0 + $0x18] sm:$0xff] }
 0x20f   :  { %1878 = vmatprep.subr.bf16.mxu0 %v14469_v53  ;;  %12704 = vmatprep.subr.mxu1 %v16289_v40 }
 0x210   :  { %12705 = vmatpush3.msra.mxu1 %v16295_v41 }
 0x211   :  { %12706 = vmatprep.subr.mxu1 %v16301_v42 }
 0x212   :  { %1879 = vmatpush1.bf16.msra.mxu0 %v14467_v56  ;;  %12707 = vmatpush3.msra.mxu1 %v16307_v43 }
 0x213   :  { %1880 = vmatprep.subr.bf16.mxu0 %v14472_v57  ;;  %12708 = vmatprep.subr.mxu1 %v16313_v44 }
 0x214   :  { %12709 = vmatpush3.msra.mxu1 %v16319_v45 }
 0x215   :  { %12710 = vmatprep.subr.mxu1 %v16325_v46 }
 0x216   :  { %1881 = vmatpush1.bf16.msra.mxu0 %v14470_v58  ;;  %12711 = vmatpush3.msra.mxu1 %v16331_v47 }
 0x217   :  { %1882 = vmatprep.subr.bf16.mxu0 %v14475_v59  ;;  %12712 = vmatprep.subr.mxu1 %v16337_v49 }
 0x218   :  { %12713 = vmatpush3.msra.mxu1 %v16343_v52 }
 0x21a   :  { %1883 = vmatpush1.bf16.msra.mxu0 %v14473_v60 }
 0x21b   :  { %1884 = vmatprep.subr.bf16.mxu0 %v14478_v61 }
 0x21e   :  { %1885 = vmatpush1.bf16.msra.mxu0 %v14476_v62 }
 0x21f   :  { %1886 = vmatprep.subr.bf16.mxu0 %v14481_v63 }
 0x222   :  { %1887 = vmatpush1.bf16.msra.mxu0 %v14479_v0 }
 0x223   :  { %1888 = vmatprep.subr.bf16.mxu0 %v14484_v1 }
 0x226   :  { %1889 = vmatpush1.bf16.msra.mxu0 %v14482_v2 }
 0x227   :  { %1890 = vmatprep.subr.bf16.mxu0 %v14487_v3 }
 0x229   :  { %v1961_v0 = vpop.f32.mrf.mxu1 }
 0x22a   :  { %1891 = vmatpush2.bf16.msra.mxu0 %v14485_v4 }
 0x22b   :  { %1892 = vmatprep.subr.bf16.mxu0 %v14490_v5  ;;  %v1963_v1 = vpop.f32.mrf.mxu1 }
 0x22d   :  { %v1965_v2 = vpop.f32.mrf.mxu1 }
 0x22e   :  { %1893 = vmatpush2.bf16.msra.mxu0 %v14488_v6 }
 0x22f   :  { %1894 = vmatprep.subr.bf16.mxu0 %v14493_v7  ;;  %v1967_v3 = vpop.f32.mrf.mxu1 }
 0x231   :  { %v1971_v6 = vpop.f32.mrf.mxu1 }
 0x232   :  { %1895 = vmatpush2.bf16.msra.mxu0 %v14491_v8 }
 0x233   :  { %1896 = vmatprep.subr.bf16.mxu0 %v14496_v9  ;;  %v1973_v9 = vpop.f32.mrf.mxu1 }
 0x236   :  { %1897 = vmatpush2.bf16.msra.mxu0 %v14494_v10 }
 0x237   :  { %1898 = vmatprep.subr.bf16.mxu0 %v14499_v11 }
 0x23a   :  { %1899 = vmatpush2.bf16.msra.mxu0 %v14497_v16  ;;  %v1975_v16 = vpop.f32.mrf.mxu1 }
 0x23b   :  { %1900 = vmatprep.subr.bf16.mxu0 %v14502_v17 }
 0x23e   :  { %1901 = vmatpush2.bf16.msra.mxu0 %v14500_v18 }
 0x23f   :  { %1902 = vmatprep.subr.bf16.mxu0 %v14505_v19  ;;  %v1977_v19 = vpop.f32.mrf.mxu1 }
 0x242   :  { %1903 = vmatpush2.bf16.msra.mxu0 %v14503_v20 }
 0x243   :  { %1904 = vmatprep.subr.bf16.mxu0 %v14508_v21 }
 0x246   :  { %1905 = vmatpush2.bf16.msra.mxu0 %v14506_v22 }
 0x249   :  { %1907 = vmatmul.mubr.bf16.vlgmr.msra.gmra.mxu0 %v15757_v54 }
 0x24a   :  { %1916 = vmatprep.mubr.bf16.mxu0 %v15787_v14  ;;  %v11783_v14 = vld [vmem:[%s20269_s9 + $0x20] sm:$0xff] }
 0x251   :  { %1917 = vmatmul.mubr.bf16.gmra.mxu0 %v15783_v12 }
 0x252   :  { %2053 = vmatprep.mubr.f32.mxu0 %v20229_v48 }
 0x2c1   :  { %v1395_v53 = vpop.f32.mrf.mxu0 }
 0x2c3   :  { %v1397_v56 = vpop.f32.mrf.mxu0 }
 0x2c5   :  { %v1401_v57 = vpop.f32.mrf.mxu0 }
 0x2c7   :  { %v16348_v58 = vpop.f32.mrf.mxu0 }
 0x2c9   :  { %v1478_v59 = vpop.f32.mrf.mxu0 }
 0x2ca   :  { %v1479_v60 = vadd.f32 %v1478_v59, %v1395_v53 }
 0x2cb   :  { %v1480_v61 = vpop.f32.mrf.mxu0 }
 0x2cd   :  { %v1484_v62 = vpop.f32.mrf.mxu0 }
 0x2ce   :  { %v16350_v63 = vadd.f32 %v1484_v62, %v1401_v57 }
 0x2cf   :  { %v1486_v4 = vpop.f32.mrf.mxu0 }
 0x309   :  { %v1908_v5 = vpop.f32.mrf.mxu0 }
 0x30a   :  { %v1962_v12 = vadd.f32 %v1961_v0, %v1908_v5  ;;  %v16365_v0 = vld [vmem:[%s20270_s0 + $0x90] sm:$0xff] }
 0x30b   :  { %v1910_v7 = vpop.f32.mrf.mxu0  ;;  %12714 = vmatprep.subr.mxu1 %v16365_v0 }
 0x30c   :  { %v1964_v48 = vadd.f32 %v1963_v1, %v1910_v7  ;;  %v16389_v1 = vld [vmem:[%s20270_s0 + $0x80] sm:$0xff] }
 0x30d   :  { %v1912_v8 = vpop.f32.mrf.mxu0 }
 0x30e   :  { %v1966_v62 = vadd.f32 %v1965_v2, %v1912_v8  ;;  %v16395_v2 = vld [vmem:[%s20270_s0] sm:$0xff] }
 0x30f   :  { %v1914_v10 = vpop.f32.mrf.mxu0 }
 0x310   :  { %v1968_v59 = vadd.f32 %v1967_v3, %v1914_v10  ;;  %v11784_v3 = vld [vmem:[%s20269_s9 + $0x28] sm:$0xff] }
 0x311   :  { %v1918_v11 = vpop.f32.mrf.mxu0 }
 0x312   :  { %v1972_v57 = vadd.f32 %v1971_v6, %v1918_v11  ;;  %v1481_v6 = vadd.f32 %v1480_v61, %v1397_v56  ;;  %v16416_v56 = vld [vmem:[%s20272_s6 + $0x38] sm:$0xff]  ;;  %v16436_v61 = vld [vmem:[%s20272_s6 + $0x20] sm:$0xff] }
 0x313   :  { %v1920_v17 = vpop.f32.mrf.mxu0 }
 0x314   :  { %v1974_v53 = vadd.f32 %v1973_v9, %v1920_v17  ;;  %v20271_v9 = vmov 0.0  }
 0x315   :  { %v1922_v18 = vpop.f32.mrf.mxu0 }
 0x316   :  { %v1976_v22 = vadd.f32 %v1975_v16, %v1922_v18  ;;  %v1487_v16 = vadd.f32 %v1486_v4, %v16348_v58  ;;  %v16422_v58 = vld [vmem:[%s20272_s6 + $0x30] sm:$0xff] }
 0x317   :  { %v1924_v20 = vpop.f32.mrf.mxu0  ;;  %v16450_v4 = vld [vmem:[%s20272_s6 + $0x10] sm:$0xff] }
 0x318   :  { %v1978_v21 = vadd.f32 %v1977_v19, %v1924_v20  ;;  %20274 = vst [vmem:[#allocation5_spill] sm:$0xff] %v16450_v4  ;;  %v16457_v20 = vld [vmem:[%s20272_s6 + $0x8] sm:$0xff] }
 0x319   :  { %20275 = vst [vmem:[#allocation6_spill] sm:$0xff] %v16457_v20 }
 0x31a   :  { %2013 = vmatprep.subr.mxu0 %v1978_v21  ;;  %v16462_v21 = vld [vmem:[%s20272_s6] sm:$0xff] }
 0x31b   :  { %2014 = vmatpush1.msra.mxu0 %v1976_v22  ;;  %20276 = vst [vmem:[#allocation7_spill] sm:$0xff] %v16462_v21 }
 0x31c   :  { %2015 = vmatprep.subr.mxu0 %v1974_v53 }
 0x31d   :  { %2016 = vmatpush1.msra.mxu0 %v1972_v57 }
 0x31e   :  { %2017 = vmatprep.subr.mxu0 %v1968_v59 }
 0x31f   :  { %2018 = vmatpush1.msra.mxu0 %v1966_v62 }
 0x320   :  { %2019 = vmatprep.subr.mxu0 %v1964_v48  ;;  %v16383_v48 = vld [vmem:[%s20270_s0 + $0x8] sm:$0xff] }
 0x321   :  { %2020 = vmatpush1.msra.mxu0 %v1962_v12  ;;  %v16371_v12 = vld [vmem:[%s20270_s0 + $0x10] sm:$0xff] }
 0x322   :  { %11785 = vmatmul.mubr.msk.f32.vlgmr.msra.gmra.mxu0 %vm1322_vm1, %v11783_v14  ;;  %12715 = vmatpush3.msra.mxu1 %v16371_v12  ;;  %v16377_v14 = vld [vmem:[%s20270_s0 + $0x88] sm:$0xff] }
 0x323   :  { %2059 = vmatprep.mubr.f32.mxu0 %v20271_v9  ;;  %12716 = vmatprep.subr.mxu1 %v16377_v14 }
 0x324   :  { %12717 = vmatpush3.msra.mxu1 %v16383_v48  ;;  %2182 = vmatprep.subr.mxu0 %v16416_v56 }
 0x325   :  { %12718 = vmatprep.subr.mxu1 %v16389_v1  ;;  %2183 = vmatpush1.msra.mxu0 %v16422_v58 }
 0x326   :  { %11786 = vmatmul.mubr.msk.f32.gmra.mxu0 %vm1322_vm1, %v11784_v3  ;;  %12719 = vmatpush3.msra.mxu1 %v16395_v2 }
 0x327   :  { %2222 = vmatprep.mubr.f32.mxu0 %v20271_v9  ;;  %2357 = vmatprep.subr.mxu1 %v16416_v56 }
 0x3e2   :  { %v2055_v5 = vpop.f32.mrf.mxu0 }
 0x3e3   :  { %v16400_v10 = vadd.f32 %v2055_v5, %v1479_v60  ;;  %v16429_v60 = vld [vmem:[%s20272_s6 + $0x28] sm:$0xff] }
 0x3e4   :  { %v2057_v7 = vpop.f32.mrf.mxu0  ;;  %2184 = vmatprep.subr.mxu0 %v16429_v60 }
 0x3e5   :  { %v16398_v8 = vadd.f32 %v2057_v7, %v1481_v6  ;;  %2185 = vmatpush1.msra.mxu0 %v16436_v61 }
 0x3e6   :  { %v2061_v11 = vpop.f32.mrf.mxu0 }
 0x3e7   :  { %2134 = vmatprep.mubr.f32.mxu1 %v16398_v8  ;;  %v16408_v19 = vadd.f32 %v2061_v11, %v16350_v63  ;;  %v16443_v63 = vld [vmem:[%s20272_s6 + $0x18] sm:$0xff] }
 0x3e8   :  { %v2063_v17 = vpop.f32.mrf.mxu0  ;;  %2135 = vmatmul.mubr.f32.vlgmr.msra.gmra.mxu1 %v16400_v10  ;;  %20273 = vst [vmem:[#allocation4_spill] sm:$0xff] %v16443_v63  ;;  %2186 = vmatprep.subr.mxu0 %v16443_v63 }
 0x3e9   :  { %v16405_v18 = vadd.f32 %v2063_v17, %v1487_v16  ;;  %2358 = vmatpush1.msra.mxu1 %v16422_v58  ;;  %2187 = vmatpush1.msra.mxu0 %v16450_v4 }
 0x3ea   :  { %2359 = vmatprep.subr.mxu1 %v16429_v60  ;;  %2188 = vmatprep.subr.mxu0 %v16457_v20 }
 0x3eb   :  { %2139 = vmatprep.mubr.f32.mxu1 %v16405_v18  ;;  %2360 = vmatpush1.msra.mxu1 %v16436_v61 }
 0x3ec   :  { %2140 = vmatmul.mubr.f32.gmra.mxu1 %v16408_v19  ;;  %2361 = vmatprep.subr.mxu1 %v16443_v63 }
 0x3ed   :  { %2397 = vmatprep.mubr.f32.mxu1 %v20271_v9  ;;  %2362 = vmatpush1.msra.mxu1 %v16450_v4 }
 0x3ee   :  { %2363 = vmatprep.subr.mxu1 %v16457_v20  ;;  %2189 = vmatpush1.msra.mxu0 %v16462_v21 }
 0x3ef   :  { %2364 = vmatpush1.msra.mxu1 %v16462_v21  ;;  %12726 = vmatprep.subr.mxu0 %v16195_v23 }
 0x4a8   :  { %v12720_v22 = vpop.f32.mrf.mxu1 }
 0x4aa   :  { %v12721_v53 = vpop.f32.mrf.mxu1 }
 0x4ab   :  { %v12722_v59 = vadd.f32 %v12721_v53, %v12720_v22 }
 0x4ac   :  { %v12723_v57 = vpop.f32.mrf.mxu1 }
 0x4ad   :  { %v2145_v5 = vsel %vm1322_vm1, %v12722_v59, 0.0 }
 0x4ae   :  { %v12724_v62 = vpop.f32.mrf.mxu1 }
 0x4af   :  { %v12725_v3 = vadd.f32 %v12724_v62, %v12723_v57 }
 0x4b1   :  { %v2146_v6 = vsel %vm1322_vm1, %v12725_v3, 0.0  ;;  %v14509_v3 = vld [vmem:[%s20277_s28 + $0x170] ss:$8 sps:$4 sm:$0xff]  }
 0x4b2   :  { %v2147_v7 = vadd.f32 %v2146_v6, %v2145_v5  ;;  %v14512_v6 = vld [vmem:[%s20277_s28 + $0x160] ss:$8 sps:$4 sm:$0xff]  }
 0x4b4   :  { %v2148_v11 = vrot.slane %v2147_v7, 4 }
 0x4b6   :  { %v2149_v16 = vadd.f32 %v2148_v11, %v2147_v7  ;;  %v14517_v7 = vld [vmem:[%s20277_s28 + $0x154] ss:$8 sps:$4 sm:$0xff]   ;;  %v14515_v11 = vld [vmem:[%s20277_s28 + $0x150] ss:$8 sps:$4 sm:$0xff]  }
 0x4b8   :  { %v2150_v17 = vrot.slane %v2149_v16, 2 }
 0x4ba   :  { %v2151_v20 = vadd.f32 %v2150_v17, %v2149_v16  ;;  %v14520_v16 = vld [vmem:[%s20277_s28 + $0x144] ss:$8 sps:$4 sm:$0xff]   ;;  %v14518_v17 = vld [vmem:[%s20277_s28 + $0x140] ss:$8 sps:$4 sm:$0xff]  }
 0x4bc   :  { %v2152_v4 = vrot.slane %v2151_v20, 1 }
 0x4be   :  { %v2153_v63 = vadd.f32 %v2152_v4, %v2151_v20 }
 0x4c0   :  { %v2154_v21 = vmul.f32 0.0078125, %v2153_v63  ;;  %v14511_v63 = vld [vmem:[%s20277_s28 + $0x174] ss:$8 sps:$4 sm:$0xff]  }
 0x4c2   :  { %11787 = vmatmul.mubr.msk.f32.vlgmr.msra.gmra.mxu0 %vm1322_vm1, %v2154_v21 }
 0x4c3   :  { %12727 = vmatpush3.msra.mxu0 %v16200_v24 }
 0x4c4   :  { %12728 = vmatprep.subr.mxu0 %v16205_v26 }
 0x4c5   :  { %12729 = vmatpush3.msra.mxu0 %v16211_v27 }
 0x4c6   :  { %12730 = vmatprep.subr.mxu0 %v16217_v28 }
 0x4c7   :  { %12731 = vmatpush3.msra.mxu0 %v16223_v29 }
 0x4c8   :  { %12732 = vmatprep.subr.mxu0 %v16229_v30 }
 0x4c9   :  { %12733 = vmatpush3.msra.mxu0 %v16235_v31 }
 0x4ca   :  { %12734 = vmatprep.subr.mxu0 %v16241_v32 }
 0x4cb   :  { %12735 = vmatpush3.msra.mxu0 %v16247_v33 }
 0x4cc   :  { %12736 = vmatprep.subr.mxu0 %v16253_v34 }
 0x4cd   :  { %12737 = vmatpush3.msra.mxu0 %v16259_v35 }
 0x4ce   :  { %12738 = vmatprep.subr.mxu0 %v16265_v36 }
 0x4cf   :  { %12739 = vmatpush3.msra.mxu0 %v16271_v37 }
 0x4d0   :  { %12740 = vmatprep.subr.mxu0 %v16277_v38 }
 0x4d1   :  { %12741 = vmatpush3.msra.mxu0 %v16283_v39 }
 0x4d2   :  { %12742 = vmatprep.subr.mxu0 %v16289_v40 }
 0x4d3   :  { %12743 = vmatpush3.msra.mxu0 %v16295_v41 }
 0x4d4   :  { %12744 = vmatprep.subr.mxu0 %v16301_v42 }
 0x4d5   :  { %12745 = vmatpush3.msra.mxu0 %v16307_v43 }
 0x4d6   :  { %12746 = vmatprep.subr.mxu0 %v16313_v44 }
 0x4d7   :  { %12747 = vmatpush3.msra.mxu0 %v16319_v45 }
 0x4d8   :  { %12748 = vmatprep.subr.mxu0 %v16325_v46 }
 0x4d9   :  { %12749 = vmatpush3.msra.mxu0 %v16331_v47 }
 0x4da   :  { %12750 = vmatprep.subr.mxu0 %v16337_v49 }
 0x4db   :  { %12751 = vmatpush3.msra.mxu0 %v16343_v52 }
 0x4dc   :  { %12752 = vmatprep.subr.mxu0 %v16365_v0 }
 0x4dd   :  { %12753 = vmatpush3.msra.mxu0 %v16371_v12 }
 0x4de   :  { %12754 = vmatprep.subr.mxu0 %v16377_v14 }
 0x4df   :  { %12755 = vmatpush3.msra.mxu0 %v16383_v48 }
 0x4e0   :  { %12756 = vmatprep.subr.mxu0 %v16389_v1 }
 0x4e1   :  { %12757 = vmatpush3.msra.mxu0 %v16395_v2 }
 0x4e2   :  { %2859 = vmatprep.subr.bf16.mxu0 %v14511_v63  ;;  %v14523_v63 = vld [vmem:[%s20277_s28 + $0x134] ss:$8 sps:$4 sm:$0xff]  }
 0x582   :  { %v2224_v4 = vpop.f32.mrf.mxu0 }
 0x583   :  { %v2232_v20 = vrot.slane %v2224_v4, %v15741_v25  ;;  %v14526_v4 = vld [vmem:[%s20277_s28 + $0x124] ss:$8 sps:$4 sm:$0xff]  }
 0x584   :  { %v2226_v21 = vpop.f32.mrf.mxu0 }
 0x585   :  { %v2236_v22 = vrot.slane %v2226_v21, %v15741_v25  ;;  %v16510_v53 = vsub.f32 %v16400_v10, %v2232_v20  ;;  %v16524_v5 = vsub.f32 %v16408_v19, %v2232_v20  ;;  %v14524_v20 = vld [vmem:[%s20277_s28 + $0x120] ss:$8 sps:$4 sm:$0xff]   ;;  %v14529_v21 = vld [vmem:[%s20277_s28 + $0x114] ss:$8 sps:$4 sm:$0xff]  }
 0x587   :  { %v16513_v57 = vsub.f32 %v16398_v8, %v2236_v22  ;;  %v16516_v59 = vsub.f32 %v16405_v18, %v2236_v22  ;;  %v2241_v10 = vmul.f32 %v16510_v53, %v16510_v53  ;;  %v14514_v8 = vld [vmem:[%s20277_s28 + $0x164] ss:$8 sps:$4 sm:$0xff]   ;;  %v2243_v19 = vmul.f32 %v16524_v5, %v16524_v5  ;;  %v14527_v22 = vld [vmem:[%s20277_s28 + $0x110] ss:$8 sps:$4 sm:$0xff]  }
 0x589   :  { %v2242_v62 = vmul.f32 %v16513_v57, %v16513_v57  ;;  %v2244_v18 = vmul.f32 %v16516_v59, %v16516_v59 }
 0x58b   :  { %2309 = vmatprep.mubr.f32.mxu0 %v2242_v62  ;;  %v14532_v62 = vld [vmem:[%s20277_s28 + $0x104] ss:$8 sps:$4 sm:$0xff]  }
 0x58c   :  { %2310 = vmatmul.mubr.f32.vlgmr.msra.gmra.mxu0 %v2241_v10  ;;  %v14535_v10 = vld [vmem:[%s20277_s28 + $0x1f4] ss:$8 sps:$4 sm:$0xff]  }
 0x58d   :  { %2860 = vmatpush1.bf16.msra.mxu0 %v14509_v3  ;;  %2314 = vmatprep.mubr.f32.mxu0 %v2244_v18  ;;  %v14530_v3 = vld [vmem:[%s20277_s28 + $0x100] ss:$8 sps:$4 sm:$0xff]   ;;  %v14538_v18 = vld [vmem:[%s20277_s28 + $0x1e4] ss:$8 sps:$4 sm:$0xff]  }
 0x58e   :  { %2861 = vmatprep.subr.bf16.mxu0 %v14514_v8  ;;  %v14533_v8 = vld [vmem:[%s20277_s28 + $0x1f0] ss:$8 sps:$4 sm:$0xff]  }
 0x590   :  { %2315 = vmatmul.mubr.f32.gmra.mxu0 %v2243_v19  ;;  %v14541_v19 = vld [vmem:[%s20277_s28 + $0x1d4] ss:$8 sps:$4 sm:$0xff]  }
 0x591   :  { %2862 = vmatpush1.bf16.msra.mxu0 %v14512_v6  ;;  %2891 = vmatprep.mubr.bf16.mxu0 %v15749_v51  ;;  %v14521_v51 = vld [vmem:[%s20277_s28 + $0x130] ss:$8 sps:$4 sm:$0xff]   ;;  %v14536_v6 = vld [vmem:[%s20277_s28 + $0x1e0] ss:$8 sps:$4 sm:$0xff]  }
 0x592   :  { %2863 = vmatprep.subr.bf16.mxu0 %v14517_v7  ;;  %v14539_v7 = vld [vmem:[%s20277_s28 + $0x1d0] ss:$8 sps:$4 sm:$0xff]  }
 0x595   :  { %2864 = vmatpush1.bf16.msra.mxu0 %v14515_v11  ;;  %v14544_v11 = vld [vmem:[%s20277_s28 + $0x1c4] ss:$8 sps:$4 sm:$0xff]  }
 0x596   :  { %2865 = vmatprep.subr.bf16.mxu0 %v14520_v16  ;;  %v14542_v16 = vld [vmem:[%s20277_s28 + $0x1c0] ss:$8 sps:$4 sm:$0xff]  }
 0x599   :  { %2866 = vmatpush1.bf16.msra.mxu0 %v14518_v17  ;;  %v14547_v17 = vld [vmem:[%s20277_s28 + $0x1b4] ss:$8 sps:$4 sm:$0xff]  }
 0x59a   :  { %2867 = vmatprep.subr.bf16.mxu0 %v14523_v63  ;;  %v14545_v63 = vld [vmem:[%s20277_s28 + $0x1b0] ss:$8 sps:$4 sm:$0xff]  }
 0x59d   :  { %2868 = vmatpush1.bf16.msra.mxu0 %v14521_v51  ;;  %v14550_v51 = vld [vmem:[%s20277_s28 + $0x1a4] ss:$8 sps:$4 sm:$0xff]  }
 0x59e   :  { %2869 = vmatprep.subr.bf16.mxu0 %v14526_v4  ;;  %v14548_v4 = vld [vmem:[%s20277_s28 + $0x1a0] ss:$8 sps:$4 sm:$0xff]  }
 0x5a1   :  { %2870 = vmatpush1.bf16.msra.mxu0 %v14524_v20  ;;  %v14553_v20 = vld [vmem:[%s20277_s28 + $0x194] ss:$8 sps:$4 sm:$0xff]  }
 0x5a2   :  { %2871 = vmatprep.subr.bf16.mxu0 %v14529_v21  ;;  %v14551_v21 = vld [vmem:[%s20277_s28 + $0x190] ss:$8 sps:$4 sm:$0xff]  }
 0x5a5   :  { %2872 = vmatpush1.bf16.msra.mxu0 %v14527_v22  ;;  %v14556_v22 = vld [vmem:[%s20277_s28 + $0x184] ss:$8 sps:$4 sm:$0xff]  }
 0x5a6   :  { %2873 = vmatprep.subr.bf16.mxu0 %v14532_v62  ;;  %v14554_v62 = vld [vmem:[%s20277_s28 + $0x180] ss:$8 sps:$4 sm:$0xff]  }
 0x5a9   :  { %2874 = vmatpush1.bf16.msra.mxu0 %v14530_v3  ;;  %v14580_v3 = vld [vmem:[%s20277_s28 + $0x4] ss:$8 sps:$4 sm:$0xff]  }
 0x5aa   :  { %2875 = vmatprep.subr.bf16.mxu0 %v14535_v10  ;;  %v14578_v10 = vld [vmem:[%s20277_s28] ss:$8 sps:$4 sm:$0xff]  }
 0x5ad   :  { %2876 = vmatpush2.bf16.msra.mxu0 %v14533_v8  ;;  %v14583_v8 = vld [vmem:[%s20277_s28 + $0xf4] ss:$8 sps:$4 sm:$0xff]  }
 0x5ae   :  { %2877 = vmatprep.subr.bf16.mxu0 %v14538_v18  ;;  %v14581_v18 = vld [vmem:[%s20277_s28 + $0xf0] ss:$8 sps:$4 sm:$0xff]  }
 0x5b1   :  { %2878 = vmatpush2.bf16.msra.mxu0 %v14536_v6  ;;  %v14586_v6 = vld [vmem:[%s20277_s28 + $0xe4] ss:$8 sps:$4 sm:$0xff]  }
 0x5b2   :  { %2879 = vmatprep.subr.bf16.mxu0 %v14541_v19  ;;  %v14584_v19 = vld [vmem:[%s20277_s28 + $0xe0] ss:$8 sps:$4 sm:$0xff]  }
 0x5b5   :  { %2880 = vmatpush2.bf16.msra.mxu0 %v14539_v7  ;;  %v14589_v7 = vld [vmem:[%s20277_s28 + $0xd4] ss:$8 sps:$4 sm:$0xff]  }
 0x5b6   :  { %2881 = vmatprep.subr.bf16.mxu0 %v14544_v11  ;;  %v14587_v11 = vld [vmem:[%s20277_s28 + $0xd0] ss:$8 sps:$4 sm:$0xff]  }
 0x5b9   :  { %2882 = vmatpush2.bf16.msra.mxu0 %v14542_v16  ;;  %v14592_v16 = vld [vmem:[%s20277_s28 + $0xc4] ss:$8 sps:$4 sm:$0xff]  }
 0x5ba   :  { %2883 = vmatprep.subr.bf16.mxu0 %v14547_v17  ;;  %v14590_v17 = vld [vmem:[%s20277_s28 + $0xc0] ss:$8 sps:$4 sm:$0xff]  }
 0x5bd   :  { %2884 = vmatpush2.bf16.msra.mxu0 %v14545_v63  ;;  %v14595_v63 = vld [vmem:[%s20277_s28 + $0xb4] ss:$8 sps:$4 sm:$0xff]  }
 0x5be   :  { %2885 = vmatprep.subr.bf16.mxu0 %v14550_v51  ;;  %v14593_v51 = vld [vmem:[%s20277_s28 + $0xb0] ss:$8 sps:$4 sm:$0xff]  }
 0x5c1   :  { %2886 = vmatpush2.bf16.msra.mxu0 %v14548_v4  ;;  %v14598_v4 = vld [vmem:[%s20277_s28 + $0xa4] ss:$8 sps:$4 sm:$0xff]  }
 0x5c2   :  { %2887 = vmatprep.subr.bf16.mxu0 %v14553_v20  ;;  %v14596_v20 = vld [vmem:[%s20277_s28 + $0xa0] ss:$8 sps:$4 sm:$0xff]  }
 0x5c5   :  { %2888 = vmatpush2.bf16.msra.mxu0 %v14551_v21  ;;  %v14601_v21 = vld [vmem:[%s20277_s28 + $0x94] ss:$8 sps:$4 sm:$0xff]  }
 0x5c6   :  { %2889 = vmatprep.subr.bf16.mxu0 %v14556_v22  ;;  %v14599_v22 = vld [vmem:[%s20277_s28 + $0x90] ss:$8 sps:$4 sm:$0xff]  }
 0x5c9   :  { %2890 = vmatpush2.bf16.msra.mxu0 %v14554_v62  ;;  %v14604_v62 = vld [vmem:[%s20277_s28 + $0x84] ss:$8 sps:$4 sm:$0xff]  }
 0x5ca   :  { %12764 = vmatprep.subr.mxu0 %v16195_v23 }
 0x5cc   :  { %2892 = vmatmul.mubr.bf16.vlgmr.msra.gmra.mxu0 %v15759_v55  ;;  %v14559_v55 = vld [vmem:[%s20277_s28 + $0x74] ss:$8 sps:$4 sm:$0xff]  }
 0x5cd   :  { %2901 = vmatprep.mubr.bf16.mxu0 %v15789_v15  ;;  %12765 = vmatpush3.msra.mxu0 %v16200_v24 }
 0x5ce   :  { %12766 = vmatprep.subr.mxu0 %v16205_v26  ;;  %2806 = vmatprep.subr.bf16.mxu1 %v14559_v55  ;;  %v14602_v55 = vld [vmem:[%s20277_s28 + $0x80] ss:$8 sps:$4 sm:$0xff]  }
 0x5cf   :  { %12767 = vmatpush3.msra.mxu0 %v16211_v27 }
 0x5d0   :  { %12768 = vmatprep.subr.mxu0 %v16217_v28 }
 0x5d1   :  { %12769 = vmatpush3.msra.mxu0 %v16223_v29 }
 0x5d2   :  { %12770 = vmatprep.subr.mxu0 %v16229_v30 }
 0x5d3   :  { %12771 = vmatpush3.msra.mxu0 %v16235_v31 }
 0x5d4   :  { %2902 = vmatmul.mubr.bf16.gmra.mxu0 %v15785_v13  ;;  %12772 = vmatprep.subr.mxu0 %v16241_v32 }
 0x5d5   :  { %12773 = vmatpush3.msra.mxu0 %v16247_v33 }
 0x5d6   :  { %12774 = vmatprep.subr.mxu0 %v16253_v34 }
 0x5d7   :  { %12775 = vmatpush3.msra.mxu0 %v16259_v35 }
 0x5d8   :  { %12776 = vmatprep.subr.mxu0 %v16265_v36 }
 0x5d9   :  { %12777 = vmatpush3.msra.mxu0 %v16271_v37  ;;  %v14557_v37 = vld [vmem:[%s20277_s28 + $0x70] ss:$8 sps:$4 sm:$0xff]  }
 0x5da   :  { %12778 = vmatprep.subr.mxu0 %v16277_v38 }
 0x5db   :  { %12779 = vmatpush3.msra.mxu0 %v16283_v39  ;;  %v14562_v39 = vld [vmem:[%s20277_s28 + $0x64] ss:$8 sps:$4 sm:$0xff]  }
 0x5dc   :  { %12780 = vmatprep.subr.mxu0 %v16289_v40  ;;  %v14560_v40 = vld [vmem:[%s20277_s28 + $0x60] ss:$8 sps:$4 sm:$0xff]  }
 0x5dd   :  { %12781 = vmatpush3.msra.mxu0 %v16295_v41  ;;  %v14565_v41 = vld [vmem:[%s20277_s28 + $0x54] ss:$8 sps:$4 sm:$0xff]  }
 0x5de   :  { %12782 = vmatprep.subr.mxu0 %v16301_v42  ;;  %v14563_v42 = vld [vmem:[%s20277_s28 + $0x50] ss:$8 sps:$4 sm:$0xff]  }
 0x5df   :  { %12783 = vmatpush3.msra.mxu0 %v16307_v43  ;;  %v14568_v43 = vld [vmem:[%s20277_s28 + $0x44] ss:$8 sps:$4 sm:$0xff]  }
 0x5e0   :  { %12784 = vmatprep.subr.mxu0 %v16313_v44  ;;  %v14571_v44 = vld [vmem:[%s20277_s28 + $0x34] ss:$8 sps:$4 sm:$0xff]  }
 0x5e1   :  { %12785 = vmatpush3.msra.mxu0 %v16319_v45  ;;  %v14569_v45 = vld [vmem:[%s20277_s28 + $0x30] ss:$8 sps:$4 sm:$0xff]  }
 0x5e2   :  { %12786 = vmatprep.subr.mxu0 %v16325_v46  ;;  %v14574_v46 = vld [vmem:[%s20277_s28 + $0x24] ss:$8 sps:$4 sm:$0xff]  }
 0x5e3   :  { %12787 = vmatpush3.msra.mxu0 %v16331_v47  ;;  %v14572_v47 = vld [vmem:[%s20277_s28 + $0x20] ss:$8 sps:$4 sm:$0xff]  }
 0x5e4   :  { %12788 = vmatprep.subr.mxu0 %v16337_v49  ;;  %v14577_v49 = vld [vmem:[%s20277_s28 + $0x14] ss:$8 sps:$4 sm:$0xff]  }
 0x5e5   :  { %12789 = vmatpush3.msra.mxu0 %v16343_v52  ;;  %v14575_v52 = vld [vmem:[%s20277_s28 + $0x10] ss:$8 sps:$4 sm:$0xff]  }
 0x5e6   :  { %12790 = vmatprep.subr.mxu0 %v16365_v0 }
 0x5e7   :  { %12791 = vmatpush3.msra.mxu0 %v16371_v12 }
 0x5e8   :  { %12792 = vmatprep.subr.mxu0 %v16377_v14 }
 0x5e9   :  { %12793 = vmatpush3.msra.mxu0 %v16383_v48 }
 0x5ea   :  { %12794 = vmatprep.subr.mxu0 %v16389_v1 }
 0x5eb   :  { %12795 = vmatpush3.msra.mxu0 %v16395_v2 }
 0x5ec   :  { %3284 = vmatprep.subr.mxu0 %v16416_v56 }
 0x64c   :  { %v12758_v13 = vpop.f32.mrf.mxu0 }
 0x64e   :  { %v12759_v15 = vpop.f32.mrf.mxu0 }
 0x64f   :  { %v12760_v24 = vadd.f32 %v12759_v15, %v12758_v13  ;;  %v20278_v13 = vld [vmem:[#allocation3_spill] sm:$0xff]  ;;  %v20279_v15 = vld [vmem:[#allocation2_spill] sm:$0xff] }
 0x650   :  { %v12761_v23 = vpop.f32.mrf.mxu0 }
 0x651   :  { %v2320_v28 = vsel %vm1322_vm1, %v12760_v24, 0.0 }
 0x652   :  { %v12762_v26 = vpop.f32.mrf.mxu0 }
 0x653   :  { %v12763_v27 = vadd.f32 %v12762_v26, %v12761_v23 }
 0x655   :  { %v2321_v29 = vsel %vm1322_vm1, %v12763_v27, 0.0 }
 0x656   :  { %v2322_v30 = vadd.f32 %v2321_v29, %v2320_v28 }
 0x658   :  { %v2323_v31 = vrot.slane %v2322_v30, 4 }
 0x65a   :  { %v2324_v32 = vadd.f32 %v2323_v31, %v2322_v30 }
 0x65c   :  { %v2325_v33 = vrot.slane %v2324_v32, 2 }
 0x65e   :  { %v2326_v34 = vadd.f32 %v2325_v33, %v2324_v32 }
 0x660   :  { %v2327_v35 = vrot.slane %v2326_v34, 1 }
 0x662   :  { %v2328_v36 = vadd.f32 %v2327_v35, %v2326_v34 }
 0x664   :  { %v2329_v38 = vmul.f32 0.0078125, %v2328_v36 }
 0x666   :  { %11788 = vmatmul.mubr.msk.f32.vlgmr.msra.gmra.mxu1 %vm1322_vm1, %v2329_v38 }
 0x667   :  { %2807 = vmatpush1.bf16.msra.mxu1 %v14557_v37  ;;  %2838 = vmatprep.mubr.bf16.mxu1 %v15747_v50  ;;  %v14566_v50 = vld [vmem:[%s20277_s28 + $0x40] ss:$8 sps:$4 sm:$0xff]  }
 0x668   :  { %2808 = vmatprep.subr.bf16.mxu1 %v14562_v39 }
 0x66b   :  { %2809 = vmatpush1.bf16.msra.mxu1 %v14560_v40 }
 0x66c   :  { %2810 = vmatprep.subr.bf16.mxu1 %v14565_v41 }
 0x66f   :  { %2811 = vmatpush1.bf16.msra.mxu1 %v14563_v42 }
 0x670   :  { %2812 = vmatprep.subr.bf16.mxu1 %v14568_v43 }
 0x673   :  { %2813 = vmatpush1.bf16.msra.mxu1 %v14566_v50 }
 0x674   :  { %2814 = vmatprep.subr.bf16.mxu1 %v14571_v44 }
 0x677   :  { %2815 = vmatpush1.bf16.msra.mxu1 %v14569_v45 }
 0x678   :  { %2816 = vmatprep.subr.bf16.mxu1 %v14574_v46 }
 0x67b   :  { %2817 = vmatpush1.bf16.msra.mxu1 %v14572_v47 }
 0x67c   :  { %2818 = vmatprep.subr.bf16.mxu1 %v14577_v49  ;;  %v2912_v49 = vld [vmem:[%s20206_s4] sm:$0xff] }
 0x67f   :  { %2819 = vmatpush1.bf16.msra.mxu1 %v14575_v52  ;;  %v2913_v52 = vld [vmem:[%s20206_s4 + $0x8] sm:$0xff] }
 0x680   :  { %2820 = vmatprep.subr.bf16.mxu1 %v14580_v3  ;;  %v20280_v3 = vld [vmem:[#allocation4_spill] sm:$0xff] }
 0x683   :  { %2821 = vmatpush1.bf16.msra.mxu1 %v14578_v10  ;;  %v20281_v10 = vld [vmem:[#allocation5_spill] sm:$0xff] }
 0x684   :  { %2822 = vmatprep.subr.bf16.mxu1 %v14583_v8  ;;  %v20283_v8 = vld [vmem:[#allocation7_spill] sm:$0xff] }
 0x687   :  { %2823 = vmatpush2.bf16.msra.mxu1 %v14581_v18  ;;  %v16788_v18 = vld [vmem:[%s20270_s0 + $0xf8] sm:$0xff] }
 0x688   :  { %2824 = vmatprep.subr.bf16.mxu1 %v14586_v6 }
 0x68b   :  { %2825 = vmatpush2.bf16.msra.mxu1 %v14584_v19 }
 0x68c   :  { %2826 = vmatprep.subr.bf16.mxu1 %v14589_v7  ;;  %v2893_v23 = vpop.f32.mrf.mxu0 }
 0x68e   :  { %v2895_v24 = vpop.f32.mrf.mxu0 }
 0x68f   :  { %2827 = vmatpush2.bf16.msra.mxu1 %v14587_v11 }
 0x690   :  { %2828 = vmatprep.subr.bf16.mxu1 %v14592_v16  ;;  %v2897_v26 = vpop.f32.mrf.mxu0 }
 0x692   :  { %v2899_v28 = vpop.f32.mrf.mxu0 }
 0x693   :  { %2829 = vmatpush2.bf16.msra.mxu1 %v14590_v17 }
 0x694   :  { %2830 = vmatprep.subr.bf16.mxu1 %v14595_v63  ;;  %v2903_v31 = vpop.f32.mrf.mxu0 }
 0x696   :  { %v2905_v34 = vpop.f32.mrf.mxu0 }
 0x697   :  { %2831 = vmatpush2.bf16.msra.mxu1 %v14593_v51 }
 0x698   :  { %2832 = vmatprep.subr.bf16.mxu1 %v14598_v4  ;;  %v2907_v36 = vpop.f32.mrf.mxu0 }
 0x69a   :  { %v2909_v39 = vpop.f32.mrf.mxu0 }
 0x69b   :  { %2833 = vmatpush2.bf16.msra.mxu1 %v14596_v20 }
 0x69c   :  { %2834 = vmatprep.subr.bf16.mxu1 %v14601_v21 }
 0x69f   :  { %2835 = vmatpush2.bf16.msra.mxu1 %v14599_v22 }
 0x6a0   :  { %2836 = vmatprep.subr.bf16.mxu1 %v14604_v62 }
 0x6a3   :  { %2837 = vmatpush2.bf16.msra.mxu1 %v14602_v55 }
 0x6a6   :  { %2839 = vmatmul.mubr.bf16.vlgmr.msra.gmra.mxu1 %v15757_v54 }
 0x6a7   :  { %2848 = vmatprep.mubr.bf16.mxu1 %v20278_v13 }
 0x6ae   :  { %2849 = vmatmul.mubr.bf16.gmra.mxu1 %v20279_v15 }
 0x6af   :  { %2984 = vmatprep.mubr.f32.mxu1 %v20271_v9 }
 0x726   :  { %v16763_v27 = vpop.f32.mrf.mxu1 }
 0x728   :  { %v16765_v29 = vpop.f32.mrf.mxu1 }
 0x766   :  { %v2840_v30 = vpop.f32.mrf.mxu1 }
 0x767   :  { %v2894_v47 = vadd.f32 %v2893_v23, %v2840_v30  ;;  %v16835_v30 = vld [vmem:[%s20270_s0 + $0xe8] sm:$0xff] }
 0x768   :  { %v2842_v32 = vpop.f32.mrf.mxu1 }
 0x769   :  { %v2896_v46 = vadd.f32 %v2895_v24, %v2842_v32  ;;  %v16817_v24 = vld [vmem:[%s20270_s0 + $0x78] sm:$0xff]  ;;  %v16847_v32 = vld [vmem:[%s20270_s0 + $0xe0] sm:$0xff] }
 0x76a   :  { %v2844_v33 = vpop.f32.mrf.mxu1 }
 0x76b   :  { %v2898_v45 = vadd.f32 %v2897_v26, %v2844_v33  ;;  %v16823_v26 = vld [vmem:[%s20270_s0 + $0xf0] sm:$0xff]  ;;  %v16853_v33 = vld [vmem:[%s20270_s0 + $0x60] sm:$0xff] }
 0x76c   :  { %v2846_v54 = vpop.f32.mrf.mxu1 }
 0x76d   :  { %v2900_v44 = vadd.f32 %v2899_v28, %v2846_v54  ;;  %v16829_v28 = vld [vmem:[%s20270_s0 + $0x70] sm:$0xff]  ;;  %v16865_v54 = vld [vmem:[%s20270_s0 + $0x58] sm:$0xff] }
 0x76e   :  { %v2850_v35 = vpop.f32.mrf.mxu1 }
 0x76f   :  { %v2904_v50 = vadd.f32 %v2903_v31, %v2850_v35  ;;  %v16841_v31 = vld [vmem:[%s20270_s0 + $0x68] sm:$0xff]  ;;  %v16871_v35 = vld [vmem:[%s20270_s0 + $0xd0] sm:$0xff] }
 0x770   :  { %v2852_v37 = vpop.f32.mrf.mxu1 }
 0x771   :  { %v2906_v43 = vadd.f32 %v2905_v34, %v2852_v37  ;;  %v16859_v34 = vld [vmem:[%s20270_s0 + $0xd8] sm:$0xff]  ;;  %v16883_v37 = vld [vmem:[%s20270_s0 + $0xc8] sm:$0xff] }
 0x772   :  { %v2854_v38 = vpop.f32.mrf.mxu1 }
 0x773   :  { %v2908_v42 = vadd.f32 %v2907_v36, %v2854_v38  ;;  %v16877_v36 = vld [vmem:[%s20270_s0 + $0x50] sm:$0xff]  ;;  %v16889_v38 = vld [vmem:[%s20270_s0 + $0x48] sm:$0xff] }
 0x774   :  { %v2856_v40 = vpop.f32.mrf.mxu1 }
 0x775   :  { %v2910_v41 = vadd.f32 %v2909_v39, %v2856_v40  ;;  %v16895_v39 = vld [vmem:[%s20270_s0 + $0xc0] sm:$0xff] }
 0x776   :  { %v16901_v40 = vld [vmem:[%s20270_s0 + $0x40] sm:$0xff] }
 0x777   :  { %2944 = vmatprep.subr.mxu1 %v2910_v41  ;;  %v16907_v41 = vld [vmem:[%s20270_s0 + $0xb8] sm:$0xff] }
 0x778   :  { %2945 = vmatpush1.msra.mxu1 %v2908_v42  ;;  %v16913_v42 = vld [vmem:[%s20270_s0 + $0x38] sm:$0xff] }
 0x779   :  { %2946 = vmatprep.subr.mxu1 %v2906_v43  ;;  %v16919_v43 = vld [vmem:[%s20270_s0 + $0xb0] sm:$0xff] }
 0x77a   :  { %2947 = vmatpush1.msra.mxu1 %v2904_v50  ;;  %v16925_v50 = vld [vmem:[%s20270_s0 + $0x30] sm:$0xff] }
 0x77b   :  { %2948 = vmatprep.subr.mxu1 %v2900_v44  ;;  %v16931_v44 = vld [vmem:[%s20270_s0 + $0xa8] sm:$0xff] }
 0x77c   :  { %2949 = vmatpush1.msra.mxu1 %v2898_v45  ;;  %v16937_v45 = vld [vmem:[%s20270_s0 + $0x28] sm:$0xff] }
 0x77d   :  { %2950 = vmatprep.subr.mxu1 %v2896_v46  ;;  %v16943_v46 = vld [vmem:[%s20270_s0 + $0xa0] sm:$0xff] }
 0x77e   :  { %2951 = vmatpush1.msra.mxu1 %v2894_v47  ;;  %v16949_v47 = vld [vmem:[%s20270_s0 + $0x20] sm:$0xff] }
 0x77f   :  { %11853 = vmatmul.mubr.msk.f32.vlgmr.msra.gmra.mxu1 %vm1322_vm1, %v2912_v49  ;;  %3109 = vmatprep.subr.mxu1 %v16416_v56  ;;  %v20282_v56 = vld [vmem:[#allocation6_spill] sm:$0xff]  ;;  %v16955_v49 = vld [vmem:[%s20270_s0 + $0x98] sm:$0xff] }
 0x780   :  { %2990 = vmatprep.mubr.f32.mxu1 %v20271_v9  ;;  %3110 = vmatpush1.msra.mxu1 %v16422_v58 }
 0x781   :  { %3111 = vmatprep.subr.mxu1 %v16429_v60 }
 0x782   :  { %3112 = vmatpush1.msra.mxu1 %v16436_v61 }
 0x783   :  { %11854 = vmatmul.mubr.msk.f32.gmra.mxu1 %vm1322_vm1, %v2913_v52  ;;  %3113 = vmatprep.subr.mxu1 %v20280_v3  ;;  %v16961_v52 = vld [vmem:[%s20270_s0 + $0x18] sm:$0xff] }
 0x784   :  { %3114 = vmatpush1.msra.mxu1 %v20281_v10  ;;  %3149 = vmatprep.mubr.f32.mxu1 %v20271_v9 }
 0x785   :  { %3115 = vmatprep.subr.mxu1 %v20282_v56 }
 0x786   :  { %3116 = vmatpush1.msra.mxu1 %v20283_v8 }
 0x787   :  { %12802 = vmatprep.subr.mxu1 %v16788_v18 }
 0x83f   :  { %v16791_v6 = vpop.f32.mrf.mxu1 }
 0x841   :  { %v16793_v19 = vpop.f32.mrf.mxu1 }
 0x842   :  { %3061 = vmatprep.mubr.f32.mxu0 %v16793_v19 }
 0x843   :  { %v16796_v7 = vpop.f32.mrf.mxu1  ;;  %3062 = vmatmul.mubr.f32.vlgmr.msra.gmra.mxu0 %v16791_v6 }
 0x844   :  { %3285 = vmatpush1.msra.mxu0 %v16422_v58 }
 0x845   :  { %v16800_v11 = vpop.f32.mrf.mxu1  ;;  %3286 = vmatprep.subr.mxu0 %v16429_v60 }
 0x846   :  { %3066 = vmatprep.mubr.f32.mxu0 %v16800_v11  ;;  %3287 = vmatpush1.msra.mxu0 %v16436_v61 }
 0x847   :  { %3067 = vmatmul.mubr.f32.gmra.mxu0 %v16796_v7  ;;  %3288 = vmatprep.subr.mxu0 %v20280_v3  ;;  %v14607_v3 = vld [vmem:[%s20207_s10 + $0x174] ss:$8 sps:$4 sm:$0xff]  }
 0x848   :  { %3289 = vmatpush1.msra.mxu0 %v20281_v10  ;;  %3324 = vmatprep.mubr.f32.mxu0 %v20271_v9  ;;  %v2402_v10 = vadd.f32 1e-05, %v16765_v29 }
 0x849   :  { %3290 = vmatprep.subr.mxu0 %v20282_v56 }
 0x84a   :  { %3291 = vmatpush1.msra.mxu0 %v20283_v8  ;;  %15173 = vrsqrt.f32 %v2402_v10  ;;  %v14628_v10 = vld [vmem:[%s20207_s10 + $0x104] ss:$8 sps:$4 sm:$0xff]  }
 0x857   :  { %v15174_v56 = vpop.eup %15173 }
 0x903   :  { %v12796_v58 = vpop.f32.mrf.mxu0 }
 0x905   :  { %v12797_v16 = vpop.f32.mrf.mxu0 }
 0x906   :  { %v12798_v60 = vadd.f32 %v12797_v16, %v12796_v58 }
 0x907   :  { %v12799_v17 = vpop.f32.mrf.mxu0 }
 0x908   :  { %v3072_v61 = vsel %vm1322_vm1, %v12798_v60, 0.0  ;;  %v14605_v60 = vld [vmem:[%s20207_s10 + $0x170] ss:$8 sps:$4 sm:$0xff]  }
 0x909   :  { %v12800_v63 = vpop.f32.mrf.mxu0 }
 0x90a   :  { %v12801_v51 = vadd.f32 %v12800_v63, %v12799_v17 }
 0x90c   :  { %v3073_v4 = vsel %vm1322_vm1, %v12801_v51, 0.0 }
 0x90d   :  { %v3074_v20 = vadd.f32 %v3073_v4, %v3072_v61  ;;  %v14613_v61 = vld [vmem:[%s20207_s10 + $0x154] ss:$8 sps:$4 sm:$0xff]  }
 0x90f   :  { %v3075_v21 = vrot.slane %v3074_v20, 4 }
 0x911   :  { %v3076_v22 = vadd.f32 %v3075_v21, %v3074_v20  ;;  %v14611_v20 = vld [vmem:[%s20207_s10 + $0x150] ss:$8 sps:$4 sm:$0xff]   ;;  %v14616_v21 = vld [vmem:[%s20207_s10 + $0x144] ss:$8 sps:$4 sm:$0xff]  }
 0x913   :  { %v3077_v62 = vrot.slane %v3076_v22, 2 }
 0x915   :  { %v3078_v55 = vadd.f32 %v3077_v62, %v3076_v22  ;;  %v14614_v22 = vld [vmem:[%s20207_s10 + $0x140] ss:$8 sps:$4 sm:$0xff]   ;;  %v14619_v62 = vld [vmem:[%s20207_s10 + $0x134] ss:$8 sps:$4 sm:$0xff]  }
 0x917   :  { %v3079_v13 = vrot.slane %v3078_v55, 1 }
 0x919   :  { %v3080_v15 = vadd.f32 %v3079_v13, %v3078_v55  ;;  %v14617_v55 = vld [vmem:[%s20207_s10 + $0x130] ss:$8 sps:$4 sm:$0xff]   ;;  %v14622_v13 = vld [vmem:[%s20207_s10 + $0x124] ss:$8 sps:$4 sm:$0xff]  }
 0x91b   :  { %v3081_v23 = vmul.f32 0.0078125, %v3080_v15  ;;  %v14620_v15 = vld [vmem:[%s20207_s10 + $0x120] ss:$8 sps:$4 sm:$0xff]  }
 0x91d   :  { %11855 = vmatmul.mubr.msk.f32.vlgmr.msra.gmra.mxu1 %vm1322_vm1, %v3081_v23  ;;  %v14625_v23 = vld [vmem:[%s20207_s10 + $0x114] ss:$8 sps:$4 sm:$0xff]  }
 0x91e   :  { %12803 = vmatpush3.msra.mxu1 %v16817_v24 }
 0x91f   :  { %12804 = vmatprep.subr.mxu1 %v16823_v26 }
 0x920   :  { %12805 = vmatpush3.msra.mxu1 %v16829_v28 }
 0x921   :  { %12806 = vmatprep.subr.mxu1 %v16835_v30 }
 0x922   :  { %12807 = vmatpush3.msra.mxu1 %v16841_v31 }
 0x923   :  { %12808 = vmatprep.subr.mxu1 %v16847_v32 }
 0x924   :  { %12809 = vmatpush3.msra.mxu1 %v16853_v33 }
 0x925   :  { %12810 = vmatprep.subr.mxu1 %v16859_v34 }
 0x926   :  { %12811 = vmatpush3.msra.mxu1 %v16865_v54 }
 0x927   :  { %12812 = vmatprep.subr.mxu1 %v16871_v35 }
 0x928   :  { %12813 = vmatpush3.msra.mxu1 %v16877_v36 }
 0x929   :  { %12814 = vmatprep.subr.mxu1 %v16883_v37 }
 0x92a   :  { %12815 = vmatpush3.msra.mxu1 %v16889_v38 }
 0x92b   :  { %12816 = vmatprep.subr.mxu1 %v16895_v39 }
 0x92c   :  { %12817 = vmatpush3.msra.mxu1 %v16901_v40 }
 0x92d   :  { %12818 = vmatprep.subr.mxu1 %v16907_v41 }
 0x92e   :  { %12819 = vmatpush3.msra.mxu1 %v16913_v42 }
 0x92f   :  { %12820 = vmatprep.subr.mxu1 %v16919_v43 }
 0x930   :  { %12821 = vmatpush3.msra.mxu1 %v16925_v50 }
 0x931   :  { %12822 = vmatprep.subr.mxu1 %v16931_v44 }
 0x932   :  { %12823 = vmatpush3.msra.mxu1 %v16937_v45 }
 0x933   :  { %12824 = vmatprep.subr.mxu1 %v16943_v46 }
 0x934   :  { %12825 = vmatpush3.msra.mxu1 %v16949_v47 }
 0x935   :  { %12826 = vmatprep.subr.mxu1 %v16955_v49 }
 0x936   :  { %12827 = vmatpush3.msra.mxu1 %v16961_v52 }
 0x937   :  { %12828 = vmatprep.subr.mxu1 %v16365_v0 }
 0x938   :  { %12829 = vmatpush3.msra.mxu1 %v16371_v12 }
 0x939   :  { %12830 = vmatprep.subr.mxu1 %v16377_v14  ;;  %v2413_v14 = vrot.slane %v15174_v56, %v15741_v25  ;;  %v14626_v56 = vld [vmem:[%s20207_s10 + $0x100] ss:$8 sps:$4 sm:$0xff]  }
 0x93a   :  { %12831 = vmatpush3.msra.mxu1 %v16383_v48 }
 0x93b   :  { %12832 = vmatprep.subr.mxu1 %v16389_v1  ;;  %v2415_v29 = vmul.f32 %v2413_v14, %v16513_v57  ;;  %v2417_v16 = vmul.f32 %v2413_v14, %v16516_v59  ;;  %v2400_v14 = vadd.f32 1e-05, %v16763_v27  ;;  %v14635_v27 = vld [vmem:[%s20207_s10 + $0x1d0] ss:$8 sps:$4 sm:$0xff]  }
 0x93c   :  { %12833 = vmatpush3.msra.mxu1 %v16395_v2 }
 0x93d   :  { %3777 = vmatprep.subr.bf16.mxu1 %v14607_v3  ;;  %v2419_v59 = vmax.f32 %v2415_v29, 0.0  ;;  %v2421_v63 = vmax.f32 %v2417_v16, 0.0  ;;  %v14623_v3 = vld [vmem:[%s20207_s10 + $0x110] ss:$8 sps:$4 sm:$0xff]   ;;  %15175 = vrsqrt.f32 %v2400_v14  ;;  %v14637_v29 = vld [vmem:[%s20207_s10 + $0x1d4] ss:$8 sps:$4 sm:$0xff]  }
 0x93e   :  { %v14640_v16 = vld [vmem:[%s20207_s10 + $0x1c4] ss:$8 sps:$4 sm:$0xff]  }
 0x93f   :  { %v17011_v4 = vpack.c.bf16 %v2421_v63, %v2419_v59  ;;  %v14644_v59 = vld [vmem:[%s20207_s10 + $0x1a0] ss:$8 sps:$4 sm:$0xff]  }
 0x9dd   :  { %v3151_v0 = vpop.f32.mrf.mxu1 }
 0x9de   :  { %v3159_v12 = vrot.slane %v3151_v0, %v15741_v25  ;;  %v14631_v0 = vld [vmem:[%s20207_s10 + $0x1f4] ss:$8 sps:$4 sm:$0xff]  }
 0x9df   :  { %v3153_v8 = vpop.f32.mrf.mxu1 }
 0x9e0   :  { %v3163_v48 = vrot.slane %v3153_v8, %v15741_v25  ;;  %v16978_v1 = vsub.f32 %v16791_v6, %v3159_v12  ;;  %v16994_v6 = vsub.f32 %v16796_v7, %v3159_v12  ;;  %v14608_v7 = vld [vmem:[%s20207_s10 + $0x160] ss:$8 sps:$4 sm:$0xff]   ;;  %v14629_v12 = vld [vmem:[%s20207_s10 + $0x1f0] ss:$8 sps:$4 sm:$0xff]   ;;  %v14634_v8 = vld [vmem:[%s20207_s10 + $0x1e4] ss:$8 sps:$4 sm:$0xff]  }
 0x9e2   :  { %v16981_v2 = vsub.f32 %v16793_v19, %v3163_v48  ;;  %v16984_v58 = vsub.f32 %v16800_v11, %v3163_v48  ;;  %v3168_v19 = vmul.f32 %v16978_v1, %v16978_v1  ;;  %v14610_v11 = vld [vmem:[%s20207_s10 + $0x164] ss:$8 sps:$4 sm:$0xff]   ;;  %v3170_v51 = vmul.f32 %v16994_v6, %v16994_v6  ;;  %v14632_v48 = vld [vmem:[%s20207_s10 + $0x1e0] ss:$8 sps:$4 sm:$0xff]  }
 0x9e4   :  { %v3169_v17 = vmul.f32 %v16981_v2, %v16981_v2  ;;  %v3171_v57 = vmul.f32 %v16984_v58, %v16984_v58 }
 0x9e6   :  { %3236 = vmatprep.mubr.f32.mxu1 %v3169_v17  ;;  %v14638_v17 = vld [vmem:[%s20207_s10 + $0x1c0] ss:$8 sps:$4 sm:$0xff]  }
 0x9e7   :  { %3237 = vmatmul.mubr.f32.vlgmr.msra.gmra.mxu1 %v3168_v19  ;;  %v14641_v19 = vld [vmem:[%s20207_s10 + $0x1b0] ss:$8 sps:$4 sm:$0xff]  }
 0x9e8   :  { %3778 = vmatpush1.bf16.msra.mxu1 %v14605_v60  ;;  %3241 = vmatprep.mubr.f32.mxu1 %v3171_v57  ;;  %v14643_v60 = vld [vmem:[%s20207_s10 + $0x1b4] ss:$8 sps:$4 sm:$0xff]   ;;  %v15176_v57 = vpop.eup %15175 }
 0x9e9   :  { %3779 = vmatprep.subr.bf16.mxu1 %v14610_v11  ;;  %v14646_v11 = vld [vmem:[%s20207_s10 + $0x1a4] ss:$8 sps:$4 sm:$0xff]   ;;  %v2409_v63 = vrot.slane %v15176_v57, %v15741_v25  ;;  %v14656_v57 = vld [vmem:[%s20207_s10 + $0x60] ss:$8 sps:$4 sm:$0xff]  }
 0x9eb   :  { %3242 = vmatmul.mubr.f32.gmra.mxu1 %v3170_v51  ;;  %v14647_v51 = vld [vmem:[%s20207_s10 + $0x190] ss:$8 sps:$4 sm:$0xff]  }
 0x9ec   :  { %3780 = vmatpush1.bf16.msra.mxu1 %v14608_v7  ;;  %3809 = vmatprep.mubr.bf16.mxu1 %v17011_v4  ;;  %v14649_v7 = vld [vmem:[%s20207_s10 + $0x194] ss:$8 sps:$4 sm:$0xff]  }
 0x9ed   :  { %3781 = vmatprep.subr.bf16.mxu1 %v14613_v61  ;;  %v14652_v61 = vld [vmem:[%s20207_s10 + $0x184] ss:$8 sps:$4 sm:$0xff]  }
 0x9f0   :  { %3782 = vmatpush1.bf16.msra.mxu1 %v14611_v20  ;;  %v2414_v20 = vmul.f32 %v2409_v63, %v16510_v53  ;;  %v14655_v53 = vld [vmem:[%s20207_s10 + $0x74] ss:$8 sps:$4 sm:$0xff]  }
 0x9f1   :  { %3783 = vmatprep.subr.bf16.mxu1 %v14616_v21  ;;  %v2416_v21 = vmul.f32 %v2409_v63, %v16524_v5  ;;  %3539 = vmatprep.subr.bf16.mxu0 %v14655_v53  ;;  %v14659_v63 = vld [vmem:[%s20207_s10 + $0x50] ss:$8 sps:$4 sm:$0xff]   ;;  %v14676_v53 = vld [vmem:[%s20207_s10 + $0x4] ss:$8 sps:$4 sm:$0xff]  }
 0x9f4   :  { %3784 = vmatpush1.bf16.msra.mxu1 %v14614_v22  ;;  %v14650_v22 = vld [vmem:[%s20207_s10 + $0x180] ss:$8 sps:$4 sm:$0xff]  }
 0x9f5   :  { %3785 = vmatprep.subr.bf16.mxu1 %v14619_v62  ;;  %v2418_v62 = vmax.f32 %v2414_v20, 0.0  ;;  %v14665_v20 = vld [vmem:[%s20207_s10 + $0x30] ss:$8 sps:$4 sm:$0xff]  }
 0x9f8   :  { %3786 = vmatpush1.bf16.msra.mxu1 %v14617_v55  ;;  %v2420_v55 = vmax.f32 %v2416_v21, 0.0  ;;  %v14670_v21 = vld [vmem:[%s20207_s10 + $0x24] ss:$8 sps:$4 sm:$0xff]  }
 0x9f9   :  { %3787 = vmatprep.subr.bf16.mxu1 %v14622_v13 }
 0x9fa   :  { %v17099_v13 = vpack.c.bf16 %v2420_v55, %v2418_v62  ;;  %v14673_v62 = vld [vmem:[%s20207_s10 + $0x14] ss:$8 sps:$4 sm:$0xff]   ;;  %v14671_v55 = vld [vmem:[%s20207_s10 + $0x10] ss:$8 sps:$4 sm:$0xff]  }
 0x9fc   :  { %3788 = vmatpush1.bf16.msra.mxu1 %v14620_v15 }
 0x9fd   :  { %3789 = vmatprep.subr.bf16.mxu1 %v14625_v23 }
 0xa00   :  { %3790 = vmatpush1.bf16.msra.mxu1 %v14623_v3 }
 0xa01   :  { %3791 = vmatprep.subr.bf16.mxu1 %v14628_v10 }
 0xa04   :  { %3792 = vmatpush1.bf16.msra.mxu1 %v14626_v56 }
 0xa05   :  { %3793 = vmatprep.subr.bf16.mxu1 %v14631_v0 }
 0xa08   :  { %3794 = vmatpush2.bf16.msra.mxu1 %v14629_v12 }
 0xa09   :  { %3795 = vmatprep.subr.bf16.mxu1 %v14634_v8 }
 0xa0c   :  { %3796 = vmatpush2.bf16.msra.mxu1 %v14632_v48 }
 0xa0d   :  { %3797 = vmatprep.subr.bf16.mxu1 %v14637_v29 }
 0xa10   :  { %3798 = vmatpush2.bf16.msra.mxu1 %v14635_v27 }
 0xa11   :  { %3799 = vmatprep.subr.bf16.mxu1 %v14640_v16 }
 0xa14   :  { %3800 = vmatpush2.bf16.msra.mxu1 %v14638_v17 }
 0xa15   :  { %3801 = vmatprep.subr.bf16.mxu1 %v14643_v60  ;;  %v14653_v60 = vld [vmem:[%s20207_s10 + $0x70] ss:$8 sps:$4 sm:$0xff]  }
 0xa18   :  { %3802 = vmatpush2.bf16.msra.mxu1 %v14641_v19 }
 0xa19   :  { %3803 = vmatprep.subr.bf16.mxu1 %v14646_v11  ;;  %v14658_v11 = vld [vmem:[%s20207_s10 + $0x64] ss:$8 sps:$4 sm:$0xff]  }
 0xa1c   :  { %3804 = vmatpush2.bf16.msra.mxu1 %v14644_v59  ;;  %v14661_v59 = vld [vmem:[%s20207_s10 + $0x54] ss:$8 sps:$4 sm:$0xff]  }
 0xa1d   :  { %3805 = vmatprep.subr.bf16.mxu1 %v14649_v7  ;;  %v14664_v7 = vld [vmem:[%s20207_s10 + $0x44] ss:$8 sps:$4 sm:$0xff]  }
 0xa20   :  { %3806 = vmatpush2.bf16.msra.mxu1 %v14647_v51  ;;  %v14662_v51 = vld [vmem:[%s20207_s10 + $0x40] ss:$8 sps:$4 sm:$0xff]  }
 0xa21   :  { %3807 = vmatprep.subr.bf16.mxu1 %v14652_v61  ;;  %v14667_v61 = vld [vmem:[%s20207_s10 + $0x34] ss:$8 sps:$4 sm:$0xff]  }
 0xa24   :  { %3808 = vmatpush2.bf16.msra.mxu1 %v14650_v22  ;;  %v14668_v22 = vld [vmem:[%s20207_s10 + $0x20] ss:$8 sps:$4 sm:$0xff]  }
 0xa27   :  { %3810 = vmatmul.mubr.bf16.vlgmr.msra.gmra.mxu1 %v17099_v13 }
 0xa28   :  { %3977 = vmatprep.mubr.f32.mxu1 %v20271_v9 }
 0xaa7   :  { %v12834_v5 = vpop.f32.mrf.mxu1 }
 0xaa9   :  { %v12835_v15 = vpop.f32.mrf.mxu1 }
 0xaaa   :  { %v12836_v3 = vadd.f32 %v12835_v15, %v12834_v5  ;;  %v14674_v5 = vld [vmem:[%s20207_s10] ss:$8 sps:$4 sm:$0xff]   ;;  %v14679_v15 = vld [vmem:[%s20207_s10 + $0xf4] ss:$8 sps:$4 sm:$0xff]  }
 0xaab   :  { %v12837_v23 = vpop.f32.mrf.mxu1 }
 0xaac   :  { %v3247_v0 = vsel %vm1322_vm1, %v12836_v3, 0.0  ;;  %v14682_v3 = vld [vmem:[%s20207_s10 + $0xe4] ss:$8 sps:$4 sm:$0xff]  }
 0xaad   :  { %v12838_v10 = vpop.f32.mrf.mxu1 }
 0xaae   :  { %v12839_v56 = vadd.f32 %v12838_v10, %v12837_v23  ;;  %v14677_v23 = vld [vmem:[%s20207_s10 + $0xf0] ss:$8 sps:$4 sm:$0xff]   ;;  %v14680_v10 = vld [vmem:[%s20207_s10 + $0xe0] ss:$8 sps:$4 sm:$0xff]  }
 0xab0   :  { %v3248_v12 = vsel %vm1322_vm1, %v12839_v56, 0.0  ;;  %v14685_v56 = vld [vmem:[%s20207_s10 + $0xd4] ss:$8 sps:$4 sm:$0xff]  }
 0xab1   :  { %v3249_v14 = vadd.f32 %v3248_v12, %v3247_v0  ;;  %v14683_v0 = vld [vmem:[%s20207_s10 + $0xd0] ss:$8 sps:$4 sm:$0xff]   ;;  %v14688_v12 = vld [vmem:[%s20207_s10 + $0xc4] ss:$8 sps:$4 sm:$0xff]  }
 0xab3   :  { %v3250_v8 = vrot.slane %v3249_v14, 4 }
 0xab5   :  { %v3251_v48 = vadd.f32 %v3250_v8, %v3249_v14  ;;  %v14686_v14 = vld [vmem:[%s20207_s10 + $0xc0] ss:$8 sps:$4 sm:$0xff]   ;;  %v14691_v8 = vld [vmem:[%s20207_s10 + $0xb4] ss:$8 sps:$4 sm:$0xff]  }
 0xab7   :  { %v3252_v29 = vrot.slane %v3251_v48, 2 }
 0xab9   :  { %v3253_v27 = vadd.f32 %v3252_v29, %v3251_v48  ;;  %v14689_v48 = vld [vmem:[%s20207_s10 + $0xb0] ss:$8 sps:$4 sm:$0xff]   ;;  %v14694_v29 = vld [vmem:[%s20207_s10 + $0xa4] ss:$8 sps:$4 sm:$0xff]  }
 0xabb   :  { %v3254_v16 = vrot.slane %v3253_v27, 1 }
 0xabd   :  { %v3255_v17 = vadd.f32 %v3254_v16, %v3253_v27  ;;  %v14692_v16 = vld [vmem:[%s20207_s10 + $0xa0] ss:$8 sps:$4 sm:$0xff]  }
 0xabf   :  { %v3256_v19 = vmul.f32 0.0078125, %v3255_v17  ;;  %v14697_v17 = vld [vmem:[%s20207_s10 + $0x94] ss:$8 sps:$4 sm:$0xff]  }
 0xac1   :  { %11856 = vmatmul.mubr.msk.f32.vlgmr.msra.gmra.mxu0 %vm1322_vm1, %v3256_v19  ;;  %v14695_v19 = vld [vmem:[%s20207_s10 + $0x90] ss:$8 sps:$4 sm:$0xff]  }
 0xac2   :  { %3540 = vmatpush1.bf16.msra.mxu0 %v14653_v60  ;;  %3571 = vmatprep.mubr.bf16.mxu0 %v17011_v4 }
 0xac3   :  { %3541 = vmatprep.subr.bf16.mxu0 %v14658_v11  ;;  %v14700_v11 = vld [vmem:[%s20207_s10 + $0x84] ss:$8 sps:$4 sm:$0xff]  }
 0xac6   :  { %3542 = vmatpush1.bf16.msra.mxu0 %v14656_v57 }
 0xac7   :  { %3543 = vmatprep.subr.bf16.mxu0 %v14661_v59  ;;  %v14698_v59 = vld [vmem:[%s20207_s10 + $0x80] ss:$8 sps:$4 sm:$0xff]  }
 0xaca   :  { %3544 = vmatpush1.bf16.msra.mxu0 %v14659_v63 }
 0xacb   :  { %3545 = vmatprep.subr.bf16.mxu0 %v14664_v7  ;;  %v14703_v7 = vld [vmem:[%s20207_s10 + $0x274] ss:$8 sps:$4 sm:$0xff]  }
 0xace   :  { %3546 = vmatpush1.bf16.msra.mxu0 %v14662_v51  ;;  %v14701_v51 = vld [vmem:[%s20207_s10 + $0x270] ss:$8 sps:$4 sm:$0xff]  }
 0xacf   :  { %3547 = vmatprep.subr.bf16.mxu0 %v14667_v61  ;;  %v11953_v61 = vld [vmem:[%s20208_s5 + $0x10] sm:$0xff] }
 0xad2   :  { %3548 = vmatpush1.bf16.msra.mxu0 %v14665_v20  ;;  %v14706_v20 = vld [vmem:[%s20207_s10 + $0x264] ss:$8 sps:$4 sm:$0xff]  }
 0xad3   :  { %3549 = vmatprep.subr.bf16.mxu0 %v14670_v21  ;;  %v14704_v21 = vld [vmem:[%s20207_s10 + $0x260] ss:$8 sps:$4 sm:$0xff]  }
 0xad6   :  { %3550 = vmatpush1.bf16.msra.mxu0 %v14668_v22  ;;  %v11954_v22 = vld [vmem:[%s20208_s5 + $0x18] sm:$0xff] }
 0xad7   :  { %3551 = vmatprep.subr.bf16.mxu0 %v14673_v62  ;;  %v14709_v62 = vld [vmem:[%s20207_s10 + $0x254] ss:$8 sps:$4 sm:$0xff]  }
 0xada   :  { %3552 = vmatpush1.bf16.msra.mxu0 %v14671_v55  ;;  %v14707_v55 = vld [vmem:[%s20207_s10 + $0x250] ss:$8 sps:$4 sm:$0xff]  }
 0xadb   :  { %3553 = vmatprep.subr.bf16.mxu0 %v14676_v53  ;;  %v14712_v53 = vld [vmem:[%s20207_s10 + $0x244] ss:$8 sps:$4 sm:$0xff]  }
 0xade   :  { %3554 = vmatpush1.bf16.msra.mxu0 %v14674_v5  ;;  %v14710_v5 = vld [vmem:[%s20207_s10 + $0x240] ss:$8 sps:$4 sm:$0xff]  }
 0xadf   :  { %3555 = vmatprep.subr.bf16.mxu0 %v14679_v15  ;;  %v14715_v15 = vld [vmem:[%s20207_s10 + $0x234] ss:$8 sps:$4 sm:$0xff]  }
 0xae2   :  { %3556 = vmatpush2.bf16.msra.mxu0 %v14677_v23  ;;  %v14718_v23 = vld [vmem:[%s20207_s10 + $0x224] ss:$8 sps:$4 sm:$0xff]  }
 0xae3   :  { %3557 = vmatprep.subr.bf16.mxu0 %v14682_v3  ;;  %v14716_v3 = vld [vmem:[%s20207_s10 + $0x220] ss:$8 sps:$4 sm:$0xff]  }
 0xae6   :  { %3558 = vmatpush2.bf16.msra.mxu0 %v14680_v10  ;;  %v14721_v10 = vld [vmem:[%s20207_s10 + $0x214] ss:$8 sps:$4 sm:$0xff]  }
 0xae7   :  { %3559 = vmatprep.subr.bf16.mxu0 %v14685_v56  ;;  %v3811_v27 = vpop.f32.mrf.mxu1  ;;  %v14719_v56 = vld [vmem:[%s20207_s10 + $0x210] ss:$8 sps:$4 sm:$0xff]  }
 0xae9   :  { %v3813_v60 = vpop.f32.mrf.mxu1 }
 0xaea   :  { %3560 = vmatpush2.bf16.msra.mxu0 %v14683_v0  ;;  %v14724_v0 = vld [vmem:[%s20207_s10 + $0x204] ss:$8 sps:$4 sm:$0xff]  }
 0xaeb   :  { %3561 = vmatprep.subr.bf16.mxu0 %v14688_v12  ;;  %v3815_v57 = vpop.f32.mrf.mxu1  ;;  %v14722_v12 = vld [vmem:[%s20207_s10 + $0x200] ss:$8 sps:$4 sm:$0xff]  }
 0xaed   :  { %v3817_v63 = vpop.f32.mrf.mxu1 }
 0xaee   :  { %3562 = vmatpush2.bf16.msra.mxu0 %v14686_v14  ;;  %v14727_v14 = vld [vmem:[%s20207_s10 + $0x2f4] ss:$8 sps:$4 sm:$0xff]  }
 0xaef   :  { %3563 = vmatprep.subr.bf16.mxu0 %v14691_v8  ;;  %v14725_v8 = vld [vmem:[%s20207_s10 + $0x2f0] ss:$8 sps:$4 sm:$0xff]  }
 0xaf2   :  { %3564 = vmatpush2.bf16.msra.mxu0 %v14689_v48  ;;  %v14730_v48 = vld [vmem:[%s20207_s10 + $0x2e4] ss:$8 sps:$4 sm:$0xff]  }
 0xaf3   :  { %3565 = vmatprep.subr.bf16.mxu0 %v14694_v29  ;;  %v14728_v29 = vld [vmem:[%s20207_s10 + $0x2e0] ss:$8 sps:$4 sm:$0xff]  }
 0xaf6   :  { %3566 = vmatpush2.bf16.msra.mxu0 %v14692_v16  ;;  %v14731_v16 = vld [vmem:[%s20207_s10 + $0x2d0] ss:$8 sps:$4 sm:$0xff]  }
 0xaf7   :  { %3567 = vmatprep.subr.bf16.mxu0 %v14697_v17  ;;  %v14736_v17 = vld [vmem:[%s20207_s10 + $0x2c4] ss:$8 sps:$4 sm:$0xff]  }
 0xafa   :  { %3568 = vmatpush2.bf16.msra.mxu0 %v14695_v19  ;;  %v14739_v19 = vld [vmem:[%s20207_s10 + $0x2b4] ss:$8 sps:$4 sm:$0xff]  }
 0xafb   :  { %3569 = vmatprep.subr.bf16.mxu0 %v14700_v11  ;;  %v14737_v11 = vld [vmem:[%s20207_s10 + $0x2b0] ss:$8 sps:$4 sm:$0xff]  }
 0xafe   :  { %3570 = vmatpush2.bf16.msra.mxu0 %v14698_v59  ;;  %v14740_v59 = vld [vmem:[%s20207_s10 + $0x2a0] ss:$8 sps:$4 sm:$0xff]  }
 0xaff   :  { %3858 = vmatprep.subr.mxu0 %v3817_v63  ;;  %v14745_v63 = vld [vmem:[%s20207_s10 + $0x294] ss:$8 sps:$4 sm:$0xff]  }
 0xb01   :  { %3572 = vmatmul.mubr.bf16.vlgmr.msra.gmra.mxu0 %v17099_v13 }
 0xb02   :  { %3859 = vmatpush1.msra.mxu0 %v3815_v57  ;;  %3894 = vmatprep.mubr.f32.mxu0 %v20271_v9  ;;  %v14742_v57 = vld [vmem:[%s20207_s10 + $0x2a4] ss:$8 sps:$4 sm:$0xff]  }
 0xb03   :  { %3860 = vmatprep.subr.mxu0 %v3813_v60  ;;  %v14734_v60 = vld [vmem:[%s20207_s10 + $0x2c0] ss:$8 sps:$4 sm:$0xff]  }
 0xb04   :  { %3861 = vmatpush1.msra.mxu0 %v3811_v27  ;;  %v14733_v27 = vld [vmem:[%s20207_s10 + $0x2d4] ss:$8 sps:$4 sm:$0xff]  }
 0xb05   :  { %4183 = vmatprep.subr.bf16.mxu0 %v14703_v7  ;;  %v14743_v7 = vld [vmem:[%s20207_s10 + $0x290] ss:$8 sps:$4 sm:$0xff]  }
 0xb09   :  { %11955 = vmatmul.mubr.msk.f32.vlgmr.msra.gmra.mxu0 %vm3823_vm2, %v11953_v61  ;;  %v14746_v61 = vld [vmem:[%s20207_s10 + $0x280] ss:$8 sps:$4 sm:$0xff]  }
 0xb0a   :  { %4184 = vmatpush1.bf16.msra.mxu0 %v14701_v51  ;;  %3900 = vmatprep.mubr.f32.mxu0 %v20271_v9  ;;  %v14748_v51 = vld [vmem:[%s20207_s10 + $0x284] ss:$8 sps:$4 sm:$0xff]  }
 0xb0b   :  { %4185 = vmatprep.subr.bf16.mxu0 %v14706_v20  ;;  %v17314_v20 = vld [vmem:[%s20272_s6 + $0x38] sm:$0xff] }
 0xb0d   :  { %11956 = vmatmul.mubr.msk.f32.gmra.mxu0 %vm3823_vm2, %v11954_v22  ;;  %v17328_v22 = vld [vmem:[%s20272_s6 + $0x28] sm:$0xff] }
 0xb0e   :  { %4186 = vmatpush1.bf16.msra.mxu0 %v14704_v21  ;;  %4215 = vmatprep.mubr.bf16.mxu0 %v17011_v4  ;;  %v14713_v4 = vld [vmem:[%s20207_s10 + $0x230] ss:$8 sps:$4 sm:$0xff]  }
 0xb0f   :  { %4187 = vmatprep.subr.bf16.mxu0 %v14709_v62  ;;  %v17321_v21 = vld [vmem:[%s20272_s6 + $0x30] sm:$0xff]  ;;  %v17340_v62 = vld [vmem:[%s20272_s6 + $0x18] sm:$0xff] }
 0xb12   :  { %4188 = vmatpush1.bf16.msra.mxu0 %v14707_v55  ;;  %v17346_v55 = vld [vmem:[%s20272_s6 + $0x10] sm:$0xff] }
 0xb13   :  { %4189 = vmatprep.subr.bf16.mxu0 %v14712_v53  ;;  %v17352_v53 = vld [vmem:[%s20272_s6 + $0x8] sm:$0xff] }
 0xb16   :  { %4190 = vmatpush1.bf16.msra.mxu0 %v14710_v5  ;;  %v17358_v5 = vld [vmem:[%s20272_s6] sm:$0xff] }
 0xb17   :  { %4191 = vmatprep.subr.bf16.mxu0 %v14715_v15 }
 0xb1a   :  { %4192 = vmatpush1.bf16.msra.mxu0 %v14713_v4 }
 0xb1b   :  { %4193 = vmatprep.subr.bf16.mxu0 %v14718_v23 }
 0xb1e   :  { %4194 = vmatpush1.bf16.msra.mxu0 %v14716_v3 }
 0xb1f   :  { %4195 = vmatprep.subr.bf16.mxu0 %v14721_v10 }
 0xb22   :  { %4196 = vmatpush1.bf16.msra.mxu0 %v14719_v56 }
 0xb23   :  { %4197 = vmatprep.subr.bf16.mxu0 %v14724_v0  ;;  %v3582_v0 = vld [vmem:[%s20208_s5] sm:$0xff] }
 0xb26   :  { %4198 = vmatpush1.bf16.msra.mxu0 %v14722_v12  ;;  %v3583_v12 = vld [vmem:[%s20208_s5 + $0x8] sm:$0xff] }
 0xb27   :  { %4199 = vmatprep.subr.bf16.mxu0 %v14727_v14 }
 0xb2a   :  { %4200 = vmatpush2.bf16.msra.mxu0 %v14725_v8 }
 0xb2b   :  { %4201 = vmatprep.subr.bf16.mxu0 %v14730_v48 }
 0xb2e   :  { %4202 = vmatpush2.bf16.msra.mxu0 %v14728_v29 }
 0xb2f   :  { %4203 = vmatprep.subr.bf16.mxu0 %v14733_v27 }
 0xb32   :  { %4204 = vmatpush2.bf16.msra.mxu0 %v14731_v16 }
 0xb33   :  { %4205 = vmatprep.subr.bf16.mxu0 %v14736_v17 }
 0xb36   :  { %4206 = vmatpush2.bf16.msra.mxu0 %v14734_v60 }
 0xb37   :  { %4207 = vmatprep.subr.bf16.mxu0 %v14739_v19  ;;  %v12023_v19 = vld [vmem:[%s20208_s5 + $0x20] sm:$0xff] }
 0xb3a   :  { %4208 = vmatpush2.bf16.msra.mxu0 %v14737_v11  ;;  %v12024_v11 = vld [vmem:[%s20208_s5 + $0x28] sm:$0xff] }
 0xb3b   :  { %4209 = vmatprep.subr.bf16.mxu0 %v14742_v57 }
 0xb3e   :  { %4210 = vmatpush2.bf16.msra.mxu0 %v14740_v59 }
 0xb3f   :  { %4211 = vmatprep.subr.bf16.mxu0 %v14745_v63 }
 0xb42   :  { %4212 = vmatpush2.bf16.msra.mxu0 %v14743_v7 }
 0xb43   :  { %4213 = vmatprep.subr.bf16.mxu0 %v14748_v51 }
 0xb46   :  { %4214 = vmatpush2.bf16.msra.mxu0 %v14746_v61 }
 0xb47   :  { %4603 = vmatprep.subr.mxu0 %v17314_v20 }
 0xb49   :  { %4216 = vmatmul.mubr.bf16.vlgmr.msra.gmra.mxu0 %v17099_v13  ;;  %v17334_v13 = vld [vmem:[%s20272_s6 + $0x20] sm:$0xff] }
 0xb4a   :  { %4604 = vmatpush1.msra.mxu0 %v17321_v21  ;;  %4643 = vmatprep.mubr.f32.mxu0 %v20271_v9 }
 0xb4b   :  { %4605 = vmatprep.subr.mxu0 %v17328_v22 }
 0xb4c   :  { %4606 = vmatpush1.msra.mxu0 %v17334_v13 }
 0xb4d   :  { %4607 = vmatprep.subr.mxu0 %v17340_v62 }
 0xb4e   :  { %4608 = vmatpush1.msra.mxu0 %v17346_v55 }
 0xb4f   :  { %4609 = vmatprep.subr.mxu0 %v17352_v53 }
 0xb50   :  { %4610 = vmatpush1.msra.mxu0 %v17358_v5 }
 0xb81   :  { %v17361_v15 = vpop.f32.mrf.mxu0 }
 0xb83   :  { %v17363_v4 = vpop.f32.mrf.mxu0 }
 0xbc1   :  { %v3573_v23 = vpop.f32.mrf.mxu0 }
 0xbc3   :  { %v3575_v3 = vpop.f32.mrf.mxu0 }
 0xbc5   :  { %v3577_v10 = vpop.f32.mrf.mxu0 }
 0xbc7   :  { %v3579_v56 = vpop.f32.mrf.mxu0 }
 0xbc8   :  { %3941 = vmatprep.subr.mxu1 %v3579_v56  ;;  %v17509_v56 = vld [vmem:[%s20270_s0 + $0x68] sm:$0xff] }
 0xbc9   :  { %3942 = vmatpush1.msra.mxu1 %v3577_v10  ;;  %v3896_v14 = vpop.f32.mrf.mxu0  ;;  %v17503_v10 = vld [vmem:[%s20270_s0 + $0xe8] sm:$0xff] }
 0xbca   :  { %3943 = vmatprep.subr.mxu1 %v3575_v3  ;;  %v17497_v3 = vld [vmem:[%s20270_s0 + $0x70] sm:$0xff] }
 0xbcb   :  { %3944 = vmatpush1.msra.mxu1 %v3573_v23  ;;  %v3898_v8 = vpop.f32.mrf.mxu0  ;;  %v17491_v23 = vld [vmem:[%s20270_s0 + $0xf0] sm:$0xff] }
 0xbcc   :  { %11957 = vmatmul.mubr.msk.f32.vlgmr.msra.gmra.mxu1 %vm3823_vm2, %v3582_v0  ;;  %v17515_v0 = vld [vmem:[%s20270_s0 + $0xe0] sm:$0xff] }
 0xbcd   :  { %3983 = vmatprep.mubr.f32.mxu1 %v20271_v9  ;;  %v17375_v48 = vpop.f32.mrf.mxu0 }
 0xbcf   :  { %v17377_v29 = vpop.f32.mrf.mxu0 }
 0xbd0   :  { %11958 = vmatmul.mubr.msk.f32.gmra.mxu1 %vm3823_vm2, %v3583_v12  ;;  %v17521_v12 = vld [vmem:[%s20270_s0 + $0x60] sm:$0xff] }
 0xbd1   :  { %4299 = vmatprep.mubr.f32.mxu1 %v20271_v9 }
 0xc09   :  { %v4217_v27 = vpop.f32.mrf.mxu0 }
 0xc0b   :  { %v4219_v16 = vpop.f32.mrf.mxu0 }
 0xc0d   :  { %v4221_v17 = vpop.f32.mrf.mxu0 }
 0xc0f   :  { %v4223_v60 = vpop.f32.mrf.mxu0 }
 0xc10   :  { %4263 = vmatprep.subr.mxu1 %v4223_v60  ;;  %v17569_v60 = vld [vmem:[%s20270_s0 + $0x40] sm:$0xff] }
 0xc11   :  { %4264 = vmatpush1.msra.mxu1 %v4221_v17  ;;  %v17563_v17 = vld [vmem:[%s20270_s0 + $0xc0] sm:$0xff] }
 0xc12   :  { %4265 = vmatprep.subr.mxu1 %v4219_v16  ;;  %v17557_v16 = vld [vmem:[%s20270_s0 + $0x48] sm:$0xff] }
 0xc13   :  { %4266 = vmatpush1.msra.mxu1 %v4217_v27  ;;  %v17551_v27 = vld [vmem:[%s20270_s0 + $0xc8] sm:$0xff] }
 0xc14   :  { %12025 = vmatmul.mubr.msk.f32.vlgmr.msra.gmra.mxu1 %vm3823_vm2, %v12023_v19  ;;  %12840 = vmatprep.subr.mxu1 %v16788_v18  ;;  %v17417_v18 = vld [vmem:[%s20270_s0 + $0x90] sm:$0xff]  ;;  %v17575_v19 = vld [vmem:[%s20270_s0 + $0xb8] sm:$0xff] }
 0xc15   :  { %4305 = vmatprep.mubr.f32.mxu1 %v20271_v9  ;;  %12841 = vmatpush3.msra.mxu1 %v16817_v24  ;;  %v17423_v24 = vld [vmem:[%s20270_s0 + $0x10] sm:$0xff] }
 0xc16   :  { %12842 = vmatprep.subr.mxu1 %v16823_v26  ;;  %v17429_v26 = vld [vmem:[%s20270_s0 + $0x88] sm:$0xff] }
 0xc17   :  { %12843 = vmatpush3.msra.mxu1 %v16829_v28  ;;  %v17435_v28 = vld [vmem:[%s20270_s0 + $0x8] sm:$0xff] }
 0xc18   :  { %12026 = vmatmul.mubr.msk.f32.gmra.mxu1 %vm3823_vm2, %v12024_v11  ;;  %12844 = vmatprep.subr.mxu1 %v16835_v30  ;;  %v17441_v30 = vld [vmem:[%s20270_s0 + $0x80] sm:$0xff]  ;;  %v17581_v11 = vld [vmem:[%s20270_s0 + $0x38] sm:$0xff] }
 0xc19   :  { %12845 = vmatpush3.msra.mxu1 %v16841_v31  ;;  %v17447_v31 = vld [vmem:[%s20270_s0] sm:$0xff] }
 0xc1a   :  { %12846 = vmatprep.subr.mxu1 %v16847_v32 }
 0xc1b   :  { %12847 = vmatpush3.msra.mxu1 %v16853_v33 }
 0xc1c   :  { %12848 = vmatprep.subr.mxu1 %v16859_v34 }
 0xc1d   :  { %12849 = vmatpush3.msra.mxu1 %v16865_v54 }
 0xc1e   :  { %12850 = vmatprep.subr.mxu1 %v16871_v35 }
 0xc1f   :  { %12851 = vmatpush3.msra.mxu1 %v16877_v36 }
 0xc20   :  { %12852 = vmatprep.subr.mxu1 %v16883_v37 }
 0xc21   :  { %12853 = vmatpush3.msra.mxu1 %v16889_v38 }
 0xc22   :  { %12854 = vmatprep.subr.mxu1 %v16895_v39 }
 0xc23   :  { %12855 = vmatpush3.msra.mxu1 %v16901_v40 }
 0xc24   :  { %12856 = vmatprep.subr.mxu1 %v16907_v41 }
 0xc25   :  { %12857 = vmatpush3.msra.mxu1 %v16913_v42 }
 0xc26   :  { %12858 = vmatprep.subr.mxu1 %v16919_v43 }
 0xc27   :  { %12859 = vmatpush3.msra.mxu1 %v16925_v50 }
 0xc28   :  { %12860 = vmatprep.subr.mxu1 %v16931_v44 }
 0xc29   :  { %12861 = vmatpush3.msra.mxu1 %v16937_v45 }
 0xc2a   :  { %12862 = vmatprep.subr.mxu1 %v16943_v46  ;;  %v17476_v46 = vld [vmem:[%s20270_s0 + $0xf8] sm:$0xff] }
 0xc2b   :  { %12863 = vmatpush3.msra.mxu1 %v16949_v47 }
 0xc2c   :  { %12864 = vmatprep.subr.mxu1 %v16955_v49 }
 0xc2d   :  { %12865 = vmatpush3.msra.mxu1 %v16961_v52 }
 0xc2e   :  { %12866 = vmatprep.subr.mxu1 %v17417_v18 }
 0xc2f   :  { %12867 = vmatpush3.msra.mxu1 %v17423_v24 }
 0xc30   :  { %12868 = vmatprep.subr.mxu1 %v17429_v26 }
 0xc31   :  { %12869 = vmatpush3.msra.mxu1 %v17435_v28 }
 0xc32   :  { %12870 = vmatprep.subr.mxu1 %v17441_v30 }
 0xc33   :  { %12871 = vmatpush3.msra.mxu1 %v17447_v31 }
 0xc34   :  { %4428 = vmatprep.subr.mxu1 %v17314_v20 }
 0xc8c   :  { %v3979_v32 = vpop.f32.mrf.mxu1 }
 0xc8d   :  { %v3980_v37 = vadd.f32 %v3979_v32, %v3896_v14  ;;  %v17527_v14 = vld [vmem:[%s20270_s0 + $0xd8] sm:$0xff]  ;;  %v17587_v32 = vld [vmem:[%s20270_s0 + $0xb0] sm:$0xff] }
 0xc8e   :  { %v3981_v33 = vpop.f32.mrf.mxu1 }
 0xc8f   :  { %v3982_v36 = vadd.f32 %v3981_v33, %v3898_v8  ;;  %v17533_v8 = vld [vmem:[%s20270_s0 + $0x58] sm:$0xff]  ;;  %v17593_v33 = vld [vmem:[%s20270_s0 + $0x30] sm:$0xff] }
 0xc90   :  { %v3985_v34 = vpop.f32.mrf.mxu1 }
 0xc91   :  { %v3986_v43 = vadd.f32 %v3985_v34, %v17375_v48  ;;  %v17539_v48 = vld [vmem:[%s20270_s0 + $0xd0] sm:$0xff]  ;;  %v17599_v34 = vld [vmem:[%s20270_s0 + $0xa8] sm:$0xff] }
 0xc92   :  { %v3987_v54 = vpop.f32.mrf.mxu1 }
 0xc93   :  { %v3988_v42 = vadd.f32 %v3987_v54, %v17377_v29  ;;  %v17545_v29 = vld [vmem:[%s20270_s0 + $0x50] sm:$0xff]  ;;  %v17605_v54 = vld [vmem:[%s20270_s0 + $0x28] sm:$0xff] }
 0xcd4   :  { %v4301_v35 = vpop.f32.mrf.mxu1 }
 0xcd5   :  { %v17453_v40 = vadd.f32 %v4301_v35, %v3980_v37  ;;  %v17611_v35 = vld [vmem:[%s20270_s0 + $0xa0] sm:$0xff]  ;;  %v17623_v37 = vld [vmem:[%s20270_s0 + $0x98] sm:$0xff] }
 0xcd6   :  { %v4303_v38 = vpop.f32.mrf.mxu1 }
 0xcd7   :  { %v17451_v39 = vadd.f32 %v4303_v38, %v3982_v36  ;;  %v17617_v36 = vld [vmem:[%s20270_s0 + $0x20] sm:$0xff]  ;;  %v17629_v38 = vld [vmem:[%s20270_s0 + $0x18] sm:$0xff] }
 0xcd8   :  { %v4307_v41 = vpop.f32.mrf.mxu1 }
 0xcd9   :  { %4380 = vmatprep.mubr.f32.mxu1 %v17451_v39  ;;  %v17462_v45 = vadd.f32 %v4307_v41, %v3986_v43 }
 0xcda   :  { %v4309_v50 = vpop.f32.mrf.mxu1  ;;  %4381 = vmatmul.mubr.f32.vlgmr.msra.gmra.mxu1 %v17453_v40 }
 0xcdb   :  { %v17459_v44 = vadd.f32 %v4309_v50, %v3988_v42  ;;  %4429 = vmatpush1.msra.mxu1 %v17321_v21 }
 0xcdc   :  { %4430 = vmatprep.subr.mxu1 %v17328_v22 }
 0xcdd   :  { %4385 = vmatprep.mubr.f32.mxu1 %v17459_v44  ;;  %4431 = vmatpush1.msra.mxu1 %v17334_v13 }
 0xcde   :  { %4386 = vmatmul.mubr.f32.gmra.mxu1 %v17462_v45  ;;  %4432 = vmatprep.subr.mxu1 %v17340_v62 }
 0xcdf   :  { %4433 = vmatpush1.msra.mxu1 %v17346_v55  ;;  %4468 = vmatprep.mubr.f32.mxu1 %v20271_v9 }
 0xce0   :  { %4434 = vmatprep.subr.mxu1 %v17352_v53 }
 0xce1   :  { %4435 = vmatpush1.msra.mxu1 %v17358_v5  ;;  %v17485_v5 = vld [vmem:[%s20270_s0 + $0x78] sm:$0xff] }
 0xce2   :  { %12878 = vmatprep.subr.mxu1 %v17476_v46 }
 0xd9a   :  { %v12872_v47 = vpop.f32.mrf.mxu1 }
 0xd9c   :  { %v12873_v49 = vpop.f32.mrf.mxu1 }
 0xd9d   :  { %v12874_v57 = vadd.f32 %v12873_v49, %v12872_v47  ;;  %v14757_v49 = vld [vmem:[%s20209_s11 + $0x164] ss:$8 sps:$4 sm:$0xff]  }
 0xd9e   :  { %v12875_v52 = vpop.f32.mrf.mxu1 }
 0xd9f   :  { %v4391_v7 = vsel %vm1322_vm1, %v12874_v57, 0.0  ;;  %v14763_v57 = vld [vmem:[%s20209_s11 + $0x154] ss:$8 sps:$4 sm:$0xff]  }
 0xda0   :  { %v12876_v59 = vpop.f32.mrf.mxu1 }
 0xda1   :  { %v12877_v63 = vadd.f32 %v12876_v59, %v12875_v52  ;;  %v14755_v52 = vld [vmem:[%s20209_s11 + $0x160] ss:$8 sps:$4 sm:$0xff]   ;;  %v14761_v59 = vld [vmem:[%s20209_s11 + $0x150] ss:$8 sps:$4 sm:$0xff]  }
 0xda3   :  { %v4392_v51 = vsel %vm1322_vm1, %v12877_v63, 0.0  ;;  %v14769_v63 = vld [vmem:[%s20209_s11 + $0x144] ss:$8 sps:$4 sm:$0xff]  }
 0xda4   :  { %v4393_v61 = vadd.f32 %v4392_v51, %v4391_v7  ;;  %v14767_v7 = vld [vmem:[%s20209_s11 + $0x140] ss:$8 sps:$4 sm:$0xff]   ;;  %v14775_v51 = vld [vmem:[%s20209_s11 + $0x134] ss:$8 sps:$4 sm:$0xff]  }
 0xda6   :  { %v4394_v20 = vrot.slane %v4393_v61, 4 }
 0xda8   :  { %v4395_v21 = vadd.f32 %v4394_v20, %v4393_v61  ;;  %v14773_v61 = vld [vmem:[%s20209_s11 + $0x130] ss:$8 sps:$4 sm:$0xff]   ;;  %v14781_v20 = vld [vmem:[%s20209_s11 + $0x124] ss:$8 sps:$4 sm:$0xff]  }
 0xdaa   :  { %v4396_v22 = vrot.slane %v4395_v21, 2 }
 0xdac   :  { %v4397_v13 = vadd.f32 %v4396_v22, %v4395_v21  ;;  %v14779_v21 = vld [vmem:[%s20209_s11 + $0x120] ss:$8 sps:$4 sm:$0xff]   ;;  %v14787_v22 = vld [vmem:[%s20209_s11 + $0x114] ss:$8 sps:$4 sm:$0xff]  }
 0xdae   :  { %v4398_v62 = vrot.slane %v4397_v13, 1 }
 0xdb0   :  { %v4399_v55 = vadd.f32 %v4398_v62, %v4397_v13  ;;  %v14785_v13 = vld [vmem:[%s20209_s11 + $0x110] ss:$8 sps:$4 sm:$0xff]   ;;  %v14793_v62 = vld [vmem:[%s20209_s11 + $0x104] ss:$8 sps:$4 sm:$0xff]  }
 0xdb2   :  { %v4400_v53 = vmul.f32 0.0078125, %v4399_v55  ;;  %v14791_v55 = vld [vmem:[%s20209_s11 + $0x100] ss:$8 sps:$4 sm:$0xff]  }
 0xdb4   :  { %12027 = vmatmul.mubr.msk.f32.vlgmr.msra.gmra.mxu1 %vm1322_vm1, %v4400_v53  ;;  %v14799_v53 = vld [vmem:[%s20209_s11 + $0x1f4] ss:$8 sps:$4 sm:$0xff]  }
 0xdb5   :  { %12879 = vmatpush3.msra.mxu1 %v17485_v5 }
 0xdb6   :  { %12880 = vmatprep.subr.mxu1 %v17491_v23 }
 0xdb7   :  { %12881 = vmatpush3.msra.mxu1 %v17497_v3 }
 0xdb8   :  { %12882 = vmatprep.subr.mxu1 %v17503_v10 }
 0xdb9   :  { %12883 = vmatpush3.msra.mxu1 %v17509_v56 }
 0xdba   :  { %12884 = vmatprep.subr.mxu1 %v17515_v0 }
 0xdbb   :  { %12885 = vmatpush3.msra.mxu1 %v17521_v12 }
 0xdbc   :  { %12886 = vmatprep.subr.mxu1 %v17527_v14 }
 0xdbd   :  { %12887 = vmatpush3.msra.mxu1 %v17533_v8 }
 0xdbe   :  { %12888 = vmatprep.subr.mxu1 %v17539_v48 }
 0xdbf   :  { %12889 = vmatpush3.msra.mxu1 %v17545_v29 }
 0xdc0   :  { %12890 = vmatprep.subr.mxu1 %v17551_v27 }
 0xdc1   :  { %12891 = vmatpush3.msra.mxu1 %v17557_v16 }
 0xdc2   :  { %12892 = vmatprep.subr.mxu1 %v17563_v17 }
 0xdc3   :  { %12893 = vmatpush3.msra.mxu1 %v17569_v60 }
 0xdc4   :  { %12894 = vmatprep.subr.mxu1 %v17575_v19 }
 0xdc5   :  { %12895 = vmatpush3.msra.mxu1 %v17581_v11 }
 0xdc6   :  { %12896 = vmatprep.subr.mxu1 %v17587_v32 }
 0xdc7   :  { %12897 = vmatpush3.msra.mxu1 %v17593_v33 }
 0xdc8   :  { %12898 = vmatprep.subr.mxu1 %v17599_v34 }
 0xdc9   :  { %12899 = vmatpush3.msra.mxu1 %v17605_v54 }
 0xdca   :  { %12900 = vmatprep.subr.mxu1 %v17611_v35 }
 0xdcb   :  { %12901 = vmatpush3.msra.mxu1 %v17617_v36 }
 0xdcc   :  { %12902 = vmatprep.subr.mxu1 %v17623_v37 }
 0xdcd   :  { %12903 = vmatpush3.msra.mxu1 %v17629_v38 }
 0xdce   :  { %12904 = vmatprep.subr.mxu1 %v17417_v18 }
 0xdcf   :  { %12905 = vmatpush3.msra.mxu1 %v17423_v24 }
 0xdd0   :  { %12906 = vmatprep.subr.mxu1 %v17429_v26 }
 0xdd1   :  { %12907 = vmatpush3.msra.mxu1 %v17435_v28 }
 0xdd2   :  { %12908 = vmatprep.subr.mxu1 %v17441_v30 }
 0xdd3   :  { %12909 = vmatpush3.msra.mxu1 %v17447_v31 }
 0xe74   :  { %v4470_v41 = vpop.f32.mrf.mxu1 }
 0xe75   :  { %v4478_v42 = vrot.slane %v4470_v41, %v15741_v25  ;;  %v14797_v41 = vld [vmem:[%s20209_s11 + $0x1f0] ss:$8 sps:$4 sm:$0xff]  }
 0xe76   :  { %v4472_v43 = vpop.f32.mrf.mxu1 }
 0xe77   :  { %v4482_v50 = vrot.slane %v4472_v43, %v15741_v25  ;;  %v17641_v47 = vsub.f32 %v17453_v40, %v4478_v42  ;;  %v17652_v28 = vsub.f32 %v17462_v45, %v4478_v42  ;;  %v14749_v40 = vld [vmem:[%s20209_s11 + $0x170] ss:$8 sps:$4 sm:$0xff]   ;;  %v14754_v45 = vld [vmem:[%s20209_s11 + $0x74] ss:$8 sps:$4 sm:$0xff]  }
 0xe78   :  { %4866 = vmatprep.subr.bf16.mxu0 %v14754_v45 }
 0xe79   :  { %v17644_v18 = vsub.f32 %v17451_v39, %v4482_v50  ;;  %v17647_v24 = vsub.f32 %v17459_v44, %v4482_v50  ;;  %v4487_v30 = vmul.f32 %v17641_v47, %v17641_v47  ;;  %v4489_v39 = vmul.f32 %v17652_v28, %v17652_v28  ;;  %v14751_v44 = vld [vmem:[%s20209_s11 + $0x174] ss:$8 sps:$4 sm:$0xff]  }
 0xe7a   :  { %5102 = vmatprep.subr.bf16.mxu1 %v14751_v44 }
 0xe7b   :  { %v4488_v26 = vmul.f32 %v17644_v18, %v17644_v18  ;;  %v4490_v31 = vmul.f32 %v17647_v24, %v17647_v24 }
 0xe7d   :  { %4555 = vmatprep.mubr.f32.mxu1 %v4488_v26 }
 0xe7e   :  { %4556 = vmatmul.mubr.f32.vlgmr.msra.gmra.mxu1 %v4487_v30 }
 0xe7f   :  { %4560 = vmatprep.mubr.f32.mxu1 %v4490_v31  ;;  %5103 = vmatpush1.bf16.msra.mxu1 %v14749_v40 }
 0xe80   :  { %5104 = vmatprep.subr.bf16.mxu1 %v14757_v49 }
 0xe82   :  { %4561 = vmatmul.mubr.f32.gmra.mxu1 %v4489_v39 }
 0xe83   :  { %5105 = vmatpush1.bf16.msra.mxu1 %v14755_v52 }
 0xe84   :  { %5106 = vmatprep.subr.bf16.mxu1 %v14763_v57 }
 0xe87   :  { %5107 = vmatpush1.bf16.msra.mxu1 %v14761_v59 }
 0xe88   :  { %5108 = vmatprep.subr.bf16.mxu1 %v14769_v63 }
 0xe8b   :  { %5109 = vmatpush1.bf16.msra.mxu1 %v14767_v7  ;;  %v14752_v7 = vld [vmem:[%s20209_s11 + $0x70] ss:$8 sps:$4 sm:$0xff]  }
 0xe8c   :  { %5110 = vmatprep.subr.bf16.mxu1 %v14775_v51 }
 0xe8f   :  { %5111 = vmatpush1.bf16.msra.mxu1 %v14773_v61  ;;  %v14760_v61 = vld [vmem:[%s20209_s11 + $0x64] ss:$8 sps:$4 sm:$0xff]  }
 0xe90   :  { %5112 = vmatprep.subr.bf16.mxu1 %v14781_v20  ;;  %v14758_v20 = vld [vmem:[%s20209_s11 + $0x60] ss:$8 sps:$4 sm:$0xff]  }
 0xe93   :  { %5113 = vmatpush1.bf16.msra.mxu1 %v14779_v21  ;;  %v14766_v21 = vld [vmem:[%s20209_s11 + $0x54] ss:$8 sps:$4 sm:$0xff]  }
 0xe94   :  { %5114 = vmatprep.subr.bf16.mxu1 %v14787_v22  ;;  %v14764_v22 = vld [vmem:[%s20209_s11 + $0x50] ss:$8 sps:$4 sm:$0xff]  }
 0xe97   :  { %5115 = vmatpush1.bf16.msra.mxu1 %v14785_v13  ;;  %v14772_v13 = vld [vmem:[%s20209_s11 + $0x44] ss:$8 sps:$4 sm:$0xff]  }
 0xe98   :  { %5116 = vmatprep.subr.bf16.mxu1 %v14793_v62  ;;  %v14770_v62 = vld [vmem:[%s20209_s11 + $0x40] ss:$8 sps:$4 sm:$0xff]  }
 0xe9b   :  { %5117 = vmatpush1.bf16.msra.mxu1 %v14791_v55  ;;  %v14778_v55 = vld [vmem:[%s20209_s11 + $0x34] ss:$8 sps:$4 sm:$0xff]  }
 0xe9c   :  { %5118 = vmatprep.subr.bf16.mxu1 %v14799_v53  ;;  %v14776_v53 = vld [vmem:[%s20209_s11 + $0x30] ss:$8 sps:$4 sm:$0xff]  }
 0xe9f   :  { %5119 = vmatpush2.bf16.msra.mxu1 %v14797_v41  ;;  %v14784_v41 = vld [vmem:[%s20209_s11 + $0x24] ss:$8 sps:$4 sm:$0xff]  }
 0xf3e   :  { %v12910_v42 = vpop.f32.mrf.mxu1 }
 0xf40   :  { %v12911_v43 = vpop.f32.mrf.mxu1 }
 0xf41   :  { %v12912_v26 = vadd.f32 %v12911_v43, %v12910_v42  ;;  %v14782_v42 = vld [vmem:[%s20209_s11 + $0x20] ss:$8 sps:$4 sm:$0xff]   ;;  %v14790_v43 = vld [vmem:[%s20209_s11 + $0x14] ss:$8 sps:$4 sm:$0xff]  }
 0xf42   :  { %v12913_v50 = vpop.f32.mrf.mxu1 }
 0xf43   :  { %v4566_v39 = vsel %vm1322_vm1, %v12912_v26, 0.0  ;;  %v14796_v26 = vld [vmem:[%s20209_s11 + $0x4] ss:$8 sps:$4 sm:$0xff]  }
 0xf44   :  { %v12914_v30 = vpop.f32.mrf.mxu1 }
 0xf45   :  { %v12915_v31 = vadd.f32 %v12914_v30, %v12913_v50  ;;  %v14788_v50 = vld [vmem:[%s20209_s11 + $0x10] ss:$8 sps:$4 sm:$0xff]   ;;  %v14794_v30 = vld [vmem:[%s20209_s11] ss:$8 sps:$4 sm:$0xff]  }
 0xf47   :  { %v4567_v40 = vsel %vm1322_vm1, %v12915_v31, 0.0  ;;  %v14802_v31 = vld [vmem:[%s20209_s11 + $0xf4] ss:$8 sps:$4 sm:$0xff]  }
 0xf48   :  { %v4568_v44 = vadd.f32 %v4567_v40, %v4566_v39  ;;  %v14800_v39 = vld [vmem:[%s20209_s11 + $0xf0] ss:$8 sps:$4 sm:$0xff]   ;;  %v14805_v40 = vld [vmem:[%s20209_s11 + $0x1e4] ss:$8 sps:$4 sm:$0xff]  }
 0xf49   :  { %5120 = vmatprep.subr.bf16.mxu1 %v14805_v40  ;;  %v14839_v40 = vld [vmem:[%s20209_s11 + $0x180] ss:$8 sps:$4 sm:$0xff]  }
 0xf4a   :  { %v4569_v45 = vrot.slane %v4568_v44, 4 }
 0xf4c   :  { %v4570_v49 = vadd.f32 %v4569_v45, %v4568_v44  ;;  %v14803_v44 = vld [vmem:[%s20209_s11 + $0x1e0] ss:$8 sps:$4 sm:$0xff]   ;;  %v14808_v45 = vld [vmem:[%s20209_s11 + $0xe4] ss:$8 sps:$4 sm:$0xff]  }
 0xf4d   :  { %5121 = vmatpush2.bf16.msra.mxu1 %v14803_v44  ;;  %v14842_v44 = vld [vmem:[%s20209_s11 + $0x80] ss:$8 sps:$4 sm:$0xff]  }
 0xf4e   :  { %v4571_v52 = vrot.slane %v4570_v49, 2 }
 0xf50   :  { %v4572_v57 = vadd.f32 %v4571_v52, %v4570_v49  ;;  %v14806_v49 = vld [vmem:[%s20209_s11 + $0xe0] ss:$8 sps:$4 sm:$0xff]   ;;  %v14811_v52 = vld [vmem:[%s20209_s11 + $0x1d4] ss:$8 sps:$4 sm:$0xff]  }
 0xf51   :  { %5122 = vmatprep.subr.bf16.mxu1 %v14811_v52  ;;  %v3329_v52 = vadd.f32 1e-05, %v17363_v4 }
 0xf52   :  { %v4573_v59 = vrot.slane %v4572_v57, 1 }
 0xf54   :  { %v4574_v63 = vadd.f32 %v4573_v59, %v4572_v57  ;;  %v14809_v57 = vld [vmem:[%s20209_s11 + $0x1d0] ss:$8 sps:$4 sm:$0xff]   ;;  %v14814_v59 = vld [vmem:[%s20209_s11 + $0xd4] ss:$8 sps:$4 sm:$0xff]  }
 0xf55   :  { %5123 = vmatpush2.bf16.msra.mxu1 %v14809_v57 }
 0xf56   :  { %v4575_v51 = vmul.f32 0.0078125, %v4574_v63  ;;  %v14812_v63 = vld [vmem:[%s20209_s11 + $0xd0] ss:$8 sps:$4 sm:$0xff]  }
 0xf58   :  { %12028 = vmatmul.mubr.msk.f32.vlgmr.msra.gmra.mxu0 %vm1322_vm1, %v4575_v51  ;;  %v14815_v51 = vld [vmem:[%s20209_s11 + $0x1c0] ss:$8 sps:$4 sm:$0xff]  }
 0xf59   :  { %4867 = vmatpush1.bf16.msra.mxu0 %v14752_v7  ;;  %v14817_v7 = vld [vmem:[%s20209_s11 + $0x1c4] ss:$8 sps:$4 sm:$0xff]  }
 0xf5a   :  { %4868 = vmatprep.subr.bf16.mxu0 %v14760_v61  ;;  %v14820_v61 = vld [vmem:[%s20209_s11 + $0xc4] ss:$8 sps:$4 sm:$0xff]   ;;  %5124 = vmatprep.subr.bf16.mxu1 %v14817_v7 }
 0xf5b   :  { %5125 = vmatpush2.bf16.msra.mxu1 %v14815_v51 }
 0xf5d   :  { %4869 = vmatpush1.bf16.msra.mxu0 %v14758_v20  ;;  %v14818_v20 = vld [vmem:[%s20209_s11 + $0xc0] ss:$8 sps:$4 sm:$0xff]  }
 0xf5e   :  { %4870 = vmatprep.subr.bf16.mxu0 %v14766_v21  ;;  %v14823_v21 = vld [vmem:[%s20209_s11 + $0x1b4] ss:$8 sps:$4 sm:$0xff]  }
 0xf5f   :  { %5126 = vmatprep.subr.bf16.mxu1 %v14823_v21 }
 0xf61   :  { %4871 = vmatpush1.bf16.msra.mxu0 %v14764_v22  ;;  %v14826_v22 = vld [vmem:[%s20209_s11 + $0xb4] ss:$8 sps:$4 sm:$0xff]  }
 0xf62   :  { %4872 = vmatprep.subr.bf16.mxu0 %v14772_v13  ;;  %v14821_v13 = vld [vmem:[%s20209_s11 + $0x1b0] ss:$8 sps:$4 sm:$0xff]  }
 0xf63   :  { %5127 = vmatpush2.bf16.msra.mxu1 %v14821_v13 }
 0xf65   :  { %4873 = vmatpush1.bf16.msra.mxu0 %v14770_v62  ;;  %v14824_v62 = vld [vmem:[%s20209_s11 + $0xb0] ss:$8 sps:$4 sm:$0xff]  }
 0xf66   :  { %4874 = vmatprep.subr.bf16.mxu0 %v14778_v55  ;;  %v14829_v55 = vld [vmem:[%s20209_s11 + $0x1a4] ss:$8 sps:$4 sm:$0xff]  }
 0xf67   :  { %5128 = vmatprep.subr.bf16.mxu1 %v14829_v55 }
 0xf69   :  { %4875 = vmatpush1.bf16.msra.mxu0 %v14776_v53  ;;  %v14832_v53 = vld [vmem:[%s20209_s11 + $0xa4] ss:$8 sps:$4 sm:$0xff]  }
 0xf6a   :  { %4876 = vmatprep.subr.bf16.mxu0 %v14784_v41  ;;  %v14827_v41 = vld [vmem:[%s20209_s11 + $0x1a0] ss:$8 sps:$4 sm:$0xff]  }
 0xf6b   :  { %5129 = vmatpush2.bf16.msra.mxu1 %v14827_v41 }
 0xf6d   :  { %4877 = vmatpush1.bf16.msra.mxu0 %v14782_v42  ;;  %v14830_v42 = vld [vmem:[%s20209_s11 + $0xa0] ss:$8 sps:$4 sm:$0xff]  }
 0xf6e   :  { %4878 = vmatprep.subr.bf16.mxu0 %v14790_v43  ;;  %v14835_v43 = vld [vmem:[%s20209_s11 + $0x194] ss:$8 sps:$4 sm:$0xff]  }
 0xf6f   :  { %5130 = vmatprep.subr.bf16.mxu1 %v14835_v43 }
 0xf71   :  { %4879 = vmatpush1.bf16.msra.mxu0 %v14788_v50  ;;  %v14838_v50 = vld [vmem:[%s20209_s11 + $0x94] ss:$8 sps:$4 sm:$0xff]  }
 0xf72   :  { %4880 = vmatprep.subr.bf16.mxu0 %v14796_v26  ;;  %v14833_v26 = vld [vmem:[%s20209_s11 + $0x190] ss:$8 sps:$4 sm:$0xff]  }
 0xf73   :  { %5131 = vmatpush2.bf16.msra.mxu1 %v14833_v26 }
 0xf75   :  { %4881 = vmatpush1.bf16.msra.mxu0 %v14794_v30  ;;  %v14836_v30 = vld [vmem:[%s20209_s11 + $0x90] ss:$8 sps:$4 sm:$0xff]  }
 0xf76   :  { %4882 = vmatprep.subr.bf16.mxu0 %v14802_v31  ;;  %v14841_v31 = vld [vmem:[%s20209_s11 + $0x184] ss:$8 sps:$4 sm:$0xff]  }
 0xf77   :  { %5132 = vmatprep.subr.bf16.mxu1 %v14841_v31 }
 0xf78   :  { %5133 = vmatpush2.bf16.msra.mxu1 %v14839_v40  ;;  %v14850_v40 = vld [vmem:[%s20209_s11 + $0x264] ss:$8 sps:$4 sm:$0xff]  }
 0xf79   :  { %4883 = vmatpush2.bf16.msra.mxu0 %v14800_v39  ;;  %v14844_v39 = vld [vmem:[%s20209_s11 + $0x84] ss:$8 sps:$4 sm:$0xff]  }
 0xf7a   :  { %4884 = vmatprep.subr.bf16.mxu0 %v14808_v45  ;;  %v14847_v45 = vld [vmem:[%s20209_s11 + $0x274] ss:$8 sps:$4 sm:$0xff]  }
 0xf7b   :  { %5492 = vmatprep.subr.bf16.mxu1 %v14847_v45  ;;  %v14853_v45 = vld [vmem:[%s20209_s11 + $0x254] ss:$8 sps:$4 sm:$0xff]  }
 0xf7d   :  { %4885 = vmatpush2.bf16.msra.mxu0 %v14806_v49  ;;  %v3327_v49 = vadd.f32 1e-05, %v17361_v15 }
 0xf7e   :  { %4886 = vmatprep.subr.bf16.mxu0 %v14814_v59 }
 0xf7f   :  { %15177 = vrsqrt.f32 %v3327_v49  ;;  %v14851_v49 = vld [vmem:[%s20209_s11 + $0x250] ss:$8 sps:$4 sm:$0xff]  }
 0xf80   :  { %15179 = vrsqrt.f32 %v3329_v52  ;;  %v14856_v52 = vld [vmem:[%s20209_s11 + $0x244] ss:$8 sps:$4 sm:$0xff]  }
 0xf81   :  { %4887 = vmatpush2.bf16.msra.mxu0 %v14812_v63 }
 0xf82   :  { %4888 = vmatprep.subr.bf16.mxu0 %v14820_v61 }
 0xf85   :  { %4889 = vmatpush2.bf16.msra.mxu0 %v14818_v20 }
 0xf86   :  { %4890 = vmatprep.subr.bf16.mxu0 %v14826_v22 }
 0xf89   :  { %4891 = vmatpush2.bf16.msra.mxu0 %v14824_v62 }
 0xf8a   :  { %4892 = vmatprep.subr.bf16.mxu0 %v14832_v53 }
 0xf8c   :  { %v15178_v51 = vpop.eup %15177 }
 0xf8d   :  { %4893 = vmatpush2.bf16.msra.mxu0 %v14830_v42  ;;  %v15180_v61 = vpop.eup %15179  ;;  %v3336_v20 = vrot.slane %v15178_v51, %v15741_v25  ;;  %v14860_v51 = vld [vmem:[%s20209_s11 + $0x220] ss:$8 sps:$4 sm:$0xff]  }
 0xf8e   :  { %4894 = vmatprep.subr.bf16.mxu0 %v14838_v50  ;;  %v3340_v22 = vrot.slane %v15180_v61, %v15741_v25  ;;  %v14865_v61 = vld [vmem:[%s20209_s11 + $0x214] ss:$8 sps:$4 sm:$0xff]  }
 0xf8f   :  { %v3341_v4 = vmul.f32 %v3336_v20, %v16978_v1  ;;  %v3343_v55 = vmul.f32 %v3336_v20, %v16994_v6  ;;  %v14863_v20 = vld [vmem:[%s20209_s11 + $0x210] ss:$8 sps:$4 sm:$0xff]  }
 0xf90   :  { %v3342_v42 = vmul.f32 %v3340_v22, %v16981_v2  ;;  %v3344_v43 = vmul.f32 %v3340_v22, %v16984_v58  ;;  %v14866_v22 = vld [vmem:[%s20209_s11 + $0x200] ss:$8 sps:$4 sm:$0xff]  }
 0xf91   :  { %4895 = vmatpush2.bf16.msra.mxu0 %v14836_v30 }
 0xf92   :  { %4896 = vmatprep.subr.bf16.mxu0 %v14844_v39 }
 0xf95   :  { %4897 = vmatpush2.bf16.msra.mxu0 %v14842_v44  ;;  %v14848_v44 = vld [vmem:[%s20209_s11 + $0x260] ss:$8 sps:$4 sm:$0xff]  }
0x1018   :  { %v4645_v57 = vpop.f32.mrf.mxu0 }
0x1019   :  { %v4646_v59 = vadd.f32 1e-05, %v4645_v57  ;;  %v14854_v57 = vld [vmem:[%s20209_s11 + $0x240] ss:$8 sps:$4 sm:$0xff]  }
0x101a   :  { %v4647_v63 = vpop.f32.mrf.mxu0 }
0x101b   :  { %15181 = vrsqrt.f32 %v4646_v59  ;;  %v4648_v7 = vadd.f32 1e-05, %v4647_v63  ;;  %v14859_v59 = vld [vmem:[%s20209_s11 + $0x234] ss:$8 sps:$4 sm:$0xff]   ;;  %v14857_v63 = vld [vmem:[%s20209_s11 + $0x230] ss:$8 sps:$4 sm:$0xff]  }
0x101d   :  { %15183 = vrsqrt.f32 %v4648_v7  ;;  %v14862_v7 = vld [vmem:[%s20209_s11 + $0x224] ss:$8 sps:$4 sm:$0xff]  }
0x1028   :  { %v15182_v21 = vpop.eup %15181 }
0x1029   :  { %v4655_v13 = vrot.slane %v15182_v21, %v15741_v25  ;;  %v14868_v21 = vld [vmem:[%s20209_s11 + $0x204] ss:$8 sps:$4 sm:$0xff]  }
0x102a   :  { %v15184_v15 = vpop.eup %15183 }
0x102b   :  { %v4659_v62 = vrot.slane %v15184_v15, %v15741_v25  ;;  %v4660_v53 = vmul.f32 %v4655_v13, %v17641_v47  ;;  %v4662_v41 = vmul.f32 %v4655_v13, %v17652_v28  ;;  %v14871_v13 = vld [vmem:[%s20209_s11 + $0x2f4] ss:$8 sps:$4 sm:$0xff]   ;;  %v14869_v15 = vld [vmem:[%s20209_s11 + $0x2f0] ss:$8 sps:$4 sm:$0xff]  }
0x102d   :  { %v4661_v50 = vmul.f32 %v4659_v62, %v17644_v18  ;;  %v4663_v26 = vmul.f32 %v4659_v62, %v17647_v24  ;;  %v17872_v30 = vadd.f32 %v4660_v53, %v3341_v4  ;;  %v17874_v31 = vadd.f32 %v4662_v41, %v3343_v55  ;;  %v14845_v24 = vld [vmem:[%s20209_s11 + $0x270] ss:$8 sps:$4 sm:$0xff]   ;;  %v14874_v4 = vld [vmem:[%s20209_s11 + $0x2e4] ss:$8 sps:$4 sm:$0xff]   ;;  %v14872_v62 = vld [vmem:[%s20209_s11 + $0x2e0] ss:$8 sps:$4 sm:$0xff]  }
0x102e   :  { %v14877_v55 = vld [vmem:[%s20209_s11 + $0x2d4] ss:$8 sps:$4 sm:$0xff]   ;;  %v14875_v53 = vld [vmem:[%s20209_s11 + $0x2d0] ss:$8 sps:$4 sm:$0xff]   ;;  %v14880_v41 = vld [vmem:[%s20209_s11 + $0x2c4] ss:$8 sps:$4 sm:$0xff]  }
0x102f   :  { %20284 = vst [vmem:[#allocation3_spill] sm:$0xff] %v17872_v30  ;;  %20285 = vst [vmem:[#allocation2_spill] sm:$0xff] %v17874_v31  ;;  %v17876_v1 = vadd.f32 %v4661_v50, %v3342_v42  ;;  %v17878_v39 = vadd.f32 %v4663_v26, %v3344_v43  ;;  %v20244_v6 = vmax.f32 %v17872_v30, 0.0  ;;  %v20243_v47 = vmax.f32 %v17874_v31, 0.0  ;;  %v14878_v42 = vld [vmem:[%s20209_s11 + $0x2c0] ss:$8 sps:$4 sm:$0xff]  }
0x1030   :  { %v14883_v43 = vld [vmem:[%s20209_s11 + $0x2b4] ss:$8 sps:$4 sm:$0xff]   ;;  %v14881_v50 = vld [vmem:[%s20209_s11 + $0x2b0] ss:$8 sps:$4 sm:$0xff]   ;;  %v14886_v26 = vld [vmem:[%s20209_s11 + $0x2a4] ss:$8 sps:$4 sm:$0xff]  }
0x1031   :  { %20286 = vst [vmem:[#allocation4_spill] sm:$0xff] %v17876_v1  ;;  %20287 = vst [vmem:[#allocation5_spill] sm:$0xff] %v17878_v39  ;;  %v20242_v2 = vmax.f32 %v17876_v1, 0.0  ;;  %v20241_v58 = vmax.f32 %v17878_v39, 0.0  ;;  %v17895_v28 = vpack.c.bf16 %v20243_v47, %v20244_v6 }
0x1033   :  { %v4673_v18 = vpack.c.bf16 %v20241_v58, %v20242_v2 }
0x1035   :  { %4898 = vmatprep.mubr.bf16.mxu0 %v4673_v18  ;;  %5134 = vmatprep.mubr.bf16.mxu1 %v4673_v18 }
0x1036   :  { %4899 = vmatmul.mubr.bf16.vlgmr.msra.gmra.mxu0 %v17895_v28  ;;  %5135 = vmatmul.mubr.bf16.vlgmr.msra.gmra.mxu1 %v17895_v28 }
0x1037   :  { %5493 = vmatpush1.bf16.msra.mxu1 %v14845_v24  ;;  %5524 = vmatprep.mubr.bf16.mxu1 %v4673_v18  ;;  %v14884_v18 = vld [vmem:[%s20209_s11 + $0x2a0] ss:$8 sps:$4 sm:$0xff]   ;;  %v14889_v24 = vld [vmem:[%s20209_s11 + $0x294] ss:$8 sps:$4 sm:$0xff]  }
0x1038   :  { %5494 = vmatprep.subr.bf16.mxu1 %v14850_v40  ;;  %5209 = vmatprep.mubr.f32.mxu0 %v20271_v9  ;;  %v14887_v40 = vld [vmem:[%s20209_s11 + $0x290] ss:$8 sps:$4 sm:$0xff]  }
0x103b   :  { %5495 = vmatpush1.bf16.msra.mxu1 %v14848_v44  ;;  %v14892_v44 = vld [vmem:[%s20209_s11 + $0x284] ss:$8 sps:$4 sm:$0xff]  }
0x103c   :  { %5496 = vmatprep.subr.bf16.mxu1 %v14853_v45  ;;  %v14890_v45 = vld [vmem:[%s20209_s11 + $0x280] ss:$8 sps:$4 sm:$0xff]  }
0x103f   :  { %5497 = vmatpush1.bf16.msra.mxu1 %v14851_v49  ;;  %v17993_v49 = vld [vmem:[%s20272_s6 + $0x38] sm:$0xff] }
0x1040   :  { %5498 = vmatprep.subr.bf16.mxu1 %v14856_v52  ;;  %v18000_v52 = vld [vmem:[%s20272_s6 + $0x30] sm:$0xff] }
0x1043   :  { %5499 = vmatpush1.bf16.msra.mxu1 %v14854_v57  ;;  %v18007_v57 = vld [vmem:[%s20272_s6 + $0x28] sm:$0xff] }
0x1044   :  { %5500 = vmatprep.subr.bf16.mxu1 %v14859_v59  ;;  %v18019_v59 = vld [vmem:[%s20272_s6 + $0x18] sm:$0xff] }
0x1047   :  { %5501 = vmatpush1.bf16.msra.mxu1 %v14857_v63  ;;  %v18025_v63 = vld [vmem:[%s20272_s6 + $0x10] sm:$0xff] }
0x1048   :  { %5502 = vmatprep.subr.bf16.mxu1 %v14862_v7  ;;  %v18031_v7 = vld [vmem:[%s20272_s6 + $0x8] sm:$0xff] }
0x104b   :  { %5503 = vmatpush1.bf16.msra.mxu1 %v14860_v51  ;;  %v18037_v51 = vld [vmem:[%s20272_s6] sm:$0xff] }
0x104c   :  { %5504 = vmatprep.subr.bf16.mxu1 %v14865_v61 }
0x104f   :  { %5505 = vmatpush1.bf16.msra.mxu1 %v14863_v20 }
0x1050   :  { %5506 = vmatprep.subr.bf16.mxu1 %v14868_v21 }
0x1053   :  { %5507 = vmatpush1.bf16.msra.mxu1 %v14866_v22 }
0x1054   :  { %5508 = vmatprep.subr.bf16.mxu1 %v14871_v13 }
0x1057   :  { %5509 = vmatpush2.bf16.msra.mxu1 %v14869_v15 }
0x1058   :  { %5510 = vmatprep.subr.bf16.mxu1 %v14874_v4 }
0x105b   :  { %5511 = vmatpush2.bf16.msra.mxu1 %v14872_v62 }
0x105c   :  { %5512 = vmatprep.subr.bf16.mxu1 %v14877_v55  ;;  %v18043_v55 = vld [vmem:[%s20208_s5 + $0x10] sm:$0xff] }
0x105f   :  { %5513 = vmatpush2.bf16.msra.mxu1 %v14875_v53  ;;  %v18051_v53 = vld [vmem:[%s20208_s5 + $0x18] sm:$0xff] }
0x1060   :  { %5514 = vmatprep.subr.bf16.mxu1 %v14880_v41  ;;  %v18059_v41 = vld [vmem:[%s20208_s5] sm:$0xff] }
0x1063   :  { %5515 = vmatpush2.bf16.msra.mxu1 %v14878_v42  ;;  %v18067_v42 = vld [vmem:[%s20208_s5 + $0x8] sm:$0xff] }
0x1064   :  { %5516 = vmatprep.subr.bf16.mxu1 %v14883_v43 }
0x1067   :  { %5517 = vmatpush2.bf16.msra.mxu1 %v14881_v50 }
0x1068   :  { %5518 = vmatprep.subr.bf16.mxu1 %v14886_v26 }
0x106b   :  { %5519 = vmatpush2.bf16.msra.mxu1 %v14884_v18 }
0x106c   :  { %5520 = vmatprep.subr.bf16.mxu1 %v14889_v24  ;;  %v18075_v24 = vld [vmem:[%s20208_s5 + $0x20] sm:$0xff] }
0x106f   :  { %5521 = vmatpush2.bf16.msra.mxu1 %v14887_v40  ;;  %v18087_v40 = vld [vmem:[%s20208_s5 + $0x28] sm:$0xff] }
0x1070   :  { %5522 = vmatprep.subr.bf16.mxu1 %v14892_v44  ;;  %v18173_v44 = vld [vmem:[%s20270_s0 + $0xf8] sm:$0xff] }
0x1073   :  { %5523 = vmatpush2.bf16.msra.mxu1 %v14890_v45 }
0x1074   :  { %5903 = vmatprep.subr.mxu1 %v17993_v49 }
0x1076   :  { %5525 = vmatmul.mubr.bf16.vlgmr.msra.gmra.mxu1 %v17895_v28  ;;  %v18013_v28 = vld [vmem:[%s20272_s6 + $0x20] sm:$0xff] }
0x1077   :  { %5904 = vmatpush1.msra.mxu1 %v18000_v52  ;;  %5943 = vmatprep.mubr.f32.mxu1 %v20271_v9 }
0x1078   :  { %5905 = vmatprep.subr.mxu1 %v18007_v57 }
0x1079   :  { %5906 = vmatpush1.msra.mxu1 %v18013_v28 }
0x107a   :  { %5907 = vmatprep.subr.mxu1 %v18019_v59 }
0x107b   :  { %5908 = vmatpush1.msra.mxu1 %v18025_v63 }
0x107c   :  { %5909 = vmatprep.subr.mxu1 %v18031_v7 }
0x107d   :  { %5910 = vmatpush1.msra.mxu1 %v18037_v51 }
0x10f6   :  { %v4900_v61 = vpop.f32.mrf.mxu0  ;;  %v5136_v20 = vpop.f32.mrf.mxu1 }
0x10f8   :  { %v4902_v21 = vpop.f32.mrf.mxu0  ;;  %v5138_v22 = vpop.f32.mrf.mxu1 }
0x10fa   :  { %v5140_v13 = vpop.f32.mrf.mxu1  ;;  %v4904_v15 = vpop.f32.mrf.mxu0 }
0x10fc   :  { %v5142_v4 = vpop.f32.mrf.mxu1  ;;  %v4906_v62 = vpop.f32.mrf.mxu0 }
0x10fd   :  { %5173 = vmatprep.subr.mxu0 %v5142_v4 }
0x10fe   :  { %5174 = vmatpush1.msra.mxu0 %v5140_v13 }
0x10ff   :  { %5175 = vmatprep.subr.mxu0 %v5138_v22 }
0x1100   :  { %5176 = vmatpush1.msra.mxu0 %v5136_v20 }
0x1101   :  { %5250 = vmatprep.subr.mxu0 %v4906_v62  ;;  %12125 = vmatmul.mubr.msk.f32.vlgmr.msra.gmra.mxu0 %vm3823_vm2, %v18043_v55 }
0x1102   :  { %5251 = vmatpush1.msra.mxu0 %v4904_v15  ;;  %5215 = vmatprep.mubr.f32.mxu0 %v20271_v9 }
0x1103   :  { %5252 = vmatprep.subr.mxu0 %v4902_v21 }
0x1104   :  { %5253 = vmatpush1.msra.mxu0 %v4900_v61 }
0x1105   :  { %12126 = vmatmul.mubr.msk.f32.gmra.mxu0 %vm3823_vm2, %v18051_v53 }
0x1106   :  { %5286 = vmatprep.mubr.f32.mxu0 %v20271_v9 }
0x1109   :  { %12127 = vmatmul.mubr.msk.f32.vlgmr.msra.gmra.mxu0 %vm3823_vm2, %v18059_v41 }
0x110a   :  { %5292 = vmatprep.mubr.f32.mxu0 %v20271_v9 }
0x110d   :  { %12128 = vmatmul.mubr.msk.f32.gmra.mxu0 %vm3823_vm2, %v18067_v42 }
0x110e   :  { %5599 = vmatprep.mubr.f32.mxu0 %v20271_v9 }
0x1136   :  { %v5526_v43 = vpop.f32.mrf.mxu1 }
0x1138   :  { %v5528_v50 = vpop.f32.mrf.mxu1 }
0x113a   :  { %v5530_v26 = vpop.f32.mrf.mxu1 }
0x113c   :  { %v5532_v18 = vpop.f32.mrf.mxu1 }
0x113d   :  { %5563 = vmatprep.subr.mxu0 %v5532_v18 }
0x113e   :  { %5564 = vmatpush1.msra.mxu0 %v5530_v26 }
0x113f   :  { %5565 = vmatprep.subr.mxu0 %v5528_v50 }
0x1140   :  { %5566 = vmatpush1.msra.mxu0 %v5526_v43 }
0x1141   :  { %12193 = vmatmul.mubr.msk.f32.vlgmr.msra.gmra.mxu0 %vm3823_vm2, %v18075_v24  ;;  %12916 = vmatprep.subr.mxu0 %v17476_v46  ;;  %v18116_v46 = vld [vmem:[%s20270_s0 + $0x90] sm:$0xff] }
0x1142   :  { %5605 = vmatprep.mubr.f32.mxu0 %v20271_v9  ;;  %12917 = vmatpush3.msra.mxu0 %v17485_v5  ;;  %20288 = vst [vmem:[#allocation6_spill] sm:$0xff] %v18116_v46  ;;  %v18122_v5 = vld [vmem:[%s20270_s0 + $0x10] sm:$0xff] }
0x1143   :  { %12918 = vmatprep.subr.mxu0 %v17491_v23  ;;  %20289 = vst [vmem:[#allocation7_spill] sm:$0xff] %v18122_v5  ;;  %v18128_v23 = vld [vmem:[%s20270_s0 + $0x88] sm:$0xff] }
0x1144   :  { %12919 = vmatpush3.msra.mxu0 %v17497_v3  ;;  %20290 = vst [vmem:[#allocation8_spill] sm:$0xff] %v18128_v23  ;;  %v18134_v3 = vld [vmem:[%s20270_s0 + $0x8] sm:$0xff] }
0x1145   :  { %12194 = vmatmul.mubr.msk.f32.gmra.mxu0 %vm3823_vm2, %v18087_v40  ;;  %12920 = vmatprep.subr.mxu0 %v17503_v10  ;;  %20291 = vst [vmem:[#allocation9_spill] sm:$0xff] %v18134_v3  ;;  %v18140_v10 = vld [vmem:[%s20270_s0 + $0x80] sm:$0xff] }
0x1146   :  { %12921 = vmatpush3.msra.mxu0 %v17509_v56  ;;  %20292 = vst [vmem:[#allocation10_spill] sm:$0xff] %v18140_v10  ;;  %v18146_v56 = vld [vmem:[%s20270_s0] sm:$0xff] }
0x1147   :  { %12922 = vmatprep.subr.mxu0 %v17515_v0  ;;  %20293 = vst [vmem:[#allocation11_spill] sm:$0xff] %v18146_v56 }
0x1148   :  { %12923 = vmatpush3.msra.mxu0 %v17521_v12 }
0x1149   :  { %12924 = vmatprep.subr.mxu0 %v17527_v14 }
0x114a   :  { %12925 = vmatpush3.msra.mxu0 %v17533_v8 }
0x114b   :  { %12926 = vmatprep.subr.mxu0 %v17539_v48 }
0x114c   :  { %12927 = vmatpush3.msra.mxu0 %v17545_v29 }
0x114d   :  { %12928 = vmatprep.subr.mxu0 %v17551_v27 }
0x114e   :  { %12929 = vmatpush3.msra.mxu0 %v17557_v16 }
0x114f   :  { %12930 = vmatprep.subr.mxu0 %v17563_v17 }
0x1150   :  { %12931 = vmatpush3.msra.mxu0 %v17569_v60 }
0x1151   :  { %12932 = vmatprep.subr.mxu0 %v17575_v19 }
0x1152   :  { %12933 = vmatpush3.msra.mxu0 %v17581_v11 }
0x1153   :  { %12934 = vmatprep.subr.mxu0 %v17587_v32 }
0x1154   :  { %12935 = vmatpush3.msra.mxu0 %v17593_v33 }
0x1155   :  { %12936 = vmatprep.subr.mxu0 %v17599_v34 }
0x1156   :  { %12937 = vmatpush3.msra.mxu0 %v17605_v54 }
0x1157   :  { %12938 = vmatprep.subr.mxu0 %v17611_v35 }
0x1158   :  { %12939 = vmatpush3.msra.mxu0 %v17617_v36 }
0x1159   :  { %12940 = vmatprep.subr.mxu0 %v17623_v37 }
0x115a   :  { %12941 = vmatpush3.msra.mxu0 %v17629_v38 }
0x115b   :  { %12942 = vmatprep.subr.mxu0 %v18116_v46 }
0x115c   :  { %12943 = vmatpush3.msra.mxu0 %v18122_v5 }
0x115d   :  { %12944 = vmatprep.subr.mxu0 %v18128_v23 }
0x115e   :  { %12945 = vmatpush3.msra.mxu0 %v18134_v3 }
0x115f   :  { %12946 = vmatprep.subr.mxu0 %v18140_v10 }
0x1160   :  { %12947 = vmatpush3.msra.mxu0 %v18146_v56 }
0x1161   :  { %5728 = vmatprep.subr.mxu0 %v17993_v49 }
0x11c1   :  { %v5211_v0 = vpop.f32.mrf.mxu0 }
0x11c3   :  { %v5213_v12 = vpop.f32.mrf.mxu0 }
0x11c5   :  { %v5217_v14 = vpop.f32.mrf.mxu0 }
0x11c7   :  { %v5219_v8 = vpop.f32.mrf.mxu0 }
0x11c9   :  { %v5288_v48 = vpop.f32.mrf.mxu0 }
0x11ca   :  { %v5289_v19 = vadd.f32 %v5288_v48, %v5211_v0  ;;  %v18188_v48 = vld [vmem:[%s20270_s0 + $0xf0] sm:$0xff] }
0x11cb   :  { %v5290_v29 = vpop.f32.mrf.mxu0 }
0x11cc   :  { %v5291_v60 = vadd.f32 %v5290_v29, %v5213_v12  ;;  %v18194_v29 = vld [vmem:[%s20270_s0 + $0x70] sm:$0xff] }
0x11cd   :  { %v5294_v27 = vpop.f32.mrf.mxu0 }
0x11ce   :  { %v5295_v35 = vadd.f32 %v5294_v27, %v5217_v14  ;;  %v18200_v27 = vld [vmem:[%s20270_s0 + $0xe8] sm:$0xff] }
0x11cf   :  { %v5296_v16 = vpop.f32.mrf.mxu0 }
0x11d0   :  { %v5297_v54 = vadd.f32 %v5296_v16, %v5219_v8  ;;  %v18182_v8 = vld [vmem:[%s20270_s0 + $0x78] sm:$0xff]  ;;  %v18206_v16 = vld [vmem:[%s20270_s0 + $0x68] sm:$0xff] }
0x1201   :  { %v5601_v17 = vpop.f32.mrf.mxu0 }
0x1202   :  { %v18152_v33 = vadd.f32 %v5601_v17, %v5289_v19  ;;  %v18212_v17 = vld [vmem:[%s20270_s0 + $0xe0] sm:$0xff]  ;;  %v18224_v19 = vld [vmem:[%s20270_s0 + $0xd8] sm:$0xff] }
0x1203   :  { %v5603_v11 = vpop.f32.mrf.mxu0 }
0x1204   :  { %v18150_v32 = vadd.f32 %v5603_v11, %v5291_v60  ;;  %v18218_v60 = vld [vmem:[%s20270_s0 + $0x60] sm:$0xff]  ;;  %v18230_v11 = vld [vmem:[%s20270_s0 + $0x58] sm:$0xff] }
0x1205   :  { %v5607_v34 = vpop.f32.mrf.mxu0 }
0x1206   :  { %5680 = vmatprep.mubr.f32.mxu0 %v18150_v32  ;;  %v18159_v38 = vadd.f32 %v5607_v34, %v5295_v35  ;;  %v18236_v34 = vld [vmem:[%s20270_s0 + $0xd0] sm:$0xff]  ;;  %v18248_v35 = vld [vmem:[%s20270_s0 + $0xc8] sm:$0xff] }
0x1207   :  { %v5609_v36 = vpop.f32.mrf.mxu0  ;;  %5681 = vmatmul.mubr.f32.vlgmr.msra.gmra.mxu0 %v18152_v33 }
0x1208   :  { %v18156_v37 = vadd.f32 %v5609_v36, %v5297_v54  ;;  %5729 = vmatpush1.msra.mxu0 %v18000_v52  ;;  %v18242_v54 = vld [vmem:[%s20270_s0 + $0x50] sm:$0xff]  ;;  %v18254_v36 = vld [vmem:[%s20270_s0 + $0x48] sm:$0xff] }
0x1209   :  { %5730 = vmatprep.subr.mxu0 %v18007_v57 }
0x120a   :  { %5685 = vmatprep.mubr.f32.mxu0 %v18156_v37  ;;  %5731 = vmatpush1.msra.mxu0 %v18013_v28 }
0x120b   :  { %5686 = vmatmul.mubr.f32.gmra.mxu0 %v18159_v38  ;;  %5732 = vmatprep.subr.mxu0 %v18019_v59 }
0x120c   :  { %5733 = vmatpush1.msra.mxu0 %v18025_v63  ;;  %5768 = vmatprep.mubr.f32.mxu0 %v20271_v9 }
0x120d   :  { %5734 = vmatprep.subr.mxu0 %v18031_v7 }
0x120e   :  { %5735 = vmatpush1.msra.mxu0 %v18037_v51 }
0x120f   :  { %12954 = vmatprep.subr.mxu0 %v18173_v44 }
0x12c7   :  { %v12948_v45 = vpop.f32.mrf.mxu0 }
0x12c9   :  { %v12949_v61 = vpop.f32.mrf.mxu0 }
0x12ca   :  { %v12950_v21 = vadd.f32 %v12949_v61, %v12948_v45  ;;  %v18260_v45 = vld [vmem:[%s20270_s0 + $0xc0] sm:$0xff] }
0x12cb   :  { %v12951_v20 = vpop.f32.mrf.mxu0  ;;  %v18266_v61 = vld [vmem:[%s20270_s0 + $0x40] sm:$0xff] }
0x12cc   :  { %v5691_v15 = vsel %vm1322_vm1, %v12950_v21, 0.0  ;;  %v18278_v21 = vld [vmem:[%s20270_s0 + $0x38] sm:$0xff] }
0x12cd   :  { %v12952_v22 = vpop.f32.mrf.mxu0 }
0x12ce   :  { %v12953_v13 = vadd.f32 %v12952_v22, %v12951_v20  ;;  %v18272_v20 = vld [vmem:[%s20270_s0 + $0xb8] sm:$0xff]  ;;  %v18284_v22 = vld [vmem:[%s20270_s0 + $0xb0] sm:$0xff] }
0x12d0   :  { %v5692_v4 = vsel %vm1322_vm1, %v12953_v13, 0.0  ;;  %v18290_v13 = vld [vmem:[%s20270_s0 + $0x30] sm:$0xff] }
0x12d1   :  { %v5693_v62 = vadd.f32 %v5692_v4, %v5691_v15  ;;  %v18296_v15 = vld [vmem:[%s20270_s0 + $0xa8] sm:$0xff] }
0x12d2   :  { %v18302_v4 = vld [vmem:[%s20270_s0 + $0x28] sm:$0xff] }
0x12d3   :  { %v5694_v43 = vrot.slane %v5693_v62, 4 }
0x12d5   :  { %v5695_v50 = vadd.f32 %v5694_v43, %v5693_v62  ;;  %v18308_v62 = vld [vmem:[%s20270_s0 + $0xa0] sm:$0xff] }
0x12d6   :  { %v18314_v43 = vld [vmem:[%s20270_s0 + $0x20] sm:$0xff] }
0x12d7   :  { %v5696_v26 = vrot.slane %v5695_v50, 2 }
0x12d9   :  { %v5697_v18 = vadd.f32 %v5696_v26, %v5695_v50  ;;  %v18320_v50 = vld [vmem:[%s20270_s0 + $0x98] sm:$0xff] }
0x12da   :  { %v18326_v26 = vld [vmem:[%s20270_s0 + $0x18] sm:$0xff] }
0x12db   :  { %v5698_v0 = vrot.slane %v5697_v18, 1 }
0x12dd   :  { %v5699_v12 = vadd.f32 %v5698_v0, %v5697_v18 }
0x12df   :  { %v5700_v14 = vmul.f32 0.0078125, %v5699_v12 }
0x12e1   :  { %12195 = vmatmul.mubr.msk.f32.vlgmr.msra.gmra.mxu0 %vm1322_vm1, %v5700_v14 }
0x12e2   :  { %12955 = vmatpush3.msra.mxu0 %v18182_v8 }
0x12e3   :  { %12956 = vmatprep.subr.mxu0 %v18188_v48 }
0x12e4   :  { %12957 = vmatpush3.msra.mxu0 %v18194_v29 }
0x12e5   :  { %12958 = vmatprep.subr.mxu0 %v18200_v27 }
0x12e6   :  { %12959 = vmatpush3.msra.mxu0 %v18206_v16 }
0x12e7   :  { %12960 = vmatprep.subr.mxu0 %v18212_v17 }
0x12e8   :  { %12961 = vmatpush3.msra.mxu0 %v18218_v60 }
0x12e9   :  { %12962 = vmatprep.subr.mxu0 %v18224_v19 }
0x12ea   :  { %12963 = vmatpush3.msra.mxu0 %v18230_v11 }
0x12eb   :  { %12964 = vmatprep.subr.mxu0 %v18236_v34 }
0x12ec   :  { %12965 = vmatpush3.msra.mxu0 %v18242_v54 }
0x12ed   :  { %12966 = vmatprep.subr.mxu0 %v18248_v35 }
0x12ee   :  { %12967 = vmatpush3.msra.mxu0 %v18254_v36 }
0x12ef   :  { %12968 = vmatprep.subr.mxu0 %v18260_v45 }
0x12f0   :  { %12969 = vmatpush3.msra.mxu0 %v18266_v61 }
0x12f1   :  { %12970 = vmatprep.subr.mxu0 %v18272_v20 }
0x12f2   :  { %12971 = vmatpush3.msra.mxu0 %v18278_v21 }
0x12f3   :  { %12972 = vmatprep.subr.mxu0 %v18284_v22 }
0x12f4   :  { %12973 = vmatpush3.msra.mxu0 %v18290_v13 }
0x12f5   :  { %12974 = vmatprep.subr.mxu0 %v18296_v15 }
0x12f6   :  { %12975 = vmatpush3.msra.mxu0 %v18302_v4 }
0x12f7   :  { %12976 = vmatprep.subr.mxu0 %v18308_v62 }
0x12f8   :  { %12977 = vmatpush3.msra.mxu0 %v18314_v43 }
0x12f9   :  { %12978 = vmatprep.subr.mxu0 %v18320_v50 }
0x12fa   :  { %12979 = vmatpush3.msra.mxu0 %v18326_v26 }
0x12fb   :  { %12980 = vmatprep.subr.mxu0 %v18116_v46 }
0x12fc   :  { %12981 = vmatpush3.msra.mxu0 %v18122_v5 }
0x12fd   :  { %12982 = vmatprep.subr.mxu0 %v18128_v23 }
0x12fe   :  { %12983 = vmatpush3.msra.mxu0 %v18134_v3 }
0x12ff   :  { %12984 = vmatprep.subr.mxu0 %v18140_v10 }
0x1300   :  { %12985 = vmatpush3.msra.mxu0 %v18146_v56 }
0x13a1   :  { %v5770_v18 = vpop.f32.mrf.mxu0 }
0x13a2   :  { %v5778_v0 = vrot.slane %v5770_v18, %v15741_v25 }
0x13a3   :  { %v5772_v12 = vpop.f32.mrf.mxu0 }
0x13a4   :  { %v5782_v14 = vrot.slane %v5772_v12, %v15741_v25  ;;  %v18338_v58 = vsub.f32 %v18152_v33, %v5778_v0  ;;  %v18349_v39 = vsub.f32 %v18159_v38, %v5778_v0  ;;  %v14895_v38 = vld [vmem:[%s20210_s12 + $0x174] ss:$8 sps:$4 sm:$0xff]   ;;  %v14901_v0 = vld [vmem:[%s20210_s12 + $0x164] ss:$8 sps:$4 sm:$0xff]   ;;  %v14899_v12 = vld [vmem:[%s20210_s12 + $0x160] ss:$8 sps:$4 sm:$0xff]  }
0x13a5   :  { %6398 = vmatprep.subr.bf16.mxu0 %v14895_v38  ;;  %v14917_v38 = vld [vmem:[%s20210_s12 + $0x130] ss:$8 sps:$4 sm:$0xff]  }
0x13a6   :  { %v18341_v2 = vsub.f32 %v18150_v32, %v5782_v14  ;;  %v18344_v47 = vsub.f32 %v18156_v37, %v5782_v14  ;;  %v5787_v18 = vmul.f32 %v18338_v58, %v18338_v58  ;;  %v5789_v32 = vmul.f32 %v18349_v39, %v18349_v39  ;;  %v14893_v37 = vld [vmem:[%s20210_s12 + $0x170] ss:$8 sps:$4 sm:$0xff]   ;;  %v14907_v14 = vld [vmem:[%s20210_s12 + $0x154] ss:$8 sps:$4 sm:$0xff]  }
0x13a8   :  { %v5788_v6 = vmul.f32 %v18341_v2, %v18341_v2  ;;  %v5790_v33 = vmul.f32 %v18344_v47, %v18344_v47 }
0x13aa   :  { %5855 = vmatprep.mubr.f32.mxu0 %v5788_v6  ;;  %v14898_v6 = vld [vmem:[%s20210_s12 + $0x74] ss:$8 sps:$4 sm:$0xff]  }
0x13ab   :  { %5856 = vmatmul.mubr.f32.vlgmr.msra.gmra.mxu0 %v5787_v18  ;;  %6162 = vmatprep.subr.bf16.mxu1 %v14898_v6  ;;  %v14905_v18 = vld [vmem:[%s20210_s12 + $0x150] ss:$8 sps:$4 sm:$0xff]   ;;  %v14925_v6 = vld [vmem:[%s20210_s12 + $0x124] ss:$8 sps:$4 sm:$0xff]  }
0x13ac   :  { %5860 = vmatprep.mubr.f32.mxu0 %v5790_v33  ;;  %6399 = vmatpush1.bf16.msra.mxu0 %v14893_v37  ;;  %v14913_v33 = vld [vmem:[%s20210_s12 + $0x144] ss:$8 sps:$4 sm:$0xff]   ;;  %v14919_v37 = vld [vmem:[%s20210_s12 + $0x134] ss:$8 sps:$4 sm:$0xff]  }
0x13ad   :  { %6400 = vmatprep.subr.bf16.mxu0 %v14901_v0  ;;  %v14923_v0 = vld [vmem:[%s20210_s12 + $0x120] ss:$8 sps:$4 sm:$0xff]  }
0x13af   :  { %5861 = vmatmul.mubr.f32.gmra.mxu0 %v5789_v32  ;;  %v14911_v32 = vld [vmem:[%s20210_s12 + $0x140] ss:$8 sps:$4 sm:$0xff]  }
0x13b0   :  { %6401 = vmatpush1.bf16.msra.mxu0 %v14899_v12  ;;  %v14931_v12 = vld [vmem:[%s20210_s12 + $0x114] ss:$8 sps:$4 sm:$0xff]  }
0x13b1   :  { %6402 = vmatprep.subr.bf16.mxu0 %v14907_v14  ;;  %v14929_v14 = vld [vmem:[%s20210_s12 + $0x110] ss:$8 sps:$4 sm:$0xff]  }
0x13b4   :  { %6403 = vmatpush1.bf16.msra.mxu0 %v14905_v18  ;;  %v14937_v18 = vld [vmem:[%s20210_s12 + $0x104] ss:$8 sps:$4 sm:$0xff]  }
0x13b5   :  { %6404 = vmatprep.subr.bf16.mxu0 %v14913_v33  ;;  %v14935_v33 = vld [vmem:[%s20210_s12 + $0x100] ss:$8 sps:$4 sm:$0xff]  }
0x13b8   :  { %6405 = vmatpush1.bf16.msra.mxu0 %v14911_v32  ;;  %v14943_v32 = vld [vmem:[%s20210_s12 + $0x1f4] ss:$8 sps:$4 sm:$0xff]  }
0x13b9   :  { %6406 = vmatprep.subr.bf16.mxu0 %v14919_v37  ;;  %v14941_v37 = vld [vmem:[%s20210_s12 + $0x1f0] ss:$8 sps:$4 sm:$0xff]  }
0x13bc   :  { %6407 = vmatpush1.bf16.msra.mxu0 %v14917_v38  ;;  %v14949_v38 = vld [vmem:[%s20210_s12 + $0x1e4] ss:$8 sps:$4 sm:$0xff]  }
0x13bd   :  { %6408 = vmatprep.subr.bf16.mxu0 %v14925_v6  ;;  %v14947_v6 = vld [vmem:[%s20210_s12 + $0x1e0] ss:$8 sps:$4 sm:$0xff]  }
0x13c0   :  { %6409 = vmatpush1.bf16.msra.mxu0 %v14923_v0 }
0x13c1   :  { %6410 = vmatprep.subr.bf16.mxu0 %v14931_v12 }
0x13c4   :  { %6411 = vmatpush1.bf16.msra.mxu0 %v14929_v14 }
0x13c5   :  { %6412 = vmatprep.subr.bf16.mxu0 %v14937_v18 }
0x13c8   :  { %6413 = vmatpush1.bf16.msra.mxu0 %v14935_v33 }
0x13c9   :  { %6414 = vmatprep.subr.bf16.mxu0 %v14943_v32 }
0x13cc   :  { %6415 = vmatpush2.bf16.msra.mxu0 %v14941_v37  ;;  %v14896_v37 = vld [vmem:[%s20210_s12 + $0x70] ss:$8 sps:$4 sm:$0xff]  }
0x13cd   :  { %6416 = vmatprep.subr.bf16.mxu0 %v14949_v38 }
0x13d0   :  { %6417 = vmatpush2.bf16.msra.mxu0 %v14947_v6  ;;  %v14904_v6 = vld [vmem:[%s20210_s12 + $0x64] ss:$8 sps:$4 sm:$0xff]  }
0x146b   :  { %v12986_v0 = vpop.f32.mrf.mxu0 }
0x146d   :  { %v12987_v12 = vpop.f32.mrf.mxu0 }
0x146e   :  { %v12988_v18 = vadd.f32 %v12987_v12, %v12986_v0  ;;  %v14934_v0 = vld [vmem:[%s20210_s12 + $0x14] ss:$8 sps:$4 sm:$0xff]   ;;  %v14932_v12 = vld [vmem:[%s20210_s12 + $0x10] ss:$8 sps:$4 sm:$0xff]  }
0x146f   :  { %v12989_v14 = vpop.f32.mrf.mxu0 }
0x1470   :  { %v5866_v31 = vsel %vm1322_vm1, %v12988_v18, 0.0  ;;  %v14938_v18 = vld [vmem:[%s20210_s12] ss:$8 sps:$4 sm:$0xff]  }
0x1471   :  { %v12990_v33 = vpop.f32.mrf.mxu0 }
0x1472   :  { %v12991_v1 = vadd.f32 %v12990_v33, %v12989_v14  ;;  %v14940_v14 = vld [vmem:[%s20210_s12 + $0x4] ss:$8 sps:$4 sm:$0xff]   ;;  %v14946_v33 = vld [vmem:[%s20210_s12 + $0xf4] ss:$8 sps:$4 sm:$0xff]  }
0x1474   :  { %v5867_v30 = vsel %vm1322_vm1, %v12991_v1, 0.0  ;;  %v14908_v1 = vld [vmem:[%s20210_s12 + $0x50] ss:$8 sps:$4 sm:$0xff]  }
0x1475   :  { %v5868_v56 = vadd.f32 %v5867_v30, %v5866_v31  ;;  %v14902_v30 = vld [vmem:[%s20210_s12 + $0x60] ss:$8 sps:$4 sm:$0xff]   ;;  %v14910_v31 = vld [vmem:[%s20210_s12 + $0x54] ss:$8 sps:$4 sm:$0xff]  }
0x1477   :  { %v5869_v10 = vrot.slane %v5868_v56, 4 }
0x1479   :  { %v5870_v32 = vadd.f32 %v5869_v10, %v5868_v56  ;;  %v14928_v10 = vld [vmem:[%s20210_s12 + $0x24] ss:$8 sps:$4 sm:$0xff]   ;;  %v14926_v56 = vld [vmem:[%s20210_s12 + $0x20] ss:$8 sps:$4 sm:$0xff]  }
0x147b   :  { %v5871_v3 = vrot.slane %v5870_v32, 2 }
0x147d   :  { %v5872_v23 = vadd.f32 %v5871_v3, %v5870_v32  ;;  %v14920_v3 = vld [vmem:[%s20210_s12 + $0x30] ss:$8 sps:$4 sm:$0xff]  }
0x147e   :  { %v14944_v32 = vld [vmem:[%s20210_s12 + $0xf0] ss:$8 sps:$4 sm:$0xff]  }
0x147f   :  { %v5873_v5 = vrot.slane %v5872_v23, 1 }
0x1481   :  { %v5874_v46 = vadd.f32 %v5873_v5, %v5872_v23  ;;  %v14914_v5 = vld [vmem:[%s20210_s12 + $0x40] ss:$8 sps:$4 sm:$0xff]   ;;  %v14922_v23 = vld [vmem:[%s20210_s12 + $0x34] ss:$8 sps:$4 sm:$0xff]  }
0x1483   :  { %v5875_v38 = vmul.f32 0.0078125, %v5874_v46  ;;  %v14916_v46 = vld [vmem:[%s20210_s12 + $0x44] ss:$8 sps:$4 sm:$0xff]  }
0x1485   :  { %12196 = vmatmul.mubr.msk.f32.vlgmr.msra.gmra.mxu1 %vm1322_vm1, %v5875_v38  ;;  %v14950_v38 = vld [vmem:[%s20210_s12 + $0xe0] ss:$8 sps:$4 sm:$0xff]  }
0x1486   :  { %6163 = vmatpush1.bf16.msra.mxu1 %v14896_v37  ;;  %v14952_v37 = vld [vmem:[%s20210_s12 + $0xe4] ss:$8 sps:$4 sm:$0xff]  }
0x1487   :  { %6164 = vmatprep.subr.bf16.mxu1 %v14904_v6  ;;  %v14955_v6 = vld [vmem:[%s20210_s12 + $0x1d4] ss:$8 sps:$4 sm:$0xff]  }
0x1488   :  { %6418 = vmatprep.subr.bf16.mxu0 %v14955_v6  ;;  %v14977_v6 = vld [vmem:[%s20210_s12 + $0x190] ss:$8 sps:$4 sm:$0xff]  }
0x148a   :  { %6165 = vmatpush1.bf16.msra.mxu1 %v14902_v30  ;;  %v14953_v30 = vld [vmem:[%s20210_s12 + $0x1d0] ss:$8 sps:$4 sm:$0xff]  }
0x148b   :  { %6166 = vmatprep.subr.bf16.mxu1 %v14910_v31  ;;  %v14958_v31 = vld [vmem:[%s20210_s12 + $0xd4] ss:$8 sps:$4 sm:$0xff]   ;;  %6419 = vmatpush2.bf16.msra.mxu0 %v14953_v30  ;;  %v14980_v30 = vld [vmem:[%s20210_s12 + $0x90] ss:$8 sps:$4 sm:$0xff]  }
0x148e   :  { %6167 = vmatpush1.bf16.msra.mxu1 %v14908_v1  ;;  %v14956_v1 = vld [vmem:[%s20210_s12 + $0xd0] ss:$8 sps:$4 sm:$0xff]  }
0x148f   :  { %6168 = vmatprep.subr.bf16.mxu1 %v14916_v46  ;;  %v14959_v46 = vld [vmem:[%s20210_s12 + $0x1c0] ss:$8 sps:$4 sm:$0xff]  }
0x1492   :  { %6169 = vmatpush1.bf16.msra.mxu1 %v14914_v5  ;;  %v14961_v5 = vld [vmem:[%s20210_s12 + $0x1c4] ss:$8 sps:$4 sm:$0xff]  }
0x1493   :  { %6170 = vmatprep.subr.bf16.mxu1 %v14922_v23  ;;  %v14962_v23 = vld [vmem:[%s20210_s12 + $0xc0] ss:$8 sps:$4 sm:$0xff]   ;;  %6420 = vmatprep.subr.bf16.mxu0 %v14961_v5 }
0x1494   :  { %6421 = vmatpush2.bf16.msra.mxu0 %v14959_v46  ;;  %v14983_v46 = vld [vmem:[%s20210_s12 + $0x180] ss:$8 sps:$4 sm:$0xff]  }
0x1495   :  { %v14986_v5 = vld [vmem:[%s20210_s12 + $0x80] ss:$8 sps:$4 sm:$0xff]  }
0x1496   :  { %6171 = vmatpush1.bf16.msra.mxu1 %v14920_v3  ;;  %v14964_v3 = vld [vmem:[%s20210_s12 + $0xc4] ss:$8 sps:$4 sm:$0xff]  }
0x1497   :  { %6172 = vmatprep.subr.bf16.mxu1 %v14928_v10  ;;  %v14967_v10 = vld [vmem:[%s20210_s12 + $0x1b4] ss:$8 sps:$4 sm:$0xff]  }
0x1498   :  { %6422 = vmatprep.subr.bf16.mxu0 %v14967_v10 }
0x149a   :  { %6173 = vmatpush1.bf16.msra.mxu1 %v14926_v56  ;;  %v14970_v56 = vld [vmem:[%s20210_s12 + $0xb4] ss:$8 sps:$4 sm:$0xff]  }
0x149b   :  { %6174 = vmatprep.subr.bf16.mxu1 %v14934_v0  ;;  %v14965_v0 = vld [vmem:[%s20210_s12 + $0x1b0] ss:$8 sps:$4 sm:$0xff]  }
0x149c   :  { %6423 = vmatpush2.bf16.msra.mxu0 %v14965_v0 }
0x149e   :  { %6175 = vmatpush1.bf16.msra.mxu1 %v14932_v12  ;;  %v14968_v12 = vld [vmem:[%s20210_s12 + $0xb0] ss:$8 sps:$4 sm:$0xff]  }
0x149f   :  { %6176 = vmatprep.subr.bf16.mxu1 %v14940_v14  ;;  %v14973_v14 = vld [vmem:[%s20210_s12 + $0x1a4] ss:$8 sps:$4 sm:$0xff]  }
0x14a0   :  { %6424 = vmatprep.subr.bf16.mxu0 %v14973_v14 }
0x14a2   :  { %6177 = vmatpush1.bf16.msra.mxu1 %v14938_v18  ;;  %v14976_v18 = vld [vmem:[%s20210_s12 + $0xa4] ss:$8 sps:$4 sm:$0xff]  }
0x14a3   :  { %6178 = vmatprep.subr.bf16.mxu1 %v14946_v33  ;;  %v14971_v33 = vld [vmem:[%s20210_s12 + $0x1a0] ss:$8 sps:$4 sm:$0xff]  }
0x14a4   :  { %6425 = vmatpush2.bf16.msra.mxu0 %v14971_v33 }
0x14a6   :  { %6179 = vmatpush2.bf16.msra.mxu1 %v14944_v32  ;;  %v14974_v32 = vld [vmem:[%s20210_s12 + $0xa0] ss:$8 sps:$4 sm:$0xff]  }
0x14a7   :  { %6180 = vmatprep.subr.bf16.mxu1 %v14952_v37  ;;  %v14979_v37 = vld [vmem:[%s20210_s12 + $0x194] ss:$8 sps:$4 sm:$0xff]  }
0x14a8   :  { %6426 = vmatprep.subr.bf16.mxu0 %v14979_v37 }
0x14a9   :  { %6427 = vmatpush2.bf16.msra.mxu0 %v14977_v6 }
0x14aa   :  { %6181 = vmatpush2.bf16.msra.mxu1 %v14950_v38  ;;  %v14982_v38 = vld [vmem:[%s20210_s12 + $0x94] ss:$8 sps:$4 sm:$0xff]  }
0x14ab   :  { %6182 = vmatprep.subr.bf16.mxu1 %v14958_v31  ;;  %v14985_v31 = vld [vmem:[%s20210_s12 + $0x184] ss:$8 sps:$4 sm:$0xff]  }
0x14ac   :  { %6428 = vmatprep.subr.bf16.mxu0 %v14985_v31 }
0x14ad   :  { %6429 = vmatpush2.bf16.msra.mxu0 %v14983_v46 }
0x14ae   :  { %6183 = vmatpush2.bf16.msra.mxu1 %v14956_v1  ;;  %v14988_v1 = vld [vmem:[%s20210_s12 + $0x84] ss:$8 sps:$4 sm:$0xff]  }
0x14af   :  { %6184 = vmatprep.subr.bf16.mxu1 %v14964_v3 }
0x14b2   :  { %6185 = vmatpush2.bf16.msra.mxu1 %v14962_v23  ;;  %v14991_v23 = vld [vmem:[%s20210_s12 + $0x274] ss:$8 sps:$4 sm:$0xff]  }
0x14b3   :  { %6186 = vmatprep.subr.bf16.mxu1 %v14970_v56  ;;  %6788 = vmatprep.subr.bf16.mxu0 %v14991_v23  ;;  %v14989_v23 = vld [vmem:[%s20210_s12 + $0x270] ss:$8 sps:$4 sm:$0xff]  }
0x14b6   :  { %6187 = vmatpush2.bf16.msra.mxu1 %v14968_v12 }
0x14b7   :  { %6188 = vmatprep.subr.bf16.mxu1 %v14976_v18 }
0x14ba   :  { %6189 = vmatpush2.bf16.msra.mxu1 %v14974_v32 }
0x14bb   :  { %6190 = vmatprep.subr.bf16.mxu1 %v14982_v38 }
0x14be   :  { %6191 = vmatpush2.bf16.msra.mxu1 %v14980_v30 }
0x14bf   :  { %6192 = vmatprep.subr.bf16.mxu1 %v14988_v1 }
0x14c2   :  { %6193 = vmatpush2.bf16.msra.mxu1 %v14986_v5 }
0x1545   :  { %v5945_v3 = vpop.f32.mrf.mxu1 }
0x1546   :  { %v5946_v10 = vadd.f32 1e-05, %v5945_v3 }
0x1547   :  { %v5947_v56 = vpop.f32.mrf.mxu1 }
0x1548   :  { %15185 = vrsqrt.f32 %v5946_v10  ;;  %v5948_v0 = vadd.f32 1e-05, %v5947_v56  ;;  %v15000_v10 = vld [vmem:[%s20210_s12 + $0x244] ss:$8 sps:$4 sm:$0xff]   ;;  %v14998_v56 = vld [vmem:[%s20210_s12 + $0x240] ss:$8 sps:$4 sm:$0xff]  }
0x154a   :  { %15187 = vrsqrt.f32 %v5948_v0  ;;  %v15003_v0 = vld [vmem:[%s20210_s12 + $0x234] ss:$8 sps:$4 sm:$0xff]  }
0x1555   :  { %v15186_v12 = vpop.eup %15185 }
0x1556   :  { %v5955_v14 = vrot.slane %v15186_v12, %v15741_v25  ;;  %v15001_v12 = vld [vmem:[%s20210_s12 + $0x230] ss:$8 sps:$4 sm:$0xff]  }
0x1557   :  { %v15188_v18 = vpop.eup %15187 }
0x1558   :  { %v5959_v33 = vrot.slane %v15188_v18, %v15741_v25  ;;  %v5960_v32 = vmul.f32 %v5955_v14, %v18338_v58  ;;  %v5962_v37 = vmul.f32 %v5955_v14, %v18349_v39  ;;  %v14994_v58 = vld [vmem:[%s20210_s12 + $0x264] ss:$8 sps:$4 sm:$0xff]   ;;  %v14992_v39 = vld [vmem:[%s20210_s12 + $0x260] ss:$8 sps:$4 sm:$0xff]  }
0x1559   :  { %v15006_v14 = vld [vmem:[%s20210_s12 + $0x224] ss:$8 sps:$4 sm:$0xff]   ;;  %v15004_v18 = vld [vmem:[%s20210_s12 + $0x220] ss:$8 sps:$4 sm:$0xff]  }
0x155a   :  { %v5961_v38 = vmul.f32 %v5959_v33, %v18341_v2  ;;  %v5963_v6 = vmul.f32 %v5959_v33, %v18344_v47  ;;  %v5964_v30 = vmax.f32 %v5960_v32, 0.0  ;;  %v5966_v31 = vmax.f32 %v5962_v37, 0.0  ;;  %v14997_v47 = vld [vmem:[%s20210_s12 + $0x254] ss:$8 sps:$4 sm:$0xff]   ;;  %v14995_v2 = vld [vmem:[%s20210_s12 + $0x250] ss:$8 sps:$4 sm:$0xff]  }
0x155b   :  { %v15009_v33 = vld [vmem:[%s20210_s12 + $0x214] ss:$8 sps:$4 sm:$0xff]   ;;  %v15007_v32 = vld [vmem:[%s20210_s12 + $0x210] ss:$8 sps:$4 sm:$0xff]   ;;  %v15012_v37 = vld [vmem:[%s20210_s12 + $0x204] ss:$8 sps:$4 sm:$0xff]  }
0x155c   :  { %v5965_v1 = vmax.f32 %v5961_v38, 0.0  ;;  %v5967_v46 = vmax.f32 %v5963_v6, 0.0  ;;  %v18564_v3 = vpack.c.bf16 %v5966_v31, %v5964_v30  ;;  %v15010_v38 = vld [vmem:[%s20210_s12 + $0x200] ss:$8 sps:$4 sm:$0xff]   ;;  %v15015_v6 = vld [vmem:[%s20210_s12 + $0x2f4] ss:$8 sps:$4 sm:$0xff]  }
0x155d   :  { %v15013_v30 = vld [vmem:[%s20210_s12 + $0x2f0] ss:$8 sps:$4 sm:$0xff]   ;;  %v15018_v31 = vld [vmem:[%s20210_s12 + $0x2e4] ss:$8 sps:$4 sm:$0xff]  }
0x155e   :  { %v5969_v5 = vpack.c.bf16 %v5967_v46, %v5965_v1  ;;  %v15016_v1 = vld [vmem:[%s20210_s12 + $0x2e0] ss:$8 sps:$4 sm:$0xff]   ;;  %v15021_v46 = vld [vmem:[%s20210_s12 + $0x2d4] ss:$8 sps:$4 sm:$0xff]  }
0x1560   :  { %6194 = vmatprep.mubr.bf16.mxu1 %v5969_v5  ;;  %6430 = vmatprep.mubr.bf16.mxu0 %v5969_v5 }
0x1561   :  { %6195 = vmatmul.mubr.bf16.vlgmr.msra.gmra.mxu1 %v18564_v3  ;;  %6431 = vmatmul.mubr.bf16.vlgmr.msra.gmra.mxu0 %v18564_v3 }
0x1562   :  { %6789 = vmatpush1.bf16.msra.mxu0 %v14989_v23  ;;  %6820 = vmatprep.mubr.bf16.mxu0 %v5969_v5  ;;  %v15019_v5 = vld [vmem:[%s20210_s12 + $0x2d0] ss:$8 sps:$4 sm:$0xff]   ;;  %v15024_v23 = vld [vmem:[%s20210_s12 + $0x2c4] ss:$8 sps:$4 sm:$0xff]  }
0x1563   :  { %6790 = vmatprep.subr.bf16.mxu0 %v14994_v58  ;;  %6505 = vmatprep.mubr.f32.mxu1 %v20271_v9  ;;  %v15022_v58 = vld [vmem:[%s20210_s12 + $0x2c0] ss:$8 sps:$4 sm:$0xff]  }
0x1566   :  { %6791 = vmatpush1.bf16.msra.mxu0 %v14992_v39  ;;  %v15027_v39 = vld [vmem:[%s20210_s12 + $0x2b4] ss:$8 sps:$4 sm:$0xff]  }
0x1567   :  { %6792 = vmatprep.subr.bf16.mxu0 %v14997_v47  ;;  %v15025_v47 = vld [vmem:[%s20210_s12 + $0x2b0] ss:$8 sps:$4 sm:$0xff]  }
0x156a   :  { %6793 = vmatpush1.bf16.msra.mxu0 %v14995_v2  ;;  %v15030_v2 = vld [vmem:[%s20210_s12 + $0x2a4] ss:$8 sps:$4 sm:$0xff]  }
0x156b   :  { %6794 = vmatprep.subr.bf16.mxu0 %v15000_v10  ;;  %v15028_v10 = vld [vmem:[%s20210_s12 + $0x2a0] ss:$8 sps:$4 sm:$0xff]  }
0x156e   :  { %6795 = vmatpush1.bf16.msra.mxu0 %v14998_v56  ;;  %v15033_v56 = vld [vmem:[%s20210_s12 + $0x294] ss:$8 sps:$4 sm:$0xff]  }
0x156f   :  { %6796 = vmatprep.subr.bf16.mxu0 %v15003_v0  ;;  %v15031_v0 = vld [vmem:[%s20210_s12 + $0x290] ss:$8 sps:$4 sm:$0xff]  }
0x1572   :  { %6797 = vmatpush1.bf16.msra.mxu0 %v15001_v12  ;;  %v15036_v12 = vld [vmem:[%s20210_s12 + $0x284] ss:$8 sps:$4 sm:$0xff]  }
0x1573   :  { %6798 = vmatprep.subr.bf16.mxu0 %v15006_v14  ;;  %v15034_v14 = vld [vmem:[%s20210_s12 + $0x280] ss:$8 sps:$4 sm:$0xff]  }
0x1576   :  { %6799 = vmatpush1.bf16.msra.mxu0 %v15004_v18 }
0x1577   :  { %6800 = vmatprep.subr.bf16.mxu0 %v15009_v33 }
0x157a   :  { %6801 = vmatpush1.bf16.msra.mxu0 %v15007_v32 }
0x157b   :  { %6802 = vmatprep.subr.bf16.mxu0 %v15012_v37 }
0x157e   :  { %6803 = vmatpush1.bf16.msra.mxu0 %v15010_v38 }
0x157f   :  { %6804 = vmatprep.subr.bf16.mxu0 %v15015_v6 }
0x1582   :  { %6805 = vmatpush2.bf16.msra.mxu0 %v15013_v30 }
0x1583   :  { %6806 = vmatprep.subr.bf16.mxu0 %v15018_v31 }
0x1586   :  { %6807 = vmatpush2.bf16.msra.mxu0 %v15016_v1 }
0x1587   :  { %6808 = vmatprep.subr.bf16.mxu0 %v15021_v46 }
0x158a   :  { %6809 = vmatpush2.bf16.msra.mxu0 %v15019_v5 }
0x158b   :  { %6810 = vmatprep.subr.bf16.mxu0 %v15024_v23 }
0x158e   :  { %6811 = vmatpush2.bf16.msra.mxu0 %v15022_v58 }
0x158f   :  { %6812 = vmatprep.subr.bf16.mxu0 %v15027_v39 }
0x1592   :  { %6813 = vmatpush2.bf16.msra.mxu0 %v15025_v47 }
0x1593   :  { %6814 = vmatprep.subr.bf16.mxu0 %v15030_v2 }
0x1596   :  { %6815 = vmatpush2.bf16.msra.mxu0 %v15028_v10 }
0x1597   :  { %6816 = vmatprep.subr.bf16.mxu0 %v15033_v56 }
0x159a   :  { %6817 = vmatpush2.bf16.msra.mxu0 %v15031_v0 }
0x159b   :  { %6818 = vmatprep.subr.bf16.mxu0 %v15036_v12 }
0x159e   :  { %6819 = vmatpush2.bf16.msra.mxu0 %v15034_v14 }
0x159f   :  { %7199 = vmatprep.subr.mxu0 %v17993_v49 }
0x15a1   :  { %6821 = vmatmul.mubr.bf16.vlgmr.msra.gmra.mxu0 %v18564_v3 }
0x15a2   :  { %7200 = vmatpush1.msra.mxu0 %v18000_v52  ;;  %7239 = vmatprep.mubr.f32.mxu0 %v20271_v9 }
0x15a3   :  { %7201 = vmatprep.subr.mxu0 %v18007_v57 }
0x15a4   :  { %7202 = vmatpush1.msra.mxu0 %v18013_v28 }
0x15a5   :  { %7203 = vmatprep.subr.mxu0 %v18019_v59 }
0x15a6   :  { %7204 = vmatpush1.msra.mxu0 %v18025_v63 }
0x15a7   :  { %7205 = vmatprep.subr.mxu0 %v18031_v7 }
0x15a8   :  { %7206 = vmatpush1.msra.mxu0 %v18037_v51  ;;  %v20294_v51 = vld [vmem:[#allocation6_spill] sm:$0xff] }
0x1621   :  { %v6196_v18 = vpop.f32.mrf.mxu1  ;;  %v6432_v49 = vpop.f32.mrf.mxu0 }
0x1623   :  { %v6198_v33 = vpop.f32.mrf.mxu1  ;;  %v6434_v3 = vpop.f32.mrf.mxu0 }
0x1625   :  { %v6436_v32 = vpop.f32.mrf.mxu0  ;;  %v6200_v52 = vpop.f32.mrf.mxu1 }
0x1627   :  { %v6438_v37 = vpop.f32.mrf.mxu0  ;;  %v6202_v57 = vpop.f32.mrf.mxu1 }
0x1628   :  { %6469 = vmatprep.subr.mxu1 %v6438_v37  ;;  %v15319_v37 = vld [vmem:[%s20272_s6 + $0x18] sm:$0xff] }
0x1629   :  { %6470 = vmatpush1.msra.mxu1 %v6436_v32  ;;  %v15317_v32 = vld [vmem:[%s20272_s6 + $0x28] sm:$0xff] }
0x162a   :  { %6471 = vmatprep.subr.mxu1 %v6434_v3 }
0x162b   :  { %6472 = vmatpush1.msra.mxu1 %v6432_v49 }
0x162c   :  { %6546 = vmatprep.subr.mxu1 %v6202_v57  ;;  %12293 = vmatmul.mubr.msk.f32.vlgmr.msra.gmra.mxu1 %vm3823_vm2, %v18043_v55  ;;  %v20295_v55 = vld [vmem:[#allocation7_spill] sm:$0xff]  ;;  %v15320_v57 = vld [vmem:[%s20272_s6 + $0x10] sm:$0xff] }
0x162d   :  { %6547 = vmatpush1.msra.mxu1 %v6200_v52  ;;  %6511 = vmatprep.mubr.f32.mxu1 %v20271_v9  ;;  %v15318_v52 = vld [vmem:[%s20272_s6 + $0x20] sm:$0xff] }
0x162e   :  { %6548 = vmatprep.subr.mxu1 %v6198_v33  ;;  %v15316_v33 = vld [vmem:[%s20272_s6 + $0x30] sm:$0xff] }
0x162f   :  { %6549 = vmatpush1.msra.mxu1 %v6196_v18 }
0x1630   :  { %12294 = vmatmul.mubr.msk.f32.gmra.mxu1 %vm3823_vm2, %v18051_v53  ;;  %v20296_v53 = vld [vmem:[#allocation8_spill] sm:$0xff] }
0x1631   :  { %6582 = vmatprep.mubr.f32.mxu1 %v20271_v9 }
0x1634   :  { %12295 = vmatmul.mubr.msk.f32.vlgmr.msra.gmra.mxu1 %vm3823_vm2, %v18059_v41  ;;  %v20297_v41 = vld [vmem:[#allocation9_spill] sm:$0xff] }
0x1635   :  { %6588 = vmatprep.mubr.f32.mxu1 %v20271_v9 }
0x1638   :  { %12296 = vmatmul.mubr.msk.f32.gmra.mxu1 %vm3823_vm2, %v18067_v42  ;;  %v20298_v42 = vld [vmem:[#allocation10_spill] sm:$0xff] }
0x1639   :  { %6895 = vmatprep.mubr.f32.mxu1 %v20271_v9 }
0x1661   :  { %v6822_v28 = vpop.f32.mrf.mxu0 }
0x1663   :  { %v6824_v59 = vpop.f32.mrf.mxu0 }
0x1665   :  { %v6826_v63 = vpop.f32.mrf.mxu0 }
0x1667   :  { %v6828_v7 = vpop.f32.mrf.mxu0 }
0x1668   :  { %6859 = vmatprep.subr.mxu1 %v6828_v7 }
0x1669   :  { %6860 = vmatpush1.msra.mxu1 %v6826_v63 }
0x166a   :  { %6861 = vmatprep.subr.mxu1 %v6824_v59  ;;  %v15322_v59 = vld [vmem:[%s20272_s6] sm:$0xff] }
0x166b   :  { %6862 = vmatpush1.msra.mxu1 %v6822_v28  ;;  %v15321_v28 = vld [vmem:[%s20272_s6 + $0x8] sm:$0xff] }
0x166c   :  { %12361 = vmatmul.mubr.msk.f32.vlgmr.msra.gmra.mxu1 %vm3823_vm2, %v18075_v24  ;;  %12992 = vmatprep.subr.mxu1 %v18173_v44  ;;  %v20299_v24 = vld [vmem:[#allocation11_spill] sm:$0xff] }
0x166d   :  { %6901 = vmatprep.mubr.f32.mxu1 %v20271_v9  ;;  %12993 = vmatpush3.msra.mxu1 %v18182_v8 }
0x166e   :  { %12994 = vmatprep.subr.mxu1 %v18188_v48 }
0x166f   :  { %12995 = vmatpush3.msra.mxu1 %v18194_v29 }
0x1670   :  { %12362 = vmatmul.mubr.msk.f32.gmra.mxu1 %vm3823_vm2, %v18087_v40  ;;  %12996 = vmatprep.subr.mxu1 %v18200_v27  ;;  %v15315_v40 = vld [vmem:[%s20272_s6 + $0x38] sm:$0xff] }
0x1671   :  { %12997 = vmatpush3.msra.mxu1 %v18206_v16 }
0x1672   :  { %12998 = vmatprep.subr.mxu1 %v18212_v17 }
0x1673   :  { %12999 = vmatpush3.msra.mxu1 %v18218_v60 }
0x1674   :  { %13000 = vmatprep.subr.mxu1 %v18224_v19 }
0x1675   :  { %13001 = vmatpush3.msra.mxu1 %v18230_v11 }
0x1676   :  { %13002 = vmatprep.subr.mxu1 %v18236_v34 }
0x1677   :  { %13003 = vmatpush3.msra.mxu1 %v18242_v54 }
0x1678   :  { %13004 = vmatprep.subr.mxu1 %v18248_v35 }
0x1679   :  { %13005 = vmatpush3.msra.mxu1 %v18254_v36 }
0x167a   :  { %13006 = vmatprep.subr.mxu1 %v18260_v45 }
0x167b   :  { %13007 = vmatpush3.msra.mxu1 %v18266_v61 }
0x167c   :  { %13008 = vmatprep.subr.mxu1 %v18272_v20 }
0x167d   :  { %13009 = vmatpush3.msra.mxu1 %v18278_v21 }
0x167e   :  { %13010 = vmatprep.subr.mxu1 %v18284_v22 }
0x167f   :  { %13011 = vmatpush3.msra.mxu1 %v18290_v13 }
0x1680   :  { %13012 = vmatprep.subr.mxu1 %v18296_v15 }
0x1681   :  { %13013 = vmatpush3.msra.mxu1 %v18302_v4 }
0x1682   :  { %13014 = vmatprep.subr.mxu1 %v18308_v62 }
0x1683   :  { %13015 = vmatpush3.msra.mxu1 %v18314_v43 }
0x1684   :  { %13016 = vmatprep.subr.mxu1 %v18320_v50 }
0x1685   :  { %13017 = vmatpush3.msra.mxu1 %v18326_v26 }
0x1686   :  { %13018 = vmatprep.subr.mxu1 %v20294_v51 }
0x1687   :  { %13019 = vmatpush3.msra.mxu1 %v20295_v55 }
0x1688   :  { %13020 = vmatprep.subr.mxu1 %v20296_v53 }
0x1689   :  { %13021 = vmatpush3.msra.mxu1 %v20297_v41 }
0x168a   :  { %13022 = vmatprep.subr.mxu1 %v20298_v42 }
0x168b   :  { %13023 = vmatpush3.msra.mxu1 %v20299_v24 }
0x168c   :  { %7024 = vmatprep.subr.mxu1 %v15315_v40 }
0x16ec   :  { %v6507_v38 = vpop.f32.mrf.mxu1 }
0x16ee   :  { %v6509_v6 = vpop.f32.mrf.mxu1 }
0x16f0   :  { %v6513_v30 = vpop.f32.mrf.mxu1 }
0x16f2   :  { %v6515_v31 = vpop.f32.mrf.mxu1 }
0x16f4   :  { %v6584_v1 = vpop.f32.mrf.mxu1 }
0x16f5   :  { %v6585_v47 = vadd.f32 %v6584_v1, %v6507_v38 }
0x16f6   :  { %v6586_v46 = vpop.f32.mrf.mxu1 }
0x16f7   :  { %v6587_v39 = vadd.f32 %v6586_v46, %v6509_v6 }
0x16f8   :  { %v6590_v5 = vpop.f32.mrf.mxu1 }
0x16f9   :  { %v6591_v14 = vadd.f32 %v6590_v5, %v6513_v30 }
0x16fa   :  { %v6592_v23 = vpop.f32.mrf.mxu1 }
0x16fb   :  { %v6593_v12 = vadd.f32 %v6592_v23, %v6515_v31 }
0x172c   :  { %v6897_v58 = vpop.f32.mrf.mxu1 }
0x172d   :  { %v18723_v56 = vadd.f32 %v6897_v58, %v6585_v47 }
0x172e   :  { %v6899_v2 = vpop.f32.mrf.mxu1 }
0x172f   :  { %v18721_v10 = vadd.f32 %v6899_v2, %v6587_v39 }
0x1730   :  { %v6903_v0 = vpop.f32.mrf.mxu1 }
0x1731   :  { %6976 = vmatprep.mubr.f32.mxu1 %v18721_v10  ;;  %v18732_v3 = vadd.f32 %v6903_v0, %v6591_v14 }
0x1732   :  { %v6905_v18 = vpop.f32.mrf.mxu1  ;;  %6977 = vmatmul.mubr.f32.vlgmr.msra.gmra.mxu1 %v18723_v56 }
0x1733   :  { %v18727_v49 = vadd.f32 %v6905_v18, %v6593_v12  ;;  %7025 = vmatpush1.msra.mxu1 %v15316_v33  ;;  %v15040_v18 = vld [vmem:[%s20211_s18 + $0x38] sm:$0xff]   ;;  %v15041_v33 = vld [vmem:[%s20211_s18 + $0xf0] sm:$0xff]  }
0x1734   :  { %7026 = vmatprep.subr.mxu1 %v15317_v32  ;;  %v15043_v32 = vld [vmem:[%s20211_s18 + $0xb0] sm:$0xff]  }
0x1735   :  { %6981 = vmatprep.mubr.f32.mxu1 %v18727_v49  ;;  %7027 = vmatpush1.msra.mxu1 %v15318_v52  ;;  %v15044_v52 = vld [vmem:[%s20211_s18 + $0x30] sm:$0xff]  }
0x1736   :  { %6982 = vmatmul.mubr.f32.gmra.mxu1 %v18732_v3  ;;  %7028 = vmatprep.subr.mxu1 %v15319_v37  ;;  %v15045_v37 = vld [vmem:[%s20211_s18 + $0xe8] sm:$0xff]  }
0x1737   :  { %7029 = vmatpush1.msra.mxu1 %v15320_v57  ;;  %7064 = vmatprep.mubr.f32.mxu1 %v20271_v9  ;;  %v15046_v57 = vld [vmem:[%s20211_s18 + $0x68] sm:$0xff]  }
0x1738   :  { %7030 = vmatprep.subr.mxu1 %v15321_v28  ;;  %v15047_v28 = vld [vmem:[%s20211_s18 + $0xa8] sm:$0xff]  }
0x1739   :  { %7031 = vmatpush1.msra.mxu1 %v15322_v59  ;;  %v15048_v59 = vld [vmem:[%s20211_s18 + $0x28] sm:$0xff]  }
0x173a   :  { %13030 = vmatprep.subr.mxu1 %v18173_v44  ;;  %v15323_v44 = vld [vmem:[%s20270_s0 + $0x90] sm:$0xff] }
0x17f2   :  { %v13024_v63 = vpop.f32.mrf.mxu1 }
0x17f4   :  { %v13025_v7 = vpop.f32.mrf.mxu1 }
0x17f5   :  { %v13026_v55 = vadd.f32 %v13025_v7, %v13024_v63  ;;  %v15049_v63 = vld [vmem:[%s20211_s18 + $0xe0] sm:$0xff]  }
0x17f6   :  { %v13027_v51 = vpop.f32.mrf.mxu1  ;;  %v15050_v7 = vld [vmem:[%s20211_s18 + $0x60] sm:$0xff]  }
0x17f7   :  { %v6987_v42 = vsel %vm1322_vm1, %v13026_v55, 0.0  ;;  %v15052_v55 = vld [vmem:[%s20211_s18 + $0x20] sm:$0xff]  }
0x17f8   :  { %v13028_v53 = vpop.f32.mrf.mxu1 }
0x17f9   :  { %v13029_v41 = vadd.f32 %v13028_v53, %v13027_v51  ;;  %v15051_v51 = vld [vmem:[%s20211_s18 + $0xa0] sm:$0xff]   ;;  %v15053_v53 = vld [vmem:[%s20211_s18 + $0xd8] sm:$0xff]  }
0x17fb   :  { %v6988_v24 = vsel %vm1322_vm1, %v13029_v41, 0.0  ;;  %v15054_v41 = vld [vmem:[%s20211_s18 + $0x58] sm:$0xff]  }
0x17fc   :  { %v6989_v40 = vadd.f32 %v6988_v24, %v6987_v42  ;;  %v15055_v42 = vld [vmem:[%s20211_s18 + $0x98] sm:$0xff]  }
0x17fd   :  { %v15056_v24 = vld [vmem:[%s20211_s18 + $0x18] sm:$0xff]  }
0x17fe   :  { %v6990_v38 = vrot.slane %v6989_v40, 4 }
0x1800   :  { %v6991_v6 = vadd.f32 %v6990_v38, %v6989_v40  ;;  %v15057_v40 = vld [vmem:[%s20211_s18 + $0xd0] sm:$0xff]  }
0x1801   :  { %v15058_v38 = vld [vmem:[%s20211_s18 + $0x50] sm:$0xff]  }
0x1802   :  { %v6992_v30 = vrot.slane %v6991_v6, 2 }
0x1804   :  { %v6993_v31 = vadd.f32 %v6992_v30, %v6991_v6  ;;  %v15059_v6 = vld [vmem:[%s20211_s18 + $0x90] sm:$0xff]  }
0x1805   :  { %v15060_v30 = vld [vmem:[%s20211_s18 + $0x10] sm:$0xff]  }
0x1806   :  { %v6994_v1 = vrot.slane %v6993_v31, 1 }
0x1808   :  { %v6995_v46 = vadd.f32 %v6994_v1, %v6993_v31  ;;  %v15061_v31 = vld [vmem:[%s20211_s18 + $0xc8] sm:$0xff]  }
0x1809   :  { %v15062_v1 = vld [vmem:[%s20211_s18 + $0x48] sm:$0xff]  }
0x180a   :  { %v6996_v5 = vmul.f32 0.0078125, %v6995_v46  ;;  %v15063_v46 = vld [vmem:[%s20211_s18 + $0x88] sm:$0xff]  }
0x180c   :  { %12363 = vmatmul.mubr.msk.f32.vlgmr.msra.gmra.mxu1 %vm1322_vm1, %v6996_v5  ;;  %v15064_v5 = vld [vmem:[%s20211_s18 + $0x8] sm:$0xff]  }
0x180d   :  { %13031 = vmatpush3.msra.mxu1 %v18182_v8  ;;  %v15324_v8 = vld [vmem:[%s20270_s0 + $0x10] sm:$0xff] }
0x180e   :  { %13032 = vmatprep.subr.mxu1 %v18188_v48  ;;  %v15325_v48 = vld [vmem:[%s20270_s0 + $0x88] sm:$0xff] }
0x180f   :  { %13033 = vmatpush3.msra.mxu1 %v18194_v29  ;;  %v15326_v29 = vld [vmem:[%s20270_s0 + $0x8] sm:$0xff] }
0x1810   :  { %13034 = vmatprep.subr.mxu1 %v18200_v27  ;;  %v15327_v27 = vld [vmem:[%s20270_s0 + $0x80] sm:$0xff] }
0x1811   :  { %13035 = vmatpush3.msra.mxu1 %v18206_v16  ;;  %v15328_v16 = vld [vmem:[%s20270_s0] sm:$0xff] }
0x1812   :  { %13036 = vmatprep.subr.mxu1 %v18212_v17 }
0x1813   :  { %13037 = vmatpush3.msra.mxu1 %v18218_v60 }
0x1814   :  { %13038 = vmatprep.subr.mxu1 %v18224_v19 }
0x1815   :  { %13039 = vmatpush3.msra.mxu1 %v18230_v11 }
0x1816   :  { %13040 = vmatprep.subr.mxu1 %v18236_v34 }
0x1817   :  { %13041 = vmatpush3.msra.mxu1 %v18242_v54 }
0x1818   :  { %13042 = vmatprep.subr.mxu1 %v18248_v35 }
0x1819   :  { %13043 = vmatpush3.msra.mxu1 %v18254_v36 }
0x181a   :  { %13044 = vmatprep.subr.mxu1 %v18260_v45 }
0x181b   :  { %13045 = vmatpush3.msra.mxu1 %v18266_v61 }
0x181c   :  { %13046 = vmatprep.subr.mxu1 %v18272_v20 }
0x181d   :  { %13047 = vmatpush3.msra.mxu1 %v18278_v21 }
0x181e   :  { %13048 = vmatprep.subr.mxu1 %v18284_v22  ;;  %v15037_v22 = vld [vmem:[%s20211_s18 + $0xf8] sm:$0xff]  }
0x181f   :  { %13049 = vmatpush3.msra.mxu1 %v18290_v13  ;;  %v15038_v13 = vld [vmem:[%s20211_s18 + $0x78] sm:$0xff]  }
0x1820   :  { %13050 = vmatprep.subr.mxu1 %v18296_v15  ;;  %v15039_v15 = vld [vmem:[%s20211_s18 + $0xb8] sm:$0xff]   ;;  %13068 = vmatprep.subr.bf16.mxu0 %v15038_v13 }
0x1821   :  { %13051 = vmatpush3.msra.mxu1 %v18302_v4 }
0x1822   :  { %13052 = vmatprep.subr.mxu1 %v18308_v62 }
0x1823   :  { %13053 = vmatpush3.msra.mxu1 %v18314_v43 }
0x1824   :  { %13054 = vmatprep.subr.mxu1 %v18320_v50 }
0x1825   :  { %13055 = vmatpush3.msra.mxu1 %v18326_v26 }
0x1826   :  { %13056 = vmatprep.subr.mxu1 %v15323_v44  ;;  %v15065_v44 = vld [vmem:[%s20211_s18 + $0xc0] sm:$0xff]  }
0x1827   :  { %13057 = vmatpush3.msra.mxu1 %v15324_v8  ;;  %v15066_v8 = vld [vmem:[%s20211_s18 + $0x40] sm:$0xff]  }
0x1828   :  { %13058 = vmatprep.subr.mxu1 %v15325_v48  ;;  %v15067_v48 = vld [vmem:[%s20211_s18 + $0x80] sm:$0xff]  }
0x1829   :  { %13059 = vmatpush3.msra.mxu1 %v15326_v29  ;;  %v15068_v29 = vld [vmem:[%s20211_s18] sm:$0xff]  }
0x182a   :  { %13060 = vmatprep.subr.mxu1 %v15327_v27  ;;  %v15069_v27 = vld [vmem:[%s20211_s18 + $0x178] sm:$0xff]  }
0x182b   :  { %13061 = vmatpush3.msra.mxu1 %v15328_v16 }
0x182c   :  { %13090 = vmatprep.subr.bf16.mxu1 %v15037_v22 }
0x18cc   :  { %v7066_v17 = vpop.f32.mrf.mxu1 }
0x18cd   :  { %v7074_v60 = vrot.slane %v7066_v17, %v15741_v25 }
0x18ce   :  { %v7068_v19 = vpop.f32.mrf.mxu1 }
0x18cf   :  { %v7078_v11 = vrot.slane %v7068_v19, %v15741_v25  ;;  %v18805_v34 = vsub.f32 %v18723_v56, %v7074_v60  ;;  %v18816_v45 = vsub.f32 %v18732_v3, %v7074_v60  ;;  %v15042_v3 = vld [vmem:[%s20211_s18 + $0x70] sm:$0xff]  }
0x18d1   :  { %v18808_v54 = vsub.f32 %v18721_v10, %v7078_v11  ;;  %v18811_v35 = vsub.f32 %v18727_v49, %v7078_v11  ;;  %v7083_v61 = vmul.f32 %v18805_v34, %v18805_v34  ;;  %v7085_v21 = vmul.f32 %v18816_v45, %v18816_v45 }
0x18d3   :  { %v7084_v36 = vmul.f32 %v18808_v54, %v18808_v54  ;;  %v7086_v20 = vmul.f32 %v18811_v35, %v18811_v35 }
0x18d5   :  { %7151 = vmatprep.mubr.f32.mxu1 %v7084_v36 }
0x18d6   :  { %7152 = vmatmul.mubr.f32.vlgmr.msra.gmra.mxu1 %v7083_v61 }
0x18d7   :  { %7156 = vmatprep.mubr.f32.mxu1 %v7086_v20  ;;  %13091 = vmatpush3.bf16.msra.mxu1 %v15039_v15 }
0x18d8   :  { %13092 = vmatprep.subr.bf16.mxu1 %v15041_v33  ;;  %v15073_v33 = vld [vmem:[%s20211_s18 + $0x168] sm:$0xff]  }
0x18da   :  { %7157 = vmatmul.mubr.f32.gmra.mxu1 %v7085_v21 }
0x18db   :  { %13093 = vmatpush3.bf16.msra.mxu1 %v15043_v32  ;;  %v15075_v32 = vld [vmem:[%s20211_s18 + $0x160] sm:$0xff]  }
0x18dc   :  { %13094 = vmatprep.subr.bf16.mxu1 %v15045_v37  ;;  %v15077_v37 = vld [vmem:[%s20211_s18 + $0x158] sm:$0xff]  }
0x18df   :  { %13095 = vmatpush3.bf16.msra.mxu1 %v15047_v28  ;;  %v15079_v28 = vld [vmem:[%s20211_s18 + $0x150] sm:$0xff]  }
0x18e0   :  { %13096 = vmatprep.subr.bf16.mxu1 %v15049_v63  ;;  %v15081_v63 = vld [vmem:[%s20211_s18 + $0x148] sm:$0xff]  }
0x18e3   :  { %13097 = vmatpush3.bf16.msra.mxu1 %v15051_v51  ;;  %v15083_v51 = vld [vmem:[%s20211_s18 + $0x140] sm:$0xff]  }
0x18e4   :  { %13098 = vmatprep.subr.bf16.mxu1 %v15053_v53 }
0x18e7   :  { %13099 = vmatpush3.bf16.msra.mxu1 %v15055_v42 }
0x18e8   :  { %13100 = vmatprep.subr.bf16.mxu1 %v15057_v40 }
0x18eb   :  { %13101 = vmatpush3.bf16.msra.mxu1 %v15059_v6 }
0x18ec   :  { %13102 = vmatprep.subr.bf16.mxu1 %v15061_v31 }
0x18ef   :  { %13103 = vmatpush3.bf16.msra.mxu1 %v15063_v46  ;;  %v12429_v46 = vld [vmem:[%s20212_s13 + $0x8] sm:$0xff] }
0x18f0   :  { %13104 = vmatprep.subr.bf16.mxu1 %v15065_v44 }
0x18f3   :  { %13105 = vmatpush3.bf16.msra.mxu1 %v15067_v48 }
0x18f4   :  { %13118 = vmatprep.subr.bf16.mxu1 %v15069_v27 }
0x1996   :  { %v13062_v4 = vpop.f32.mrf.mxu1 }
0x1998   :  { %v13063_v62 = vpop.f32.mrf.mxu1 }
0x1999   :  { %v13064_v50 = vadd.f32 %v13063_v62, %v13062_v4  ;;  %v20300_v4 = vld [vmem:[#allocation3_spill] sm:$0xff] }
0x199a   :  { %v13065_v43 = vpop.f32.mrf.mxu1  ;;  %v20301_v62 = vmax.f32 %v20300_v4, 0.0  ;;  %v19082_v4 = vld [vmem:[%s20213_s16 + $0x38] sm:$0xff] }
0x199b   :  { %v7162_v58 = vsel %vm1322_vm1, %v13064_v50, 0.0  ;;  %v20302_v50 = vld [vmem:[#allocation2_spill] sm:$0xff] }
0x199c   :  { %v13066_v26 = vpop.f32.mrf.mxu1 }
0x199d   :  { %v13067_v23 = vadd.f32 %v13066_v26, %v13065_v43  ;;  %v20303_v26 = vmax.f32 %v20302_v50, 0.0  ;;  %v19105_v50 = vld [vmem:[%s20213_s16 + $0x20] sm:$0xff] }
0x199f   :  { %v7163_v39 = vsel %vm1322_vm1, %v13067_v23, 0.0 }
0x19a0   :  { %v7164_v47 = vadd.f32 %v7163_v39, %v7162_v58  ;;  %v20304_v58 = vld [vmem:[#allocation4_spill] sm:$0xff] }
0x19a1   :  { %v20305_v39 = vmax.f32 %v20304_v58, 0.0  ;;  %v19126_v58 = vld [vmem:[%s20213_s16 + $0x8] sm:$0xff] }
0x19a2   :  { %v7165_v2 = vrot.slane %v7164_v47, 4 }
0x19a4   :  { %v7166_v10 = vadd.f32 %v7165_v2, %v7164_v47  ;;  %v20306_v2 = vld [vmem:[#allocation5_spill] sm:$0xff] }
0x19a6   :  { %v7167_v56 = vrot.slane %v7166_v10, 2 }
0x19a8   :  { %v7168_v0 = vadd.f32 %v7167_v56, %v7166_v10  ;;  %v20307_v10 = vmax.f32 %v20306_v2, 0.0 }
0x19aa   :  { %v7169_v12 = vrot.slane %v7168_v0, 1 }
0x19ac   :  { %v7170_v14 = vadd.f32 %v7169_v12, %v7168_v0 }
0x19ae   :  { %v7171_v49 = vmul.f32 0.0078125, %v7170_v14 }
0x19b0   :  { %12364 = vmatmul.mubr.msk.f32.vlgmr.msra.gmra.mxu0 %vm1322_vm1, %v7171_v49  ;;  %v15072_v49 = vld [vmem:[%s20211_s18 + $0x130] sm:$0xff]  }
0x19b1   :  { %13069 = vmatpush3.bf16.msra.mxu0 %v15040_v18  ;;  %v15071_v18 = vld [vmem:[%s20211_s18 + $0x170] sm:$0xff]  }
0x19b2   :  { %13070 = vmatprep.subr.bf16.mxu0 %v15042_v3  ;;  %v15074_v3 = vld [vmem:[%s20211_s18 + $0x128] sm:$0xff]  }
0x19b5   :  { %13071 = vmatpush3.bf16.msra.mxu0 %v15044_v52  ;;  %v15076_v52 = vld [vmem:[%s20211_s18 + $0x120] sm:$0xff]  }
0x19b6   :  { %13072 = vmatprep.subr.bf16.mxu0 %v15046_v57  ;;  %v15078_v57 = vld [vmem:[%s20211_s18 + $0x118] sm:$0xff]  }
0x19b9   :  { %13073 = vmatpush3.bf16.msra.mxu0 %v15048_v59  ;;  %v15080_v59 = vld [vmem:[%s20211_s18 + $0x110] sm:$0xff]  }
0x19ba   :  { %13074 = vmatprep.subr.bf16.mxu0 %v15050_v7  ;;  %v15082_v7 = vld [vmem:[%s20211_s18 + $0x108] sm:$0xff]  }
0x19bd   :  { %13075 = vmatpush3.bf16.msra.mxu0 %v15052_v55  ;;  %v15084_v55 = vld [vmem:[%s20211_s18 + $0x100] sm:$0xff]  }
0x19be   :  { %13076 = vmatprep.subr.bf16.mxu0 %v15054_v41 }
0x19c1   :  { %13077 = vmatpush3.bf16.msra.mxu0 %v15056_v24 }
0x19c2   :  { %13078 = vmatprep.subr.bf16.mxu0 %v15058_v38 }
0x19c5   :  { %13079 = vmatpush3.bf16.msra.mxu0 %v15060_v30 }
0x19c6   :  { %13080 = vmatprep.subr.bf16.mxu0 %v15062_v1 }
0x19c9   :  { %13081 = vmatpush3.bf16.msra.mxu0 %v15064_v5 }
0x19ca   :  { %13082 = vmatprep.subr.bf16.mxu0 %v15066_v8  ;;  %v7459_v8 = vld [vmem:[%s20212_s13] sm:$0xff] }
0x19cd   :  { %13083 = vmatpush3.bf16.msra.mxu0 %v15068_v29 }
0x19ce   :  { %13487 = vmatprep.subr.mxu0 %v20271_v9 }
0x1a70   :  { %v7241_v16 = vpop.f32.mrf.mxu0 }
0x1a71   :  { %v7242_v17 = vadd.f32 1e-05, %v7241_v16 }
0x1a72   :  { %v7243_v60 = vpop.f32.mrf.mxu0 }
0x1a73   :  { %15189 = vrsqrt.f32 %v7242_v17  ;;  %v7244_v19 = vadd.f32 1e-05, %v7243_v60 }
0x1a75   :  { %15191 = vrsqrt.f32 %v7244_v19  ;;  %v12480_v19 = vld [vmem:[%s20212_s13 + $0x10] sm:$0xff] }
0x1a80   :  { %v15190_v11 = vpop.eup %15189 }
0x1a81   :  { %v7251_v36 = vrot.slane %v15190_v11, %v15741_v25  ;;  %v19024_v11 = vld [vmem:[%s20213_s16 + $0x78] sm:$0xff] }
0x1a82   :  { %v15192_v61 = vpop.eup %15191 }
0x1a83   :  { %v7255_v20 = vrot.slane %v15192_v61, %v15741_v25  ;;  %v7256_v21 = vmul.f32 %v7251_v36, %v18805_v34  ;;  %v7258_v22 = vmul.f32 %v7251_v36, %v18816_v45  ;;  %v19031_v36 = vld [vmem:[%s20213_s16 + $0x70] sm:$0xff]  ;;  %v19040_v61 = vld [vmem:[%s20213_s16 + $0x68] sm:$0xff] }
0x1a85   :  { %v7257_v13 = vmul.f32 %v7255_v20, %v18808_v54  ;;  %v7259_v15 = vmul.f32 %v7255_v20, %v18811_v35  ;;  %v7260_v43 = vadd.f32 %v7256_v21, %v20301_v62  ;;  %v7262_v23 = vadd.f32 %v7258_v22, %v20303_v26  ;;  %v15070_v54 = vld [vmem:[%s20211_s18 + $0x138] sm:$0xff]   ;;  %v19047_v20 = vld [vmem:[%s20213_s16 + $0x60] sm:$0xff]  ;;  %v19061_v22 = vld [vmem:[%s20213_s16 + $0x50] sm:$0xff] }
0x1a86   :  { %v19054_v21 = vld [vmem:[%s20213_s16 + $0x58] sm:$0xff]  ;;  %v19091_v62 = vld [vmem:[%s20213_s16 + $0x30] sm:$0xff] }
0x1a87   :  { %v7261_v47 = vadd.f32 %v7257_v13, %v20305_v39  ;;  %v7263_v56 = vadd.f32 %v7259_v15, %v20307_v10  ;;  %v7264_v0 = vmax.f32 %v7260_v43, 0.0  ;;  %v7266_v34 = vmax.f32 %v7262_v23, 0.0  ;;  %v19068_v13 = vld [vmem:[%s20213_s16 + $0x48] sm:$0xff]  ;;  %v19075_v15 = vld [vmem:[%s20213_s16 + $0x40] sm:$0xff]  ;;  %v19110_v26 = vld [vmem:[%s20213_s16 + $0x18] sm:$0xff] }
0x1a88   :  { %v19098_v43 = vld [vmem:[%s20213_s16 + $0x28] sm:$0xff]  ;;  %v19117_v23 = vld [vmem:[%s20213_s16 + $0x10] sm:$0xff]  ;;  %v19133_v39 = vld [vmem:[%s20213_s16] sm:$0xff] }
0x1a89   :  { %v7265_v12 = vmax.f32 %v7261_v47, 0.0  ;;  %v7267_v45 = vmax.f32 %v7263_v56, 0.0  ;;  %v18946_v35 = vpack.c.bf16 %v7266_v34, %v7264_v0 }
0x1a8b   :  { %v18941_v14 = vpack.c.bf16 %v7267_v45, %v7265_v12 }
0x1a8d   :  { %7450 = vmatprep.mubr.bf16.mxu0 %v18941_v14  ;;  %7621 = vmatprep.mubr.bf16.mxu1 %v18941_v14 }
0x1a8e   :  { %7451 = vmatmul.mubr.bf16.vlgmr.msra.gmra.mxu0 %v18946_v35  ;;  %7622 = vmatmul.mubr.bf16.vlgmr.msra.gmra.mxu1 %v18946_v35 }
0x1a8f   :  { %13119 = vmatpush3.bf16.msra.mxu1 %v15070_v54  ;;  %7939 = vmatprep.mubr.bf16.mxu1 %v18941_v14  ;;  %v19177_v54 = vld [vmem:[%s20214_s17 + $0x18] sm:$0xff] }
0x1a90   :  { %13120 = vmatprep.subr.bf16.mxu1 %v15071_v18  ;;  %13491 = vmatprep.mubr.msk.f32.mxu0 %vm15370_vm3, %v20271_v9  ;;  %v19184_v18 = vld [vmem:[%s20214_s17 + $0x10] sm:$0xff] }
0x1a93   :  { %13121 = vmatpush3.bf16.msra.mxu1 %v15072_v49  ;;  %v19191_v49 = vld [vmem:[%s20214_s17 + $0x8] sm:$0xff] }
0x1a94   :  { %13122 = vmatprep.subr.bf16.mxu1 %v15073_v33  ;;  %v19198_v33 = vld [vmem:[%s20214_s17] sm:$0xff] }
0x1a97   :  { %13123 = vmatpush3.bf16.msra.mxu1 %v15074_v3 }
0x1a98   :  { %13124 = vmatprep.subr.bf16.mxu1 %v15075_v32 }
0x1a9b   :  { %13125 = vmatpush3.bf16.msra.mxu1 %v15076_v52 }
0x1a9c   :  { %13126 = vmatprep.subr.bf16.mxu1 %v15077_v37 }
0x1a9f   :  { %13127 = vmatpush3.bf16.msra.mxu1 %v15078_v57 }
0x1aa0   :  { %13128 = vmatprep.subr.bf16.mxu1 %v15079_v28 }
0x1aa3   :  { %13129 = vmatpush3.bf16.msra.mxu1 %v15080_v59 }
0x1aa4   :  { %13130 = vmatprep.subr.bf16.mxu1 %v15081_v63 }
0x1aa7   :  { %13131 = vmatpush3.bf16.msra.mxu1 %v15082_v7 }
0x1aa8   :  { %13132 = vmatprep.subr.bf16.mxu1 %v15083_v51 }
0x1aab   :  { %13133 = vmatpush3.bf16.msra.mxu1 %v15084_v55 }
0x1aac   :  { %13543 = vmatprep.subr.mxu1 %v20271_v9 }
0x1aae   :  { %7940 = vmatmul.mubr.bf16.vlgmr.msra.gmra.mxu1 %v18946_v35 }
0x1aaf   :  { %13551 = vmatprep.mubr.msk.f32.mxu1 %vm15370_vm3, %v20271_v9  ;;  %13544 = vmatpush3.msra.mxu1 %v19177_v54 }
0x1ab0   :  { %13545 = vmatprep.subr.mxu1 %v20271_v9 }
0x1ab1   :  { %13546 = vmatpush3.msra.mxu1 %v19184_v18 }
0x1ab2   :  { %13547 = vmatprep.subr.mxu1 %v20271_v9 }
0x1ab3   :  { %13548 = vmatpush3.msra.mxu1 %v19191_v49 }
0x1ab4   :  { %13549 = vmatprep.subr.mxu1 %v20271_v9 }
0x1ab5   :  { %13550 = vmatpush3.msra.mxu1 %v19198_v33 }
0x1ab6   :  { %13589 = vmatprep.subr.mxu1 %v20271_v9 }
0x1b4e   :  { %v13084_v53 = vpop.f32.mrf.mxu0  ;;  %v13106_v41 = vpop.f32.mrf.mxu1 }
0x1b50   :  { %v13085_v42 = vpop.f32.mrf.mxu0  ;;  %v13107_v24 = vpop.f32.mrf.mxu1 }
0x1b51   :  { %v13108_v1 = vadd.f32 %v13107_v24, %v13106_v41  ;;  %v13086_v44 = vadd.f32 %v13085_v42, %v13084_v53 }
0x1b52   :  { %v13087_v40 = vpop.f32.mrf.mxu0  ;;  %v13109_v38 = vpop.f32.mrf.mxu1 }
0x1b54   :  { %v13110_v6 = vpop.f32.mrf.mxu1  ;;  %v13088_v31 = vpop.f32.mrf.mxu0 }
0x1b55   :  { %v13111_v30 = vadd.f32 %v13110_v6, %v13109_v38  ;;  %v13089_v5 = vadd.f32 %v13088_v31, %v13087_v40  ;;  %v15085_v40 = vld [vmem:[%s20215_s19 + $0x78] sm:$0xff]  }
0x1b57   :  { %13488 = vmatpush3.msra.mxu0 %v13111_v30 }
0x1b58   :  { %13489 = vmatprep.subr.mxu0 %v20271_v9 }
0x1b59   :  { %13490 = vmatpush3.msra.mxu0 %v13108_v1 }
0x1b5a   :  { %13494 = vmatprep.subr.mxu0 %v20271_v9  ;;  %13492 = vmatmul.mubr.msk.f32.vlgmr.msra.gmra.mxu0 %vm3823_vm2, %v12429_v46 }
0x1b5b   :  { %13495 = vmatpush3.msra.mxu0 %v13089_v5  ;;  %13498 = vmatprep.mubr.msk.f32.mxu0 %vm15370_vm3, %v20271_v9 }
0x1b5c   :  { %13496 = vmatprep.subr.mxu0 %v20271_v9 }
0x1b5d   :  { %13497 = vmatpush3.msra.mxu0 %v13086_v44 }
0x1b5e   :  { %13499 = vmatmul.mubr.msk.f32.vlgmr.msra.gmra.mxu0 %vm3823_vm2, %v7459_v8  ;;  %13501 = vmatprep.subr.mxu0 %v20271_v9 }
0x1b5f   :  { %13505 = vmatprep.mubr.msk.f32.mxu0 %vm15370_vm3, %v20271_v9 }
0x1b6e   :  { %v13134_v48 = vpop.f32.mrf.mxu1 }
0x1b70   :  { %v13135_v29 = vpop.f32.mrf.mxu1 }
0x1b71   :  { %v13136_v60 = vadd.f32 %v13135_v29, %v13134_v48  ;;  %v15086_v48 = vld [vmem:[%s20215_s19 + $0x38] sm:$0xff]  }
0x1b72   :  { %v13137_v27 = vpop.f32.mrf.mxu1 }
0x1b74   :  { %v13138_v16 = vpop.f32.mrf.mxu1 }
0x1b75   :  { %v13139_v17 = vadd.f32 %v13138_v16, %v13137_v27  ;;  %v15087_v27 = vld [vmem:[%s20215_s19 + $0x70] sm:$0xff]  }
0x1b76   :  { %v15088_v16 = vld [vmem:[%s20215_s19 + $0x30] sm:$0xff]  }
0x1b77   :  { %13502 = vmatpush3.msra.mxu0 %v13139_v17  ;;  %v15089_v17 = vld [vmem:[%s20215_s19 + $0x68] sm:$0xff]  }
0x1b78   :  { %13503 = vmatprep.subr.mxu0 %v20271_v9 }
0x1b79   :  { %13504 = vmatpush3.msra.mxu0 %v13136_v60  ;;  %v15090_v60 = vld [vmem:[%s20215_s19 + $0x28] sm:$0xff]  }
0x1b7a   :  { %13506 = vmatmul.mubr.msk.f32.vlgmr.msra.gmra.mxu0 %vm3823_vm2, %v12480_v19  ;;  %13508 = vmatprep.subr.mxu0 %v20271_v9  ;;  %v15091_v19 = vld [vmem:[%s20215_s19 + $0x60] sm:$0xff]  }
0x1b7b   :  { %13509 = vmatpush3.msra.mxu0 %v19024_v11  ;;  %13540 = vmatprep.mubr.msk.f32.mxu0 %vm15370_vm3, %v20271_v9 }
0x1b7c   :  { %13510 = vmatprep.subr.mxu0 %v20271_v9 }
0x1b7d   :  { %13511 = vmatpush3.msra.mxu0 %v19031_v36 }
0x1b7e   :  { %13512 = vmatprep.subr.mxu0 %v20271_v9 }
0x1b7f   :  { %13513 = vmatpush3.msra.mxu0 %v19040_v61 }
0x1b80   :  { %13514 = vmatprep.subr.mxu0 %v20271_v9 }
0x1b81   :  { %13515 = vmatpush3.msra.mxu0 %v19047_v20 }
0x1b82   :  { %13516 = vmatprep.subr.mxu0 %v20271_v9 }
0x1b83   :  { %13517 = vmatpush3.msra.mxu0 %v19054_v21 }
0x1b84   :  { %13518 = vmatprep.subr.mxu0 %v20271_v9 }
0x1b85   :  { %13519 = vmatpush3.msra.mxu0 %v19061_v22 }
0x1b86   :  { %13520 = vmatprep.subr.mxu0 %v20271_v9 }
0x1b87   :  { %13521 = vmatpush3.msra.mxu0 %v19068_v13 }
0x1b88   :  { %13522 = vmatprep.subr.mxu0 %v20271_v9 }
0x1b89   :  { %13523 = vmatpush3.msra.mxu0 %v19075_v15 }
0x1b8a   :  { %13524 = vmatprep.subr.mxu0 %v20271_v9 }
0x1b8b   :  { %13525 = vmatpush3.msra.mxu0 %v19082_v4 }
0x1b8c   :  { %13526 = vmatprep.subr.mxu0 %v20271_v9 }
0x1b8d   :  { %13527 = vmatpush3.msra.mxu0 %v19091_v62 }
0x1b8e   :  { %13528 = vmatprep.subr.mxu0 %v20271_v9 }
0x1b8f   :  { %13529 = vmatpush3.msra.mxu0 %v19098_v43 }
0x1b90   :  { %13530 = vmatprep.subr.mxu0 %v20271_v9 }
0x1b91   :  { %13531 = vmatpush3.msra.mxu0 %v19105_v50 }
0x1b92   :  { %13532 = vmatprep.subr.mxu0 %v20271_v9 }
0x1b93   :  { %13533 = vmatpush3.msra.mxu0 %v19110_v26 }
0x1b94   :  { %13534 = vmatprep.subr.mxu0 %v20271_v9 }
0x1b95   :  { %13535 = vmatpush3.msra.mxu0 %v19117_v23 }
0x1b96   :  { %13536 = vmatprep.subr.mxu0 %v20271_v9 }
0x1b97   :  { %13537 = vmatpush3.msra.mxu0 %v19126_v58 }
0x1b98   :  { %13538 = vmatprep.subr.mxu0 %v20271_v9 }
0x1b99   :  { %13539 = vmatpush3.msra.mxu0 %v19133_v39 }
0x1b9a   :  { %13554 = vmatprep.subr.mxu0 %v20271_v9 }
0x1c1a   :  { %v7701_v47 = vpop.f32.mrf.mxu0 }
0x1c1c   :  { %v13493_v2 = vpop.f32.mrf.mxu0 }
0x1c1d   :  { %v15094_v2 = vld [vmem:[%s20215_s19 + $0x18] sm:$0xff]  }
0x1c1e   :  { %v7774_v10 = vpop.f32.mrf.mxu0 }
0x1c1f   :  { %v7775_v0 = vadd.f32 %v7774_v10, %v7701_v47  ;;  %v15093_v47 = vld [vmem:[%s20215_s19 + $0x58] sm:$0xff]   ;;  %v15095_v10 = vld [vmem:[%s20215_s19 + $0x50] sm:$0xff]  }
0x1c20   :  { %v13500_v56 = vpop.f32.mrf.mxu0 }
0x1c21   :  { %v15096_v56 = vld [vmem:[%s20215_s19 + $0x10] sm:$0xff]  }
0x1c3a   :  { %v8019_v34 = vpop.f32.mrf.mxu0 }
0x1c3b   :  { %v19137_v12 = vadd.f32 %v8019_v34, %v7775_v0  ;;  %v15097_v0 = vld [vmem:[%s20215_s19 + $0x48] sm:$0xff]  }
0x1c3c   :  { %v13507_v45 = vpop.f32.mrf.mxu0  ;;  %v15098_v34 = vld [vmem:[%s20215_s19 + $0x8] sm:$0xff]  }
0x1c3d   :  { %13541 = vmatmul.mubr.f32.vlgmr.msra.gmra.mxu0 %v19137_v12  ;;  %v15100_v45 = vld [vmem:[%s20215_s19] sm:$0xff]  }
0x1c3e   :  { %13555 = vmatpush3.msra.mxu0 %v19024_v11  ;;  %13586 = vmatprep.mubr.msk.f32.mxu0 %vm15370_vm3, %v20271_v9 }
0x1c3f   :  { %13556 = vmatprep.subr.mxu0 %v20271_v9 }
0x1c40   :  { %13557 = vmatpush3.msra.mxu0 %v19031_v36 }
0x1c41   :  { %13558 = vmatprep.subr.mxu0 %v20271_v9 }
0x1c42   :  { %13559 = vmatpush3.msra.mxu0 %v19040_v61 }
0x1c43   :  { %13560 = vmatprep.subr.mxu0 %v20271_v9 }
0x1c44   :  { %13561 = vmatpush3.msra.mxu0 %v19047_v20 }
0x1c45   :  { %13562 = vmatprep.subr.mxu0 %v20271_v9 }
0x1c46   :  { %13563 = vmatpush3.msra.mxu0 %v19054_v21 }
0x1c47   :  { %13564 = vmatprep.subr.mxu0 %v20271_v9 }
0x1c48   :  { %13565 = vmatpush3.msra.mxu0 %v19061_v22 }
0x1c49   :  { %13566 = vmatprep.subr.mxu0 %v20271_v9 }
0x1c4a   :  { %13567 = vmatpush3.msra.mxu0 %v19068_v13 }
0x1c4b   :  { %13568 = vmatprep.subr.mxu0 %v20271_v9 }
0x1c4c   :  { %13569 = vmatpush3.msra.mxu0 %v19075_v15 }
0x1c4d   :  { %13570 = vmatprep.subr.mxu0 %v20271_v9 }
0x1c4e   :  { %13571 = vmatpush3.msra.mxu0 %v19082_v4 }
0x1c4f   :  { %13572 = vmatprep.subr.mxu0 %v20271_v9 }
0x1c50   :  { %13573 = vmatpush3.msra.mxu0 %v19091_v62 }
0x1c51   :  { %13574 = vmatprep.subr.mxu0 %v20271_v9 }
0x1c52   :  { %13575 = vmatpush3.msra.mxu0 %v19098_v43 }
0x1c53   :  { %13576 = vmatprep.subr.mxu0 %v20271_v9 }
0x1c54   :  { %13577 = vmatpush3.msra.mxu0 %v19105_v50 }
0x1c55   :  { %13578 = vmatprep.subr.mxu0 %v20271_v9 }
0x1c56   :  { %13579 = vmatpush3.msra.mxu0 %v19110_v26 }
0x1c57   :  { %13580 = vmatprep.subr.mxu0 %v20271_v9 }
0x1c58   :  { %13581 = vmatpush3.msra.mxu0 %v19117_v23 }
0x1c59   :  { %13582 = vmatprep.subr.mxu0 %v20271_v9 }
0x1c5a   :  { %13583 = vmatpush3.msra.mxu0 %v19126_v58 }
0x1c5b   :  { %13584 = vmatprep.subr.mxu0 %v20271_v9 }
0x1c5c   :  { %13585 = vmatpush3.msra.mxu0 %v19133_v39 }
0x1c5d   :  { %13600 = vmatprep.subr.mxu0 %v20271_v9 }
0x1cfd   :  { %v8090_v3 = vpop.f32.mrf.mxu0 }
0x1cfe   :  { %v8094_v32 = vsel %vm1322_vm1, %v8090_v3, 0.0 }
0x1cff   :  { %v8095_v52 = vrot.slane %v8094_v32, 4  ;;  %v13542_v37 = vpop.f32.mrf.mxu0 }
0x1d01   :  { %v8096_v57 = vadd.f32 %v8095_v52, %v8094_v32 }
0x1d03   :  { %v8097_v28 = vrot.slane %v8096_v57, 2 }
0x1d05   :  { %v8098_v59 = vadd.f32 %v8097_v28, %v8096_v57 }
0x1d07   :  { %v8099_v63 = vrot.slane %v8098_v59, 1 }
0x1d09   :  { %v8100_v7 = vadd.f32 %v8099_v63, %v8098_v59  ;;  %v8508_v63 = vld [vmem:[%s20216_s14] sm:$0xff] }
0x1d0b   :  { %v8101_v51 = vmul.f32 0.03125, %v8100_v7 }
0x1d0d   :  { %13552 = vmatmul.mubr.msk.f32.vlgmr.msra.gmra.mxu1 %vm1322_vm1, %v8101_v51 }
0x1d0e   :  { %13590 = vmatpush3.msra.mxu1 %v19177_v54  ;;  %13597 = vmatprep.mubr.msk.f32.mxu1 %vm15370_vm3, %v20271_v9 }
0x1d0f   :  { %13591 = vmatprep.subr.mxu1 %v20271_v9 }
0x1d10   :  { %13592 = vmatpush3.msra.mxu1 %v19184_v18 }
0x1d11   :  { %13593 = vmatprep.subr.mxu1 %v20271_v9 }
0x1d12   :  { %13594 = vmatpush3.msra.mxu1 %v19191_v49 }
0x1d13   :  { %13595 = vmatprep.subr.mxu1 %v20271_v9 }
0x1d14   :  { %13596 = vmatpush3.msra.mxu1 %v19198_v33 }
0x1d15   :  { %13187 = vmatprep.subr.bf16.mxu1 %v15085_v40 }
0x1dcd   :  { %v8171_v55 = vpop.f32.mrf.mxu1 }
0x1dce   :  { %v8178_v53 = vrot.slane %v8171_v55, %v15741_v25 }
0x1dcf   :  { %v13553_v41 = vpop.f32.mrf.mxu1 }
0x1dd0   :  { %v19215_v42 = vsub.f32 %v19137_v12, %v8178_v53  ;;  %v15099_v12 = vld [vmem:[%s20215_s19 + $0x40] sm:$0xff]  }
0x1dd2   :  { %v8180_v24 = vmul.f32 %v19215_v42, %v19215_v42 }
0x1dd4   :  { %13587 = vmatmul.mubr.f32.vlgmr.msra.gmra.mxu0 %v8180_v24 }
0x1dd5   :  { %13604 = vmatprep.mubr.msk.f32.mxu0 %vm15370_vm3, %v20271_v9 }
0x1e94   :  { %v8247_v38 = vpop.f32.mrf.mxu0 }
0x1e95   :  { %v8251_v6 = vsel %vm1322_vm1, %v8247_v38, 0.0 }
0x1e96   :  { %v8252_v30 = vrot.slane %v8251_v6, 4  ;;  %v13588_v31 = vpop.f32.mrf.mxu0 }
0x1e98   :  { %v8253_v1 = vadd.f32 %v8252_v30, %v8251_v6 }
0x1e9a   :  { %v8254_v46 = vrot.slane %v8253_v1, 2 }
0x1e9c   :  { %v8255_v5 = vadd.f32 %v8254_v46, %v8253_v1  ;;  %v15101_v46 = vld [vmem:[%s20217_s20 + $0x78] sm:$0xff]  }
0x1e9e   :  { %v8256_v44 = vrot.slane %v8255_v5, 1 }
0x1ea0   :  { %v8257_v8 = vadd.f32 %v8256_v44, %v8255_v5 }
0x1ea2   :  { %v8258_v29 = vmul.f32 0.03125, %v8257_v8  ;;  %v15102_v8 = vld [vmem:[%s20217_s20 + $0x70] sm:$0xff]  }
0x1ea4   :  { %13598 = vmatmul.mubr.msk.f32.vlgmr.msra.gmra.mxu1 %vm1322_vm1, %v8258_v29  ;;  %v15104_v29 = vld [vmem:[%s20217_s20 + $0x60] sm:$0xff]  }
0x1ea5   :  { %13188 = vmatpush3.bf16.msra.mxu1 %v15086_v48  ;;  %8499 = vmatprep.mubr.bf16.mxu1 %v18941_v14  ;;  %v15092_v14 = vld [vmem:[%s20215_s19 + $0x20] sm:$0xff]   ;;  %v15103_v48 = vld [vmem:[%s20217_s20 + $0x68] sm:$0xff]  }
0x1ea6   :  { %13189 = vmatprep.subr.bf16.mxu1 %v15087_v27  ;;  %v15105_v27 = vld [vmem:[%s20217_s20 + $0x58] sm:$0xff]  }
0x1ea9   :  { %13190 = vmatpush3.bf16.msra.mxu1 %v15088_v16 }
0x1eaa   :  { %13191 = vmatprep.subr.bf16.mxu1 %v15089_v17  ;;  %v15106_v17 = vld [vmem:[%s20217_s20 + $0x50] sm:$0xff]  }
0x1ead   :  { %13192 = vmatpush3.bf16.msra.mxu1 %v15090_v60 }
0x1eae   :  { %13193 = vmatprep.subr.bf16.mxu1 %v15091_v19  ;;  %v15107_v19 = vld [vmem:[%s20217_s20 + $0x48] sm:$0xff]  }
0x1eb1   :  { %13194 = vmatpush3.bf16.msra.mxu1 %v15092_v14 }
0x1eb2   :  { %13195 = vmatprep.subr.bf16.mxu1 %v15093_v47  ;;  %v15108_v47 = vld [vmem:[%s20217_s20 + $0x40] sm:$0xff]  }
0x1eb5   :  { %13196 = vmatpush3.bf16.msra.mxu1 %v15094_v2 }
0x1eb6   :  { %13197 = vmatprep.subr.bf16.mxu1 %v15095_v10  ;;  %v15109_v10 = vld [vmem:[%s20217_s20 + $0xb8] sm:$0xff]  }
0x1eb9   :  { %13198 = vmatpush3.bf16.msra.mxu1 %v15096_v56 }
0x1eba   :  { %13199 = vmatprep.subr.bf16.mxu1 %v15097_v0  ;;  %v15111_v0 = vld [vmem:[%s20217_s20 + $0xa8] sm:$0xff]  }
0x1ebd   :  { %13200 = vmatpush3.bf16.msra.mxu1 %v15098_v34  ;;  %v15112_v34 = vld [vmem:[%s20217_s20 + $0xa0] sm:$0xff]  }
0x1ebe   :  { %13201 = vmatprep.subr.bf16.mxu1 %v15099_v12  ;;  %v15113_v12 = vld [vmem:[%s20217_s20 + $0x98] sm:$0xff]  }
0x1ec1   :  { %13202 = vmatpush3.bf16.msra.mxu1 %v15100_v45  ;;  %v15114_v45 = vld [vmem:[%s20217_s20 + $0x90] sm:$0xff]  }
0x1ec2   :  { %13642 = vmatprep.subr.mxu1 %v20271_v9 }
0x1ec4   :  { %8500 = vmatmul.mubr.bf16.vlgmr.msra.gmra.mxu1 %v18946_v35 }
0x1ec5   :  { %13643 = vmatpush3.msra.mxu1 %v19177_v54  ;;  %13650 = vmatprep.mubr.msk.f32.mxu1 %vm15370_vm3, %v20271_v9 }
0x1ec6   :  { %13644 = vmatprep.subr.mxu1 %v20271_v9 }
0x1ec7   :  { %13645 = vmatpush3.msra.mxu1 %v19184_v18 }
0x1ec8   :  { %13646 = vmatprep.subr.mxu1 %v20271_v9 }
0x1ec9   :  { %13647 = vmatpush3.msra.mxu1 %v19191_v49 }
0x1eca   :  { %13648 = vmatprep.subr.mxu1 %v20271_v9 }
0x1ecb   :  { %13649 = vmatpush3.msra.mxu1 %v19198_v33 }
0x1ecc   :  { %13653 = vmatprep.subr.mxu1 %v20271_v9 }
0x1f64   :  { %v19284_v35 = vpop.f32.mrf.mxu1 }
0x1f65   :  { %v8329_v5 = vadd.f32 1e-05, %v19284_v35  ;;  %v15115_v35 = vld [vmem:[%s20217_s20 + $0x88] sm:$0xff]  }
0x1f66   :  { %v13599_v3 = vpop.f32.mrf.mxu1 }
0x1f67   :  { %15193 = vrsqrt.f32 %v8329_v5  ;;  %v15116_v3 = vld [vmem:[%s20217_s20 + $0x80] sm:$0xff]  }
0x1f74   :  { %v15194_v16 = vpop.eup %15193 }
0x1f75   :  { %v8336_v60 = vrot.slane %v15194_v16, %v15741_v25  ;;  %v19516_v16 = vld [vmem:[%s20218_s15] sm:$0xff] }
0x1f77   :  { %v8337_v14 = vmul.f32 %v8336_v60, %v19215_v42  ;;  %v15110_v42 = vld [vmem:[%s20217_s20 + $0xb0] sm:$0xff]  }
0x1f79   :  { %v8338_v2 = vmax.f32 %v8337_v14, 0.0 }
0x1f7b   :  { %v19416_v56 = vpack.c.bf16 %v8338_v2, %v8338_v2  ;;  %v19534_v2 = vld [vmem:[%s20213_s16 + $0x78] sm:$0xff] }
0x1f84   :  { %v13203_v32 = vpop.f32.mrf.mxu1 }
0x1f86   :  { %v13204_v52 = vpop.f32.mrf.mxu1 }
0x1f87   :  { %v13205_v59 = vadd.f32 %v13204_v52, %v13203_v32 }
0x1f88   :  { %v13206_v37 = vpop.f32.mrf.mxu1 }
0x1f8a   :  { %v13207_v57 = vpop.f32.mrf.mxu1 }
0x1f8b   :  { %v13208_v28 = vadd.f32 %v13207_v57, %v13206_v37 }
0x1f8d   :  { %13601 = vmatpush3.msra.mxu0 %v13208_v28 }
0x1f8e   :  { %13602 = vmatprep.subr.mxu0 %v20271_v9 }
0x1f8f   :  { %13603 = vmatpush3.msra.mxu0 %v13205_v59 }
0x1f90   :  { %13605 = vmatmul.mubr.msk.f32.vlgmr.msra.gmra.mxu0 %vm3823_vm2, %v8508_v63  ;;  %13607 = vmatprep.subr.mxu0 %v20271_v9 }
0x1f91   :  { %13608 = vmatpush3.msra.mxu0 %v19024_v11  ;;  %13639 = vmatprep.mubr.msk.f32.mxu0 %vm15370_vm3, %v20271_v9 }
0x1f92   :  { %13609 = vmatprep.subr.mxu0 %v20271_v9 }
0x1f93   :  { %13610 = vmatpush3.msra.mxu0 %v19031_v36 }
0x1f94   :  { %13611 = vmatprep.subr.mxu0 %v20271_v9 }
0x1f95   :  { %13612 = vmatpush3.msra.mxu0 %v19040_v61 }
0x1f96   :  { %13613 = vmatprep.subr.mxu0 %v20271_v9 }
0x1f97   :  { %13614 = vmatpush3.msra.mxu0 %v19047_v20 }
0x1f98   :  { %13615 = vmatprep.subr.mxu0 %v20271_v9 }
0x1f99   :  { %13616 = vmatpush3.msra.mxu0 %v19054_v21 }
0x1f9a   :  { %13617 = vmatprep.subr.mxu0 %v20271_v9 }
0x1f9b   :  { %13618 = vmatpush3.msra.mxu0 %v19061_v22 }
0x1f9c   :  { %13619 = vmatprep.subr.mxu0 %v20271_v9 }
0x1f9d   :  { %13620 = vmatpush3.msra.mxu0 %v19068_v13 }
0x1f9e   :  { %13621 = vmatprep.subr.mxu0 %v20271_v9 }
0x1f9f   :  { %13622 = vmatpush3.msra.mxu0 %v19075_v15 }
0x1fa0   :  { %13623 = vmatprep.subr.mxu0 %v20271_v9 }
0x1fa1   :  { %13624 = vmatpush3.msra.mxu0 %v19082_v4 }
0x1fa2   :  { %13625 = vmatprep.subr.mxu0 %v20271_v9 }
0x1fa3   :  { %13626 = vmatpush3.msra.mxu0 %v19091_v62 }
0x1fa4   :  { %13627 = vmatprep.subr.mxu0 %v20271_v9 }
0x1fa5   :  { %13628 = vmatpush3.msra.mxu0 %v19098_v43 }
0x1fa6   :  { %13629 = vmatprep.subr.mxu0 %v20271_v9 }
0x1fa7   :  { %13630 = vmatpush3.msra.mxu0 %v19105_v50 }
0x1fa8   :  { %13631 = vmatprep.subr.mxu0 %v20271_v9 }
0x1fa9   :  { %13632 = vmatpush3.msra.mxu0 %v19110_v26 }
0x1faa   :  { %13633 = vmatprep.subr.mxu0 %v20271_v9 }
0x1fab   :  { %13634 = vmatpush3.msra.mxu0 %v19117_v23 }
0x1fac   :  { %13635 = vmatprep.subr.mxu0 %v20271_v9 }
0x1fad   :  { %13636 = vmatpush3.msra.mxu0 %v19126_v58 }
0x1fae   :  { %13637 = vmatprep.subr.mxu0 %v20271_v9 }
0x1faf   :  { %13638 = vmatpush3.msra.mxu0 %v19133_v39 }
0x1fb0   :  { %13688 = vmatprep.subr.mxu0 %v20271_v9 }
0x2050   :  { %v8578_v7 = vpop.f32.mrf.mxu0 }
0x2051   :  { %13640 = vmatmul.mubr.f32.vlgmr.msra.gmra.mxu0 %v8578_v7 }
0x2052   :  { %v13606_v51 = vpop.f32.mrf.mxu0  ;;  %13689 = vmatpush3.msra.mxu0 %v19177_v54  ;;  %13696 = vmatprep.mubr.msk.f32.mxu0 %vm15370_vm3, %v20271_v9 }
0x2053   :  { %13690 = vmatprep.subr.mxu0 %v20271_v9 }
0x2054   :  { %13691 = vmatpush3.msra.mxu0 %v19184_v18 }
0x2055   :  { %13692 = vmatprep.subr.mxu0 %v20271_v9 }
0x2056   :  { %13693 = vmatpush3.msra.mxu0 %v19191_v49 }
0x2057   :  { %13694 = vmatprep.subr.mxu0 %v20271_v9 }
0x2058   :  { %13695 = vmatpush3.msra.mxu0 %v19198_v33 }
0x2059   :  { %13699 = vmatprep.subr.bf16.mxu0 %v20271_v9 }
0x2111   :  { %v8648_v55 = vpop.f32.mrf.mxu0 }
0x2112   :  { %v8652_v53 = vsel %vm1322_vm1, %v8648_v55, 0.0  ;;  %v15117_v55 = vld [vmem:[%s20217_s20 + $0x38] sm:$0xff]  }
0x2113   :  { %v8653_v41 = vrot.slane %v8652_v53, 4  ;;  %v13641_v24 = vpop.f32.mrf.mxu0 }
0x2114   :  { %v15119_v24 = vld [vmem:[%s20217_s20 + $0x28] sm:$0xff]  }
0x2115   :  { %v8654_v40 = vadd.f32 %v8653_v41, %v8652_v53  ;;  %v15118_v41 = vld [vmem:[%s20217_s20 + $0x30] sm:$0xff]  }
0x2117   :  { %v8655_v38 = vrot.slane %v8654_v40, 2 }
0x2119   :  { %v8656_v6 = vadd.f32 %v8655_v38, %v8654_v40  ;;  %v15120_v40 = vld [vmem:[%s20217_s20 + $0x20] sm:$0xff]   ;;  %v15121_v38 = vld [vmem:[%s20217_s20 + $0x18] sm:$0xff]  }
0x211b   :  { %v8657_v30 = vrot.slane %v8656_v6, 1 }
0x211d   :  { %v8658_v31 = vadd.f32 %v8657_v30, %v8656_v6  ;;  %v15122_v30 = vld [vmem:[%s20217_s20 + $0x10] sm:$0xff]  }
0x211f   :  { %v8659_v1 = vmul.f32 0.03125, %v8658_v31 }
0x2121   :  { %13651 = vmatmul.mubr.msk.f32.vlgmr.msra.gmra.mxu1 %vm1322_vm1, %v8659_v1 }
0x2122   :  { %13654 = vmatpush3.msra.mxu1 %v19024_v11  ;;  %13685 = vmatprep.mubr.msk.f32.mxu1 %vm15370_vm3, %v20271_v9 }
0x2123   :  { %13655 = vmatprep.subr.mxu1 %v20271_v9 }
0x2124   :  { %13656 = vmatpush3.msra.mxu1 %v19031_v36 }
0x2125   :  { %13657 = vmatprep.subr.mxu1 %v20271_v9 }
0x2126   :  { %13658 = vmatpush3.msra.mxu1 %v19040_v61 }
0x2127   :  { %13659 = vmatprep.subr.mxu1 %v20271_v9 }
0x2128   :  { %13660 = vmatpush3.msra.mxu1 %v19047_v20 }
0x2129   :  { %13661 = vmatprep.subr.mxu1 %v20271_v9 }
0x212a   :  { %13662 = vmatpush3.msra.mxu1 %v19054_v21 }
0x212b   :  { %13663 = vmatprep.subr.mxu1 %v20271_v9 }
0x212c   :  { %13664 = vmatpush3.msra.mxu1 %v19061_v22 }
0x212d   :  { %13665 = vmatprep.subr.mxu1 %v20271_v9 }
0x212e   :  { %13666 = vmatpush3.msra.mxu1 %v19068_v13 }
0x212f   :  { %13667 = vmatprep.subr.mxu1 %v20271_v9 }
0x2130   :  { %13668 = vmatpush3.msra.mxu1 %v19075_v15 }
0x2131   :  { %13669 = vmatprep.subr.mxu1 %v20271_v9 }
0x2132   :  { %13670 = vmatpush3.msra.mxu1 %v19082_v4 }
0x2133   :  { %13671 = vmatprep.subr.mxu1 %v20271_v9 }
0x2134   :  { %13672 = vmatpush3.msra.mxu1 %v19091_v62 }
0x2135   :  { %13673 = vmatprep.subr.mxu1 %v20271_v9 }
0x2136   :  { %13674 = vmatpush3.msra.mxu1 %v19098_v43 }
0x2137   :  { %13675 = vmatprep.subr.mxu1 %v20271_v9 }
0x2138   :  { %13676 = vmatpush3.msra.mxu1 %v19105_v50 }
0x2139   :  { %13677 = vmatprep.subr.mxu1 %v20271_v9 }
0x213a   :  { %13678 = vmatpush3.msra.mxu1 %v19110_v26 }
0x213b   :  { %13679 = vmatprep.subr.mxu1 %v20271_v9 }
0x213c   :  { %13680 = vmatpush3.msra.mxu1 %v19117_v23 }
0x213d   :  { %13681 = vmatprep.subr.mxu1 %v20271_v9 }
0x213e   :  { %13682 = vmatpush3.msra.mxu1 %v19126_v58 }
0x213f   :  { %13683 = vmatprep.subr.mxu1 %v20271_v9 }
0x2140   :  { %13684 = vmatpush3.msra.mxu1 %v19133_v39 }
0x2141   :  { %13719 = vmatprep.subr.bf16.mxu1 %v20271_v9 }
0x21e1   :  { %v8729_v11 = vpop.f32.mrf.mxu1 }
0x21e2   :  { %v8736_v36 = vrot.slane %v8729_v11, %v15741_v25  ;;  %v15123_v11 = vld [vmem:[%s20217_s20 + $0x8] sm:$0xff]  }
0x21e3   :  { %v13652_v61 = vpop.f32.mrf.mxu1 }
0x21e4   :  { %v19373_v20 = vsub.f32 %v8578_v7, %v8736_v36  ;;  %v15124_v61 = vld [vmem:[%s20217_s20] sm:$0xff]  }
0x21e6   :  { %v8738_v44 = vmul.f32 %v19373_v20, %v19373_v20 }
0x21e8   :  { %13686 = vmatmul.mubr.f32.vlgmr.msra.gmra.mxu1 %v8738_v44 }
0x21e9   :  { %13720 = vmatpush3.bf16.msra.mxu1 %v15101_v46  ;;  %13735 = vmatprep.mubr.msk.bf16.mxu1 %vm15370_vm3, %v20271_v9 }
0x21ea   :  { %13721 = vmatprep.subr.bf16.mxu1 %v20271_v9 }
0x21ed   :  { %13722 = vmatpush3.bf16.msra.mxu1 %v15102_v8 }
0x21ee   :  { %13723 = vmatprep.subr.bf16.mxu1 %v20271_v9 }
0x21f1   :  { %13724 = vmatpush3.bf16.msra.mxu1 %v15103_v48  ;;  %v19505_v48 = vld [vmem:[%s20218_s15 + $0x8] sm:$0xff] }
0x21f2   :  { %13725 = vmatprep.subr.bf16.mxu1 %v20271_v9 }
0x21f5   :  { %13726 = vmatpush3.bf16.msra.mxu1 %v15104_v29 }
0x21f6   :  { %13727 = vmatprep.subr.bf16.mxu1 %v20271_v9 }
0x21f9   :  { %13728 = vmatpush3.bf16.msra.mxu1 %v15105_v27 }
0x21fa   :  { %13729 = vmatprep.subr.bf16.mxu1 %v20271_v9 }
0x21fd   :  { %13730 = vmatpush3.bf16.msra.mxu1 %v15106_v17 }
0x21fe   :  { %13731 = vmatprep.subr.bf16.mxu1 %v20271_v9 }
0x2201   :  { %13732 = vmatpush3.bf16.msra.mxu1 %v15107_v19  ;;  %v19526_v19 = vld [vmem:[%s20218_s15 + $0x10] sm:$0xff] }
0x2202   :  { %13733 = vmatprep.subr.bf16.mxu1 %v20271_v9 }
0x2205   :  { %13734 = vmatpush3.bf16.msra.mxu1 %v15108_v47 }
0x2206   :  { %13749 = vmatprep.subr.bf16.mxu1 %v20271_v9 }
0x2208   :  { %13736 = vmatmul.mubr.bf16.vlgmr.msra.gmra.mxu1 %v19416_v56 }
0x2209   :  { %13750 = vmatpush3.bf16.msra.mxu1 %v15109_v10  ;;  %13765 = vmatprep.mubr.msk.bf16.mxu1 %vm15370_vm3, %v20271_v9  ;;  %v19543_v10 = vld [vmem:[%s20213_s16 + $0x70] sm:$0xff] }
0x220a   :  { %13751 = vmatprep.subr.bf16.mxu1 %v20271_v9 }
0x220d   :  { %13752 = vmatpush3.bf16.msra.mxu1 %v15110_v42  ;;  %v19557_v42 = vld [vmem:[%s20213_s16 + $0x60] sm:$0xff] }
0x220e   :  { %13753 = vmatprep.subr.bf16.mxu1 %v20271_v9 }
0x2211   :  { %13754 = vmatpush3.bf16.msra.mxu1 %v15111_v0 }
0x2212   :  { %13755 = vmatprep.subr.bf16.mxu1 %v20271_v9 }
0x2215   :  { %13756 = vmatpush3.bf16.msra.mxu1 %v15112_v34 }
0x2216   :  { %13757 = vmatprep.subr.bf16.mxu1 %v20271_v9 }
0x2219   :  { %13758 = vmatpush3.bf16.msra.mxu1 %v15113_v12 }
0x221a   :  { %13759 = vmatprep.subr.bf16.mxu1 %v20271_v9 }
0x221d   :  { %13760 = vmatpush3.bf16.msra.mxu1 %v15114_v45 }
0x221e   :  { %13761 = vmatprep.subr.bf16.mxu1 %v20271_v9 }
0x2221   :  { %13762 = vmatpush3.bf16.msra.mxu1 %v15115_v35  ;;  %v19627_v35 = vld [vmem:[%s20213_s16 + $0x48] sm:$0xff] }
0x2222   :  { %13763 = vmatprep.subr.bf16.mxu1 %v20271_v9 }
0x2225   :  { %13764 = vmatpush3.bf16.msra.mxu1 %v15116_v3  ;;  %v19634_v3 = vld [vmem:[%s20213_s16 + $0x40] sm:$0xff] }
0x2226   :  { %13809 = vmatprep.subr.mxu1 %v20271_v9 }
0x2228   :  { %13766 = vmatmul.mubr.bf16.vlgmr.msra.gmra.mxu1 %v19416_v56 }
0x2229   :  { %13810 = vmatpush3.msra.mxu1 %v19177_v54  ;;  %13817 = vmatprep.mubr.msk.f32.mxu1 %vm15370_vm3, %v20271_v9 }
0x222a   :  { %13811 = vmatprep.subr.mxu1 %v20271_v9 }
0x222b   :  { %13812 = vmatpush3.msra.mxu1 %v19184_v18 }
0x222c   :  { %13813 = vmatprep.subr.mxu1 %v20271_v9 }
0x222d   :  { %13814 = vmatpush3.msra.mxu1 %v19191_v49 }
0x222e   :  { %13815 = vmatprep.subr.mxu1 %v20271_v9 }
0x222f   :  { %13816 = vmatpush3.msra.mxu1 %v19198_v33 }
0x2230   :  { %13820 = vmatprep.subr.mxu1 %v20271_v9 }
0x22a8   :  { %v8805_v32 = vpop.f32.mrf.mxu1 }
0x22a9   :  { %v8809_v52 = vsel %vm1322_vm1, %v8805_v32, 0.0  ;;  %v19641_v32 = vld [vmem:[%s20213_s16 + $0x38] sm:$0xff] }
0x22aa   :  { %v8810_v37 = vrot.slane %v8809_v52, 4  ;;  %v13687_v57 = vpop.f32.mrf.mxu1 }
0x22ab   :  { %v19662_v57 = vld [vmem:[%s20213_s16 + $0x20] sm:$0xff] }
0x22ac   :  { %v8811_v28 = vadd.f32 %v8810_v37, %v8809_v52  ;;  %v19648_v52 = vld [vmem:[%s20213_s16 + $0x30] sm:$0xff]  ;;  %v19655_v37 = vld [vmem:[%s20213_s16 + $0x28] sm:$0xff] }
0x22ae   :  { %v8812_v59 = vrot.slane %v8811_v28, 2 }
0x22b0   :  { %v8813_v63 = vadd.f32 %v8812_v59, %v8811_v28  ;;  %v19669_v28 = vld [vmem:[%s20213_s16 + $0x18] sm:$0xff]  ;;  %v19676_v59 = vld [vmem:[%s20213_s16 + $0x10] sm:$0xff] }
0x22b2   :  { %v8814_v7 = vrot.slane %v8813_v63, 1 }
0x22b4   :  { %v8815_v51 = vadd.f32 %v8814_v7, %v8813_v63  ;;  %v19683_v63 = vld [vmem:[%s20213_s16 + $0x8] sm:$0xff]  ;;  %v19690_v7 = vld [vmem:[%s20213_s16] sm:$0xff] }
0x22b6   :  { %v8816_v53 = vmul.f32 0.03125, %v8815_v51 }
0x22b8   :  { %13697 = vmatmul.mubr.msk.f32.vlgmr.msra.gmra.mxu0 %vm1322_vm1, %v8816_v53 }
0x22b9   :  { %13700 = vmatpush3.bf16.msra.mxu0 %v15117_v55  ;;  %13715 = vmatprep.mubr.msk.bf16.mxu0 %vm15370_vm3, %v20271_v9 }
0x22ba   :  { %13701 = vmatprep.subr.bf16.mxu0 %v20271_v9 }
0x22bd   :  { %13702 = vmatpush3.bf16.msra.mxu0 %v15118_v41 }
0x22be   :  { %13703 = vmatprep.subr.bf16.mxu0 %v20271_v9 }
0x22c1   :  { %13704 = vmatpush3.bf16.msra.mxu0 %v15119_v24 }
0x22c2   :  { %13705 = vmatprep.subr.bf16.mxu0 %v20271_v9 }
0x22c5   :  { %13706 = vmatpush3.bf16.msra.mxu0 %v15120_v40  ;;  %v15126_v40 = vld [vmem:[%s20219_s21 + $0x78] sm:$0xff]  }
0x22c6   :  { %13707 = vmatprep.subr.bf16.mxu0 %v20271_v9 }
0x22c8   :  { %v9101_v6 = vpop.f32.mrf.mxu1 }
0x22c9   :  { %13708 = vmatpush3.bf16.msra.mxu0 %v15121_v38 }
0x22ca   :  { %v13737_v31 = vpop.f32.mrf.mxu1  ;;  %13709 = vmatprep.subr.bf16.mxu0 %v20271_v9 }
0x22cc   :  { %v9104_v1 = vpop.f32.mrf.mxu1 }
0x22cd   :  { %13710 = vmatpush3.bf16.msra.mxu0 %v15122_v30 }
0x22ce   :  { %v13738_v36 = vpop.f32.mrf.mxu1  ;;  %13711 = vmatprep.subr.bf16.mxu0 %v20271_v9 }
0x22d1   :  { %13712 = vmatpush3.bf16.msra.mxu0 %v15123_v11 }
0x22d2   :  { %13713 = vmatprep.subr.bf16.mxu0 %v20271_v9 }
0x22d5   :  { %13714 = vmatpush3.bf16.msra.mxu0 %v15124_v61 }
0x22d6   :  { %13739 = vmatprep.subr.mxu0 %v20271_v9 }
0x22d8   :  { %13716 = vmatmul.mubr.bf16.vlgmr.msra.gmra.mxu0 %v19416_v56  ;;  %v19550_v56 = vld [vmem:[%s20213_s16 + $0x68] sm:$0xff] }
0x22d9   :  { %13740 = vmatpush3.msra.mxu0 %v9101_v6  ;;  %13741 = vmatprep.mubr.msk.f32.mxu0 %vm15370_vm3, %v20271_v9 }
0x22da   :  { %13744 = vmatprep.subr.mxu0 %v20271_v9 }
0x22e0   :  { %13742 = vmatmul.mubr.msk.f32.vlgmr.msra.gmra.mxu0 %vm9109_vm4, %v19505_v48 }
0x22e1   :  { %13746 = vmatprep.mubr.msk.f32.mxu0 %vm15370_vm3, %v20271_v9 }
0x22e8   :  { %v9355_v46 = vpop.f32.mrf.mxu1 }
0x22ea   :  { %v13767_v5 = vpop.f32.mrf.mxu1 }
0x22eb   :  { %v15125_v5 = vld [vmem:[%s20219_s21 + $0x38] sm:$0xff]  }
0x22ec   :  { %v9358_v44 = vpop.f32.mrf.mxu1 }
0x22ee   :  { %v13768_v8 = vpop.f32.mrf.mxu1 }
0x22ef   :  { %v15127_v8 = vld [vmem:[%s20219_s21 + $0x30] sm:$0xff]  }
0x2378   :  { %v19511_v29 = vpop.f32.mrf.mxu0 }
0x237a   :  { %v13698_v27 = vpop.f32.mrf.mxu0 }
0x237b   :  { %v15128_v27 = vld [vmem:[%s20219_s21 + $0x70] sm:$0xff]  }
0x2398   :  { %v8995_v17 = vpop.f32.mrf.mxu0 }
0x2399   :  { %13745 = vmatpush3.msra.mxu0 %v8995_v17  ;;  %v15129_v17 = vld [vmem:[%s20219_s21 + $0x28] sm:$0xff]  }
0x239a   :  { %v13717_v60 = vpop.f32.mrf.mxu0  ;;  %13747 = vmatmul.mubr.msk.f32.vlgmr.msra.gmra.mxu0 %vm9109_vm4, %v19516_v16  ;;  %13769 = vmatprep.subr.mxu0 %v20271_v9 }
0x239b   :  { %13770 = vmatpush3.msra.mxu0 %v9355_v46  ;;  %13771 = vmatprep.mubr.msk.f32.mxu0 %vm15370_vm3, %v20271_v9  ;;  %v15130_v60 = vld [vmem:[%s20219_s21 + $0x68] sm:$0xff]  }
0x239c   :  { %v8998_v14 = vpop.f32.mrf.mxu0  ;;  %13774 = vmatprep.subr.mxu0 %v20271_v9 }
0x239d   :  { %v15131_v14 = vld [vmem:[%s20219_s21 + $0x20] sm:$0xff]  }
0x239e   :  { %v13718_v47 = vpop.f32.mrf.mxu0  ;;  %13772 = vmatmul.mubr.msk.f32.vlgmr.msra.gmra.mxu0 %vm9109_vm4, %v19526_v19 }
0x239f   :  { %13775 = vmatpush3.msra.mxu0 %v19534_v2  ;;  %13806 = vmatprep.mubr.msk.f32.mxu0 %vm15370_vm3, %v20271_v9  ;;  %v15132_v47 = vld [vmem:[%s20219_s21 + $0x60] sm:$0xff]  }
0x23a0   :  { %13776 = vmatprep.subr.mxu0 %v20271_v9 }
0x23a1   :  { %13777 = vmatpush3.msra.mxu0 %v19543_v10 }
0x23a2   :  { %13778 = vmatprep.subr.mxu0 %v20271_v9 }
0x23a3   :  { %13779 = vmatpush3.msra.mxu0 %v19550_v56 }
0x23a4   :  { %13780 = vmatprep.subr.mxu0 %v20271_v9 }
0x23a5   :  { %13781 = vmatpush3.msra.mxu0 %v19557_v42 }
0x23a6   :  { %13782 = vmatprep.subr.mxu0 %v20271_v9 }
0x23a7   :  { %13783 = vmatpush3.msra.mxu0 %v19054_v21  ;;  %v9179_v21 = vpop.f32.mrf.mxu0 }
0x23a8   :  { %13784 = vmatprep.subr.mxu0 %v20271_v9 }
0x23a9   :  { %13785 = vmatpush3.msra.mxu0 %v19061_v22  ;;  %v13743_v22 = vpop.f32.mrf.mxu0 }
0x23aa   :  { %13786 = vmatprep.subr.mxu0 %v20271_v9  ;;  %v15134_v22 = vld [vmem:[%s20219_s21 + $0x58] sm:$0xff]  }
0x23ab   :  { %13787 = vmatpush3.msra.mxu0 %v19068_v13 }
0x23ac   :  { %13788 = vmatprep.subr.mxu0 %v20271_v9 }
0x23ad   :  { %13789 = vmatpush3.msra.mxu0 %v19075_v15 }
0x23ae   :  { %13790 = vmatprep.subr.mxu0 %v20271_v9 }
0x23af   :  { %13791 = vmatpush3.msra.mxu0 %v19082_v4 }
0x23b0   :  { %13792 = vmatprep.subr.mxu0 %v20271_v9 }
0x23b1   :  { %13793 = vmatpush3.msra.mxu0 %v19091_v62 }
0x23b2   :  { %13794 = vmatprep.subr.mxu0 %v20271_v9 }
0x23b3   :  { %13795 = vmatpush3.msra.mxu0 %v19098_v43 }
0x23b4   :  { %13796 = vmatprep.subr.mxu0 %v20271_v9 }
0x23b5   :  { %13797 = vmatpush3.msra.mxu0 %v19105_v50 }
0x23b6   :  { %13798 = vmatprep.subr.mxu0 %v20271_v9 }
0x23b7   :  { %13799 = vmatpush3.msra.mxu0 %v19110_v26 }
0x23b8   :  { %13800 = vmatprep.subr.mxu0 %v20271_v9 }
0x23b9   :  { %13801 = vmatpush3.msra.mxu0 %v19117_v23 }
0x23ba   :  { %13802 = vmatprep.subr.mxu0 %v20271_v9 }
0x23bb   :  { %13803 = vmatpush3.msra.mxu0 %v19126_v58 }
0x23bc   :  { %13804 = vmatprep.subr.mxu0 %v20271_v9 }
0x23bd   :  { %13805 = vmatpush3.msra.mxu0 %v19133_v39 }
0x23be   :  { %13855 = vmatprep.subr.mxu0 %v20271_v9 }
0x245a   :  { %v9252_v13 = vpop.f32.mrf.mxu0 }
0x245b   :  { %v9253_v4 = vadd.f32 %v9252_v13, %v9179_v21  ;;  %v15133_v21 = vld [vmem:[%s20219_s21 + $0x18] sm:$0xff]   ;;  %v15135_v13 = vld [vmem:[%s20219_s21 + $0x10] sm:$0xff]  }
0x245c   :  { %v13748_v15 = vpop.f32.mrf.mxu0 }
0x245d   :  { %v15136_v15 = vld [vmem:[%s20219_s21 + $0x50] sm:$0xff]  }
0x245e   :  { %v9432_v62 = vpop.f32.mrf.mxu0 }
0x245f   :  { %v19585_v43 = vadd.f32 %v9432_v62, %v9253_v4  ;;  %v15137_v4 = vld [vmem:[%s20219_s21 + $0x8] sm:$0xff]  }
0x2460   :  { %v13773_v50 = vpop.f32.mrf.mxu0  ;;  %v15138_v62 = vld [vmem:[%s20219_s21 + $0x48] sm:$0xff]  }
0x2461   :  { %13807 = vmatmul.mubr.f32.vlgmr.msra.gmra.mxu0 %v19585_v43  ;;  %v15140_v50 = vld [vmem:[%s20219_s21 + $0x40] sm:$0xff]  }
0x2462   :  { %13856 = vmatpush3.msra.mxu0 %v19177_v54  ;;  %13863 = vmatprep.mubr.msk.f32.mxu0 %vm15370_vm3, %v20271_v9 }
0x2463   :  { %13857 = vmatprep.subr.mxu0 %v20271_v9 }
0x2464   :  { %13858 = vmatpush3.msra.mxu0 %v19184_v18 }
0x2465   :  { %13859 = vmatprep.subr.mxu0 %v20271_v9 }
0x2466   :  { %13860 = vmatpush3.msra.mxu0 %v19191_v49  ;;  %v19613_v49 = vld [vmem:[%s20213_s16 + $0x58] sm:$0xff] }
0x2467   :  { %13861 = vmatprep.subr.mxu0 %v20271_v9 }
0x2468   :  { %13862 = vmatpush3.msra.mxu0 %v19198_v33  ;;  %v19620_v33 = vld [vmem:[%s20213_s16 + $0x50] sm:$0xff] }
0x2469   :  { %13866 = vmatprep.subr.bf16.mxu0 %v20271_v9 }
0x2521   :  { %v9503_v26 = vpop.f32.mrf.mxu0 }
0x2522   :  { %v9507_v23 = vsel %vm1322_vm1, %v9503_v26, 0.0  ;;  %v8887_v26 = vadd.f32 1e-05, %v19511_v29 }
0x2523   :  { %v9508_v58 = vrot.slane %v9507_v23, 4  ;;  %v13808_v39 = vpop.f32.mrf.mxu0 }
0x2524   :  { %15195 = vrsqrt.f32 %v8887_v26 }
0x2525   :  { %v9509_v54 = vadd.f32 %v9508_v58, %v9507_v23 }
0x2527   :  { %v9510_v0 = vrot.slane %v9509_v54, 2 }
0x2529   :  { %v9511_v34 = vadd.f32 %v9510_v0, %v9509_v54 }
0x252b   :  { %v9512_v12 = vrot.slane %v9511_v34, 1 }
0x252d   :  { %v9513_v18 = vadd.f32 %v9512_v12, %v9511_v34 }
0x252f   :  { %v9514_v45 = vmul.f32 0.03125, %v9513_v18 }
0x2531   :  { %13818 = vmatmul.mubr.msk.f32.vlgmr.msra.gmra.mxu1 %vm1322_vm1, %v9514_v45  ;;  %v15196_v54 = vpop.eup %15195 }
0x2532   :  { %13821 = vmatpush3.msra.mxu1 %v19534_v2  ;;  %13852 = vmatprep.mubr.msk.f32.mxu1 %vm15370_vm3, %v20271_v9  ;;  %v8894_v0 = vrot.slane %v15196_v54, %v15741_v25 }
0x2533   :  { %13822 = vmatprep.subr.mxu1 %v20271_v9 }
0x2534   :  { %13823 = vmatpush3.msra.mxu1 %v19543_v10  ;;  %v8895_v18 = vmul.f32 %v8894_v0, %v19373_v20 }
0x2535   :  { %13824 = vmatprep.subr.mxu1 %v20271_v9 }
0x2536   :  { %13825 = vmatpush3.msra.mxu1 %v19550_v56 }
0x2537   :  { %13826 = vmatprep.subr.mxu1 %v20271_v9 }
0x2538   :  { %13827 = vmatpush3.msra.mxu1 %v19557_v42 }
0x2539   :  { %13828 = vmatprep.subr.mxu1 %v20271_v9 }
0x253a   :  { %13829 = vmatpush3.msra.mxu1 %v19613_v49 }
0x253b   :  { %13830 = vmatprep.subr.mxu1 %v20271_v9 }
0x253c   :  { %13831 = vmatpush3.msra.mxu1 %v19620_v33 }
0x253d   :  { %13832 = vmatprep.subr.mxu1 %v20271_v9 }
0x253e   :  { %13833 = vmatpush3.msra.mxu1 %v19627_v35 }
0x253f   :  { %13834 = vmatprep.subr.mxu1 %v20271_v9 }
0x2540   :  { %13835 = vmatpush3.msra.mxu1 %v19634_v3 }
0x2541   :  { %13836 = vmatprep.subr.mxu1 %v20271_v9 }
0x2542   :  { %13837 = vmatpush3.msra.mxu1 %v19641_v32 }
0x2543   :  { %13838 = vmatprep.subr.mxu1 %v20271_v9 }
0x2544   :  { %13839 = vmatpush3.msra.mxu1 %v19648_v52 }
0x2545   :  { %13840 = vmatprep.subr.mxu1 %v20271_v9 }
0x2546   :  { %13841 = vmatpush3.msra.mxu1 %v19655_v37 }
0x2547   :  { %13842 = vmatprep.subr.mxu1 %v20271_v9 }
0x2548   :  { %13843 = vmatpush3.msra.mxu1 %v19662_v57 }
0x2549   :  { %13844 = vmatprep.subr.mxu1 %v20271_v9 }
0x254a   :  { %13845 = vmatpush3.msra.mxu1 %v19669_v28 }
0x254b   :  { %13846 = vmatprep.subr.mxu1 %v20271_v9 }
0x254c   :  { %13847 = vmatpush3.msra.mxu1 %v19676_v59 }
0x254d   :  { %13848 = vmatprep.subr.mxu1 %v20271_v9 }
0x254e   :  { %13849 = vmatpush3.msra.mxu1 %v19683_v63 }
0x254f   :  { %13850 = vmatprep.subr.mxu1 %v20271_v9 }
0x2550   :  { %13851 = vmatpush3.msra.mxu1 %v19690_v7 }
0x2551   :  { %13886 = vmatprep.subr.bf16.mxu1 %v20271_v9 }
0x25f1   :  { %v9584_v51 = vpop.f32.mrf.mxu1 }
0x25f2   :  { %v9591_v55 = vrot.slane %v9584_v51, %v15741_v25 }
0x25f3   :  { %v13819_v53 = vpop.f32.mrf.mxu1 }
0x25f4   :  { %v19696_v41 = vsub.f32 %v19585_v43, %v9591_v55  ;;  %v15139_v43 = vld [vmem:[%s20219_s21] sm:$0xff]  }
0x25f6   :  { %v9593_v24 = vmul.f32 %v19696_v41, %v19696_v41 }
0x25f8   :  { %13853 = vmatmul.mubr.f32.vlgmr.msra.gmra.mxu1 %v9593_v24 }
0x25f9   :  { %13902 = vmatprep.mubr.msk.bf16.mxu1 %vm15370_vm3, %v20271_v9  ;;  %13887 = vmatpush3.bf16.msra.mxu1 %v15126_v40 }
0x25fa   :  { %13888 = vmatprep.subr.bf16.mxu1 %v20271_v9 }
0x25fd   :  { %13889 = vmatpush3.bf16.msra.mxu1 %v15128_v27  ;;  %v19851_v27 = vld [vmem:[%s20214_s17] sm:$0xff] }
0x25fe   :  { %13890 = vmatprep.subr.bf16.mxu1 %v20271_v9 }
0x2601   :  { %13891 = vmatpush3.bf16.msra.mxu1 %v15130_v60 }
0x2602   :  { %13892 = vmatprep.subr.bf16.mxu1 %v20271_v9 }
0x2605   :  { %13893 = vmatpush3.bf16.msra.mxu1 %v15132_v47 }
0x2606   :  { %13894 = vmatprep.subr.bf16.mxu1 %v20271_v9 }
0x2609   :  { %13895 = vmatpush3.bf16.msra.mxu1 %v15134_v22 }
0x260a   :  { %13896 = vmatprep.subr.bf16.mxu1 %v20271_v9 }
0x260d   :  { %13897 = vmatpush3.bf16.msra.mxu1 %v15136_v15 }
0x260e   :  { %13898 = vmatprep.subr.bf16.mxu1 %v20271_v9 }
0x2611   :  { %13899 = vmatpush3.bf16.msra.mxu1 %v15138_v62 }
0x2612   :  { %13900 = vmatprep.subr.bf16.mxu1 %v20271_v9 }
0x2615   :  { %13901 = vmatpush3.bf16.msra.mxu1 %v15140_v50 }
0x2616   :  { %13936 = vmatprep.subr.mxu1 %v20271_v9 }
0x26b8   :  { %v9660_v38 = vpop.f32.mrf.mxu1 }
0x26b9   :  { %v9664_v6 = vsel %vm1322_vm1, %v9660_v38, 0.0 }
0x26ba   :  { %v9665_v30 = vrot.slane %v9664_v6, 4  ;;  %v13854_v31 = vpop.f32.mrf.mxu1 }
0x26bc   :  { %v9666_v1 = vadd.f32 %v9665_v30, %v9664_v6 }
0x26be   :  { %v9667_v11 = vrot.slane %v9666_v1, 2 }
0x26c0   :  { %v9668_v36 = vadd.f32 %v9667_v11, %v9666_v1  ;;  %v15143_v1 = vld [vmem:[%s20219_s21 + $0xa8] sm:$0xff]   ;;  %v15145_v11 = vld [vmem:[%s20219_s21 + $0x98] sm:$0xff]  }
0x26c2   :  { %v9669_v61 = vrot.slane %v9668_v36, 1 }
0x26c4   :  { %v9670_v46 = vadd.f32 %v9669_v61, %v9668_v36  ;;  %v15146_v36 = vld [vmem:[%s20219_s21 + $0x90] sm:$0xff]   ;;  %v15147_v61 = vld [vmem:[%s20219_s21 + $0x88] sm:$0xff]  }
0x26c6   :  { %v9671_v44 = vmul.f32 0.03125, %v9670_v46  ;;  %v15148_v46 = vld [vmem:[%s20219_s21 + $0x80] sm:$0xff]  }
0x26c8   :  { %13864 = vmatmul.mubr.msk.f32.vlgmr.msra.gmra.mxu0 %vm1322_vm1, %v9671_v44  ;;  %v19837_v44 = vld [vmem:[%s20214_s17 + $0x10] sm:$0xff] }
0x26c9   :  { %13867 = vmatpush3.bf16.msra.mxu0 %v15125_v5  ;;  %13882 = vmatprep.mubr.msk.bf16.mxu0 %vm15370_vm3, %v20271_v9  ;;  %v19828_v5 = vld [vmem:[%s20214_s17 + $0x18] sm:$0xff] }
0x26ca   :  { %13868 = vmatprep.subr.bf16.mxu0 %v20271_v9 }
0x26cd   :  { %13869 = vmatpush3.bf16.msra.mxu0 %v15127_v8  ;;  %v19844_v8 = vld [vmem:[%s20214_s17 + $0x8] sm:$0xff] }
0x26ce   :  { %13870 = vmatprep.subr.bf16.mxu0 %v20271_v9 }
0x26d1   :  { %13871 = vmatpush3.bf16.msra.mxu0 %v15129_v17 }
0x26d2   :  { %13872 = vmatprep.subr.bf16.mxu0 %v20271_v9 }
0x26d5   :  { %13873 = vmatpush3.bf16.msra.mxu0 %v15131_v14 }
0x26d6   :  { %13874 = vmatprep.subr.bf16.mxu0 %v20271_v9 }
0x26d9   :  { %13875 = vmatpush3.bf16.msra.mxu0 %v15133_v21 }
0x26da   :  { %13876 = vmatprep.subr.bf16.mxu0 %v20271_v9 }
0x26dd   :  { %13877 = vmatpush3.bf16.msra.mxu0 %v15135_v13 }
0x26de   :  { %13878 = vmatprep.subr.bf16.mxu0 %v20271_v9 }
0x26e1   :  { %13879 = vmatpush3.bf16.msra.mxu0 %v15137_v4 }
0x26e2   :  { %13880 = vmatprep.subr.bf16.mxu0 %v20271_v9 }
0x26e5   :  { %13881 = vmatpush3.bf16.msra.mxu0 %v15139_v43 }
0x26e6   :  { %13906 = vmatprep.subr.mxu0 %v20271_v9 }
0x2788   :  { %v9741_v23 = vpop.f32.mrf.mxu0 }
0x2789   :  { %v9742_v58 = vadd.f32 1e-05, %v9741_v23 }
0x278a   :  { %v13865_v39 = vpop.f32.mrf.mxu0 }
0x278b   :  { %15197 = vrsqrt.f32 %v9742_v58 }
0x2798   :  { %v15198_v34 = vpop.eup %15197 }
0x2799   :  { %v9749_v12 = vrot.slane %v15198_v34, %v15741_v25 }
0x279b   :  { %v9750_v45 = vmul.f32 %v9749_v12, %v19696_v41  ;;  %v15141_v41 = vld [vmem:[%s20219_s21 + $0xb8] sm:$0xff]  }
0x279d   :  { %v9751_v51 = vadd.f32 %v9750_v45, %v8895_v18 }
0x279f   :  { %v19775_v55 = vmax.f32 %v9751_v51, 0.0  ;;  %v15150_v51 = vld [vmem:[%s20220_s22 + $0x78] sm:$0xff]  }
0x27a1   :  { %v9753_v29 = vpack.c.bf16 %v19775_v55, %v19775_v55 }
0x27a3   :  { %13883 = vmatmul.mubr.bf16.vlgmr.msra.gmra.mxu0 %v9753_v29  ;;  %13903 = vmatmul.mubr.bf16.vlgmr.msra.gmra.mxu1 %v9753_v29 }
0x27a4   :  { %13908 = vmatprep.mubr.msk.f32.mxu0 %vm15370_vm3, %v20271_v9  ;;  %13938 = vmatprep.mubr.msk.f32.mxu1 %vm15370_vm3, %v20271_v9 }
0x2863   :  { %v9852_v53 = vpop.f32.mrf.mxu0  ;;  %v9957_v24 = vpop.f32.mrf.mxu1 }
0x2864   :  { %13907 = vmatpush3.msra.mxu0 %v9957_v24 }
0x2865   :  { %v13884_v20 = vpop.f32.mrf.mxu0  ;;  %v13904_v40 = vpop.f32.mrf.mxu1  ;;  %13909 = vmatmul.mubr.msk.f32.vlgmr.msra.gmra.mxu0 %vm9109_vm4, %v19505_v48  ;;  %13911 = vmatprep.subr.mxu0 %v20271_v9  ;;  %v15142_v48 = vld [vmem:[%s20219_s21 + $0xb0] sm:$0xff]  }
0x2866   :  { %13912 = vmatpush3.msra.mxu0 %v9852_v53  ;;  %13913 = vmatprep.mubr.msk.f32.mxu0 %vm15370_vm3, %v20271_v9 }
0x2867   :  { %v9855_v38 = vpop.f32.mrf.mxu0  ;;  %v9960_v6 = vpop.f32.mrf.mxu1  ;;  %13916 = vmatprep.subr.bf16.mxu0 %v20271_v9 }
0x2869   :  { %v13885_v30 = vpop.f32.mrf.mxu0  ;;  %v13905_v31 = vpop.f32.mrf.mxu1  ;;  %13914 = vmatmul.mubr.msk.f32.vlgmr.msra.gmra.mxu0 %vm9109_vm4, %v19516_v16  ;;  %v15144_v16 = vld [vmem:[%s20219_s21 + $0xa0] sm:$0xff]  }
0x286a   :  { %13917 = vmatpush3.bf16.msra.mxu0 %v15141_v41  ;;  %13932 = vmatprep.mubr.msk.bf16.mxu0 %vm15370_vm3, %v20271_v9 }
0x286b   :  { %13918 = vmatprep.subr.bf16.mxu0 %v20271_v9 }
0x286e   :  { %13919 = vmatpush3.bf16.msra.mxu0 %v15142_v48  ;;  %v15149_v48 = vld [vmem:[%s20220_s22 + $0x38] sm:$0xff]  }
0x286f   :  { %13920 = vmatprep.subr.bf16.mxu0 %v20271_v9 }
0x2872   :  { %13921 = vmatpush3.bf16.msra.mxu0 %v15143_v1 }
0x2873   :  { %13922 = vmatprep.subr.bf16.mxu0 %v20271_v9 }
0x2876   :  { %13923 = vmatpush3.bf16.msra.mxu0 %v15144_v16  ;;  %v15151_v16 = vld [vmem:[%s20220_s22 + $0x30] sm:$0xff]  }
0x2877   :  { %13924 = vmatprep.subr.bf16.mxu0 %v20271_v9 }
0x287a   :  { %13925 = vmatpush3.bf16.msra.mxu0 %v15145_v11  ;;  %v15153_v11 = vld [vmem:[%s20220_s22 + $0x28] sm:$0xff]  }
0x287b   :  { %13926 = vmatprep.subr.bf16.mxu0 %v20271_v9 }
0x287e   :  { %13927 = vmatpush3.bf16.msra.mxu0 %v15146_v36  ;;  %v15154_v36 = vld [vmem:[%s20220_s22 + $0x68] sm:$0xff]  }
0x287f   :  { %13928 = vmatprep.subr.bf16.mxu0 %v20271_v9 }
0x2882   :  { %13929 = vmatpush3.bf16.msra.mxu0 %v15147_v61  ;;  %v15155_v61 = vld [vmem:[%s20220_s22 + $0x20] sm:$0xff]  }
0x2883   :  { %13930 = vmatprep.subr.bf16.mxu0 %v20271_v9 }
0x2886   :  { %13931 = vmatpush3.bf16.msra.mxu0 %v15148_v46  ;;  %v15156_v46 = vld [vmem:[%s20220_s22 + $0x60] sm:$0xff]  }
0x2887   :  { %13976 = vmatprep.subr.mxu0 %v20271_v9 }
0x2889   :  { %13933 = vmatmul.mubr.bf16.vlgmr.msra.gmra.mxu0 %v9753_v29  ;;  %v15152_v29 = vld [vmem:[%s20220_s22 + $0x70] sm:$0xff]  }
0x288a   :  { %13977 = vmatpush3.msra.mxu0 %v19828_v5  ;;  %13984 = vmatprep.mubr.msk.f32.mxu0 %vm15370_vm3, %v20271_v9 }
0x288b   :  { %13978 = vmatprep.subr.mxu0 %v20271_v9 }
0x288c   :  { %13979 = vmatpush3.msra.mxu0 %v19837_v44 }
0x288d   :  { %13980 = vmatprep.subr.mxu0 %v20271_v9 }
0x288e   :  { %13981 = vmatpush3.msra.mxu0 %v19844_v8 }
0x288f   :  { %13982 = vmatprep.subr.mxu0 %v20271_v9 }
0x2890   :  { %13983 = vmatpush3.msra.mxu0 %v19851_v27 }
0x2891   :  { %13987 = vmatprep.subr.mxu0 %v20271_v9 }
0x2925   :  { %v10029_v17 = vpop.f32.mrf.mxu0 }
0x2927   :  { %v13910_v60 = vpop.f32.mrf.mxu0 }
0x2928   :  { %v15158_v60 = vld [vmem:[%s20220_s22 + $0x58] sm:$0xff]  }
0x2929   :  { %v10099_v14 = vpop.f32.mrf.mxu0 }
0x292a   :  { %v10100_v47 = vadd.f32 %v10099_v14, %v10029_v17  ;;  %v15157_v17 = vld [vmem:[%s20220_s22 + $0x18] sm:$0xff]   ;;  %v15159_v14 = vld [vmem:[%s20220_s22 + $0x10] sm:$0xff]  }
0x292b   :  { %v13915_v21 = vpop.f32.mrf.mxu0 }
0x292c   :  { %v15161_v21 = vld [vmem:[%s20220_s22 + $0x8] sm:$0xff]  }
0x2949   :  { %v10202_v22 = vpop.f32.mrf.mxu0 }
0x294a   :  { %13937 = vmatpush3.msra.mxu1 %v10202_v22  ;;  %v15162_v22 = vld [vmem:[%s20220_s22 + $0x48] sm:$0xff]  }
0x294b   :  { %v13934_v13 = vpop.f32.mrf.mxu0  ;;  %13939 = vmatmul.mubr.msk.f32.vlgmr.msra.gmra.mxu1 %vm9109_vm4, %v19526_v19  ;;  %13941 = vmatprep.subr.mxu1 %v20271_v9 }
0x294c   :  { %13942 = vmatpush3.msra.mxu1 %v19534_v2  ;;  %13973 = vmatprep.mubr.msk.f32.mxu1 %vm15370_vm3, %v20271_v9  ;;  %v15163_v13 = vld [vmem:[%s20220_s22] sm:$0xff]  }
0x294d   :  { %v10205_v15 = vpop.f32.mrf.mxu0  ;;  %13943 = vmatprep.subr.mxu1 %v20271_v9 }
0x294e   :  { %13944 = vmatpush3.msra.mxu1 %v19543_v10  ;;  %v15164_v15 = vld [vmem:[%s20220_s22 + $0x40] sm:$0xff]  }
0x294f   :  { %v13935_v4 = vpop.f32.mrf.mxu0  ;;  %13945 = vmatprep.subr.mxu1 %v20271_v9 }
0x2950   :  { %13946 = vmatpush3.msra.mxu1 %v19550_v56 }
0x2951   :  { %13947 = vmatprep.subr.mxu1 %v20271_v9 }
0x2952   :  { %13948 = vmatpush3.msra.mxu1 %v19557_v42 }
0x2953   :  { %13949 = vmatprep.subr.mxu1 %v20271_v9 }
0x2954   :  { %13950 = vmatpush3.msra.mxu1 %v19613_v49 }
0x2955   :  { %13951 = vmatprep.subr.mxu1 %v20271_v9 }
0x2956   :  { %13952 = vmatpush3.msra.mxu1 %v19620_v33 }
0x2957   :  { %13953 = vmatprep.subr.mxu1 %v20271_v9 }
0x2958   :  { %13954 = vmatpush3.msra.mxu1 %v19627_v35 }
0x2959   :  { %13955 = vmatprep.subr.mxu1 %v20271_v9 }
0x295a   :  { %13956 = vmatpush3.msra.mxu1 %v19634_v3 }
0x295b   :  { %13957 = vmatprep.subr.mxu1 %v20271_v9 }
0x295c   :  { %13958 = vmatpush3.msra.mxu1 %v19641_v32 }
0x295d   :  { %13959 = vmatprep.subr.mxu1 %v20271_v9 }
0x295e   :  { %13960 = vmatpush3.msra.mxu1 %v19648_v52 }
0x295f   :  { %13961 = vmatprep.subr.mxu1 %v20271_v9 }
0x2960   :  { %13962 = vmatpush3.msra.mxu1 %v19655_v37 }
0x2961   :  { %13963 = vmatprep.subr.mxu1 %v20271_v9 }
0x2962   :  { %13964 = vmatpush3.msra.mxu1 %v19662_v57 }
0x2963   :  { %13965 = vmatprep.subr.mxu1 %v20271_v9 }
0x2964   :  { %13966 = vmatpush3.msra.mxu1 %v19669_v28 }
0x2965   :  { %13967 = vmatprep.subr.mxu1 %v20271_v9 }
0x2966   :  { %13968 = vmatpush3.msra.mxu1 %v19676_v59 }
0x2967   :  { %13969 = vmatprep.subr.mxu1 %v20271_v9 }
0x2968   :  { %13970 = vmatpush3.msra.mxu1 %v19683_v63 }
0x2969   :  { %13971 = vmatprep.subr.mxu1 %v20271_v9 }
0x296a   :  { %13972 = vmatpush3.msra.mxu1 %v19690_v7 }
0x296b   :  { %14022 = vmatprep.subr.mxu1 %v20271_v9 }
0x2a0b   :  { %v10274_v19 = vpop.f32.mrf.mxu1 }
0x2a0c   :  { %v10278_v62 = vadd.f32 %v10274_v19, %v10100_v47  ;;  %v15160_v47 = vld [vmem:[%s20220_s22 + $0x50] sm:$0xff]  }
0x2a0d   :  { %v13940_v43 = vpop.f32.mrf.mxu1 }
0x2a0e   :  { %13974 = vmatmul.mubr.f32.vlgmr.msra.gmra.mxu1 %v10278_v62 }
0x2a0f   :  { %14023 = vmatpush3.msra.mxu1 %v19828_v5  ;;  %14030 = vmatprep.mubr.msk.f32.mxu1 %vm15370_vm3, %v20271_v9 }
0x2a10   :  { %14024 = vmatprep.subr.mxu1 %v20271_v9 }
0x2a11   :  { %14025 = vmatpush3.msra.mxu1 %v19837_v44 }
0x2a12   :  { %14026 = vmatprep.subr.mxu1 %v20271_v9 }
0x2a13   :  { %14027 = vmatpush3.msra.mxu1 %v19844_v8 }
0x2a14   :  { %14028 = vmatprep.subr.mxu1 %v20271_v9 }
0x2a15   :  { %14029 = vmatpush3.msra.mxu1 %v19851_v27 }
0x2a16   :  { %14033 = vmatprep.subr.bf16.mxu1 %v20271_v9 }
0x2ace   :  { %v10345_v50 = vpop.f32.mrf.mxu1 }
0x2acf   :  { %v10349_v26 = vsel %vm1322_vm1, %v10345_v50, 0.0 }
0x2ad0   :  { %v10350_v23 = vrot.slane %v10349_v26, 4  ;;  %v13975_v58 = vpop.f32.mrf.mxu1 }
0x2ad2   :  { %v10351_v39 = vadd.f32 %v10350_v23, %v10349_v26 }
0x2ad4   :  { %v10352_v54 = vrot.slane %v10351_v39, 2 }
0x2ad6   :  { %v10353_v0 = vadd.f32 %v10352_v54, %v10351_v39 }
0x2ad8   :  { %v10354_v34 = vrot.slane %v10353_v0, 1 }
0x2ada   :  { %v10355_v12 = vadd.f32 %v10354_v34, %v10353_v0 }
0x2adc   :  { %v10356_v18 = vmul.f32 0.03125, %v10355_v12  ;;  %v15349_v12 = vld [vmem:[%s20218_s15 + $0x8] sm:$0xff] }
0x2ade   :  { %13985 = vmatmul.mubr.msk.f32.vlgmr.msra.gmra.mxu0 %vm1322_vm1, %v10356_v18  ;;  %v15165_v18 = vld [vmem:[%s20220_s22 + $0xb8] sm:$0xff]  }
0x2adf   :  { %13988 = vmatpush3.msra.mxu0 %v19534_v2  ;;  %14019 = vmatprep.mubr.msk.f32.mxu0 %vm15370_vm3, %v20271_v9 }
0x2ae0   :  { %13989 = vmatprep.subr.mxu0 %v20271_v9 }
0x2ae1   :  { %13990 = vmatpush3.msra.mxu0 %v19543_v10 }
0x2ae2   :  { %13991 = vmatprep.subr.mxu0 %v20271_v9 }
0x2ae3   :  { %13992 = vmatpush3.msra.mxu0 %v19550_v56 }
0x2ae4   :  { %13993 = vmatprep.subr.mxu0 %v20271_v9 }
0x2ae5   :  { %13994 = vmatpush3.msra.mxu0 %v19557_v42 }
0x2ae6   :  { %13995 = vmatprep.subr.mxu0 %v20271_v9 }
0x2ae7   :  { %13996 = vmatpush3.msra.mxu0 %v19613_v49 }
0x2ae8   :  { %13997 = vmatprep.subr.mxu0 %v20271_v9 }
0x2ae9   :  { %13998 = vmatpush3.msra.mxu0 %v19620_v33 }
0x2aea   :  { %13999 = vmatprep.subr.mxu0 %v20271_v9 }
0x2aeb   :  { %14000 = vmatpush3.msra.mxu0 %v19627_v35 }
0x2aec   :  { %14001 = vmatprep.subr.mxu0 %v20271_v9 }
0x2aed   :  { %14002 = vmatpush3.msra.mxu0 %v19634_v3 }
0x2aee   :  { %14003 = vmatprep.subr.mxu0 %v20271_v9 }
0x2aef   :  { %14004 = vmatpush3.msra.mxu0 %v19641_v32 }
0x2af0   :  { %14005 = vmatprep.subr.mxu0 %v20271_v9 }
0x2af1   :  { %14006 = vmatpush3.msra.mxu0 %v19648_v52 }
0x2af2   :  { %14007 = vmatprep.subr.mxu0 %v20271_v9 }
0x2af3   :  { %14008 = vmatpush3.msra.mxu0 %v19655_v37 }
0x2af4   :  { %14009 = vmatprep.subr.mxu0 %v20271_v9 }
0x2af5   :  { %14010 = vmatpush3.msra.mxu0 %v19662_v57 }
0x2af6   :  { %14011 = vmatprep.subr.mxu0 %v20271_v9 }
0x2af7   :  { %14012 = vmatpush3.msra.mxu0 %v19669_v28 }
0x2af8   :  { %14013 = vmatprep.subr.mxu0 %v20271_v9 }
0x2af9   :  { %14014 = vmatpush3.msra.mxu0 %v19676_v59 }
0x2afa   :  { %14015 = vmatprep.subr.mxu0 %v20271_v9 }
0x2afb   :  { %14016 = vmatpush3.msra.mxu0 %v19683_v63 }
0x2afc   :  { %14017 = vmatprep.subr.mxu0 %v20271_v9 }
0x2afd   :  { %14018 = vmatpush3.msra.mxu0 %v19690_v7 }
0x2afe   :  { %14053 = vmatprep.subr.bf16.mxu0 %v20271_v9 }
0x2b9e   :  { %v10426_v2 = vpop.f32.mrf.mxu0 }
0x2b9f   :  { %v10433_v10 = vrot.slane %v10426_v2, %v15741_v25 }
0x2ba0   :  { %v13986_v56 = vpop.f32.mrf.mxu0 }
0x2ba1   :  { %v19939_v42 = vsub.f32 %v10278_v62, %v10433_v10 }
0x2ba3   :  { %v10435_v45 = vmul.f32 %v19939_v42, %v19939_v42 }
0x2ba5   :  { %14020 = vmatmul.mubr.f32.vlgmr.msra.gmra.mxu0 %v10435_v45  ;;  %v15350_v45 = vld [vmem:[%s20218_s15] sm:$0xff] }
0x2ba6   :  { %14069 = vmatprep.mubr.msk.bf16.mxu0 %vm15370_vm3, %v20271_v9  ;;  %14054 = vmatpush3.bf16.msra.mxu0 %v15150_v51  ;;  %v15166_v51 = vld [vmem:[%s20220_s22 + $0xb0] sm:$0xff]  }
0x2ba7   :  { %14055 = vmatprep.subr.bf16.mxu0 %v20271_v9 }
0x2baa   :  { %14056 = vmatpush3.bf16.msra.mxu0 %v15152_v29  ;;  %v15167_v29 = vld [vmem:[%s20220_s22 + $0xa8] sm:$0xff]  }
0x2bab   :  { %14057 = vmatprep.subr.bf16.mxu0 %v20271_v9 }
0x2bae   :  { %14058 = vmatpush3.bf16.msra.mxu0 %v15154_v36  ;;  %v15352_v36 = vld [vmem:[%s20213_s16 + $0x78] sm:$0xff] }
0x2baf   :  { %14059 = vmatprep.subr.bf16.mxu0 %v20271_v9 }
0x2bb2   :  { %14060 = vmatpush3.bf16.msra.mxu0 %v15156_v46  ;;  %v15353_v46 = vld [vmem:[%s20213_s16 + $0x70] sm:$0xff] }
0x2bb3   :  { %14061 = vmatprep.subr.bf16.mxu0 %v20271_v9 }
0x2bb6   :  { %14062 = vmatpush3.bf16.msra.mxu0 %v15158_v60  ;;  %v15354_v60 = vld [vmem:[%s20213_s16 + $0x68] sm:$0xff] }
0x2bb7   :  { %14063 = vmatprep.subr.bf16.mxu0 %v20271_v9 }
0x2bba   :  { %14064 = vmatpush3.bf16.msra.mxu0 %v15160_v47  ;;  %v15359_v47 = vld [vmem:[%s20213_s16 + $0x40] sm:$0xff] }
0x2bbb   :  { %14065 = vmatprep.subr.bf16.mxu0 %v20271_v9 }
0x2bbe   :  { %14066 = vmatpush3.bf16.msra.mxu0 %v15162_v22  ;;  %v15361_v22 = vld [vmem:[%s20213_s16 + $0x30] sm:$0xff] }
0x2bbf   :  { %14067 = vmatprep.subr.bf16.mxu0 %v20271_v9 }
0x2bc2   :  { %14068 = vmatpush3.bf16.msra.mxu0 %v15164_v15  ;;  %v15363_v15 = vld [vmem:[%s20213_s16 + $0x20] sm:$0xff] }
0x2bc3   :  { %14103 = vmatprep.subr.mxu0 %v20271_v9 }
0x2c65   :  { %v10502_v53 = vpop.f32.mrf.mxu0 }
0x2c66   :  { %v10506_v24 = vsel %vm1322_vm1, %v10502_v53, 0.0  ;;  %v15168_v53 = vld [vmem:[%s20220_s22 + $0xa0] sm:$0xff]  }
0x2c67   :  { %v10507_v20 = vrot.slane %v10506_v24, 4  ;;  %v14021_v40 = vpop.f32.mrf.mxu0 }
0x2c68   :  { %v15171_v40 = vld [vmem:[%s20220_s22 + $0x88] sm:$0xff]  }
0x2c69   :  { %v10508_v41 = vadd.f32 %v10507_v20, %v10506_v24  ;;  %v15169_v24 = vld [vmem:[%s20220_s22 + $0x98] sm:$0xff]   ;;  %v15170_v20 = vld [vmem:[%s20220_s22 + $0x90] sm:$0xff]  }
0x2c6b   :  { %v10509_v38 = vrot.slane %v10508_v41, 2 }
0x2c6d   :  { %v10510_v6 = vadd.f32 %v10509_v38, %v10508_v41  ;;  %v15172_v41 = vld [vmem:[%s20220_s22 + $0x80] sm:$0xff]  }
0x2c6f   :  { %v10511_v30 = vrot.slane %v10510_v6, 1 }
0x2c71   :  { %v10512_v31 = vadd.f32 %v10511_v30, %v10510_v6 }
0x2c73   :  { %v10513_v1 = vmul.f32 0.03125, %v10512_v31 }
0x2c75   :  { %14031 = vmatmul.mubr.msk.f32.vlgmr.msra.gmra.mxu1 %vm1322_vm1, %v10513_v1 }
0x2c76   :  { %14034 = vmatpush3.bf16.msra.mxu1 %v15149_v48  ;;  %14049 = vmatprep.mubr.msk.bf16.mxu1 %vm15370_vm3, %v20271_v9 }
0x2c77   :  { %14035 = vmatprep.subr.bf16.mxu1 %v20271_v9 }
0x2c7a   :  { %14036 = vmatpush3.bf16.msra.mxu1 %v15151_v16 }
0x2c7b   :  { %14037 = vmatprep.subr.bf16.mxu1 %v20271_v9 }
0x2c7e   :  { %14038 = vmatpush3.bf16.msra.mxu1 %v15153_v11  ;;  %v15351_v11 = vld [vmem:[%s20218_s15 + $0x10] sm:$0xff] }
0x2c7f   :  { %14039 = vmatprep.subr.bf16.mxu1 %v20271_v9 }
0x2c82   :  { %14040 = vmatpush3.bf16.msra.mxu1 %v15155_v61 }
0x2c83   :  { %14041 = vmatprep.subr.bf16.mxu1 %v20271_v9 }
0x2c86   :  { %14042 = vmatpush3.bf16.msra.mxu1 %v15157_v17 }
0x2c87   :  { %14043 = vmatprep.subr.bf16.mxu1 %v20271_v9 }
0x2c8a   :  { %14044 = vmatpush3.bf16.msra.mxu1 %v15159_v14  ;;  %v15355_v14 = vld [vmem:[%s20213_s16 + $0x60] sm:$0xff] }
0x2c8b   :  { %14045 = vmatprep.subr.bf16.mxu1 %v20271_v9 }
0x2c8e   :  { %14046 = vmatpush3.bf16.msra.mxu1 %v15161_v21  ;;  %v15360_v21 = vld [vmem:[%s20213_s16 + $0x38] sm:$0xff] }
0x2c8f   :  { %14047 = vmatprep.subr.bf16.mxu1 %v20271_v9 }
0x2c92   :  { %14048 = vmatpush3.bf16.msra.mxu1 %v15163_v13  ;;  %v15362_v13 = vld [vmem:[%s20213_s16 + $0x28] sm:$0xff] }
0x2c93   :  { %14073 = vmatprep.subr.mxu1 %v20271_v9 }
0x2d35   :  { %v10583_v4 = vpop.f32.mrf.mxu1 }
0x2d36   :  { %v10584_v19 = vadd.f32 1e-05, %v10583_v4  ;;  %v15364_v4 = vld [vmem:[%s20213_s16 + $0x18] sm:$0xff] }
0x2d37   :  { %v14032_v62 = vpop.f32.mrf.mxu1 }
0x2d38   :  { %15199 = vrsqrt.f32 %v10584_v19  ;;  %v15365_v19 = vld [vmem:[%s20213_s16 + $0x10] sm:$0xff]  ;;  %v15366_v62 = vld [vmem:[%s20213_s16 + $0x8] sm:$0xff] }
0x2d45   :  { %v15200_v43 = vpop.eup %15199 }
0x2d46   :  { %v10591_v50 = vrot.slane %v15200_v43, %v15741_v25  ;;  %v15367_v43 = vld [vmem:[%s20213_s16] sm:$0xff] }
0x2d48   :  { %v10592_v26 = vmul.f32 %v10591_v50, %v19939_v42 }
0x2d4a   :  { %v10593_v23 = vmax.f32 %v10592_v26, 0.0 }
0x2d4c   :  { %v10594_v58 = vpack.c.bf16 %v10593_v23, %v10593_v23 }
0x2d4e   :  { %14050 = vmatmul.mubr.bf16.vlgmr.msra.gmra.mxu1 %v10594_v58  ;;  %14070 = vmatmul.mubr.bf16.vlgmr.msra.gmra.mxu0 %v10594_v58 }
0x2d4f   :  { %14075 = vmatprep.mubr.msk.f32.mxu1 %vm15370_vm3, %v20271_v9  ;;  %14105 = vmatprep.mubr.msk.f32.mxu0 %vm15370_vm3, %v20271_v9 }
0x2e0e   :  { %v10693_v39 = vpop.f32.mrf.mxu1  ;;  %v10798_v54 = vpop.f32.mrf.mxu0 }
0x2e0f   :  { %14074 = vmatpush3.msra.mxu1 %v10798_v54 }
0x2e10   :  { %v14051_v0 = vpop.f32.mrf.mxu1  ;;  %v14071_v34 = vpop.f32.mrf.mxu0  ;;  %14076 = vmatmul.mubr.msk.f32.vlgmr.msra.gmra.mxu1 %vm9109_vm4, %v15349_v12  ;;  %14078 = vmatprep.subr.mxu1 %v20271_v9 }
0x2e11   :  { %14079 = vmatpush3.msra.mxu1 %v10693_v39  ;;  %14080 = vmatprep.mubr.msk.f32.mxu1 %vm15370_vm3, %v20271_v9 }
0x2e12   :  { %v10696_v2 = vpop.f32.mrf.mxu1  ;;  %v10801_v10 = vpop.f32.mrf.mxu0  ;;  %14083 = vmatprep.subr.bf16.mxu1 %v20271_v9 }
0x2e14   :  { %v14052_v56 = vpop.f32.mrf.mxu1  ;;  %v14072_v42 = vpop.f32.mrf.mxu0  ;;  %14081 = vmatmul.mubr.msk.f32.vlgmr.msra.gmra.mxu1 %vm9109_vm4, %v15350_v45 }
0x2e15   :  { %14084 = vmatpush3.bf16.msra.mxu1 %v15165_v18  ;;  %14099 = vmatprep.mubr.msk.bf16.mxu1 %vm15370_vm3, %v20271_v9 }
0x2e16   :  { %14085 = vmatprep.subr.bf16.mxu1 %v20271_v9 }
0x2e19   :  { %14086 = vmatpush3.bf16.msra.mxu1 %v15166_v51 }
0x2e1a   :  { %14087 = vmatprep.subr.bf16.mxu1 %v20271_v9 }
0x2e1d   :  { %14088 = vmatpush3.bf16.msra.mxu1 %v15167_v29 }
0x2e1e   :  { %14089 = vmatprep.subr.bf16.mxu1 %v20271_v9 }
0x2e21   :  { %14090 = vmatpush3.bf16.msra.mxu1 %v15168_v53 }
0x2e22   :  { %14091 = vmatprep.subr.bf16.mxu1 %v20271_v9 }
0x2e25   :  { %14092 = vmatpush3.bf16.msra.mxu1 %v15169_v24 }
0x2e26   :  { %14093 = vmatprep.subr.bf16.mxu1 %v20271_v9 }
0x2e29   :  { %14094 = vmatpush3.bf16.msra.mxu1 %v15170_v20 }
0x2e2a   :  { %14095 = vmatprep.subr.bf16.mxu1 %v20271_v9 }
0x2e2d   :  { %14096 = vmatpush3.bf16.msra.mxu1 %v15171_v40 }
0x2e2e   :  { %14097 = vmatprep.subr.bf16.mxu1 %v20271_v9 }
0x2e31   :  { %14098 = vmatpush3.bf16.msra.mxu1 %v15172_v41 }
0x2e32   :  { %14143 = vmatprep.subr.mxu1 %v20271_v9 }
0x2e34   :  { %14100 = vmatmul.mubr.bf16.vlgmr.msra.gmra.mxu1 %v10594_v58 }
0x2e35   :  { %14144 = vmatpush3.msra.mxu1 %v19828_v5  ;;  %14151 = vmatprep.mubr.msk.f32.mxu1 %vm15370_vm3, %v20271_v9 }
0x2e36   :  { %14145 = vmatprep.subr.mxu1 %v20271_v9 }
0x2e37   :  { %14146 = vmatpush3.msra.mxu1 %v19837_v44 }
0x2e38   :  { %14147 = vmatprep.subr.mxu1 %v20271_v9 }
0x2e39   :  { %14148 = vmatpush3.msra.mxu1 %v19844_v8 }
0x2e3a   :  { %14149 = vmatprep.subr.mxu1 %v20271_v9 }
0x2e3b   :  { %14150 = vmatpush3.msra.mxu1 %v19851_v27 }
0x2e3c   :  { %14154 = vmatprep.subr.mxu1 %v20271_v9 }
0x2ed0   :  { %v10870_v38 = vpop.f32.mrf.mxu1 }
0x2ed2   :  { %v14077_v6 = vpop.f32.mrf.mxu1 }
0x2ed4   :  { %v10940_v30 = vpop.f32.mrf.mxu1 }
0x2ed5   :  { %v10941_v31 = vadd.f32 %v10940_v30, %v10870_v38 }
0x2ed6   :  { %v14082_v48 = vpop.f32.mrf.mxu1 }
0x2ef4   :  { %v11043_v1 = vpop.f32.mrf.mxu1 }
0x2ef5   :  { %14104 = vmatpush3.msra.mxu0 %v11043_v1 }
0x2ef6   :  { %v14101_v16 = vpop.f32.mrf.mxu1  ;;  %14106 = vmatmul.mubr.msk.f32.vlgmr.msra.gmra.mxu0 %vm9109_vm4, %v15351_v11  ;;  %14108 = vmatprep.subr.mxu0 %v20271_v9 }
0x2ef7   :  { %14109 = vmatpush3.msra.mxu0 %v15352_v36  ;;  %14140 = vmatprep.mubr.msk.f32.mxu0 %vm15370_vm3, %v20271_v9 }
0x2ef8   :  { %v11046_v61 = vpop.f32.mrf.mxu1  ;;  %14110 = vmatprep.subr.mxu0 %v20271_v9 }
0x2ef9   :  { %14111 = vmatpush3.msra.mxu0 %v15353_v46 }
0x2efa   :  { %v14102_v17 = vpop.f32.mrf.mxu1  ;;  %14112 = vmatprep.subr.mxu0 %v20271_v9 }
0x2efb   :  { %14113 = vmatpush3.msra.mxu0 %v15354_v60 }
0x2efc   :  { %14114 = vmatprep.subr.mxu0 %v20271_v9 }
0x2efd   :  { %14115 = vmatpush3.msra.mxu0 %v15355_v14 }
0x2efe   :  { %14116 = vmatprep.subr.mxu0 %v20271_v9 }
0x2eff   :  { %14117 = vmatpush3.msra.mxu0 %v19613_v49 }
0x2f00   :  { %14118 = vmatprep.subr.mxu0 %v20271_v9 }
0x2f01   :  { %14119 = vmatpush3.msra.mxu0 %v19620_v33 }
0x2f02   :  { %14120 = vmatprep.subr.mxu0 %v20271_v9 }
0x2f03   :  { %14121 = vmatpush3.msra.mxu0 %v19627_v35 }
0x2f04   :  { %14122 = vmatprep.subr.mxu0 %v20271_v9 }
0x2f05   :  { %14123 = vmatpush3.msra.mxu0 %v19634_v3 }
0x2f06   :  { %14124 = vmatprep.subr.mxu0 %v20271_v9 }
0x2f07   :  { %14125 = vmatpush3.msra.mxu0 %v19641_v32 }
0x2f08   :  { %14126 = vmatprep.subr.mxu0 %v20271_v9 }
0x2f09   :  { %14127 = vmatpush3.msra.mxu0 %v19648_v52 }
0x2f0a   :  { %14128 = vmatprep.subr.mxu0 %v20271_v9 }
0x2f0b   :  { %14129 = vmatpush3.msra.mxu0 %v19655_v37 }
0x2f0c   :  { %14130 = vmatprep.subr.mxu0 %v20271_v9 }
0x2f0d   :  { %14131 = vmatpush3.msra.mxu0 %v19662_v57 }
0x2f0e   :  { %14132 = vmatprep.subr.mxu0 %v20271_v9 }
0x2f0f   :  { %14133 = vmatpush3.msra.mxu0 %v19669_v28 }
0x2f10   :  { %14134 = vmatprep.subr.mxu0 %v20271_v9 }
0x2f11   :  { %14135 = vmatpush3.msra.mxu0 %v19676_v59 }
0x2f12   :  { %14136 = vmatprep.subr.mxu0 %v20271_v9 }
0x2f13   :  { %14137 = vmatpush3.msra.mxu0 %v19683_v63 }
0x2f14   :  { %14138 = vmatprep.subr.mxu0 %v20271_v9 }
0x2f15   :  { %14139 = vmatpush3.msra.mxu0 %v19690_v7 }
0x2f16   :  { %14189 = vmatprep.subr.mxu0 %v20271_v9 }
0x2fb6   :  { %v11115_v49 = vpop.f32.mrf.mxu0 }
0x2fb7   :  { %v20122_v33 = vadd.f32 %v11115_v49, %v10941_v31 }
0x2fb8   :  { %v14107_v35 = vpop.f32.mrf.mxu0 }
0x2fb9   :  { %14141 = vmatmul.mubr.f32.vlgmr.msra.gmra.mxu0 %v20122_v33 }
0x2fba   :  { %14190 = vmatpush3.msra.mxu0 %v19828_v5  ;;  %14197 = vmatprep.mubr.msk.f32.mxu0 %vm15370_vm3, %v20271_v9 }
0x2fbb   :  { %14191 = vmatprep.subr.mxu0 %v20271_v9 }
0x2fbc   :  { %14192 = vmatpush3.msra.mxu0 %v19837_v44  ;;  %v15356_v44 = vld [vmem:[%s20213_s16 + $0x58] sm:$0xff] }
0x2fbd   :  { %14193 = vmatprep.subr.mxu0 %v20271_v9 }
0x2fbe   :  { %14194 = vmatpush3.msra.mxu0 %v19844_v8  ;;  %v15357_v8 = vld [vmem:[%s20213_s16 + $0x50] sm:$0xff] }
0x2fbf   :  { %14195 = vmatprep.subr.mxu0 %v20271_v9 }
0x2fc0   :  { %14196 = vmatpush3.msra.mxu0 %v19851_v27  ;;  %v15358_v27 = vld [vmem:[%s20213_s16 + $0x48] sm:$0xff] }
0x3079   :  { %v11186_v3 = vpop.f32.mrf.mxu0 }
0x307a   :  { %v11190_v32 = vsel %vm1322_vm1, %v11186_v3, 0.0 }
0x307b   :  { %v11191_v52 = vrot.slane %v11190_v32, 4  ;;  %v14142_v37 = vpop.f32.mrf.mxu0 }
0x307d   :  { %v11192_v57 = vadd.f32 %v11191_v52, %v11190_v32 }
0x307f   :  { %v11193_v28 = vrot.slane %v11192_v57, 2 }
0x3081   :  { %v11194_v59 = vadd.f32 %v11193_v28, %v11192_v57 }
0x3083   :  { %v11195_v63 = vrot.slane %v11194_v59, 1 }
0x3085   :  { %v11196_v7 = vadd.f32 %v11195_v63, %v11194_v59 }
0x3087   :  { %v11197_v5 = vmul.f32 0.03125, %v11196_v7 }
0x3089   :  { %14152 = vmatmul.mubr.msk.f32.vlgmr.msra.gmra.mxu1 %vm1322_vm1, %v11197_v5 }
0x308a   :  { %14155 = vmatpush3.msra.mxu1 %v15352_v36  ;;  %14186 = vmatprep.mubr.msk.f32.mxu1 %vm15370_vm3, %v20271_v9 }
0x308b   :  { %14156 = vmatprep.subr.mxu1 %v20271_v9 }
0x308c   :  { %14157 = vmatpush3.msra.mxu1 %v15353_v46 }
0x308d   :  { %14158 = vmatprep.subr.mxu1 %v20271_v9 }
0x308e   :  { %14159 = vmatpush3.msra.mxu1 %v15354_v60 }
0x308f   :  { %14160 = vmatprep.subr.mxu1 %v20271_v9 }
0x3090   :  { %14161 = vmatpush3.msra.mxu1 %v15355_v14 }
0x3091   :  { %14162 = vmatprep.subr.mxu1 %v20271_v9 }
0x3092   :  { %14163 = vmatpush3.msra.mxu1 %v15356_v44 }
0x3093   :  { %14164 = vmatprep.subr.mxu1 %v20271_v9 }
0x3094   :  { %14165 = vmatpush3.msra.mxu1 %v15357_v8 }
0x3095   :  { %14166 = vmatprep.subr.mxu1 %v20271_v9 }
0x3096   :  { %14167 = vmatpush3.msra.mxu1 %v15358_v27 }
0x3097   :  { %14168 = vmatprep.subr.mxu1 %v20271_v9 }
0x3098   :  { %14169 = vmatpush3.msra.mxu1 %v15359_v47 }
0x3099   :  { %14170 = vmatprep.subr.mxu1 %v20271_v9 }
0x309a   :  { %14171 = vmatpush3.msra.mxu1 %v15360_v21 }
0x309b   :  { %14172 = vmatprep.subr.mxu1 %v20271_v9 }
0x309c   :  { %14173 = vmatpush3.msra.mxu1 %v15361_v22 }
0x309d   :  { %14174 = vmatprep.subr.mxu1 %v20271_v9 }
0x309e   :  { %14175 = vmatpush3.msra.mxu1 %v15362_v13 }
0x309f   :  { %14176 = vmatprep.subr.mxu1 %v20271_v9 }
0x30a0   :  { %14177 = vmatpush3.msra.mxu1 %v15363_v15 }
0x30a1   :  { %14178 = vmatprep.subr.mxu1 %v20271_v9 }
0x30a2   :  { %14179 = vmatpush3.msra.mxu1 %v15364_v4 }
0x30a3   :  { %14180 = vmatprep.subr.mxu1 %v20271_v9 }
0x30a4   :  { %14181 = vmatpush3.msra.mxu1 %v15365_v19 }
0x30a5   :  { %14182 = vmatprep.subr.mxu1 %v20271_v9 }
0x30a6   :  { %14183 = vmatpush3.msra.mxu1 %v15366_v62 }
0x30a7   :  { %14184 = vmatprep.subr.mxu1 %v20271_v9 }
0x30a8   :  { %14185 = vmatpush3.msra.mxu1 %v15367_v43 }
0x3149   :  { %v11267_v50 = vpop.f32.mrf.mxu1 }
0x314a   :  { %v11274_v26 = vrot.slane %v11267_v50, %v15741_v25 }
0x314b   :  { %v14153_v23 = vpop.f32.mrf.mxu1 }
0x314c   :  { %v11275_v58 = vsub.f32 %v20122_v33, %v11274_v26 }
0x314e   :  { %v11276_v39 = vmul.f32 %v11275_v58, %v11275_v58 }
0x3150   :  { %14187 = vmatmul.mubr.f32.vlgmr.msra.gmra.mxu1 %v11276_v39 }
0x3210   :  { %v11343_v54 = vpop.f32.mrf.mxu1 }
0x3211   :  { %v11347_v0 = vsel %vm1322_vm1, %v11343_v54, 0.0 }
0x3212   :  { %v11348_v34 = vrot.slane %v11347_v0, 4  ;;  %v14188_v12 = vpop.f32.mrf.mxu1 }
0x3214   :  { %v11349_v18 = vadd.f32 %v11348_v34, %v11347_v0 }
0x3216   :  { %v11350_v9 = vrot.slane %v11349_v18, 2 }
0x3218   :  { %v11351_v2 = vadd.f32 %v11350_v9, %v11349_v18 }
0x321a   :  { %v11352_v10 = vrot.slane %v11351_v2, 1 }
0x321c   :  { %v11353_v56 = vadd.f32 %v11352_v10, %v11351_v2 }
0x321e   :  { %v11354_v42 = vmul.f32 0.03125, %v11353_v56 }
0x3220   :  { %14198 = vmatmul.mubr.msk.f32.vlgmr.msra.gmra.mxu0 %vm1322_vm1, %v11354_v42 }
0x32e0   :  { %v11424_v45 = vpop.f32.mrf.mxu0 }
0x32e1   :  { %v11425_v51 = vadd.f32 1e-05, %v11424_v45 }
0x32e2   :  { %v14199_v29 = vpop.f32.mrf.mxu0 }
0x32e3   :  { %15201 = vrsqrt.f32 %v11425_v51 }
0x32f0   :  { %v15202_v53 = vpop.eup %15201 }
0x32f1   :  { %v11432_v24 = vrot.slane %v15202_v53, %v15741_v25 }
0x32f3   :  { %v11433_v20 = vmul.f32 %v11432_v24, %v11275_v58 }
0x32f5   :  { %v11434_v40 = vadd.f32 %v11433_v20, %v19775_v55 }
0x32f7   :  { %v11435_v41 = vmax.f32 %v11434_v40, 0.0 }
0x32f9   :  { %11436 = vst [vmem:[%s20221_s23] sm:$0xff] %v11435_v41 }

</bundles_post_ra>
